<compile_context>
chip_gen: v6e
topology: v6e:2x2x1
jax: 0.10.0
libtpu: 0.0.40
codegen_flags: <defaults>
</compile_context>

<pallas_src>
import functools
import math

import jax
import jax.numpy as jnp
from jax.experimental import pallas as pl
from jax.experimental.pallas import tpu as pltpu

_TWO_PI = 2.0 * math.pi
_INV_TWO_PI = 1.0 / _TWO_PI
_HALF_PI = 0.5 * math.pi


def _wrap(x):
    """Wrap angles to [-pi, pi) to keep f32 cos arguments small."""
    return x - _TWO_PI * jnp.floor(x * _INV_TWO_PI + 0.5)


# --------------------------------------------------------------------------
# Pallas kernel: one (row block, frame chunk) tile of the resonance synthesis
# --------------------------------------------------------------------------
def resonance_kernel(logmag_ref, ph0_ref, start_ref, basis_ref, o_ref, *,
                     fc, step, cpad, compute_dtype):
    # logmag/ph0/start : (RB, 2*cpad)  precomputed activations, duplicated into
    #                    the [real | imag] lane halves (pad lanes hold start=0).
    # basis            : (2, 2*cpad, step)  [first-half | second-half] windowed
    #                    IDFT bases (zero rows for padded coefficients).
    # o                : (RB, fc*step)  time-major, lane-dense OLA output block.
    fcp1 = fc + 1
    rb, k2 = logmag_ref.shape
    chunk = pl.program_id(1)

    logmag = logmag_ref[...]
    ph0 = ph0_ref[...]
    start = start_ref[...]

    # Chunk-base terms, once per (row block, chunk):  t + 1 = chunk*fc + j.
    nb = (chunk * fc).astype(jnp.float32)
    base_ang = _wrap(nb * ph0)                      # (RB, 2*cpad), wrapped once
    base_amp = start * jnp.exp(nb * logmag)         # start * mag**(chunk*fc)

    # Imag lanes (k >= cpad) get a -pi/2 shift so ONE cos sweep yields
    # [cos | sin] — the real and imaginary spectrum parts in a single EUP pass.
    lane = jax.lax.broadcasted_iota(jnp.int32, (1, 1, k2), 2)
    quarter = jnp.where(lane >= cpad, _HALF_PI, 0.0)

    # Local frame index j in [0, fc]; j == 0 is the previous chunk's last frame
    # (virtual frame -1 for chunk 0, masked out below).
    j = jax.lax.broadcasted_iota(jnp.int32, (fcp1, 1, 1), 0)
    jf = j.astype(jnp.float32)

    ang = _wrap(base_ang[None, :, :] + jf * ph0[None, :, :] - quarter)
    m = base_amp[None, :, :] * jnp.exp(jf * logmag[None, :, :])
    valid = (chunk * fc + j) >= 1                    # global frame index >= 0
    x = jnp.where(valid, m * jnp.cos(ang), 0.0)      # (fc+1, RB, 2*cpad)

    # One flat MXU LHS: M = (fc+1)*RB (free reshape when RB % 8 == 0),
    # K = 2*cpad (multiple of 128).  Two dots (first/second half-window bases)
    # so the overlap-add needs no lane slices at non-aligned offsets.
    x2 = x.reshape(fcp1 * rb, k2).astype(compute_dtype)
    first = jnp.dot(x2, basis_ref[0], preferred_element_type=jnp.float32)
    second = jnp.dot(x2, basis_ref[1], preferred_element_type=jnp.float32)
    first = first.reshape(fcp1, rb, step)
    second = second.reshape(fcp1, rb, step)

    # 50%-overlap OLA straight into the lane-dense output block:
    # output segment f = first half of local frame f+1 + second half of frame f.
    for f in range(fc):                              # static, small per-frame stores
        seg = first[f + 1] + second[f]               # (RB, step)
        o_ref[:, f * step:(f + 1) * step] = seg.astype(o_ref.dtype)


# --------------------------------------------------------------------------
# Constant basis construction (plain-JAX glue, built once)
# --------------------------------------------------------------------------
def make_split_basis(window_size, n_coeffs, cpad, dtype):
    """Windowed orthonormal-IDFT bases for unit real/imag spectra, K-padded to
    2*cpad and split into first/second half-window (shape (2, 2*cpad, step))."""
    eye = jnp.eye(n_coeffs, dtype=jnp.complex64)
    re_basis = jnp.fft.irfft(eye, n=window_size, norm="ortho")
    im_basis = jnp.fft.irfft(1j * eye, n=window_size, norm="ortho")
    n = jnp.arange(window_size, dtype=jnp.float32)
    win = 0.5 - 0.5 * jnp.cos(_TWO_PI * n / window_size)     # periodic Hann
    full = jnp.zeros((2 * cpad, window_size), jnp.float32)
    full = full.at[:n_coeffs].set(re_basis * win[None, :])
    full = full.at[cpad:cpad + n_coeffs].set(im_basis * win[None, :])
    step = window_size // 2
    return jnp.stack([full[:, :step], full[:, step:]], axis=0).astype(dtype)


# --------------------------------------------------------------------------
# VMEM budgeting & tile selection
# --------------------------------------------------------------------------
def _vmem_budget_bytes():
    cap = None
    try:
        info = pltpu.get_tpu_info()
        cap = getattr(info, "vmem_capacity_bytes", None)
    except Exception:
        cap = None
    if not cap:
        cap = 64 * 1024 * 1024          # conservative: v7x per-core VMEM
    return int(cap) * 3 // 4            # leave headroom for the compiler


def _estimate_vmem(rb, fc, cpad, step):
    k2 = 2 * cpad
    blocks = (3 * rb * k2 * 4 * 2           # params, f32, double-buffered
              + 2 * k2 * step * 2 * 2       # split basis, bf16, double-buffered
              + rb * fc * step * 4 * 2)     # output block, f32, double-buffered
    interm = ((fc + 1) * rb * k2 * (4 + 2)      # spectra f32 + bf16 copy
              + 2 * (fc + 1) * rb * step * 4)   # two frame-half matmul results
    return blocks + 3 * interm                  # headroom for temporaries


def _pick_tiles(n_rows, n_frames, step, cpad, budget):
    row_cands = [c for c in (128, 64, 32, 16, 8) if n_rows % c == 0] or [n_rows]

    def frame_cands(cap):
        cands = []
        for d in range(min(n_frames, cap), 0, -1):
            if n_frames % d:
                continue
            if (d * step) % 128 != 0 and d != n_frames:
                continue                  # keep the output block lane-aligned
            cands.append(d)
        return cands or [n_frames]

    for rb in row_cands:
        for cap in (64, 32, 16, 8, 4, 2, 1):
            cands = frame_cands(cap)
            even = [d for d in cands if (n_frames // d) % 2 == 0]
            fc = (even or cands)[0]       # prefer even frame grid (v7x, 2 TCs)
            if _estimate_vmem(rb, fc, cpad, step) <= budget:
                return rb, fc
    return row_cands[-1], frame_cands(1)[0]


# --------------------------------------------------------------------------
# Forward builder: sets up the pipelined pallas_call once
# --------------------------------------------------------------------------
def build_forward(n_samples, window_size, n_resonances, expressivity,
                  base_resonance=0.5, compute_dtype=jnp.bfloat16):
    step = window_size // 2
    n_coeffs = window_size // 2 + 1
    n_frames = n_samples // step
    assert n_frames * step == n_samples, \
        "n_samples must be a multiple of window_size // 2"
    n_rows = n_resonances * expressivity
    cpad = max(64, ((n_coeffs + 63) // 64) * 64)   # K = 2*cpad is a multiple of 128
    k2 = 2 * cpad

    budget = _vmem_budget_bytes()
    row_block, frame_chunk = _pick_tiles(n_rows, n_frames, step, cpad, budget)
    grid = (n_rows // row_block, n_frames // frame_chunk)

    basis = make_split_basis(window_size, n_coeffs, cpad, compute_dtype)

    kern = functools.partial(resonance_kernel, fc=frame_chunk, step=step,
                             cpad=cpad, compute_dtype=compute_dtype)

    param_spec = pl.BlockSpec((row_block, k2), lambda b, c: (b, 0))
    call = pl.pallas_call(
        kern,
        grid_spec=pltpu.PrefetchScalarGridSpec(
            num_scalar_prefetch=0,
            grid=grid,
            in_specs=[param_spec, param_spec, param_spec,
                      pl.BlockSpec((2, k2, step), lambda b, c: (0, 0, 0))],
            out_specs=pl.BlockSpec((row_block, frame_chunk * step),
                                   lambda b, c: (b, c))),
        out_shape=jax.ShapeDtypeStruct((n_rows, n_samples), jnp.float32),
        compiler_params=pltpu.CompilerParams(
            dimension_semantics=("parallel", "parallel"),
            vmem_limit_bytes=budget),
    )

    res_span = 1.0 - base_resonance
    res_factor = 0.9

    def forward(amp, phase, decay):
        def to2d(p):   # (R, C, E) -> (R*E, C), matches torch permute(0, 2, 1)
            return jnp.transpose(p, (0, 2, 1)).reshape(
                n_rows, n_coeffs).astype(jnp.float32)

        # Per-row activations hoisted out of the kernel (tiny arrays, computed
        # once instead of once per frame chunk).
        mag = base_resonance + jax.nn.sigmoid(to2d(decay)) * res_span * res_factor
        logmag = jnp.log(mag)
        ph0 = jnp.tanh(to2d(phase)) * math.pi
        start = jnp.abs(to2d(amp))

        def dup(x):    # duplicate into the [real | imag] lane halves, zero-pad
            out = jnp.zeros((n_rows, k2), jnp.float32)
            out = out.at[:, :n_coeffs].set(x)
            return out.at[:, cpad:cpad + n_coeffs].set(x)

        sig = call(dup(logmag), dup(ph0), dup(start), basis)  # (n_rows, n_samples)
        return sig.reshape(1, 1, n_resonances, expressivity, n_samples)

    return jax.jit(forward)


# --------------------------------------------------------------------------
# Module: parameter init + forward (mirrors the PyTorch FFTResonanceBlock)
# --------------------------------------------------------------------------
class FFTResonanceBlockPallas:
    def __init__(self, n_samples, resonance_window_size, n_resonances,
                 expressivity, base_resonance=0.5, key=None,
                 compute_dtype=jnp.bfloat16):
        self.n_samples = n_samples
        self.resonance_window_size = resonance_window_size
        self.n_resonances = n_resonances
        self.expressivity = expressivity
        self.base_resonance = base_resonance
        n_coeffs = resonance_window_size // 2 + 1

        key = jax.random.PRNGKey(0) if key is None else key
        ks = jax.random.split(key, 6)

        def init_resonance(k_res, k_def):
            res = jax.random.uniform(k_res, (n_resonances, n_coeffs, 1),
                                     minval=0.01, maxval=1.0, dtype=jnp.float32)
            deform = jax.random.uniform(k_def, (1, n_coeffs, expressivity),
                                        minval=-0.02, maxval=0.02,
                                        dtype=jnp.float32)
            return res + deform

        self.resonances = {
            "amp": init_resonance(ks[0], ks[1]),
            "phase": init_resonance(ks[2], ks[3]),
            "decay": init_resonance(ks[4], ks[5]),
        }

        self._forward = build_forward(
            n_samples, resonance_window_size, n_resonances, expressivity,
            base_resonance=base_resonance, compute_dtype=compute_dtype)

    def forward(self):
        return self._forward(self.resonances["amp"],
                             self.resonances["phase"],
                             self.resonances["decay"])


# --------------------------------------------------------------------------
if __name__ == "__main__":
    # Small shapes consistent with the module (n_samples a multiple of
    # window_size // 2).
    n_samples = 2048
    resonance_window_size = 64
    n_resonances = 4
    expressivity = 2

    block = FFTResonanceBlockPallas(
        n_samples=n_samples,
        resonance_window_size=resonance_window_size,
        n_resonances=n_resonances,
        expressivity=expressivity,
        base_resonance=0.5,
        key=jax.random.PRNGKey(0),
    )

    out = block.forward()
    out = jax.block_until_ready(out)

    expected_shape = (1, 1, n_resonances, expressivity, n_samples)
    assert out.shape == expected_shape, (out.shape, expected_shape)
    assert out.dtype == jnp.float32
    assert bool(jnp.all(jnp.isfinite(out)))
    print("KERNEL_OK")
</pallas_src>

<mosaic_0001>
module attributes {stable_mosaic.version = 11 : i64} {
  func.func @resonance_kernel(%arg0: i32, %arg1: i32, %arg2: memref<8x128xf32, #tpu.memory_space<vmem>>, %arg3: memref<8x128xf32, #tpu.memory_space<vmem>>, %arg4: memref<8x128xf32, #tpu.memory_space<vmem>>, %arg5: memref<2x128x32xbf16, #tpu.memory_space<vmem>>, %arg6: memref<8x1024xf32, #tpu.memory_space<vmem>>) attributes {dimension_semantics = [#tpu.dimension_semantics<parallel>, #tpu.dimension_semantics<parallel>], iteration_bounds = array<i64: 1, 2>, scalar_prefetch = 0 : i64, scratch_operands = 0 : i64, tpu.core_type = #tpu.core_type<tc>, window_params = [{transform_indices = @transform_0, window_bounds = array<i64: 8, 128>}, {transform_indices = @transform_1, window_bounds = array<i64: 8, 128>}, {transform_indices = @transform_2, window_bounds = array<i64: 8, 128>}, {pipeline_mode = #tpu.pipeline_mode<synchronous>, transform_indices = @transform_3, window_bounds = array<i64: 2, 128, 32>}, {transform_indices = @transform_4, window_bounds = array<i64: 8, 1024>}]} {
    %c0 = arith.constant 0 : index
    %c0_0 = arith.constant 0 : index
    %0 = vector.load %arg2[%c0, %c0_0] : memref<8x128xf32, #tpu.memory_space<vmem>>, vector<8x128xf32>
    %c0_1 = arith.constant 0 : index
    %c0_2 = arith.constant 0 : index
    %1 = vector.load %arg3[%c0_1, %c0_2] : memref<8x128xf32, #tpu.memory_space<vmem>>, vector<8x128xf32>
    %c0_3 = arith.constant 0 : index
    %c0_4 = arith.constant 0 : index
    %2 = vector.load %arg4[%c0_3, %c0_4] : memref<8x128xf32, #tpu.memory_space<vmem>>, vector<8x128xf32>
    %c32_i32 = arith.constant 32 : i32
    %3 = arith.muli %arg1, %c32_i32 : i32
    %4 = arith.sitofp %3 : i32 to f32
    %5 = vector.broadcast %4 : f32 to vector<8x128xf32>
    %6 = arith.mulf %5, %1 : vector<8x128xf32>
    %cst = arith.constant 0.159154937 : f32
    %7 = vector.broadcast %cst : f32 to vector<8x128xf32>
    %8 = arith.mulf %6, %7 : vector<8x128xf32>
    %cst_5 = arith.constant 5.000000e-01 : f32
    %9 = vector.broadcast %cst_5 : f32 to vector<8x128xf32>
    %10 = arith.addf %8, %9 : vector<8x128xf32>
    %11 = math.floor %10 : vector<8x128xf32>
    %cst_6 = arith.constant 6.28318548 : f32
    %12 = vector.broadcast %cst_6 : f32 to vector<8x128xf32>
    %13 = arith.mulf %12, %11 : vector<8x128xf32>
    %14 = arith.subf %6, %13 : vector<8x128xf32>
    %15 = vector.broadcast %4 : f32 to vector<8x128xf32>
    %16 = arith.mulf %15, %0 : vector<8x128xf32>
    %17 = math.exp %16 : vector<8x128xf32>
    %18 = arith.mulf %2, %17 : vector<8x128xf32>
    %19 = tpu.iota {dimensions = array<i32: 2>} : vector<1x1x128xi32>
    %c64_i32 = arith.constant 64 : i32
    %20 = vector.broadcast %c64_i32 : i32 to vector<1x1x128xi32>
    %21 = arith.cmpi sge, %19, %20 : vector<1x1x128xi32>
    %cst_7 = arith.constant 1.57079637 : f32
    %cst_8 = arith.constant 0.000000e+00 : f32
    %22 = vector.broadcast %cst_7 : f32 to vector<1x1x128xf32>
    %23 = vector.broadcast %cst_8 : f32 to vector<1x1x128xf32>
    %24 = arith.select %21, %22, %23 : vector<1x1x128xi1>, vector<1x1x128xf32>
    %25 = tpu.iota {dimensions = array<i32: 0>} : vector<33x1x1xi32>
    %26 = arith.sitofp %25 : vector<33x1x1xi32> to vector<33x1x1xf32>
    %27 = vector.shape_cast %14 : vector<8x128xf32> to vector<1x8x128xf32>
    %28 = vector.shape_cast %1 : vector<8x128xf32> to vector<1x8x128xf32>
    %29 = vector.broadcast %26 : vector<33x1x1xf32> to vector<33x8x128xf32>
    %30 = vector.broadcast %28 : vector<1x8x128xf32> to vector<33x8x128xf32>
    %31 = arith.mulf %29, %30 : vector<33x8x128xf32>
    %32 = vector.broadcast %27 : vector<1x8x128xf32> to vector<33x8x128xf32>
    %33 = arith.addf %32, %31 : vector<33x8x128xf32>
    %34 = vector.broadcast %24 : vector<1x1x128xf32> to vector<33x8x128xf32>
    %35 = arith.subf %33, %34 : vector<33x8x128xf32>
    %cst_9 = arith.constant 0.159154937 : f32
    %36 = vector.broadcast %cst_9 : f32 to vector<33x8x128xf32>
    %37 = arith.mulf %35, %36 : vector<33x8x128xf32>
    %cst_10 = arith.constant 5.000000e-01 : f32
    %38 = vector.broadcast %cst_10 : f32 to vector<33x8x128xf32>
    %39 = arith.addf %37, %38 : vector<33x8x128xf32>
    %40 = math.floor %39 : vector<33x8x128xf32>
    %cst_11 = arith.constant 6.28318548 : f32
    %41 = vector.broadcast %cst_11 : f32 to vector<33x8x128xf32>
    %42 = arith.mulf %41, %40 : vector<33x8x128xf32>
    %43 = arith.subf %35, %42 : vector<33x8x128xf32>
    %44 = vector.shape_cast %18 : vector<8x128xf32> to vector<1x8x128xf32>
    %45 = vector.shape_cast %0 : vector<8x128xf32> to vector<1x8x128xf32>
    %46 = vector.broadcast %26 : vector<33x1x1xf32> to vector<33x8x128xf32>
    %47 = vector.broadcast %45 : vector<1x8x128xf32> to vector<33x8x128xf32>
    %48 = arith.mulf %46, %47 : vector<33x8x128xf32>
    %49 = math.exp %48 : vector<33x8x128xf32>
    %50 = vector.broadcast %44 : vector<1x8x128xf32> to vector<33x8x128xf32>
    %51 = arith.mulf %50, %49 : vector<33x8x128xf32>
    %c32_i32_12 = arith.constant 32 : i32
    %52 = arith.muli %arg1, %c32_i32_12 : i32
    %53 = vector.broadcast %52 : i32 to vector<33x1x1xi32>
    %54 = arith.addi %53, %25 : vector<33x1x1xi32>
    %c1_i32 = arith.constant 1 : i32
    %55 = vector.broadcast %c1_i32 : i32 to vector<33x1x1xi32>
    %56 = arith.cmpi sge, %54, %55 : vector<33x1x1xi32>
    %57 = math.cos %43 : vector<33x8x128xf32>
    %58 = arith.mulf %51, %57 : vector<33x8x128xf32>
    %cst_13 = arith.constant 0.000000e+00 : f32
    %59 = vector.shape_cast %56 : vector<33x1x1xi1> to vector<33x1x1xi1>
    %60 = vector.broadcast %59 : vector<33x1x1xi1> to vector<33x8x128xi1>
    %61 = vector.broadcast %cst_13 : f32 to vector<33x8x128xf32>
    %62 = arith.select %60, %58, %61 : vector<33x8x128xi1>, vector<33x8x128xf32>
    %63 = vector.shape_cast %62 : vector<33x8x128xf32> to vector<264x128xf32>
    %64 = arith.truncf %63 : vector<264x128xf32> to vector<264x128xbf16>
    %c0_14 = arith.constant 0 : index
    %c0_15 = arith.constant 0 : index
    %c0_16 = arith.constant 0 : index
    %65 = vector.load %arg5[%c0_14, %c0_15, %c0_16] : memref<2x128x32xbf16, #tpu.memory_space<vmem>>, vector<1x128x32xbf16>
    %66 = vector.shape_cast %65 : vector<1x128x32xbf16> to vector<128x32xbf16>
    %cst_17 = arith.constant dense<0.000000e+00> : vector<264x32xf32>
    %67 = tpu.matmul %64, %66, %cst_17 {dimension_numbers = #tpu.dot_dimension_numbers<[1], [0], [0], [1], [0, 0, 1, 1], [], []>} : vector<264x128xbf16>, vector<128x32xbf16>, vector<264x32xf32> -> vector<264x32xf32>
    %c1 = arith.constant 1 : index
    %c0_18 = arith.constant 0 : index
    %c0_19 = arith.constant 0 : index
    %68 = vector.load %arg5[%c1, %c0_18, %c0_19] : memref<2x128x32xbf16, #tpu.memory_space<vmem>>, vector<1x128x32xbf16>
    %69 = vector.shape_cast %68 : vector<1x128x32xbf16> to vector<128x32xbf16>
    %cst_20 = arith.constant dense<0.000000e+00> : vector<264x32xf32>
    %70 = tpu.matmul %64, %69, %cst_20 {dimension_numbers = #tpu.dot_dimension_numbers<[1], [0], [0], [1], [0, 0, 1, 1], [], []>} : vector<264x128xbf16>, vector<128x32xbf16>, vector<264x32xf32> -> vector<264x32xf32>
    %71 = vector.shape_cast %67 : vector<264x32xf32> to vector<33x8x32xf32>
    %72 = vector.shape_cast %70 : vector<264x32xf32> to vector<33x8x32xf32>
    %73 = vector.extract_strided_slice %71 {offsets = [1, 0, 0], sizes = [1, 8, 32], strides = [1, 1, 1]} : vector<33x8x32xf32> to vector<1x8x32xf32>
    %74 = vector.shape_cast %73 : vector<1x8x32xf32> to vector<8x32xf32>
    %75 = vector.extract_strided_slice %72 {offsets = [0, 0, 0], sizes = [1, 8, 32], strides = [1, 1, 1]} : vector<33x8x32xf32> to vector<1x8x32xf32>
    %76 = vector.shape_cast %75 : vector<1x8x32xf32> to vector<8x32xf32>
    %77 = arith.addf %74, %76 : vector<8x32xf32>
    %c0_21 = arith.constant 0 : index
    %c0_22 = arith.constant 0 : index
    %78 = vector.load %arg6[%c0_21, %c0_22] : memref<8x1024xf32, #tpu.memory_space<vmem>>, vector<8x32xf32>
    tpu.vector_store %arg6[%c0_21, %c0_22], %77 {strides = array<i32>} : memref<8x1024xf32, #tpu.memory_space<vmem>>, vector<8x32xf32>,
    %79 = vector.extract_strided_slice %71 {offsets = [2, 0, 0], sizes = [1, 8, 32], strides = [1, 1, 1]} : vector<33x8x32xf32> to vector<1x8x32xf32>
    %80 = vector.shape_cast %79 : vector<1x8x32xf32> to vector<8x32xf32>
    %81 = vector.extract_strided_slice %72 {offsets = [1, 0, 0], sizes = [1, 8, 32], strides = [1, 1, 1]} : vector<33x8x32xf32> to vector<1x8x32xf32>
    %82 = vector.shape_cast %81 : vector<1x8x32xf32> to vector<8x32xf32>
    %83 = arith.addf %80, %82 : vector<8x32xf32>
    %c0_23 = arith.constant 0 : index
    %c32 = arith.constant 32 : index
    %84 = vector.load %arg6[%c0_23, %c32] : memref<8x1024xf32, #tpu.memory_space<vmem>>, vector<8x32xf32>
    tpu.vector_store %arg6[%c0_23, %c32], %83 {strides = array<i32>} : memref<8x1024xf32, #tpu.memory_space<vmem>>, vector<8x32xf32>,
    %85 = vector.extract_strided_slice %71 {offsets = [3, 0, 0], sizes = [1, 8, 32], strides = [1, 1, 1]} : vector<33x8x32xf32> to vector<1x8x32xf32>
    %86 = vector.shape_cast %85 : vector<1x8x32xf32> to vector<8x32xf32>
    %87 = vector.extract_strided_slice %72 {offsets = [2, 0, 0], sizes = [1, 8, 32], strides = [1, 1, 1]} : vector<33x8x32xf32> to vector<1x8x32xf32>
    %88 = vector.shape_cast %87 : vector<1x8x32xf32> to vector<8x32xf32>
    %89 = arith.addf %86, %88 : vector<8x32xf32>
    %c0_24 = arith.constant 0 : index
    %c64 = arith.constant 64 : index
    %90 = vector.load %arg6[%c0_24, %c64] : memref<8x1024xf32, #tpu.memory_space<vmem>>, vector<8x32xf32>
    tpu.vector_store %arg6[%c0_24, %c64], %89 {strides = array<i32>} : memref<8x1024xf32, #tpu.memory_space<vmem>>, vector<8x32xf32>,
    %91 = vector.extract_strided_slice %71 {offsets = [4, 0, 0], sizes = [1, 8, 32], strides = [1, 1, 1]} : vector<33x8x32xf32> to vector<1x8x32xf32>
    %92 = vector.shape_cast %91 : vector<1x8x32xf32> to vector<8x32xf32>
    %93 = vector.extract_strided_slice %72 {offsets = [3, 0, 0], sizes = [1, 8, 32], strides = [1, 1, 1]} : vector<33x8x32xf32> to vector<1x8x32xf32>
    %94 = vector.shape_cast %93 : vector<1x8x32xf32> to vector<8x32xf32>
    %95 = arith.addf %92, %94 : vector<8x32xf32>
    %c0_25 = arith.constant 0 : index
    %c96 = arith.constant 96 : index
    %96 = vector.load %arg6[%c0_25, %c96] : memref<8x1024xf32, #tpu.memory_space<vmem>>, vector<8x32xf32>
    tpu.vector_store %arg6[%c0_25, %c96], %95 {strides = array<i32>} : memref<8x1024xf32, #tpu.memory_space<vmem>>, vector<8x32xf32>,
    %97 = vector.extract_strided_slice %71 {offsets = [5, 0, 0], sizes = [1, 8, 32], strides = [1, 1, 1]} : vector<33x8x32xf32> to vector<1x8x32xf32>
    %98 = vector.shape_cast %97 : vector<1x8x32xf32> to vector<8x32xf32>
    %99 = vector.extract_strided_slice %72 {offsets = [4, 0, 0], sizes = [1, 8, 32], strides = [1, 1, 1]} : vector<33x8x32xf32> to vector<1x8x32xf32>
    %100 = vector.shape_cast %99 : vector<1x8x32xf32> to vector<8x32xf32>
    %101 = arith.addf %98, %100 : vector<8x32xf32>
    %c0_26 = arith.constant 0 : index
    %c128 = arith.constant 128 : index
    %102 = vector.load %arg6[%c0_26, %c128] : memref<8x1024xf32, #tpu.memory_space<vmem>>, vector<8x32xf32>
    tpu.vector_store %arg6[%c0_26, %c128], %101 {strides = array<i32>} : memref<8x1024xf32, #tpu.memory_space<vmem>>, vector<8x32xf32>,
    %103 = vector.extract_strided_slice %71 {offsets = [6, 0, 0], sizes = [1, 8, 32], strides = [1, 1, 1]} : vector<33x8x32xf32> to vector<1x8x32xf32>
    %104 = vector.shape_cast %103 : vector<1x8x32xf32> to vector<8x32xf32>
    %105 = vector.extract_strided_slice %72 {offsets = [5, 0, 0], sizes = [1, 8, 32], strides = [1, 1, 1]} : vector<33x8x32xf32> to vector<1x8x32xf32>
    %106 = vector.shape_cast %105 : vector<1x8x32xf32> to vector<8x32xf32>
    %107 = arith.addf %104, %106 : vector<8x32xf32>
    %c0_27 = arith.constant 0 : index
    %c160 = arith.constant 160 : index
    %108 = vector.load %arg6[%c0_27, %c160] : memref<8x1024xf32, #tpu.memory_space<vmem>>, vector<8x32xf32>
    tpu.vector_store %arg6[%c0_27, %c160], %107 {strides = array<i32>} : memref<8x1024xf32, #tpu.memory_space<vmem>>, vector<8x32xf32>,
    %109 = vector.extract_strided_slice %71 {offsets = [7, 0, 0], sizes = [1, 8, 32], strides = [1, 1, 1]} : vector<33x8x32xf32> to vector<1x8x32xf32>
    %110 = vector.shape_cast %109 : vector<1x8x32xf32> to vector<8x32xf32>
    %111 = vector.extract_strided_slice %72 {offsets = [6, 0, 0], sizes = [1, 8, 32], strides = [1, 1, 1]} : vector<33x8x32xf32> to vector<1x8x32xf32>
    %112 = vector.shape_cast %111 : vector<1x8x32xf32> to vector<8x32xf32>
    %113 = arith.addf %110, %112 : vector<8x32xf32>
    %c0_28 = arith.constant 0 : index
    %c192 = arith.constant 192 : index
    %114 = vector.load %arg6[%c0_28, %c192] : memref<8x1024xf32, #tpu.memory_space<vmem>>, vector<8x32xf32>
    tpu.vector_store %arg6[%c0_28, %c192], %113 {strides = array<i32>} : memref<8x1024xf32, #tpu.memory_space<vmem>>, vector<8x32xf32>,
    %115 = vector.extract_strided_slice %71 {offsets = [8, 0, 0], sizes = [1, 8, 32], strides = [1, 1, 1]} : vector<33x8x32xf32> to vector<1x8x32xf32>
    %116 = vector.shape_cast %115 : vector<1x8x32xf32> to vector<8x32xf32>
    %117 = vector.extract_strided_slice %72 {offsets = [7, 0, 0], sizes = [1, 8, 32], strides = [1, 1, 1]} : vector<33x8x32xf32> to vector<1x8x32xf32>
    %118 = vector.shape_cast %117 : vector<1x8x32xf32> to vector<8x32xf32>
    %119 = arith.addf %116, %118 : vector<8x32xf32>
    %c0_29 = arith.constant 0 : index
    %c224 = arith.constant 224 : index
    %120 = vector.load %arg6[%c0_29, %c224] : memref<8x1024xf32, #tpu.memory_space<vmem>>, vector<8x32xf32>
    tpu.vector_store %arg6[%c0_29, %c224], %119 {strides = array<i32>} : memref<8x1024xf32, #tpu.memory_space<vmem>>, vector<8x32xf32>,
    %121 = vector.extract_strided_slice %71 {offsets = [9, 0, 0], sizes = [1, 8, 32], strides = [1, 1, 1]} : vector<33x8x32xf32> to vector<1x8x32xf32>
    %122 = vector.shape_cast %121 : vector<1x8x32xf32> to vector<8x32xf32>
    %123 = vector.extract_strided_slice %72 {offsets = [8, 0, 0], sizes = [1, 8, 32], strides = [1, 1, 1]} : vector<33x8x32xf32> to vector<1x8x32xf32>
    %124 = vector.shape_cast %123 : vector<1x8x32xf32> to vector<8x32xf32>
    %125 = arith.addf %122, %124 : vector<8x32xf32>
    %c0_30 = arith.constant 0 : index
    %c256 = arith.constant 256 : index
    %126 = vector.load %arg6[%c0_30, %c256] : memref<8x1024xf32, #tpu.memory_space<vmem>>, vector<8x32xf32>
    tpu.vector_store %arg6[%c0_30, %c256], %125 {strides = array<i32>} : memref<8x1024xf32, #tpu.memory_space<vmem>>, vector<8x32xf32>,
    %127 = vector.extract_strided_slice %71 {offsets = [10, 0, 0], sizes = [1, 8, 32], strides = [1, 1, 1]} : vector<33x8x32xf32> to vector<1x8x32xf32>
    %128 = vector.shape_cast %127 : vector<1x8x32xf32> to vector<8x32xf32>
    %129 = vector.extract_strided_slice %72 {offsets = [9, 0, 0], sizes = [1, 8, 32], strides = [1, 1, 1]} : vector<33x8x32xf32> to vector<1x8x32xf32>
    %130 = vector.shape_cast %129 : vector<1x8x32xf32> to vector<8x32xf32>
    %131 = arith.addf %128, %130 : vector<8x32xf32>
    %c0_31 = arith.constant 0 : index
    %c288 = arith.constant 288 : index
    %132 = vector.load %arg6[%c0_31, %c288] : memref<8x1024xf32, #tpu.memory_space<vmem>>, vector<8x32xf32>
    tpu.vector_store %arg6[%c0_31, %c288], %131 {strides = array<i32>} : memref<8x1024xf32, #tpu.memory_space<vmem>>, vector<8x32xf32>,
    %133 = vector.extract_strided_slice %71 {offsets = [11, 0, 0], sizes = [1, 8, 32], strides = [1, 1, 1]} : vector<33x8x32xf32> to vector<1x8x32xf32>
    %134 = vector.shape_cast %133 : vector<1x8x32xf32> to vector<8x32xf32>
    %135 = vector.extract_strided_slice %72 {offsets = [10, 0, 0], sizes = [1, 8, 32], strides = [1, 1, 1]} : vector<33x8x32xf32> to vector<1x8x32xf32>
    %136 = vector.shape_cast %135 : vector<1x8x32xf32> to vector<8x32xf32>
    %137 = arith.addf %134, %136 : vector<8x32xf32>
    %c0_32 = arith.constant 0 : index
    %c320 = arith.constant 320 : index
    %138 = vector.load %arg6[%c0_32, %c320] : memref<8x1024xf32, #tpu.memory_space<vmem>>, vector<8x32xf32>
    tpu.vector_store %arg6[%c0_32, %c320], %137 {strides = array<i32>} : memref<8x1024xf32, #tpu.memory_space<vmem>>, vector<8x32xf32>,
    %139 = vector.extract_strided_slice %71 {offsets = [12, 0, 0], sizes = [1, 8, 32], strides = [1, 1, 1]} : vector<33x8x32xf32> to vector<1x8x32xf32>
    %140 = vector.shape_cast %139 : vector<1x8x32xf32> to vector<8x32xf32>
    %141 = vector.extract_strided_slice %72 {offsets = [11, 0, 0], sizes = [1, 8, 32], strides = [1, 1, 1]} : vector<33x8x32xf32> to vector<1x8x32xf32>
    %142 = vector.shape_cast %141 : vector<1x8x32xf32> to vector<8x32xf32>
    %143 = arith.addf %140, %142 : vector<8x32xf32>
    %c0_33 = arith.constant 0 : index
    %c352 = arith.constant 352 : index
    %144 = vector.load %arg6[%c0_33, %c352] : memref<8x1024xf32, #tpu.memory_space<vmem>>, vector<8x32xf32>
    tpu.vector_store %arg6[%c0_33, %c352], %143 {strides = array<i32>} : memref<8x1024xf32, #tpu.memory_space<vmem>>, vector<8x32xf32>,
    %145 = vector.extract_strided_slice %71 {offsets = [13, 0, 0], sizes = [1, 8, 32], strides = [1, 1, 1]} : vector<33x8x32xf32> to vector<1x8x32xf32>
    %146 = vector.shape_cast %145 : vector<1x8x32xf32> to vector<8x32xf32>
    %147 = vector.extract_strided_slice %72 {offsets = [12, 0, 0], sizes = [1, 8, 32], strides = [1, 1, 1]} : vector<33x8x32xf32> to vector<1x8x32xf32>
    %148 = vector.shape_cast %147 : vector<1x8x32xf32> to vector<8x32xf32>
    %149 = arith.addf %146, %148 : vector<8x32xf32>
    %c0_34 = arith.constant 0 : index
    %c384 = arith.constant 384 : index
    %150 = vector.load %arg6[%c0_34, %c384] : memref<8x1024xf32, #tpu.memory_space<vmem>>, vector<8x32xf32>
    tpu.vector_store %arg6[%c0_34, %c384], %149 {strides = array<i32>} : memref<8x1024xf32, #tpu.memory_space<vmem>>, vector<8x32xf32>,
    %151 = vector.extract_strided_slice %71 {offsets = [14, 0, 0], sizes = [1, 8, 32], strides = [1, 1, 1]} : vector<33x8x32xf32> to vector<1x8x32xf32>
    %152 = vector.shape_cast %151 : vector<1x8x32xf32> to vector<8x32xf32>
    %153 = vector.extract_strided_slice %72 {offsets = [13, 0, 0], sizes = [1, 8, 32], strides = [1, 1, 1]} : vector<33x8x32xf32> to vector<1x8x32xf32>
    %154 = vector.shape_cast %153 : vector<1x8x32xf32> to vector<8x32xf32>
    %155 = arith.addf %152, %154 : vector<8x32xf32>
    %c0_35 = arith.constant 0 : index
    %c416 = arith.constant 416 : index
    %156 = vector.load %arg6[%c0_35, %c416] : memref<8x1024xf32, #tpu.memory_space<vmem>>, vector<8x32xf32>
    tpu.vector_store %arg6[%c0_35, %c416], %155 {strides = array<i32>} : memref<8x1024xf32, #tpu.memory_space<vmem>>, vector<8x32xf32>,
    %157 = vector.extract_strided_slice %71 {offsets = [15, 0, 0], sizes = [1, 8, 32], strides = [1, 1, 1]} : vector<33x8x32xf32> to vector<1x8x32xf32>
    %158 = vector.shape_cast %157 : vector<1x8x32xf32> to vector<8x32xf32>
    %159 = vector.extract_strided_slice %72 {offsets = [14, 0, 0], sizes = [1, 8, 32], strides = [1, 1, 1]} : vector<33x8x32xf32> to vector<1x8x32xf32>
    %160 = vector.shape_cast %159 : vector<1x8x32xf32> to vector<8x32xf32>
    %161 = arith.addf %158, %160 : vector<8x32xf32>
    %c0_36 = arith.constant 0 : index
    %c448 = arith.constant 448 : index
    %162 = vector.load %arg6[%c0_36, %c448] : memref<8x1024xf32, #tpu.memory_space<vmem>>, vector<8x32xf32>
    tpu.vector_store %arg6[%c0_36, %c448], %161 {strides = array<i32>} : memref<8x1024xf32, #tpu.memory_space<vmem>>, vector<8x32xf32>,
    %163 = vector.extract_strided_slice %71 {offsets = [16, 0, 0], sizes = [1, 8, 32], strides = [1, 1, 1]} : vector<33x8x32xf32> to vector<1x8x32xf32>
    %164 = vector.shape_cast %163 : vector<1x8x32xf32> to vector<8x32xf32>
    %165 = vector.extract_strided_slice %72 {offsets = [15, 0, 0], sizes = [1, 8, 32], strides = [1, 1, 1]} : vector<33x8x32xf32> to vector<1x8x32xf32>
    %166 = vector.shape_cast %165 : vector<1x8x32xf32> to vector<8x32xf32>
    %167 = arith.addf %164, %166 : vector<8x32xf32>
    %c0_37 = arith.constant 0 : index
    %c480 = arith.constant 480 : index
    %168 = vector.load %arg6[%c0_37, %c480] : memref<8x1024xf32, #tpu.memory_space<vmem>>, vector<8x32xf32>
    tpu.vector_store %arg6[%c0_37, %c480], %167 {strides = array<i32>} : memref<8x1024xf32, #tpu.memory_space<vmem>>, vector<8x32xf32>,
    %169 = vector.extract_strided_slice %71 {offsets = [17, 0, 0], sizes = [1, 8, 32], strides = [1, 1, 1]} : vector<33x8x32xf32> to vector<1x8x32xf32>
    %170 = vector.shape_cast %169 : vector<1x8x32xf32> to vector<8x32xf32>
    %171 = vector.extract_strided_slice %72 {offsets = [16, 0, 0], sizes = [1, 8, 32], strides = [1, 1, 1]} : vector<33x8x32xf32> to vector<1x8x32xf32>
    %172 = vector.shape_cast %171 : vector<1x8x32xf32> to vector<8x32xf32>
    %173 = arith.addf %170, %172 : vector<8x32xf32>
    %c0_38 = arith.constant 0 : index
    %c512 = arith.constant 512 : index
    %174 = vector.load %arg6[%c0_38, %c512] : memref<8x1024xf32, #tpu.memory_space<vmem>>, vector<8x32xf32>
    tpu.vector_store %arg6[%c0_38, %c512], %173 {strides = array<i32>} : memref<8x1024xf32, #tpu.memory_space<vmem>>, vector<8x32xf32>,
    %175 = vector.extract_strided_slice %71 {offsets = [18, 0, 0], sizes = [1, 8, 32], strides = [1, 1, 1]} : vector<33x8x32xf32> to vector<1x8x32xf32>
    %176 = vector.shape_cast %175 : vector<1x8x32xf32> to vector<8x32xf32>
    %177 = vector.extract_strided_slice %72 {offsets = [17, 0, 0], sizes = [1, 8, 32], strides = [1, 1, 1]} : vector<33x8x32xf32> to vector<1x8x32xf32>
    %178 = vector.shape_cast %177 : vector<1x8x32xf32> to vector<8x32xf32>
    %179 = arith.addf %176, %178 : vector<8x32xf32>
    %c0_39 = arith.constant 0 : index
    %c544 = arith.constant 544 : index
    %180 = vector.load %arg6[%c0_39, %c544] : memref<8x1024xf32, #tpu.memory_space<vmem>>, vector<8x32xf32>
    tpu.vector_store %arg6[%c0_39, %c544], %179 {strides = array<i32>} : memref<8x1024xf32, #tpu.memory_space<vmem>>, vector<8x32xf32>,
    %181 = vector.extract_strided_slice %71 {offsets = [19, 0, 0], sizes = [1, 8, 32], strides = [1, 1, 1]} : vector<33x8x32xf32> to vector<1x8x32xf32>
    %182 = vector.shape_cast %181 : vector<1x8x32xf32> to vector<8x32xf32>
    %183 = vector.extract_strided_slice %72 {offsets = [18, 0, 0], sizes = [1, 8, 32], strides = [1, 1, 1]} : vector<33x8x32xf32> to vector<1x8x32xf32>
    %184 = vector.shape_cast %183 : vector<1x8x32xf32> to vector<8x32xf32>
    %185 = arith.addf %182, %184 : vector<8x32xf32>
    %c0_40 = arith.constant 0 : index
    %c576 = arith.constant 576 : index
    %186 = vector.load %arg6[%c0_40, %c576] : memref<8x1024xf32, #tpu.memory_space<vmem>>, vector<8x32xf32>
    tpu.vector_store %arg6[%c0_40, %c576], %185 {strides = array<i32>} : memref<8x1024xf32, #tpu.memory_space<vmem>>, vector<8x32xf32>,
    %187 = vector.extract_strided_slice %71 {offsets = [20, 0, 0], sizes = [1, 8, 32], strides = [1, 1, 1]} : vector<33x8x32xf32> to vector<1x8x32xf32>
    %188 = vector.shape_cast %187 : vector<1x8x32xf32> to vector<8x32xf32>
    %189 = vector.extract_strided_slice %72 {offsets = [19, 0, 0], sizes = [1, 8, 32], strides = [1, 1, 1]} : vector<33x8x32xf32> to vector<1x8x32xf32>
    %190 = vector.shape_cast %189 : vector<1x8x32xf32> to vector<8x32xf32>
    %191 = arith.addf %188, %190 : vector<8x32xf32>
    %c0_41 = arith.constant 0 : index
    %c608 = arith.constant 608 : index
    %192 = vector.load %arg6[%c0_41, %c608] : memref<8x1024xf32, #tpu.memory_space<vmem>>, vector<8x32xf32>
    tpu.vector_store %arg6[%c0_41, %c608], %191 {strides = array<i32>} : memref<8x1024xf32, #tpu.memory_space<vmem>>, vector<8x32xf32>,
    %193 = vector.extract_strided_slice %71 {offsets = [21, 0, 0], sizes = [1, 8, 32], strides = [1, 1, 1]} : vector<33x8x32xf32> to vector<1x8x32xf32>
    %194 = vector.shape_cast %193 : vector<1x8x32xf32> to vector<8x32xf32>
    %195 = vector.extract_strided_slice %72 {offsets = [20, 0, 0], sizes = [1, 8, 32], strides = [1, 1, 1]} : vector<33x8x32xf32> to vector<1x8x32xf32>
    %196 = vector.shape_cast %195 : vector<1x8x32xf32> to vector<8x32xf32>
    %197 = arith.addf %194, %196 : vector<8x32xf32>
    %c0_42 = arith.constant 0 : index
    %c640 = arith.constant 640 : index
    %198 = vector.load %arg6[%c0_42, %c640] : memref<8x1024xf32, #tpu.memory_space<vmem>>, vector<8x32xf32>
    tpu.vector_store %arg6[%c0_42, %c640], %197 {strides = array<i32>} : memref<8x1024xf32, #tpu.memory_space<vmem>>, vector<8x32xf32>,
    %199 = vector.extract_strided_slice %71 {offsets = [22, 0, 0], sizes = [1, 8, 32], strides = [1, 1, 1]} : vector<33x8x32xf32> to vector<1x8x32xf32>
    %200 = vector.shape_cast %199 : vector<1x8x32xf32> to vector<8x32xf32>
    %201 = vector.extract_strided_slice %72 {offsets = [21, 0, 0], sizes = [1, 8, 32], strides = [1, 1, 1]} : vector<33x8x32xf32> to vector<1x8x32xf32>
    %202 = vector.shape_cast %201 : vector<1x8x32xf32> to vector<8x32xf32>
    %203 = arith.addf %200, %202 : vector<8x32xf32>
    %c0_43 = arith.constant 0 : index
    %c672 = arith.constant 672 : index
    %204 = vector.load %arg6[%c0_43, %c672] : memref<8x1024xf32, #tpu.memory_space<vmem>>, vector<8x32xf32>
    tpu.vector_store %arg6[%c0_43, %c672], %203 {strides = array<i32>} : memref<8x1024xf32, #tpu.memory_space<vmem>>, vector<8x32xf32>,
    %205 = vector.extract_strided_slice %71 {offsets = [23, 0, 0], sizes = [1, 8, 32], strides = [1, 1, 1]} : vector<33x8x32xf32> to vector<1x8x32xf32>
    %206 = vector.shape_cast %205 : vector<1x8x32xf32> to vector<8x32xf32>
    %207 = vector.extract_strided_slice %72 {offsets = [22, 0, 0], sizes = [1, 8, 32], strides = [1, 1, 1]} : vector<33x8x32xf32> to vector<1x8x32xf32>
    %208 = vector.shape_cast %207 : vector<1x8x32xf32> to vector<8x32xf32>
    %209 = arith.addf %206, %208 : vector<8x32xf32>
    %c0_44 = arith.constant 0 : index
    %c704 = arith.constant 704 : index
    %210 = vector.load %arg6[%c0_44, %c704] : memref<8x1024xf32, #tpu.memory_space<vmem>>, vector<8x32xf32>
    tpu.vector_store %arg6[%c0_44, %c704], %209 {strides = array<i32>} : memref<8x1024xf32, #tpu.memory_space<vmem>>, vector<8x32xf32>,
    %211 = vector.extract_strided_slice %71 {offsets = [24, 0, 0], sizes = [1, 8, 32], strides = [1, 1, 1]} : vector<33x8x32xf32> to vector<1x8x32xf32>
    %212 = vector.shape_cast %211 : vector<1x8x32xf32> to vector<8x32xf32>
    %213 = vector.extract_strided_slice %72 {offsets = [23, 0, 0], sizes = [1, 8, 32], strides = [1, 1, 1]} : vector<33x8x32xf32> to vector<1x8x32xf32>
    %214 = vector.shape_cast %213 : vector<1x8x32xf32> to vector<8x32xf32>
    %215 = arith.addf %212, %214 : vector<8x32xf32>
    %c0_45 = arith.constant 0 : index
    %c736 = arith.constant 736 : index
    %216 = vector.load %arg6[%c0_45, %c736] : memref<8x1024xf32, #tpu.memory_space<vmem>>, vector<8x32xf32>
    tpu.vector_store %arg6[%c0_45, %c736], %215 {strides = array<i32>} : memref<8x1024xf32, #tpu.memory_space<vmem>>, vector<8x32xf32>,
    %217 = vector.extract_strided_slice %71 {offsets = [25, 0, 0], sizes = [1, 8, 32], strides = [1, 1, 1]} : vector<33x8x32xf32> to vector<1x8x32xf32>
    %218 = vector.shape_cast %217 : vector<1x8x32xf32> to vector<8x32xf32>
    %219 = vector.extract_strided_slice %72 {offsets = [24, 0, 0], sizes = [1, 8, 32], strides = [1, 1, 1]} : vector<33x8x32xf32> to vector<1x8x32xf32>
    %220 = vector.shape_cast %219 : vector<1x8x32xf32> to vector<8x32xf32>
    %221 = arith.addf %218, %220 : vector<8x32xf32>
    %c0_46 = arith.constant 0 : index
    %c768 = arith.constant 768 : index
    %222 = vector.load %arg6[%c0_46, %c768] : memref<8x1024xf32, #tpu.memory_space<vmem>>, vector<8x32xf32>
    tpu.vector_store %arg6[%c0_46, %c768], %221 {strides = array<i32>} : memref<8x1024xf32, #tpu.memory_space<vmem>>, vector<8x32xf32>,
    %223 = vector.extract_strided_slice %71 {offsets = [26, 0, 0], sizes = [1, 8, 32], strides = [1, 1, 1]} : vector<33x8x32xf32> to vector<1x8x32xf32>
    %224 = vector.shape_cast %223 : vector<1x8x32xf32> to vector<8x32xf32>
    %225 = vector.extract_strided_slice %72 {offsets = [25, 0, 0], sizes = [1, 8, 32], strides = [1, 1, 1]} : vector<33x8x32xf32> to vector<1x8x32xf32>
    %226 = vector.shape_cast %225 : vector<1x8x32xf32> to vector<8x32xf32>
    %227 = arith.addf %224, %226 : vector<8x32xf32>
    %c0_47 = arith.constant 0 : index
    %c800 = arith.constant 800 : index
    %228 = vector.load %arg6[%c0_47, %c800] : memref<8x1024xf32, #tpu.memory_space<vmem>>, vector<8x32xf32>
    tpu.vector_store %arg6[%c0_47, %c800], %227 {strides = array<i32>} : memref<8x1024xf32, #tpu.memory_space<vmem>>, vector<8x32xf32>,
    %229 = vector.extract_strided_slice %71 {offsets = [27, 0, 0], sizes = [1, 8, 32], strides = [1, 1, 1]} : vector<33x8x32xf32> to vector<1x8x32xf32>
    %230 = vector.shape_cast %229 : vector<1x8x32xf32> to vector<8x32xf32>
    %231 = vector.extract_strided_slice %72 {offsets = [26, 0, 0], sizes = [1, 8, 32], strides = [1, 1, 1]} : vector<33x8x32xf32> to vector<1x8x32xf32>
    %232 = vector.shape_cast %231 : vector<1x8x32xf32> to vector<8x32xf32>
    %233 = arith.addf %230, %232 : vector<8x32xf32>
    %c0_48 = arith.constant 0 : index
    %c832 = arith.constant 832 : index
    %234 = vector.load %arg6[%c0_48, %c832] : memref<8x1024xf32, #tpu.memory_space<vmem>>, vector<8x32xf32>
    tpu.vector_store %arg6[%c0_48, %c832], %233 {strides = array<i32>} : memref<8x1024xf32, #tpu.memory_space<vmem>>, vector<8x32xf32>,
    %235 = vector.extract_strided_slice %71 {offsets = [28, 0, 0], sizes = [1, 8, 32], strides = [1, 1, 1]} : vector<33x8x32xf32> to vector<1x8x32xf32>
    %236 = vector.shape_cast %235 : vector<1x8x32xf32> to vector<8x32xf32>
    %237 = vector.extract_strided_slice %72 {offsets = [27, 0, 0], sizes = [1, 8, 32], strides = [1, 1, 1]} : vector<33x8x32xf32> to vector<1x8x32xf32>
    %238 = vector.shape_cast %237 : vector<1x8x32xf32> to vector<8x32xf32>
    %239 = arith.addf %236, %238 : vector<8x32xf32>
    %c0_49 = arith.constant 0 : index
    %c864 = arith.constant 864 : index
    %240 = vector.load %arg6[%c0_49, %c864] : memref<8x1024xf32, #tpu.memory_space<vmem>>, vector<8x32xf32>
    tpu.vector_store %arg6[%c0_49, %c864], %239 {strides = array<i32>} : memref<8x1024xf32, #tpu.memory_space<vmem>>, vector<8x32xf32>,
    %241 = vector.extract_strided_slice %71 {offsets = [29, 0, 0], sizes = [1, 8, 32], strides = [1, 1, 1]} : vector<33x8x32xf32> to vector<1x8x32xf32>
    %242 = vector.shape_cast %241 : vector<1x8x32xf32> to vector<8x32xf32>
    %243 = vector.extract_strided_slice %72 {offsets = [28, 0, 0], sizes = [1, 8, 32], strides = [1, 1, 1]} : vector<33x8x32xf32> to vector<1x8x32xf32>
    %244 = vector.shape_cast %243 : vector<1x8x32xf32> to vector<8x32xf32>
    %245 = arith.addf %242, %244 : vector<8x32xf32>
    %c0_50 = arith.constant 0 : index
    %c896 = arith.constant 896 : index
    %246 = vector.load %arg6[%c0_50, %c896] : memref<8x1024xf32, #tpu.memory_space<vmem>>, vector<8x32xf32>
    tpu.vector_store %arg6[%c0_50, %c896], %245 {strides = array<i32>} : memref<8x1024xf32, #tpu.memory_space<vmem>>, vector<8x32xf32>,
    %247 = vector.extract_strided_slice %71 {offsets = [30, 0, 0], sizes = [1, 8, 32], strides = [1, 1, 1]} : vector<33x8x32xf32> to vector<1x8x32xf32>
    %248 = vector.shape_cast %247 : vector<1x8x32xf32> to vector<8x32xf32>
    %249 = vector.extract_strided_slice %72 {offsets = [29, 0, 0], sizes = [1, 8, 32], strides = [1, 1, 1]} : vector<33x8x32xf32> to vector<1x8x32xf32>
    %250 = vector.shape_cast %249 : vector<1x8x32xf32> to vector<8x32xf32>
    %251 = arith.addf %248, %250 : vector<8x32xf32>
    %c0_51 = arith.constant 0 : index
    %c928 = arith.constant 928 : index
    %252 = vector.load %arg6[%c0_51, %c928] : memref<8x1024xf32, #tpu.memory_space<vmem>>, vector<8x32xf32>
    tpu.vector_store %arg6[%c0_51, %c928], %251 {strides = array<i32>} : memref<8x1024xf32, #tpu.memory_space<vmem>>, vector<8x32xf32>,
    %253 = vector.extract_strided_slice %71 {offsets = [31, 0, 0], sizes = [1, 8, 32], strides = [1, 1, 1]} : vector<33x8x32xf32> to vector<1x8x32xf32>
    %254 = vector.shape_cast %253 : vector<1x8x32xf32> to vector<8x32xf32>
    %255 = vector.extract_strided_slice %72 {offsets = [30, 0, 0], sizes = [1, 8, 32], strides = [1, 1, 1]} : vector<33x8x32xf32> to vector<1x8x32xf32>
    %256 = vector.shape_cast %255 : vector<1x8x32xf32> to vector<8x32xf32>
    %257 = arith.addf %254, %256 : vector<8x32xf32>
    %c0_52 = arith.constant 0 : index
    %c960 = arith.constant 960 : index
    %258 = vector.load %arg6[%c0_52, %c960] : memref<8x1024xf32, #tpu.memory_space<vmem>>, vector<8x32xf32>
    tpu.vector_store %arg6[%c0_52, %c960], %257 {strides = array<i32>} : memref<8x1024xf32, #tpu.memory_space<vmem>>, vector<8x32xf32>,
    %259 = vector.extract_strided_slice %71 {offsets = [32, 0, 0], sizes = [1, 8, 32], strides = [1, 1, 1]} : vector<33x8x32xf32> to vector<1x8x32xf32>
    %260 = vector.shape_cast %259 : vector<1x8x32xf32> to vector<8x32xf32>
    %261 = vector.extract_strided_slice %72 {offsets = [31, 0, 0], sizes = [1, 8, 32], strides = [1, 1, 1]} : vector<33x8x32xf32> to vector<1x8x32xf32>
    %262 = vector.shape_cast %261 : vector<1x8x32xf32> to vector<8x32xf32>
    %263 = arith.addf %260, %262 : vector<8x32xf32>
    %c0_53 = arith.constant 0 : index
    %c992 = arith.constant 992 : index
    %264 = vector.load %arg6[%c0_53, %c992] : memref<8x1024xf32, #tpu.memory_space<vmem>>, vector<8x32xf32>
    tpu.vector_store %arg6[%c0_53, %c992], %263 {strides = array<i32>} : memref<8x1024xf32, #tpu.memory_space<vmem>>, vector<8x32xf32>,
    return
  }
  func.func @transform_0(%arg0: i32, %arg1: i32) -> (i32, i32) {
    %c0_i32 = arith.constant 0 : i32
    %c0_i32_0 = arith.constant 0 : i32
    return %arg0, %c0_i32 : i32, i32
  }
  func.func @transform_1(%arg0: i32, %arg1: i32) -> (i32, i32) {
    %c0_i32 = arith.constant 0 : i32
    %c0_i32_0 = arith.constant 0 : i32
    return %arg0, %c0_i32 : i32, i32
  }
  func.func @transform_2(%arg0: i32, %arg1: i32) -> (i32, i32) {
    %c0_i32 = arith.constant 0 : i32
    %c0_i32_0 = arith.constant 0 : i32
    return %arg0, %c0_i32 : i32, i32
  }
  func.func @transform_3(%arg0: i32, %arg1: i32) -> (i32, i32, i32) {
    %c0_i32 = arith.constant 0 : i32
    %c0_i32_0 = arith.constant 0 : i32
    %c0_i32_1 = arith.constant 0 : i32
    %c0_i32_2 = arith.constant 0 : i32
    return %c0_i32, %c0_i32_0, %c0_i32_1 : i32, i32, i32
  }
  func.func @transform_4(%arg0: i32, %arg1: i32) -> (i32, i32) {
    %c0_i32 = arith.constant 0 : i32
    return %arg0, %arg1 : i32, i32
  }
}

</mosaic_0001>

<bundles_post_ra>
// kernel: forward.1
= control target key start
LH: loop header
LB: loop body
LE: loop exit
PB: predicated region body
PF: predicated region fallthrough
CT: control target
= control target key end

     0   :  { %s6007_s15 = smov 0   ;;  %s6009_s16 = smov 0   ;;  %s9857_s0 = inlined_call_operand.vmem [shape: f32[8,128], index: 0, kind: input, shape index: {}]   ;;  %s9858_s1 = inlined_call_operand.vmem [shape: f32[8,128], index: 1, kind: input, shape index: {}]   ;;  %s9859_s2 = inlined_call_operand.vmem [shape: f32[8,128], index: 2, kind: input, shape index: {}]   ;;  %s9860_s3 = inlined_call_operand.vmem [shape: bf16[2,128,32], index: 3, kind: input, shape index: {}]   ;;  %s9861_s4 = inlined_call_operand.vmem [shape: f32[8,2048], index: 4, kind: output, shape index: {}]  }
   0x1   :  { %s6011_s17 = smov 0  }
   0x2 LB: > { %s23_s18 = sadd.s32 1, %s5965_s16  ;;  %p5063_p0 = scmp.ge.s32.totalorder %s5969_s17, 1  ;;  %s5969_s17 = sphi %s6011_s17, %s14_s17   ;;  %s5965_s16 = sphi %s6009_s16, %s9934_s16   ;;  %s5961_s15 = sphi %s6007_s15, %s9933_s15  }
   0x3   : > { %p24_p1 = scmp.ge.s32.totalorder %s23_s18, 2  ;;  %p193_p2 = scmp.lt.s32.totalorder %s5969_s17, 3 }
   0x5   : > { %s9936_s18 = smov (%p24_p1, %s23_s18), 0  ;;  %p194_p3 = pnand %p5063_p0, %p193_p2 }
   0x6   : > { %s5066_s5 = sshll.u32 (!%p194_p3), %s5961_s15, 5  ;;  %s5979_s14 = smov (!%p194_p3), 32  }
   0x7   : > { %197 = sbr.rel (%p194_p3) target bundleno = 1319 (0x527), region = 36  ;;  %s6061_s8 = scvt.s32.f32 (!%p194_p3), %s5066_s5 }
   0x8   : > { %s5980_s19 = smov (!%p194_p3), 64   ;;  %s5981_s20 = smov (!%p194_p3), 96  }
   0xc   : > { %v5720_v0 = vld [vmem:[%s9860_s3 + $0x38] sm:$0xff]   ;;  %v9862_v1 = vmov 0.0   ;;  %v5722_v3 = vld [vmem:[%s9860_s3 + $0x30] sm:$0xff]   ;;  %vm5972_vm0 = vmmov 0   ;;  %v5724_v5 = vld [vmem:[%s9860_s3 + $0x28] sm:$0xff]   ;;  %v258_v10 = vstv %s6061_s8  ;;  %v269_v14 = vlaneseq }
   0xd   : > { %5385 = vmatprep.subr.bf16.mxu0 %v9862_v1  ;;  %5469 = vmatprep.subr.bf16.mxu1 %v9862_v1  ;;  %v5721_v2 = vld [vmem:[%s9860_s3 + $0x78] sm:$0xff]   ;;  %v5723_v4 = vld [vmem:[%s9860_s3 + $0x70] sm:$0xff]   ;;  %v5725_v6 = vld [vmem:[%s9860_s3 + $0x68] sm:$0xff]   ;;  %v6131_v47 = vstv %s5066_s5  ;;  %s5064_s5 = sshll.u32 %s5961_s15, 3 }
   0xe   : > { %5386 = vmatpush3.bf16.msra.mxu0 %v5720_v0  ;;  %5401 = vmatprep.mubr.msk.bf16.mxu0 %vm5972_vm0, %v9862_v1  ;;  %v5726_v7 = vld [vmem:[%s9860_s3 + $0x20] sm:$0xff]   ;;  %v5728_v9 = vld [vmem:[%s9860_s3 + $0x18] sm:$0xff]   ;;  %v5730_v15 = vld [vmem:[%s9860_s3 + $0x10] sm:$0xff]   ;;  %v270_v19 = vand.u32 127, %v269_v14  ;;  %v6139_v56 = vadd.s32 1, %v6131_v47  ;;  %v6144_v60 = vadd.s32 2, %v6131_v47 }
   0xf   : > { %5470 = vmatpush3.bf16.msra.mxu1 %v5721_v2  ;;  %5387 = vmatprep.subr.bf16.mxu0 %v9862_v1  ;;  %v5727_v8 = vld [vmem:[%s9860_s3 + $0x60] sm:$0xff]   ;;  %v5729_v11 = vld [vmem:[%s9860_s3 + $0x58] sm:$0xff]   ;;  %v5731_v16 = vld [vmem:[%s9860_s3 + $0x50] sm:$0xff]   ;;  %v6153_v2 = vadd.s32 3, %v6131_v47  ;;  %p9508_p4 = scmp.lt.s32.totalorder %s5064_s5, 15 }
  0x10   : > { %5471 = vmatprep.subr.bf16.mxu1 %v9862_v1  ;;  %5485 = vmatprep.mubr.msk.bf16.mxu1 %vm5972_vm0, %v9862_v1  ;;  %v6080_v12 = vld [vmem:[%s9858_s1] sm:$0xff]  ;;  %v5732_v20 = vld [vmem:[%s9860_s3 + $0x8] sm:$0xff]   ;;  %vm271_vm1 = vcmp.ge.s32.totalorder %v270_v19, 64 }
  0x11   : > { %v259_v13 = vmul.f32 %v258_v10, %v6080_v12  ;;  %v5733_v21 = vld [vmem:[%s9860_s3 + $0x48] sm:$0xff]   ;;  %v6102_v23 = vld [vmem:[%s9857_s0] sm:$0xff]  ;;  %v306_v25 = vmul.f32 0.0, %v6080_v12  ;;  %v308_v26 = vmul.f32 2.0, %v6080_v12  ;;  %v6118_v31 = vsel %vm271_vm1, 1.5707964, %v9862_v1 }
  0x12   : > { %5388 = vmatpush3.bf16.msra.mxu0 %v5722_v3  ;;  %v5734_v27 = vld [vmem:[%s9860_s3] sm:$0xff]   ;;  %v265_v30 = vmul.f32 %v258_v10, %v6102_v23  ;;  %v309_v32 = vmul.f32 3.0, %v6080_v12  ;;  %v310_v49 = vmul.f32 4.0, %v6080_v12  ;;  %v570_v52 = vmul.f32 0.0, %v6102_v23  ;;  %s9938_s5 = smov (!%p9508_p4, %s5064_s5), 15 }
  0x13   : > { %5472 = vmatpush3.bf16.msra.mxu1 %v5723_v4  ;;  %5389 = vmatprep.subr.bf16.mxu0 %v9862_v1  ;;  %v260_v17 = vmul.f32 0.15915494, %v259_v13  ;;  %v5735_v28 = vld [vmem:[%s9860_s3 + $0x40] sm:$0xff]   ;;  %v311_v57 = vmul.f32 5.0, %v6080_v12  ;;  %v605_v0 = vmul.f32 1.442695, %v6102_v23 }
  0x14   : > { %5473 = vmatprep.subr.bf16.mxu1 %v9862_v1  ;;  %v266_v36 = vmul.f32 1.442695, %v265_v30  ;;  %v603_v3 = vmul.f32 1.442695, %v570_v52  ;;  %v6179_v30 = vmul.f32 2.0, %v6102_v23  ;;  %s5065_s15 = sshll.u32 %s9938_s5, 3 }
  0x15   : > { %v261_v18 = vadd.f32 0.5, %v260_v17  ;;  %s9586_s13 = scalar_lea.vmem %s9861_s4, %s5065_s15 }
  0x16   : > { %5390 = vmatpush3.bf16.msra.mxu0 %v5724_v5  ;;  %5736 = vpow2.f32 %v266_v36 }
  0x17   : > { %5474 = vmatpush3.bf16.msra.mxu1 %v5725_v6  ;;  %5391 = vmatprep.subr.bf16.mxu0 %v9862_v1  ;;  %v262_v22 = vfloor.f32 %v261_v18  ;;  %5738 = vpow2.f32 %v605_v0 }
  0x18   : > { %5475 = vmatprep.subr.bf16.mxu1 %v9862_v1  ;;  %5740 = vpow2.f32 %v603_v3  ;;  %v5977_v3 = vmov 920167782  }
  0x19   : > { %v263_v24 = vmul.f32 6.2831855, %v262_v22  ;;  %v255_v22 = vld [vmem:[%s9859_s2] sm:$0xff] }
  0x1a   : > { %5392 = vmatpush3.bf16.msra.mxu0 %v5726_v7 }
  0x1b   : > { %5476 = vmatpush3.bf16.msra.mxu1 %v5727_v8  ;;  %5393 = vmatprep.subr.bf16.mxu0 %v9862_v1  ;;  %v6113_v29 = vsub.f32 %v259_v13, %v263_v24 }
  0x1c   : > { %5477 = vmatprep.subr.bf16.mxu1 %v9862_v1 }
  0x1d   : > { %v339_v33 = vadd.f32 %v306_v25, %v6113_v29  ;;  %v340_v34 = vadd.f32 %v6113_v29, %v6080_v12  ;;  %v341_v35 = vadd.f32 %v308_v26, %v6113_v29  ;;  %v342_v40 = vadd.f32 %v309_v32, %v6113_v29 }
  0x1e   : > { %5394 = vmatpush3.bf16.msra.mxu0 %v5728_v9  ;;  %v343_v61 = vadd.f32 %v310_v49, %v6113_v29  ;;  %v344_v7 = vadd.f32 %v311_v57, %v6113_v29  ;;  %v6182_v32 = vmul.f32 7.0, %v6080_v12 }
  0x1f   : > { %5478 = vmatpush3.bf16.msra.mxu1 %v5729_v11  ;;  %5395 = vmatprep.subr.bf16.mxu0 %v9862_v1  ;;  %v372_v37 = vsub.f32 %v339_v33, %v6118_v31  ;;  %v373_v38 = vsub.f32 %v340_v34, %v6118_v31  ;;  %v374_v39 = vsub.f32 %v341_v35, %v6118_v31 }
  0x20   : > { %5479 = vmatprep.subr.bf16.mxu1 %v9862_v1  ;;  %v6134_v48 = vsub.f32 %v342_v40, %v6118_v31  ;;  %v6163_v11 = vsub.f32 %v343_v61, %v6118_v31  ;;  %v6171_v19 = vsub.f32 %v344_v7, %v6118_v31  ;;  %v5976_v61 = vmov 2102212464  }
  0x21   : > { %v405_v41 = vmul.f32 0.15915494, %v372_v37  ;;  %v406_v42 = vmul.f32 0.15915494, %v373_v38  ;;  %v407_v43 = vmul.f32 0.15915494, %v374_v39 }
  0x22   : > { %5396 = vmatpush3.bf16.msra.mxu0 %v5730_v15  ;;  %v408_v58 = vmul.f32 0.15915494, %v6134_v48 }
  0x23   : > { %5480 = vmatpush3.bf16.msra.mxu1 %v5731_v16  ;;  %5397 = vmatprep.subr.bf16.mxu0 %v9862_v1  ;;  %v438_v44 = vadd.f32 0.5, %v405_v41  ;;  %v439_v45 = vadd.f32 0.5, %v406_v42  ;;  %v440_v46 = vadd.f32 0.5, %v407_v43 }
  0x24   : > { %5481 = vmatprep.subr.bf16.mxu1 %v9862_v1  ;;  %v441_v10 = vadd.f32 0.5, %v408_v58  ;;  %v5975_v58 = vmov 2131351028  }
  0x25   : > { %v471_v50 = vfloor.f32 %v438_v44  ;;  %v472_v51 = vfloor.f32 %v439_v45  ;;  %v473_v53 = vfloor.f32 %v440_v46 }
  0x26   : > { %5398 = vmatpush3.bf16.msra.mxu0 %v5732_v20  ;;  %v312_v20 = vmul.f32 6.0, %v6080_v12  ;;  %v474_v25 = vfloor.f32 %v441_v10 }
  0x27   : > { %5482 = vmatpush3.bf16.msra.mxu1 %v5733_v21  ;;  %5399 = vmatprep.subr.bf16.mxu0 %v9862_v1  ;;  %v504_v54 = vmul.f32 6.2831855, %v471_v50  ;;  %v505_v55 = vmul.f32 6.2831855, %v472_v51  ;;  %v506_v59 = vmul.f32 6.2831855, %v473_v53  ;;  %v5737_v21 = vpop.eup %5736 }
  0x28   : > { %5483 = vmatprep.subr.bf16.mxu1 %v9862_v1  ;;  %v6192_v41 = vmul.f32 6.2831855, %v474_v25  ;;  %v5973_v53 = vmov 683565275  }
  0x29   : > { %v6147_v62 = vsub.f32 %v372_v37, %v504_v54  ;;  %v6149_v63 = vsub.f32 %v373_v38, %v505_v55  ;;  %v6155_v4 = vsub.f32 %v374_v39, %v506_v59  ;;  %v6184_v37 = vmul.f32 %v5737_v21, %v255_v22 }
  0x2a   : > { %5400 = vmatpush3.bf16.msra.mxu0 %v5734_v27  ;;  %v409_v27 = vmul.f32 0.15915494, %v6163_v11  ;;  %v6187_v38 = vmul.f32 0.15915494, %v6171_v19  ;;  %v6190_v39 = vadd.f32 %v312_v20, %v6113_v29  ;;  %v5974_v55 = vmov 2475754826  }
  0x2b   : > { %5484 = vmatpush3.bf16.msra.mxu1 %v5735_v28  ;;  %v768_v5 = vand.u32 2147483647, %v6147_v62  ;;  %v771_v6 = vand.u32 2139095040, %v6147_v62  ;;  %v871_v8 = vand.u32 2147483647, %v6149_v63  ;;  %v874_v9 = vand.u32 2139095040, %v6149_v63 }
  0x2c   : > { %v977_v17 = vand.u32 2139095040, %v6155_v4  ;;  %v6194_v42 = vadd.f32 0.5, %v409_v27  ;;  %v9864_v45 = vand.u32 2147483647, %v6155_v4 }
  0x2d   : > { %v772_v13 = vshrl.u32 %v771_v6, 23  ;;  %v775_v14 = vand.u32 8388607, %v768_v5  ;;  %v875_v15 = vshrl.u32 %v874_v9, 23  ;;  %v878_v16 = vand.u32 8388607, %v871_v8 }
  0x2e   : > { %v978_v26 = vshrl.u32 %v977_v17, 23  ;;  %v5978_v17 = vmov 1326507024  }
  0x2f   : > { %v5067_v18 = vadd.s32 4294967169, %v772_v13  ;;  %v5071_v24 = vadd.s32 4294967169, %v875_v15  ;;  %v776_v33 = vor.u32 8388608, %v775_v14  ;;  %v879_v34 = vor.u32 8388608, %v878_v16  ;;  %v6214_v15 = vpop.eup %5738 }
  0x30   : > { %v5075_v36 = vadd.s32 4294967169, %v978_v26 }
  0x31   : > { %v778_v28 = vadd.s32 1, %v5067_v18  ;;  %v881_v35 = vadd.s32 1, %v5071_v24  ;;  %v6197_v46 = vshll.u32 %v776_v33, 8  ;;  %v6199_v50 = vshll.u32 %v879_v34, 8 }
  0x32   : > { %v6201_v51 = vadd.s32 1, %v5075_v36  ;;  %v6223_v36 = vpop.eup %5740 }
  0x33   : > { %vm779_vm2 = vcmp.gt.s32.totalorder %v778_v28, 0  ;;  %vm882_vm3 = vcmp.gt.s32.totalorder %v881_v35, 0 }
  0x34   : > { %v780_v40 = vsel %vm779_vm2, %v778_v28, 0  ;;  %v883_v44 = vsel %vm882_vm3, %v881_v35, 0  ;;  %vm985_vm8 = vcmp.gt.s32.totalorder %v6201_v51, 0 }
  0x35   : > { %v781_v12 = vshrl.u32 %v780_v40, 5  ;;  %v782_v43 = vand.u32 31, %v780_v40  ;;  %v885_v49 = vand.u32 31, %v883_v44  ;;  %v6208_v7 = vshrl.u32 %v883_v44, 5 }
  0x37   : > { %v783_v52 = vsub.s32 32, %v782_v43  ;;  %v785_v54 = vshll.u32 %v5973_v53, %v782_v43  ;;  %v788_v57 = vshll.u32 %v5974_v55, %v782_v43  ;;  %v791_v59 = vshll.u32 %v5975_v58, %v782_v43 }
  0x38   : > { %v794_v0 = vshll.u32 %v5976_v61, %v782_v43  ;;  %v797_v6 = vshll.u32 %v5977_v3, %v782_v43  ;;  %vm800_vm4 = vcmp.lt.s32.totalorder %v781_v12, 1  ;;  %vm801_vm5 = vcmp.lt.s32.totalorder %v781_v12, 2 }
  0x39   : > { %v784_v9 = vshrl.u32 %v5973_v53, %v783_v52  ;;  %v786_v10 = vshrl.u32 %v5974_v55, %v783_v52  ;;  %v789_v13 = vshrl.u32 %v5975_v58, %v783_v52  ;;  %v792_v14 = vshrl.u32 %v5976_v61, %v783_v52 }
  0x3a   : > { %v795_v16 = vshrl.u32 %v5977_v3, %v783_v52  ;;  %v798_v18 = vshrl.u32 %v5978_v17, %v783_v52  ;;  %vm803_vm6 = vcmp.lt.s32.totalorder %v781_v12, 4  ;;  %v886_v24 = vsub.s32 32, %v885_v49 }
  0x3b   : > { %v787_v20 = vor.u32 %v786_v10, %v785_v54  ;;  %v790_v21 = vor.u32 %v789_v13, %v788_v57  ;;  %v793_v22 = vor.u32 %v792_v14, %v791_v59  ;;  %vm802_vm7 = vcmp.lt.s32.totalorder %v781_v12, 3 }
  0x3c   : > { %v796_v25 = vor.u32 %v795_v16, %v794_v0  ;;  %v799_v26 = vor.u32 %v798_v18, %v797_v6  ;;  %v888_v27 = vshll.u32 %v5973_v53, %v885_v49  ;;  %v891_v52 = vshll.u32 %v5974_v55, %v885_v49 }
  0x3d   : > { %v804_v28 = vsel %vm800_vm4, %v784_v9, %v787_v20  ;;  %v805_v33 = vsel %vm803_vm6, %v793_v22, 2102212464  ;;  %v808_v34 = vsel %vm800_vm4, %v787_v20, %v790_v21  ;;  %v812_v35 = vsel %vm800_vm4, %v790_v21, %v793_v22 }
  0x3e   : > { %v806_v40 = vsel %vm802_vm7, %v790_v21, %v805_v33  ;;  %v809_v43 = vsel %vm803_vm6, %v796_v25, 920167782  ;;  %v813_v44 = vsel %vm803_vm6, %v799_v26, 1326507024  ;;  %v887_v59 = vshrl.u32 %v5973_v53, %v886_v24 }
  0x3f   : > { %v810_v54 = vsel %vm802_vm7, %v793_v22, %v809_v43  ;;  %v814_v57 = vsel %vm802_vm7, %v796_v25, %v813_v44  ;;  %v889_v0 = vshrl.u32 %v5974_v55, %v886_v24  ;;  %v807_v6 = vsel %vm801_vm5, %v804_v28, %v806_v40 }
  0x40   : > { %v811_v9 = vsel %vm801_vm5, %v808_v34, %v810_v54  ;;  %v815_v10 = vsel %vm801_vm5, %v812_v35, %v814_v57  ;;  %v892_v13 = vshrl.u32 %v5975_v58, %v886_v24  ;;  %v894_v25 = vshll.u32 %v5975_v58, %v885_v49 }
  0x41   : > { %v6236_v14 = vmul.u32.u64.low %v6197_v46, %v815_v10  ;;  %v6237_v16 = vmul.u32.u64.high %v6197_v46, %v815_v10, %v6236_v14  ;;  %v6240_v18 = vmul.u32.u64.low %v6197_v46, %v811_v9  ;;  %v6241_v20 = vmul.u32.u64.high %v6197_v46, %v811_v9, %v6240_v18 }
  0x42   : > { %v890_v21 = vor.u32 %v889_v0, %v888_v27  ;;  %v893_v22 = vor.u32 %v892_v13, %v891_v52  ;;  %v895_v26 = vshrl.u32 %v5976_v61, %v886_v24  ;;  %v897_v12 = vshll.u32 %v5976_v61, %v885_v49 }
  0x43   : > { %v898_v28 = vshrl.u32 %v5977_v3, %v886_v24  ;;  %v900_v33 = vshll.u32 %v5977_v3, %v885_v49  ;;  %v901_v34 = vshrl.u32 %v5978_v17, %v886_v24  ;;  %v823_v35 = vmul.u32 %v6197_v46, %v807_v6 }
  0x44   : > { %v896_v40 = vor.u32 %v895_v26, %v894_v25  ;;  %vm903_vm9 = vcmp.lt.s32.totalorder %v6208_v7, 1  ;;  %vm904_vm10 = vcmp.lt.s32.totalorder %v6208_v7, 2  ;;  %vm825_vm11 = vc.u32 %v6237_v16, %v6240_v18 }
  0x45   : > { %v826_v27 = vadd.s32 1, %v6241_v20  ;;  %v899_v43 = vor.u32 %v898_v28, %v897_v12  ;;  %vm905_vm12 = vcmp.lt.s32.totalorder %v6208_v7, 3  ;;  %v902_v44 = vor.u32 %v901_v34, %v900_v33 }
  0x46   : > { %vm906_vm13 = vcmp.lt.s32.totalorder %v6208_v7, 4  ;;  %v907_v49 = vsel %vm903_vm9, %v887_v59, %v890_v21  ;;  %v911_v24 = vsel %vm903_vm9, %v890_v21, %v893_v22  ;;  %v915_v57 = vsel %vm903_vm9, %v893_v22, %v896_v40 }
  0x47   : > { %v827_v46 = vsel %vm825_vm11, %v826_v27, %v6241_v20  ;;  %v908_v52 = vsel %vm906_vm13, %v896_v40, 2102212464  ;;  %v912_v54 = vsel %vm906_vm13, %v899_v43, 920167782  ;;  %v916_v10 = vsel %vm906_vm13, %v902_v44, 1326507024 }
  0x48   : > { %v828_v0 = vadd.s32 %v827_v46, %v823_v35  ;;  %v909_v6 = vsel %vm905_vm12, %v893_v22, %v908_v52  ;;  %v913_v9 = vsel %vm905_vm12, %v896_v40, %v912_v54  ;;  %v917_v25 = vsel %vm905_vm12, %v899_v43, %v916_v10 }
  0x49   : > { %v910_v13 = vsel %vm904_vm10, %v907_v49, %v909_v6  ;;  %v914_v14 = vsel %vm904_vm10, %v911_v24, %v913_v9  ;;  %v986_v59 = vsel %vm985_vm8, %v6201_v51, 0  ;;  %v918_v20 = vsel %vm904_vm10, %v915_v57, %v917_v25 }
  0x4a   : > { %v829_v21 = vadd.s32 536870912, %v828_v0  ;;  %v6269_v26 = vmul.u32.u64.low %v6199_v50, %v914_v14  ;;  %v6270_v22 = vmul.u32.u64.high %v6199_v50, %v914_v14, %v6269_v26  ;;  %v6279_v33 = vsub.f32 %v6134_v48, %v6192_v41 }
  0x4b   : > { %v6274_v12 = vmul.u32.u64.low %v6199_v50, %v918_v20  ;;  %v6275_v28 = vmul.u32.u64.high %v6199_v50, %v918_v20, %v6274_v12  ;;  %v981_v51 = vand.u32 8388607, %v9864_v45  ;;  %v6286_v7 = vmul.f32 3.0, %v6102_v23 }
  0x4c   : > { %v6283_v34 = vshrl.u32 %v829_v21, 30  ;;  %v988_v35 = vand.u32 31, %v986_v59  ;;  %v6289_v40 = vadd.f32 0.5, %v6187_v38  ;;  %v926_v27 = vmul.u32 %v6199_v50, %v910_v13 }
  0x4d   : > { %v6293_v43 = vmul.f32 1.442695, %v6179_v30  ;;  %v6297_v48 = vadd.f32 %v6182_v32, %v6113_v29  ;;  %v6301_v41 = vsub.f32 %v6190_v39, %v6118_v31  ;;  %v6305_v23 = vmul.f32 %v6223_v36, %v6184_v37 }
  0x4e   : > { %v831_v38 = vshll.u32 %v6283_v34, 30  ;;  %v929_v44 = vadd.s32 1, %v6270_v22  ;;  %v989_v50 = vsub.s32 32, %v988_v35  ;;  %vm928_vm14 = vc.u32 %v6275_v28, %v6269_v26 }
  0x4f   : > { %v982_v30 = vor.u32 8388608, %v981_v51  ;;  %v1080_v32 = vand.u32 2139095040, %v6279_v33  ;;  %v475_v49 = vfloor.f32 %v6194_v42  ;;  %v987_v46 = vshrl.u32 %v986_v59, 5 }
  0x50   : > { %v6313_v24 = vsub.s32 %v828_v0, %v831_v38  ;;  %v930_v39 = vsel %vm928_vm14, %v929_v44, %v6270_v22  ;;  %v991_v54 = vshll.u32 %v5973_v53, %v988_v35  ;;  %v992_v57 = vshrl.u32 %v5974_v55, %v989_v50 }
  0x51   : > { %v931_v52 = vadd.s32 %v930_v39, %v926_v27  ;;  %v994_v6 = vshll.u32 %v5974_v55, %v988_v35  ;;  %v995_v10 = vshrl.u32 %v5975_v58, %v989_v50  ;;  %v997_v13 = vshll.u32 %v5975_v58, %v988_v35 }
  0x52   : > { %v834_v9 = vsub.s32 0, %v6313_v24  ;;  %v998_v0 = vshrl.u32 %v5976_v61, %v989_v50  ;;  %v1000_v25 = vshll.u32 %v5976_v61, %v988_v35  ;;  %v6325_v59 = vshll.u32 %v982_v30, 8 }
  0x53   : > { %v932_v14 = vadd.s32 536870912, %v931_v52  ;;  %v1081_v21 = vshrl.u32 %v1080_v32, 23  ;;  %v824_v20 = vadd.s32 %v6240_v18, %v6237_v16  ;;  %v990_v12 = vshrl.u32 %v5973_v53, %v989_v50 }
  0x54   : > { %v5068_v22 = vmin.u32 %v834_v9, %v6313_v24  ;;  %vm1009_vm15 = vcmp.lt.s32.totalorder %v987_v46, 4  ;;  %v993_v27 = vor.u32 %v992_v57, %v991_v54  ;;  %v1001_v38 = vshrl.u32 %v5977_v3, %v989_v50 }
  0x55   : > { %v6331_v51 = vshrl.u32 %v932_v14, 30  ;;  %v1003_v44 = vshll.u32 %v5977_v3, %v988_v35  ;;  %v996_v1 = vor.u32 %v995_v10, %v994_v6  ;;  %v999_v30 = vor.u32 %v998_v0, %v997_v13 }
  0x56   : > { %v836_v39 = vclz %v5068_v22  ;;  %v1004_v32 = vshrl.u32 %v5978_v17, %v989_v50  ;;  %v1002_v16 = vor.u32 %v1001_v38, %v1000_v25  ;;  %vm1006_vm1 = vcmp.lt.s32.totalorder %v987_v46, 1 }
  0x57   : > { %v934_v45 = vshll.u32 %v6331_v51, 30  ;;  %vm1008_vm2 = vcmp.lt.s32.totalorder %v987_v46, 3  ;;  %v1011_v14 = vsel %vm1009_vm15, %v999_v30, 2102212464  ;;  %v5079_v36 = vadd.s32 4294967169, %v1081_v21 }
  0x58   : > { %v5069_v18 = vadd.s32 4294967294, %v836_v39  ;;  %v1005_v9 = vor.u32 %v1004_v32, %v1003_v44  ;;  %vm1007_vm3 = vcmp.lt.s32.totalorder %v987_v46, 2  ;;  %v1010_v35 = vsel %vm1006_vm1, %v990_v12, %v993_v27 }
  0x59   : > { %v6338_v54 = vsub.s32 %v931_v52, %v934_v45  ;;  %v1015_v57 = vsel %vm1009_vm15, %v1002_v16, 920167782  ;;  %vm770_vm4 = vcmp.lt.s32.totalorder %v6147_v62, 0  ;;  %v1014_v50 = vsel %vm1006_vm1, %v993_v27, %v996_v1 }
  0x5a   : > { %vm5070_vm5 = vcmp.lt.s32.totalorder %v5069_v18, 0  ;;  %v1016_v6 = vsel %vm1008_vm2, %v999_v30, %v1015_v57  ;;  %v1019_v10 = vsel %vm1009_vm15, %v1005_v9, 1326507024  ;;  %v1012_v45 = vsel %vm1008_vm2, %v996_v1, %v1011_v14 }
  0x5b   : > { %v839_v13 = vsel %vm5070_vm5, 0, %v5069_v18  ;;  %v937_v0 = vsub.s32 0, %v6338_v54  ;;  %v1018_v52 = vsel %vm1006_vm1, %v996_v1, %v999_v30  ;;  %v1020_v12 = vsel %vm1008_vm2, %v1002_v16, %v1019_v10 }
  0x5c   : > { %v840_v25 = vsub.s32 32, %v839_v13  ;;  %v841_v21 = vshll.u32 %v6313_v24, %v839_v13  ;;  %v844_v22 = vsub.s32 4294967266, %v839_v13  ;;  %v854_v38 = vsub.s32 4, %v6283_v34 }
  0x5d   : > { %v5072_v27 = vmin.u32 %v937_v0, %v6338_v54  ;;  %v1017_v44 = vsel %vm1007_vm3, %v1014_v50, %v1016_v6  ;;  %v1077_v39 = vand.u32 2147483647, %v6279_v33  ;;  %v1013_v9 = vsel %vm1007_vm3, %v1010_v35, %v1012_v45 }
  0x5e   : > { %v842_v32 = vshrl.u32 %v824_v20, %v840_v25  ;;  %v845_v18 = vadd.s32 127, %v844_v22  ;;  %v1021_v1 = vsel %vm1007_vm3, %v1018_v52, %v1020_v12  ;;  %v1087_v16 = vadd.s32 1, %v5079_v36 }
  0x5f   : > { %v939_v30 = vclz %v5072_v27  ;;  %v6358_v24 = vmul.u32.u64.low %v6325_v59, %v1021_v1  ;;  %v6359_v14 = vmul.u32.u64.high %v6325_v59, %v1021_v1, %v6358_v24  ;;  %vm6368_vm6 = vcmp.le.f32.partialorder %v768_v5, 0.7853982 }
  0x60   : > { %v843_v57 = vor.u32 %v842_v32, %v841_v21  ;;  %v846_v10 = vshll.u32 %v845_v18, 23  ;;  %v6362_v13 = vmul.u32.u64.low %v6325_v59, %v1017_v44  ;;  %v6363_v0 = vmul.u32.u64.high %v6325_v59, %v1017_v44, %v6362_v13 }
  0x61   : > { %v5073_v46 = vadd.s32 4294967294, %v939_v30  ;;  %v6374_v35 = vand.u32 8388607, %v1077_v39  ;;  %vm1088_vm7 = vcmp.gt.s32.totalorder %v1087_v16, 0  ;;  %v927_v6 = vadd.s32 %v6269_v26, %v6275_v28 }
  0x62   : > { %v847_v36 = vor.u32 4788187, %v846_v10  ;;  %v850_v50 = vcvt.s32.f32 %v843_v57  ;;  %v1089_v45 = vsel %vm1088_vm7, %v1087_v16, 0  ;;  %v855_v52 = vsel %vm770_vm4, %v854_v38, %v6283_v34 }
  0x63   : > { %vm5074_vm8 = vcmp.lt.s32.totalorder %v5073_v46, 0  ;;  %v1029_v5 = vmul.u32 %v6325_v59, %v1013_v9  ;;  %vm1031_vm9 = vc.u32 %v6359_v14, %v6362_v13  ;;  %v1032_v22 = vadd.s32 1, %v6363_v0 }
  0x64   : > { %v848_v25 = vand.u32 2147483647, %v847_v36  ;;  %v942_v21 = vsel %vm5074_vm8, 0, %v5073_v46  ;;  %v1091_v12 = vand.u32 31, %v1089_v45  ;;  %v1085_v28 = vor.u32 8388608, %v6374_v35 }
  0x65   : > { %v943_v27 = vsub.s32 32, %v942_v21  ;;  %v944_v44 = vshll.u32 %v6338_v54, %v942_v21  ;;  %v947_v26 = vsub.s32 4294967266, %v942_v21  ;;  %v857_v34 = vsel %vm6368_vm6, 0, %v855_v52 }
  0x66   : > { %v851_v32 = vmul.f32 %v850_v50, %v848_v25  ;;  %v1033_v59 = vsel %vm1031_vm9, %v1032_v22, %v6363_v0  ;;  %v1092_v38 = vsub.s32 32, %v1091_v12  ;;  %v957_v1 = vsub.s32 4, %v6331_v51 }
  0x67   : > { %v945_v18 = vshrl.u32 %v927_v6, %v943_v27  ;;  %v948_v9 = vadd.s32 127, %v947_v26  ;;  %v1034_v30 = vadd.s32 %v1033_v59, %v1029_v5  ;;  %vm873_vm10 = vcmp.lt.s32.totalorder %v6149_v63, 0 }
  0x68   : > { %v852_v24 = vxor.u32 2147483648, %v851_v32  ;;  %v1090_v16 = vshrl.u32 %v1089_v45, 5  ;;  %v1094_v54 = vshll.u32 %v5973_v53, %v1091_v12  ;;  %v1097_v57 = vshll.u32 %v5974_v55, %v1091_v12 }
  0x69   : > { %v946_v10 = vor.u32 %v945_v18, %v944_v44  ;;  %v949_v46 = vshll.u32 %v948_v9, 23  ;;  %v1035_v35 = vadd.s32 536870912, %v1034_v30  ;;  %v1095_v36 = vshrl.u32 %v5974_v55, %v1092_v38 }
  0x6a   : > { %v853_v0 = vsel %vm770_vm4, %v852_v24, %v851_v32  ;;  %v1098_v50 = vshrl.u32 %v5975_v58, %v1092_v38  ;;  %v1100_v6 = vshll.u32 %v5975_v58, %v1091_v12  ;;  %v1101_v52 = vshrl.u32 %v5976_v61, %v1092_v38 }
  0x6b   : > { %v856_v45 = vsel %vm6368_vm6, %v6147_v62, %v853_v0  ;;  %v950_v5 = vor.u32 4788187, %v949_v46  ;;  %v953_v25 = vcvt.s32.f32 %v946_v10  ;;  %v6403_v21 = vshrl.u32 %v1035_v35, 30 }
  0x6c   : > { %5742 = vcosq.f32 %v856_v45  ;;  %v1103_v22 = vshll.u32 %v5976_v61, %v1091_v12  ;;  %v1104_v27 = vshrl.u32 %v5977_v3, %v1092_v38  ;;  %vm1109_vm11 = vcmp.lt.s32.totalorder %v1090_v16, 1 }
  0x6d   : > { %5744 = vsinq.f32 %v856_v45  ;;  %v951_v44 = vand.u32 2147483647, %v950_v5  ;;  %v1037_v26 = vshll.u32 %v6403_v21, 30  ;;  %v1096_v32 = vor.u32 %v1095_v36, %v1094_v54 }
  0x6e   : > { %v1099_v59 = vor.u32 %v1098_v50, %v1097_v57  ;;  %v1105_v18 = vor.u32 %v1104_v27, %v1103_v22  ;;  %v1106_v20 = vshll.u32 %v5977_v3, %v1091_v12  ;;  %v1107_v9 = vshrl.u32 %v5978_v17, %v1092_v38 }
  0x6f   : > { %v954_v24 = vmul.f32 %v953_v25, %v951_v44  ;;  %v6410_v10 = vsub.s32 %v1034_v30, %v1037_v26  ;;  %v1093_v46 = vshrl.u32 %v5973_v53, %v1092_v38  ;;  %v1102_v35 = vor.u32 %v1101_v52, %v1100_v6 }
  0x70   : > { %v6413_v0 = vand.u32 3, %v857_v34  ;;  %vm6417_vm12 = vcmp.le.f32.partialorder %v871_v8, 0.7853982  ;;  %vm1111_vm13 = vcmp.lt.s32.totalorder %v1090_v16, 3  ;;  %vm1112_vm14 = vcmp.lt.s32.totalorder %v1090_v16, 4 }
  0x71   : > { %v955_v54 = vxor.u32 2147483648, %v954_v24  ;;  %v1040_v12 = vsub.s32 0, %v6410_v10  ;;  %v1108_v57 = vor.u32 %v1107_v9, %v1106_v20  ;;  %v1114_v30 = vsel %vm1112_vm14, %v1102_v35, 2102212464 }
  0x72   : > { %vm1110_vm15 = vcmp.lt.s32.totalorder %v1090_v16, 2  ;;  %v1117_v38 = vsel %vm1109_vm11, %v1096_v32, %v1099_v59  ;;  %v1118_v34 = vsel %vm1112_vm14, %v1105_v18, 920167782  ;;  %v1125_v36 = vshll.u32 %v1085_v28, 8 }
  0x73   : > { %v956_v8 = vsel %vm873_vm10, %v955_v54, %v954_v24  ;;  %v958_v50 = vsel %vm873_vm10, %v957_v1, %v6331_v51  ;;  %v5076_v6 = vmin.u32 %v1040_v12, %v6410_v10  ;;  %v1113_v52 = vsel %vm1109_vm11, %v1093_v46, %v1096_v32 }
  0x74   : > { %v959_v5 = vsel %vm6417_vm12, %v6149_v63, %v956_v8  ;;  %v1115_v25 = vsel %vm1111_vm13, %v1099_v59, %v1114_v30  ;;  %v1119_v22 = vsel %vm1111_vm13, %v1102_v35, %v1118_v34  ;;  %v1121_v28 = vsel %vm1109_vm11, %v1099_v59, %v1102_v35 }
  0x75   : > { %5746 = vcosq.f32 %v959_v5  ;;  %v1042_v27 = vclz %v5076_v6  ;;  %v1120_v44 = vsel %vm1110_vm15, %v1117_v38, %v1119_v22  ;;  %v1122_v51 = vsel %vm1112_vm14, %v1108_v57, 1326507024 }
  0x76   : > { %5748 = vsinq.f32 %v959_v5  ;;  %v1123_v1 = vsel %vm1111_vm13, %v1105_v18, %v1122_v51  ;;  %v6441_v26 = vmul.u32.u64.low %v1125_v36, %v1120_v44  ;;  %v6442_v32 = vmul.u32.u64.high %v1125_v36, %v1120_v44, %v6441_v26 }
  0x77   : > { %v5077_v20 = vadd.s32 4294967294, %v1042_v27  ;;  %v1116_v9 = vsel %vm1110_vm15, %v1113_v52, %v1115_v25  ;;  %v1124_v24 = vsel %vm1110_vm15, %v1121_v28, %v1123_v1  ;;  %v508_v59 = vmul.f32 6.2831855, %v475_v49 }
  0x78   : > { %vm863_vm1 = vcmp.eq.s32.totalorder %v6413_v0, 0  ;;  %v6450_v46 = vmul.u32.u64.low %v1125_v36, %v1124_v24  ;;  %v6451_v35 = vmul.u32.u64.high %v1125_v36, %v1124_v24, %v6450_v46  ;;  %v9869_v54 = vfloor.f32 %v6289_v40 }
  0x79   : > { %v5743_v12 = vpop.eup %5742  ;;  %vm866_vm2 = vcmp.eq.s32.totalorder %v6413_v0, 2  ;;  %v960_v57 = vsel %vm6417_vm12, 0, %v958_v50  ;;  %v1030_v16 = vadd.s32 %v6362_v13, %v6359_v14  ;;  %vm5078_vm3 = vcmp.lt.s32.totalorder %v5077_v20, 0 }
  0x7a   : > { %v509_v18 = vmul.f32 6.2831855, %v9869_v54  ;;  %v5745_v42 = vpop.eup %5744  ;;  %v867_v49 = vxor.u32 2147483648, %v5743_v12  ;;  %v1045_v30 = vsel %vm5078_vm3, 0, %v5077_v20  ;;  %v1132_v38 = vmul.u32 %v1125_v36, %v1116_v9 }
  0x7b   : > { %v1135_v34 = vadd.s32 1, %v6442_v32  ;;  %v864_v8 = vxor.u32 2147483648, %v5745_v42  ;;  %v1046_v6 = vsub.s32 32, %v1045_v30  ;;  %v1047_v40 = vshll.u32 %v6410_v10, %v1045_v30 }
  0x7c   : > { %v1050_v52 = vsub.s32 4294967266, %v1045_v30  ;;  %v670_v5 = vmul.f32 %v6214_v15, %v6184_v37  ;;  %v964_v45 = vand.u32 3, %v960_v57  ;;  %vm1134_vm4 = vc.u32 %v6451_v35, %v6441_v26 }
  0x7d   : > { %v6467_v14 = vsub.f32 %v6163_v11, %v508_v59  ;;  %vm860_vm5 = vweird.f32 %v6147_v62  ;;  %v1048_v13 = vshrl.u32 %v1030_v16, %v1046_v6  ;;  %v1136_v50 = vsel %vm1134_vm4, %v1135_v34, %v6442_v32 }
  0x7e   : > { %v1051_v36 = vadd.s32 127, %v1050_v52  ;;  %vm862_vm6 = vcmp.lt.s32.totalorder %v6413_v0, 2  ;;  %v865_v10 = vsel %vm863_vm1, %v5743_v12, %v864_v8  ;;  %v868_v15 = vsel %vm866_vm2, %v867_v49, %v5745_v42 }
  0x7f   : > { %v1137_v25 = vadd.s32 %v1136_v50, %v1132_v38  ;;  %vm735_vm7 = vcmp.ge.s32.totalorder %v6131_v47, 1  ;;  %vm736_vm8 = vcmp.ge.s32.totalorder %v6139_v56, 1  ;;  %vm963_vm9 = vweird.f32 %v6149_v63 }
  0x80   : > { %v1049_v11 = vor.u32 %v1048_v13, %v1047_v40  ;;  %v1052_v22 = vshll.u32 %v1051_v36, 23  ;;  %v6480_v28 = vsub.f32 %v6171_v19, %v509_v18  ;;  %vm965_vm10 = vcmp.lt.s32.totalorder %v964_v45, 2  ;;  %vm5207_vm1 = vmpackc.low %vm736_vm8, %vm735_vm7 }
  0x81   : > { %vm976_vm11 = vcmp.lt.s32.totalorder %v6155_v4, 0  ;;  %v1138_v27 = vadd.s32 536870912, %v1137_v25  ;;  %v1183_v44 = vand.u32 2139095040, %v6467_v14  ;;  %v869_v0 = vsel %vm862_vm6, %v865_v10, %v868_v15 }
  0x82   : > { %v1053_v51 = vor.u32 4788187, %v1052_v22  ;;  %v1056_v1 = vcvt.s32.f32 %v1049_v11  ;;  %v1060_v32 = vsub.s32 4, %v6403_v21  ;;  %v5747_v20 = vpop.eup %5746  ;;  %vm969_vm12 = vcmp.eq.s32.totalorder %v964_v45, 2 }
  0x83   : > { %v6485_v9 = vshrl.u32 %v1138_v27, 30  ;;  %v1180_v24 = vand.u32 2147483647, %v6467_v14  ;;  %v1184_v59 = vshrl.u32 %v1183_v44, 23  ;;  %v5749_v19 = vpop.eup %5748  ;;  %vm966_vm13 = vcmp.eq.s32.totalorder %v964_v45, 0 }
  0x84   : > { %v970_v46 = vxor.u32 2147483648, %v5747_v20  ;;  %v1054_v54 = vand.u32 2147483647, %v1053_v51  ;;  %v1286_v18 = vand.u32 2139095040, %v6480_v28  ;;  %v870_v12 = vsel %vm860_vm5, nan, %v869_v0 }
  0x85   : > { %v967_v57 = vxor.u32 2147483648, %v5749_v19  ;;  %v1140_v16 = vshll.u32 %v6485_v9, 30  ;;  %v5083_v42 = vadd.s32 4294967169, %v1184_v59  ;;  %v9870_v30 = vand.u32 2147483647, %v6155_v4 }
  0x86   : > { %v971_v49 = vsel %vm969_vm12, %v970_v46, %v5749_v19  ;;  %v1057_v34 = vmul.f32 %v1056_v1, %v1054_v54  ;;  %v1061_v8 = vsel %vm976_vm11, %v1060_v32, %v6403_v21  ;;  %v1187_v62 = vand.u32 8388607, %v1180_v24 }
  0x87   : > { %vm6494_vm14 = vcmp.le.f32.partialorder %v9870_v30, 0.7853982  ;;  %v968_v6 = vsel %vm966_vm13, %v5747_v20, %v967_v57  ;;  %v6501_v40 = vsub.s32 %v1137_v25, %v1140_v16  ;;  %v1190_v52 = vadd.s32 1, %v5083_v42 }
  0x88   : > { %v972_v13 = vsel %vm965_vm10, %v968_v6, %v971_v49  ;;  %v4167_v36 = vmul.f32 %v870_v12, %v6305_v23  ;;  %v1058_v50 = vxor.u32 2147483648, %v1057_v34  ;;  %v1287_v10 = vshrl.u32 %v1286_v18, 23 }
  0x89   : > { %v973_v15 = vsel %vm963_vm9, nan, %v972_v13  ;;  %5750 = vpow2.f32 %v6293_v43  ;;  %v6511_v21 = vmul.f32 1.442695, %v6286_v7  ;;  %v1143_v25 = vsub.s32 0, %v6501_v40 }
  0x8a   : > { %v4168_v11 = vmul.f32 %v973_v15, %v670_v5  ;;  %v1059_v22 = vsel %vm976_vm11, %v1058_v50, %v1057_v34  ;;  %v1063_v45 = vsel %vm6494_vm14, 0, %v1061_v8  ;;  %vm1191_vm15 = vcmp.gt.s32.totalorder %v1190_v52, 0 }
  0x8b   : > { %v1062_v63 = vsel %vm6494_vm14, %v6155_v4, %v1059_v22  ;;  %v5080_v7 = vmin.u32 %v1143_v25, %v6501_v40  ;;  %v1188_v43 = vor.u32 8388608, %v1187_v62  ;;  %v5087_v23 = vadd.s32 4294967169, %v1287_v10 }
  0x8c   : > { %v5208_v5 = vpack.c.bf16 %v4168_v11, %v4167_v36  ;;  %5752 = vcosq.f32 %v1062_v63  ;;  %v6528_v27 = vsub.f32 %v6297_v48, %v6118_v31  ;;  %v6531_v44 = vmul.f32 0.15915494, %v6301_v41 }
  0x8d   : > { %5754 = vsinq.f32 %v1062_v63  ;;  %v6533_v56 = vand.u32 3, %v1063_v45  ;;  %v1145_v0 = vclz %v5080_v7  ;;  %v1192_v51 = vsel %vm1191_vm15, %v1190_v52, 0 }
  0x8e   : > { %5402 = vmatmul.mubr.msk.bf16.vlgmr.msra.gmra.mxu0 %vm5207_vm1, %v5208_v5  ;;  %5486 = vmatmul.mubr.msk.bf16.vlgmr.msra.gmra.mxu1 %vm5207_vm1, %v5208_v5  ;;  %v1133_v1 = vadd.s32 %v6441_v26, %v6451_v35  ;;  %v6537_v32 = vshrl.u32 %v1192_v51, 5  ;;  %v1194_v20 = vand.u32 31, %v1192_v51  ;;  %v1283_v59 = vand.u32 2147483647, %v6480_v28 }
  0x8f   : > { %v9873_v48 = vmov 0.0   ;;  %vm1079_vm2 = vcmp.lt.s32.totalorder %v6279_v33, 0  ;;  %v5081_v19 = vadd.s32 4294967294, %v1145_v0  ;;  %v1163_v46 = vsub.s32 4, %v6485_v9 }
  0x90   : > { %5405 = vmatprep.mubr.msk.bf16.mxu0 %vm5972_vm0, %v9873_v48  ;;  %5489 = vmatprep.mubr.msk.bf16.mxu1 %vm5972_vm0, %v9873_v48  ;;  %v6546_v54 = vshll.u32 %v1188_v43, 8  ;;  %v6548_v18 = vadd.s32 1, %v5087_v23  ;;  %v1195_v26 = vsub.s32 32, %v1194_v20  ;;  %v1197_v35 = vshll.u32 %v5973_v53, %v1194_v20 }
  0x91   : > { %v1200_v12 = vshll.u32 %v5974_v55, %v1194_v20  ;;  %v1203_v57 = vshll.u32 %v5975_v58, %v1194_v20  ;;  %vm5082_vm3 = vcmp.lt.s32.totalorder %v5081_v19, 0  ;;  %v1206_v16 = vshll.u32 %v5976_v61, %v1194_v20 }
  0x92   : > { %v1209_v42 = vshll.u32 %v5977_v3, %v1194_v20  ;;  %vm1212_vm4 = vcmp.lt.s32.totalorder %v6537_v32, 1  ;;  %v1148_v49 = vsel %vm5082_vm3, 0, %v5081_v19  ;;  %v1196_v30 = vshrl.u32 %v5973_v53, %v1195_v26 }
  0x93   : > { %v1198_v38 = vshrl.u32 %v5974_v55, %v1195_v26  ;;  %v1201_v34 = vshrl.u32 %v5975_v58, %v1195_v26  ;;  %v1149_v8 = vsub.s32 32, %v1148_v49  ;;  %v1150_v6 = vshll.u32 %v6501_v40, %v1148_v49 }
  0x94   : > { %v1153_v62 = vsub.s32 4294967266, %v1148_v49  ;;  %v1204_v52 = vshrl.u32 %v5976_v61, %v1195_v26  ;;  %v1207_v50 = vshrl.u32 %v5977_v3, %v1195_v26  ;;  %v1210_v10 = vshrl.u32 %v5978_v17, %v1195_v26 }
  0x95   : > { %v1199_v13 = vor.u32 %v1198_v38, %v1197_v35  ;;  %v1202_v36 = vor.u32 %v1201_v34, %v1200_v12  ;;  %vm1069_vm5 = vcmp.eq.s32.totalorder %v6533_v56, 0  ;;  %vm6566_vm6 = vcmp.le.f32.partialorder %v1077_v39, 0.7853982 }
  0x96   : > { %v1151_v25 = vshrl.u32 %v1133_v1, %v1149_v8  ;;  %v1154_v11 = vadd.s32 127, %v1153_v62  ;;  %v1205_v40 = vor.u32 %v1204_v52, %v1203_v57  ;;  %vm1213_vm7 = vcmp.lt.s32.totalorder %v6537_v32, 2  ;;  %v6571_v22 = vpop.eup %5750 }
  0x97   : > { %v1208_v45 = vor.u32 %v1207_v50, %v1206_v16  ;;  %v1211_v63 = vor.u32 %v1210_v10, %v1209_v42  ;;  %vm1214_vm8 = vcmp.lt.s32.totalorder %v6537_v32, 3  ;;  %vm1215_vm9 = vcmp.lt.s32.totalorder %v6537_v32, 4 }
  0x98   : > { %v1152_v7 = vor.u32 %v1151_v25, %v1150_v6  ;;  %v1155_v43 = vshll.u32 %v1154_v11, 23  ;;  %v1216_v39 = vsel %vm1212_vm4, %v1196_v30, %v1199_v13  ;;  %v1217_v23 = vsel %vm1215_vm9, %v1205_v40, 2102212464 }
  0x99   : > { %v6582_v5 = vsel %vm1079_vm2, %v1163_v46, %v6485_v9  ;;  %v1218_v0 = vsel %vm1214_vm8, %v1202_v36, %v1217_v23  ;;  %v1220_v51 = vsel %vm1212_vm4, %v1199_v13, %v1202_v36  ;;  %v1221_v1 = vsel %vm1215_vm9, %v1208_v45, 920167782  ;;  %v5753_v20 = vpop.eup %5752 }
  0x9a   : > { %v1156_v19 = vor.u32 4788187, %v1155_v43  ;;  %v1159_v26 = vcvt.s32.f32 %v1152_v7  ;;  %v1222_v35 = vsel %vm1214_vm8, %v1205_v40, %v1221_v1  ;;  %v1224_v12 = vsel %vm1212_vm4, %v1202_v36, %v1205_v40  ;;  %v5755_v9 = vpop.eup %5754 }
  0x9b   : > { %v1219_v46 = vsel %vm1213_vm7, %v1216_v39, %v1218_v0  ;;  %v1223_v57 = vsel %vm1213_vm7, %v1220_v51, %v1222_v35  ;;  %v1225_v16 = vsel %vm1215_vm9, %v1211_v63, 1326507024  ;;  %v1290_v42 = vand.u32 8388607, %v1283_v59 }
  0x9c   : > { %v1073_v49 = vxor.u32 2147483648, %v5753_v20  ;;  %v1157_v30 = vand.u32 2147483647, %v1156_v19  ;;  %v1226_v38 = vsel %vm1214_vm8, %v1208_v45, %v1225_v16  ;;  %vm1294_vm10 = vcmp.gt.s32.totalorder %v6548_v18, 0 }
  0x9d   : > { %v1070_v34 = vxor.u32 2147483648, %v5755_v9  ;;  %v1227_v8 = vsel %vm1213_vm7, %v1224_v12, %v1226_v38  ;;  %v6608_v6 = vmul.u32.u64.low %v6546_v54, %v1223_v57  ;;  %v6609_v62 = vmul.u32.u64.high %v6546_v54, %v1223_v57, %v6608_v6 }
  0x9e   : > { %vm1072_vm11 = vcmp.eq.s32.totalorder %v6533_v56, 2  ;;  %v1160_v52 = vmul.f32 %v1159_v26, %v1157_v30  ;;  %v6614_v13 = vmul.u32.u64.low %v6546_v54, %v1227_v8  ;;  %v6615_v36 = vmul.u32.u64.high %v6546_v54, %v1227_v8, %v6614_v13 }
  0x9f   : > { %5756 = vpow2.f32 %v6511_v21  ;;  %v1166_v50 = vsel %vm6566_vm6, 0, %v6582_v5  ;;  %v1295_v32 = vsel %vm1294_vm10, %v6548_v18, 0  ;;  %v412_v10 = vmul.f32 0.15915494, %v6528_v27 }
  0xa0   : > { %v1161_v25 = vxor.u32 2147483648, %v1160_v52  ;;  %v1235_v11 = vmul.u32 %v6546_v54, %v1219_v46  ;;  %v1291_v40 = vor.u32 8388608, %v1290_v42  ;;  %v1297_v45 = vand.u32 31, %v1295_v32 }
  0xa1   : > { %v1071_v63 = vsel %vm1069_vm5, %v5753_v20, %v1070_v34  ;;  %v1074_v7 = vsel %vm1072_vm11, %v1073_v49, %v5755_v9  ;;  %v1238_v43 = vadd.s32 1, %v6609_v62  ;;  %v6628_v21 = vadd.f32 0.5, %v6531_v44 }
  0xa2   : > { %v1162_v39 = vsel %vm1079_vm2, %v1161_v25, %v1160_v52  ;;  %vm1237_vm12 = vc.u32 %v6615_v36, %v6608_v6  ;;  %v1296_v18 = vshrl.u32 %v1295_v32, 5  ;;  %v1298_v23 = vsub.s32 32, %v1297_v45 }
  0xa3   : > { %vm1068_vm13 = vcmp.lt.s32.totalorder %v6533_v56, 2  ;;  %v1165_v54 = vsel %vm6566_vm6, %v6279_v33, %v1162_v39  ;;  %v1239_v5 = vsel %vm1237_vm12, %v1238_v43, %v6609_v62  ;;  %v1300_v0 = vshll.u32 %v5973_v53, %v1297_v45 }
  0xa4   : > { %v1303_v44 = vshll.u32 %v5974_v55, %v1297_v45  ;;  %5758 = vcosq.f32 %v1165_v54  ;;  %v1240_v51 = vadd.s32 %v1239_v5, %v1235_v11  ;;  %v1299_v1 = vshrl.u32 %v5973_v53, %v1298_v23 }
  0xa5   : > { %v1301_v20 = vshrl.u32 %v5974_v55, %v1298_v23  ;;  %5760 = vsinq.f32 %v1165_v54  ;;  %v1304_v19 = vshrl.u32 %v5975_v58, %v1298_v23  ;;  %v1306_v26 = vshll.u32 %v5975_v58, %v1297_v45 }
  0xa6   : > { %v1307_v15 = vshrl.u32 %v5976_v61, %v1298_v23  ;;  %v1241_v35 = vadd.s32 536870912, %v1240_v51  ;;  %v1309_v9 = vshll.u32 %v5976_v61, %v1297_v45  ;;  %v1310_v46 = vshrl.u32 %v5977_v3, %v1298_v23 }
  0xa7   : > { %v1302_v12 = vor.u32 %v1301_v20, %v1300_v0  ;;  %v1305_v57 = vor.u32 %v1304_v19, %v1303_v44  ;;  %v1312_v42 = vshll.u32 %v5977_v3, %v1297_v45  ;;  %v1313_v49 = vshrl.u32 %v5978_v17, %v1298_v23 }
  0xa8   : > { %v1308_v16 = vor.u32 %v1307_v15, %v1306_v26  ;;  %v6650_v30 = vshrl.u32 %v1241_v35, 30  ;;  %v1311_v38 = vor.u32 %v1310_v46, %v1309_v9  ;;  %vm1315_vm14 = vcmp.lt.s32.totalorder %v1296_v18, 1 }
  0xa9   : > { %v1331_v34 = vshll.u32 %v1291_v40, 8  ;;  %v1314_v8 = vor.u32 %v1313_v49, %v1312_v42  ;;  %vm1316_vm15 = vcmp.lt.s32.totalorder %v1296_v18, 2  ;;  %vm1317_vm1 = vcmp.lt.s32.totalorder %v1296_v18, 3 }
  0xaa   : > { %vm1318_vm2 = vcmp.lt.s32.totalorder %v1296_v18, 4  ;;  %v1243_v62 = vshll.u32 %v6650_v30, 30  ;;  %v1319_v52 = vsel %vm1315_vm14, %v1299_v1, %v1302_v12  ;;  %v1323_v32 = vsel %vm1315_vm14, %v1302_v12, %v1305_v57 }
  0xab   : > { %v1320_v13 = vsel %vm1318_vm2, %v1308_v16, 2102212464  ;;  %v1324_v11 = vsel %vm1318_vm2, %v1311_v38, 920167782  ;;  %v1327_v45 = vsel %vm1315_vm14, %v1305_v57, %v1308_v16  ;;  %v1328_v43 = vsel %vm1318_vm2, %v1314_v8, 1326507024 }
  0xac   : > { %v1321_v25 = vsel %vm1317_vm1, %v1305_v57, %v1320_v13  ;;  %v5757_v39 = vpop.eup %5756  ;;  %vm1066_vm3 = vweird.f32 %v6155_v4  ;;  %v1170_v23 = vand.u32 3, %v1166_v50  ;;  %v6655_v54 = vsub.s32 %v1240_v51, %v1243_v62 }
  0xad   : > { %v1325_v40 = vsel %vm1317_vm1, %v1308_v16, %v1324_v11  ;;  %v1329_v0 = vsel %vm1317_vm1, %v1311_v38, %v1328_v43  ;;  %v445_v44 = vadd.f32 0.5, %v412_v10  ;;  %v477_v1 = vfloor.f32 %v6628_v21 }
  0xae   : > { %v1326_v5 = vsel %vm1316_vm15, %v1323_v32, %v1325_v40  ;;  %vm737_vm4 = vcmp.ge.s32.totalorder %v6144_v60, 1  ;;  %v1075_v20 = vsel %vm1068_vm13, %v1071_v63, %v1074_v7  ;;  %v1246_v19 = vsub.s32 0, %v6655_v54 }
  0xaf   : > { %v1322_v50 = vsel %vm1316_vm15, %v1319_v52, %v1321_v25  ;;  %v1330_v51 = vsel %vm1316_vm15, %v1327_v45, %v1329_v0  ;;  %v6670_v35 = vmul.u32.u64.low %v1331_v34, %v1326_v5  ;;  %v6671_v12 = vmul.u32.u64.high %v1331_v34, %v1326_v5, %v6670_v35 }
  0xb0   : > { %v6667_v26 = vmul.u32.u64.low %v1331_v34, %v1330_v51  ;;  %v6668_v15 = vmul.u32.u64.high %v1331_v34, %v1330_v51, %v6667_v26  ;;  %v671_v10 = vmul.f32 %v6571_v22, %v6184_v37  ;;  %v672_v21 = vmul.f32 %v5757_v39, %v6184_v37 }
  0xb1   : > { %vm738_vm5 = vcmp.ge.s32.totalorder %v6153_v2, 1  ;;  %v5084_v56 = vmin.u32 %v1246_v19, %v6655_v54  ;;  %v5759_v63 = vpop.eup %5758  ;;  %v1076_v7 = vsel %vm1066_vm3, nan, %v1075_v20  ;;  %vm1172_vm6 = vcmp.eq.s32.totalorder %v1170_v23, 0 }
  0xb2   : > { %vm1175_vm7 = vcmp.eq.s32.totalorder %v1170_v23, 2  ;;  %v510_v18 = vmul.f32 6.2831855, %v477_v1  ;;  %v5761_v9 = vpop.eup %5760  ;;  %v1176_v46 = vxor.u32 2147483648, %v5759_v63  ;;  %v1338_v16 = vmul.u32 %v1331_v34, %v1322_v50  ;;  %vm5210_vm12 = vmpackc.low %vm738_vm5, %vm737_vm4 }
  0xb3   : > { %v1248_v57 = vclz %v5084_v56  ;;  %v478_v42 = vfloor.f32 %v445_v44  ;;  %vm1171_vm8 = vcmp.lt.s32.totalorder %v1170_v23, 2  ;;  %v1173_v22 = vxor.u32 2147483648, %v5761_v9 }
  0xb4   : > { %vm1340_vm9 = vc.u32 %v6668_v15, %v6670_v35  ;;  %v1341_v49 = vadd.s32 1, %v6671_v12  ;;  %vm1169_vm10 = vweird.f32 %v6279_v33  ;;  %v1177_v38 = vsel %vm1175_vm7, %v1176_v46, %v5761_v9  ;;  %v6695_v33 = vld [vmem:[%s9857_s0] sm:$0xff] }
  0xb5   : > { %v4169_v4 = vmul.f32 %v1076_v7, %v671_v10  ;;  %v5085_v8 = vadd.s32 4294967294, %v1248_v57  ;;  %v1174_v62 = vsel %vm1172_vm6, %v5759_v63, %v1173_v22  ;;  %v1236_v52 = vadd.s32 %v6608_v6, %v6615_v36 }
  0xb6   : > { %v1342_v34 = vsel %vm1340_vm9, %v1341_v49, %v6671_v12  ;;  %v6690_v13 = vsub.f32 %v6301_v41, %v510_v18  ;;  %v1178_v32 = vsel %vm1171_vm8, %v1174_v62, %v1177_v38  ;;  %v511_v11 = vmul.f32 6.2831855, %v478_v42 }
  0xb7   : > { %vm5086_vm11 = vcmp.lt.s32.totalorder %v5085_v8, 0  ;;  %v1343_v25 = vadd.s32 %v1342_v34, %v1338_v16  ;;  %v1179_v45 = vsel %vm1169_vm10, nan, %v1178_v32  ;;  %v574_v43 = vmul.f32 4.0, %v6695_v33 }
  0xb8   : > { %v1251_v39 = vsel %vm5086_vm11, 0, %v5085_v8  ;;  %v1386_v6 = vand.u32 2147483647, %v6690_v13  ;;  %v4170_v36 = vmul.f32 %v1179_v45, %v672_v21  ;;  %v575_v5 = vmul.f32 5.0, %v6695_v33 }
  0xb9   : > { %v1252_v23 = vsub.s32 32, %v1251_v39  ;;  %v1253_v41 = vshll.u32 %v6655_v54, %v1251_v39  ;;  %v1256_v40 = vsub.s32 4294967266, %v1251_v39  ;;  %v1266_v0 = vsub.s32 4, %v6650_v30 }
  0xba   : > { %v1344_v44 = vadd.s32 536870912, %v1343_v25  ;;  %v1389_v1 = vand.u32 2139095040, %v6690_v13  ;;  %v5211_v20 = vpack.c.bf16 %v4170_v36, %v4169_v4  ;;  %v6708_v51 = vsub.f32 %v6528_v27, %v511_v11 }
  0xbb   : > { %v1254_v19 = vshrl.u32 %v1236_v52, %v1252_v23  ;;  %v1257_v50 = vadd.s32 127, %v1256_v40  ;;  %vm1182_vm13 = vcmp.lt.s32.totalorder %v6467_v14, 0  ;;  %v1393_v12 = vand.u32 8388607, %v1386_v6 }
  0xbc   : > { %v1345_v54 = vshrl.u32 %v1344_v44, 30  ;;  %v1390_v26 = vshrl.u32 %v1389_v1, 23  ;;  %5406 = vmatmul.mubr.msk.bf16.gmra.mxu0 %vm5210_vm12, %v5211_v20  ;;  %5490 = vmatmul.mubr.msk.bf16.gmra.mxu1 %vm5210_vm12, %v5211_v20  ;;  %v611_v10 = vmul.f32 1.442695, %v574_v43  ;;  %v1267_v27 = vsel %vm1182_vm13, %v1266_v0, %v6650_v30 }
  0xbd   : > { %v1255_v60 = vor.u32 %v1254_v19, %v1253_v41  ;;  %v1258_v2 = vshll.u32 %v1257_v50, 23  ;;  %5409 = vmatprep.mubr.msk.bf16.mxu0 %vm5972_vm0, %v9873_v48  ;;  %5493 = vmatprep.mubr.msk.bf16.mxu1 %vm5972_vm0, %v9873_v48  ;;  %v613_v63 = vmul.f32 1.442695, %v575_v5  ;;  %v1492_v9 = vand.u32 2139095040, %v6708_v51 }
  0xbe   : > { %v1346_v21 = vshll.u32 %v1345_v54, 30  ;;  %v5091_v56 = vadd.s32 4294967169, %v1390_v26  ;;  %v6722_v46 = vadd.s32 4, %v6131_v47  ;;  %vm6726_vm14 = vcmp.le.f32.partialorder %v1180_v24, 0.7853982 }
  0xbf   : > { %v1259_v7 = vor.u32 4788187, %v1258_v2  ;;  %v1262_v18 = vcvt.s32.f32 %v1255_v60  ;;  %v1269_v22 = vsel %vm6726_vm14, 0, %v1267_v27  ;;  %v1394_v49 = vor.u32 8388608, %v1393_v12 }
  0xc0   : > { %v6730_v16 = vsub.s32 %v1343_v25, %v1346_v21  ;;  %v1396_v42 = vadd.s32 1, %v5091_v56  ;;  %v1493_v38 = vshrl.u32 %v1492_v9, 23  ;;  %5762 = vpow2.f32 %v611_v10 }
  0xc1   : > { %v1260_v30 = vand.u32 2147483647, %v1259_v7  ;;  %v1369_v8 = vsub.s32 4, %v1345_v54  ;;  %5764 = vpow2.f32 %v613_v63  ;;  %v6735_v34 = vand.u32 3, %v1269_v22 }
  0xc2   : > { %v1349_v4 = vsub.s32 0, %v6730_v16  ;;  %vm1397_vm15 = vcmp.gt.s32.totalorder %v1396_v42, 0  ;;  %v5095_v52 = vadd.s32 4294967169, %v1493_v38  ;;  %vm1285_vm1 = vcmp.lt.s32.totalorder %v6480_v28, 0 }
  0xc3   : > { %v1263_v62 = vmul.f32 %v1262_v18, %v1260_v30  ;;  %v1398_v24 = vsel %vm1397_vm15, %v1396_v42, 0  ;;  %v1339_v32 = vadd.s32 %v6670_v35, %v6668_v15  ;;  %v6741_v43 = vshll.u32 %v1394_v49, 8 }
  0xc4   : > { %v5088_v25 = vmin.u32 %v1349_v4, %v6730_v16  ;;  %v1400_v45 = vand.u32 31, %v1398_v24  ;;  %v1489_v39 = vand.u32 2147483647, %v6708_v51  ;;  %v6746_v23 = vsel %vm1285_vm1, %v1369_v8, %v1345_v54 }
  0xc5   : > { %v1264_v11 = vxor.u32 2147483648, %v1263_v62  ;;  %v1399_v41 = vshrl.u32 %v1398_v24, 5  ;;  %v1499_v40 = vadd.s32 1, %v5095_v52  ;;  %vm6790_vm8 = vcmp.le.f32.partialorder %v1283_v59, 0.7853982 }
  0xc6   : > { %v1351_v36 = vclz %v5088_v25  ;;  %v1401_v0 = vsub.s32 32, %v1400_v45  ;;  %v1403_v15 = vshll.u32 %v5973_v53, %v1400_v45  ;;  %v1406_v35 = vshll.u32 %v5974_v55, %v1400_v45 }
  0xc7   : > { %v1265_v5 = vsel %vm1182_vm13, %v1264_v11, %v1263_v62  ;;  %v1409_v20 = vshll.u32 %v5975_v58, %v1400_v45  ;;  %v1412_v19 = vshll.u32 %v5976_v61, %v1400_v45  ;;  %v1415_v21 = vshll.u32 %v5977_v3, %v1400_v45 }
  0xc8   : > { %v1268_v44 = vsel %vm6726_vm14, %v6467_v14, %v1265_v5  ;;  %v5089_v1 = vadd.s32 4294967294, %v1351_v36  ;;  %v1402_v50 = vshrl.u32 %v5973_v53, %v1401_v0  ;;  %v1404_v54 = vshrl.u32 %v5974_v55, %v1401_v0 }
  0xc9   : > { %5766 = vcosq.f32 %v1268_v44  ;;  %v1407_v26 = vshrl.u32 %v5975_v58, %v1401_v0  ;;  %v1410_v60 = vshrl.u32 %v5976_v61, %v1401_v0  ;;  %v1413_v2 = vshrl.u32 %v5977_v3, %v1401_v0 }
  0xca   : > { %5768 = vsinq.f32 %v1268_v44  ;;  %vm5090_vm2 = vcmp.lt.s32.totalorder %v5089_v1, 0  ;;  %v1405_v10 = vor.u32 %v1404_v54, %v1403_v15  ;;  %v1416_v57 = vshrl.u32 %v5978_v17, %v1401_v0 }
  0xcb   : > { %v1354_v12 = vsel %vm5090_vm2, 0, %v5089_v1  ;;  %v1408_v27 = vor.u32 %v1407_v26, %v1406_v35  ;;  %v1411_v18 = vor.u32 %v1410_v60, %v1409_v20  ;;  %v1414_v9 = vor.u32 %v1413_v2, %v1412_v19 }
  0xcc   : > { %v1355_v56 = vsub.s32 32, %v1354_v12  ;;  %v1356_v63 = vshll.u32 %v6730_v16, %v1354_v12  ;;  %v1359_v7 = vsub.s32 4294967266, %v1354_v12  ;;  %vm1418_vm3 = vcmp.lt.s32.totalorder %v1399_v41, 1 }
  0xcd   : > { %vm1419_vm4 = vcmp.lt.s32.totalorder %v1399_v41, 2  ;;  %vm1420_vm5 = vcmp.lt.s32.totalorder %v1399_v41, 3  ;;  %vm1421_vm6 = vcmp.lt.s32.totalorder %v1399_v41, 4  ;;  %v5763_v22 = vpop.eup %5762  ;;  %v1417_v49 = vor.u32 %v1416_v57, %v1415_v21 }
  0xce   : > { %v1357_v42 = vshrl.u32 %v1339_v32, %v1355_v56  ;;  %v1360_v30 = vadd.s32 127, %v1359_v7  ;;  %v1422_v38 = vsel %vm1418_vm3, %v1402_v50, %v1405_v10  ;;  %v1423_v4 = vsel %vm1421_vm6, %v1411_v18, 2102212464  ;;  %v5765_v62 = vpop.eup %5764 }
  0xcf   : > { %v1426_v8 = vsel %vm1418_vm3, %v1405_v10, %v1408_v27  ;;  %v1424_v52 = vsel %vm1420_vm5, %v1408_v27, %v1423_v4  ;;  %v1427_v25 = vsel %vm1421_vm6, %v1414_v9, 920167782  ;;  %v1430_v32 = vsel %vm1418_vm3, %v1408_v27, %v1411_v18 }
  0xd0   : > { %v1358_v16 = vor.u32 %v1357_v42, %v1356_v63  ;;  %v1361_v24 = vshll.u32 %v1360_v30, 23  ;;  %v1428_v11 = vsel %vm1420_vm5, %v1411_v18, %v1427_v25  ;;  %v1431_v45 = vsel %vm1421_vm6, %v1417_v49, 1326507024 }
  0xd1   : > { %v1496_v36 = vand.u32 8388607, %v1489_v39  ;;  %v1429_v15 = vsel %vm1419_vm4, %v1426_v8, %v1428_v11  ;;  %v1432_v35 = vsel %vm1420_vm5, %v1414_v9, %v1431_v45  ;;  %v1425_v44 = vsel %vm1419_vm4, %v1422_v38, %v1424_v52 }
  0xd2   : > { %v1362_v5 = vor.u32 4788187, %v1361_v24  ;;  %v1365_v0 = vcvt.s32.f32 %v1358_v16  ;;  %v1433_v1 = vsel %vm1419_vm4, %v1430_v32, %v1432_v35  ;;  %vm1500_vm7 = vcmp.gt.s32.totalorder %v1499_v40, 0 }
  0xd3   : > { %v6777_v20 = vmul.u32.u64.low %v6741_v43, %v1429_v15  ;;  %v6778_v19 = vmul.u32.u64.high %v6741_v43, %v1429_v15, %v6777_v20  ;;  %v6782_v54 = vmul.u32.u64.low %v6741_v43, %v1433_v1  ;;  %v6783_v26 = vmul.u32.u64.high %v6741_v43, %v1433_v1, %v6782_v54 }
  0xd4   : > { %v1363_v50 = vand.u32 2147483647, %v1362_v5  ;;  %v6786_v60 = vadd.s32 5, %v6131_v47  ;;  %v1497_v41 = vor.u32 8388608, %v1496_v36  ;;  %v1501_v12 = vsel %vm1500_vm7, %v1499_v40, 0  ;;  %v6808_v40 = vld [vmem:[%s9858_s1] sm:$0xff] }
  0xd5   : > { %v1372_v21 = vsel %vm6790_vm8, 0, %v6746_v23  ;;  %v1441_v56 = vmul.u32 %v6741_v43, %v1425_v44  ;;  %v1503_v63 = vand.u32 31, %v1501_v12  ;;  %v6799_v18 = vmul.f32 %v5763_v22, %v6184_v37 }
  0xd6   : > { %v5767_v10 = vpop.eup %5766  ;;  %v1366_v27 = vmul.f32 %v1365_v0, %v1363_v50  ;;  %v6802_v59 = vmul.f32 %v5765_v62, %v6184_v37  ;;  %v1444_v9 = vadd.s32 1, %v6778_v19  ;;  %v314_v57 = vmul.f32 8.0, %v6808_v40 }
  0xd7   : > { %v5769_v7 = vpop.eup %5768  ;;  %vm1275_vm9 = vcmp.eq.s32.totalorder %v6735_v34, 0  ;;  %vm1278_vm10 = vcmp.eq.s32.totalorder %v6735_v34, 2  ;;  %vm1443_vm11 = vc.u32 %v6783_v26, %v6777_v20  ;;  %v6815_v23 = vand.u32 3, %v1372_v21 }
  0xd8   : > { %v1367_v43 = vxor.u32 2147483648, %v1366_v27  ;;  %v1445_v42 = vsel %vm1443_vm11, %v1444_v9, %v6778_v19  ;;  %v1504_v30 = vsub.s32 32, %v1503_v63  ;;  %v6818_v22 = vshll.u32 %v1497_v41, 8 }
  0xd9   : > { %v1446_v38 = vadd.s32 %v1445_v42, %v1441_v56  ;;  %v1506_v4 = vshll.u32 %v5973_v53, %v1503_v63  ;;  %v315_v8 = vmul.f32 9.0, %v6808_v40  ;;  %vm1274_vm12 = vcmp.lt.s32.totalorder %v6735_v34, 2 }
  0xda   : > { %v1368_v49 = vsel %vm1285_vm1, %v1367_v43, %v1366_v27  ;;  %v1507_v16 = vshrl.u32 %v5974_v55, %v1504_v30  ;;  %v1509_v24 = vshll.u32 %v5974_v55, %v1503_v63  ;;  %v347_v52 = vadd.f32 %v314_v57, %v6113_v29 }
  0xdb   : > { %v1371_v62 = vsel %vm6790_vm8, %v6480_v28, %v1368_v49  ;;  %v1447_v25 = vadd.s32 536870912, %v1446_v38  ;;  %v1502_v11 = vshrl.u32 %v1501_v12, 5  ;;  %v1510_v32 = vshrl.u32 %v5975_v58, %v1504_v30 }
  0xdc   : > { %5770 = vcosq.f32 %v1371_v62  ;;  %v1276_v45 = vxor.u32 2147483648, %v5769_v7  ;;  %v1279_v36 = vxor.u32 2147483648, %v5767_v10  ;;  %v1512_v5 = vshll.u32 %v5975_v58, %v1503_v63 }
  0xdd   : > { %5772 = vsinq.f32 %v1371_v62  ;;  %v6833_v0 = vshrl.u32 %v1447_v25, 30  ;;  %v1508_v15 = vor.u32 %v1507_v16, %v1506_v4  ;;  %v1513_v35 = vshrl.u32 %v5976_v61, %v1504_v30 }
  0xde   : > { %v1515_v44 = vshll.u32 %v5976_v61, %v1503_v63  ;;  %vm1272_vm13 = vweird.f32 %v6467_v14  ;;  %v1511_v1 = vor.u32 %v1510_v32, %v1509_v24  ;;  %v1516_v19 = vshrl.u32 %v5977_v3, %v1504_v30 }
  0xdf   : > { %v1518_v50 = vshll.u32 %v5977_v3, %v1503_v63  ;;  %v1519_v54 = vshrl.u32 %v5978_v17, %v1504_v30  ;;  %v1449_v2 = vshll.u32 %v6833_v0, 30  ;;  %v1514_v41 = vor.u32 %v1513_v35, %v1512_v5 }
  0xe0   : > { %vm1521_vm14 = vcmp.lt.s32.totalorder %v1502_v11, 1  ;;  %v348_v12 = vadd.f32 %v315_v8, %v6113_v29  ;;  %v1517_v27 = vor.u32 %v1516_v19, %v1515_v44  ;;  %vm1523_vm15 = vcmp.lt.s32.totalorder %v1502_v11, 3 }
  0xe1   : > { %v1520_v21 = vor.u32 %v1519_v54, %v1518_v50  ;;  %vm1524_vm1 = vcmp.lt.s32.totalorder %v1502_v11, 4  ;;  %v1280_v56 = vsel %vm1278_vm10, %v1279_v36, %v5769_v7  ;;  %v6845_v9 = vsub.s32 %v1446_v38, %v1449_v2 }
  0xe2   : > { %v1505_v57 = vshrl.u32 %v5973_v53, %v1504_v30  ;;  %vm1522_vm2 = vcmp.lt.s32.totalorder %v1502_v11, 2  ;;  %v1277_v63 = vsel %vm1275_vm9, %v5767_v10, %v1276_v45  ;;  %v1526_v43 = vsel %vm1524_vm1, %v1514_v41, 2102212464 }
  0xe3   : > { %v1529_v42 = vsel %vm1521_vm14, %v1508_v15, %v1511_v1  ;;  %v1530_v49 = vsel %vm1524_vm1, %v1517_v27, 920167782  ;;  %vm1375_vm3 = vweird.f32 %v6480_v28  ;;  %vm1377_vm4 = vcmp.lt.s32.totalorder %v6815_v23, 2 }
  0xe4   : > { %v1452_v7 = vsub.s32 0, %v6845_v9  ;;  %v1531_v38 = vsel %vm1523_vm15, %v1514_v41, %v1530_v49  ;;  %v380_v30 = vsub.f32 %v347_v52, %v6118_v31  ;;  %vm1378_vm5 = vcmp.eq.s32.totalorder %v6815_v23, 0 }
  0xe5   : > { %v1532_v10 = vsel %vm1522_vm2, %v1529_v42, %v1531_v38  ;;  %v1533_v4 = vsel %vm1521_vm14, %v1511_v1, %v1514_v41  ;;  %v1534_v8 = vsel %vm1524_vm1, %v1520_v21, 1326507024  ;;  %vm739_vm6 = vcmp.ge.s32.totalorder %v6722_v46, 1 }
  0xe6   : > { %vm740_vm7 = vcmp.ge.s32.totalorder %v6786_v60, 1  ;;  %v1281_v62 = vsel %vm1274_vm12, %v1277_v63, %v1280_v56  ;;  %v5092_v16 = vmin.u32 %v1452_v7, %v6845_v9  ;;  %v1525_v24 = vsel %vm1521_vm14, %v1505_v57, %v1508_v15 }
  0xe7   : > { %v1527_v52 = vsel %vm1523_vm15, %v1511_v1, %v1526_v43  ;;  %v1535_v25 = vsel %vm1523_vm15, %v1517_v27, %v1534_v8  ;;  %v6871_v32 = vmul.u32.u64.low %v6818_v22, %v1532_v10  ;;  %v6872_v45 = vmul.u32.u64.high %v6818_v22, %v1532_v10, %v6871_v32  ;;  %vm5213_vm11 = vmpackc.low %vm740_vm7, %vm739_vm6 }
  0xe8   : > { %v381_v36 = vsub.f32 %v348_v12, %v6118_v31  ;;  %vm1381_vm8 = vcmp.eq.s32.totalorder %v6815_v23, 2  ;;  %v1454_v5 = vclz %v5092_v16  ;;  %v1536_v34 = vsel %vm1522_vm2, %v1533_v4, %v1535_v25 }
  0xe9   : > { %v413_v35 = vmul.f32 0.15915494, %v380_v30  ;;  %v5771_v44 = vpop.eup %5770  ;;  %v1528_v15 = vsel %vm1522_vm2, %v1525_v24, %v1527_v52  ;;  %v6880_v1 = vmul.u32.u64.low %v6818_v22, %v1536_v34  ;;  %v6881_v19 = vmul.u32.u64.high %v6818_v22, %v1536_v34, %v6880_v1 }
  0xea   : > { %v414_v50 = vmul.f32 0.15915494, %v381_v36  ;;  %v5773_v54 = vpop.eup %5772  ;;  %v1282_v2 = vsel %vm1272_vm13, nan, %v1281_v62  ;;  %v1382_v41 = vxor.u32 2147483648, %v5771_v44  ;;  %v5093_v12 = vadd.s32 4294967294, %v1454_v5 }
  0xeb   : > { %v446_v27 = vadd.f32 0.5, %v413_v35  ;;  %v1379_v21 = vxor.u32 2147483648, %v5773_v54  ;;  %v1442_v56 = vadd.s32 %v6777_v20, %v6783_v26  ;;  %v1547_v57 = vadd.s32 1, %v6872_v45 }
  0xec   : > { %v447_v11 = vadd.f32 0.5, %v414_v50  ;;  %v1383_v63 = vsel %vm1381_vm8, %v1382_v41, %v5773_v54  ;;  %vm5094_vm9 = vcmp.lt.s32.totalorder %v5093_v12, 0  ;;  %v1544_v43 = vmul.u32 %v6818_v22, %v1528_v15 }
  0xed   : > { %v479_v42 = vfloor.f32 %v446_v27  ;;  %v1380_v14 = vsel %vm1378_vm5, %v5771_v44, %v1379_v21  ;;  %v4171_v49 = vmul.f32 %v1282_v2, %v6799_v18  ;;  %v1457_v7 = vsel %vm5094_vm9, 0, %v5093_v12 }
  0xee   : > { %vm1546_vm10 = vc.u32 %v6881_v19, %v6871_v32  ;;  %v1384_v20 = vsel %vm1377_vm4, %v1380_v14, %v1383_v63  ;;  %v1458_v26 = vsub.s32 32, %v1457_v7  ;;  %v1459_v38 = vshll.u32 %v6845_v9, %v1457_v7 }
  0xef   : > { %v1462_v10 = vsub.s32 4294967266, %v1457_v7  ;;  %v1385_v22 = vsel %vm1375_vm3, nan, %v1384_v20  ;;  %v1548_v4 = vsel %vm1546_vm10, %v1547_v57, %v6872_v45  ;;  %v480_v8 = vfloor.f32 %v447_v11 }
  0xf0   : > { %v512_v62 = vmul.f32 6.2831855, %v479_v42  ;;  %v4172_v18 = vmul.f32 %v1385_v22, %v6802_v59  ;;  %v1460_v16 = vshrl.u32 %v1442_v56, %v1458_v26  ;;  %v1549_v52 = vadd.s32 %v1548_v4, %v1544_v43 }
  0xf1   : > { %v1463_v24 = vadd.s32 127, %v1462_v10  ;;  %v1472_v23 = vsub.s32 4, %v6833_v0  ;;  %v513_v9 = vmul.f32 6.2831855, %v480_v8  ;;  %v576_v35 = vmul.f32 6.0, %v6695_v33 }
  0xf2   : > { %v6908_v25 = vsub.f32 %v380_v30, %v512_v62  ;;  %v5214_v28 = vpack.c.bf16 %v4172_v18, %v4171_v49  ;;  %v1461_v5 = vor.u32 %v1460_v16, %v1459_v38  ;;  %v1550_v34 = vadd.s32 536870912, %v1549_v52 }
  0xf3   : > { %v1464_v45 = vshll.u32 %v1463_v24, 23  ;;  %v6911_v59 = vsub.f32 %v381_v36, %v513_v9  ;;  %v577_v30 = vmul.f32 7.0, %v6695_v33  ;;  %vm1388_vm12 = vcmp.lt.s32.totalorder %v6690_v13, 0 }
  0xf4   : > { %v1592_v44 = vand.u32 2147483647, %v6908_v25  ;;  %5410 = vmatmul.mubr.msk.bf16.gmra.mxu0 %vm5213_vm11, %v5214_v28  ;;  %5494 = vmatmul.mubr.msk.bf16.gmra.mxu1 %vm5213_vm11, %v5214_v28  ;;  %v1468_v60 = vcvt.s32.f32 %v1461_v5  ;;  %v1551_v15 = vshrl.u32 %v1550_v34, 30  ;;  %v1595_v1 = vand.u32 2139095040, %v6908_v25 }
  0xf5   : > { %v1465_v46 = vor.u32 4788187, %v1464_v45  ;;  %5413 = vmatprep.mubr.msk.bf16.mxu0 %vm5972_vm0, %v9873_v48  ;;  %5497 = vmatprep.mubr.msk.bf16.mxu1 %vm5972_vm0, %v9873_v48  ;;  %v1473_v50 = vsel %vm1388_vm12, %v1472_v23, %v6833_v0  ;;  %v615_v41 = vmul.f32 1.442695, %v576_v35  ;;  %v1698_v27 = vand.u32 2139095040, %v6911_v59 }
  0xf6   : > { %v1552_v54 = vshll.u32 %v1551_v15, 30  ;;  %v1596_v2 = vshrl.u32 %v1595_v1, 23  ;;  %v1599_v12 = vand.u32 8388607, %v1592_v44  ;;  %v6928_v21 = vadd.s32 6, %v6131_v47 }
  0xf7   : > { %v1466_v36 = vand.u32 2147483647, %v1465_v46  ;;  %vm6932_vm13 = vcmp.le.f32.partialorder %v1386_v6, 0.7853982  ;;  %v6938_v0 = vmul.f32 1.442695, %v577_v30  ;;  %5774 = vpow2.f32 %v615_v41 }
  0xf8   : > { %v6936_v11 = vsub.s32 %v1549_v52, %v1552_v54  ;;  %v6941_v63 = vadd.s32 7, %v6131_v47  ;;  %v1475_v43 = vsel %vm6932_vm13, 0, %v1473_v50  ;;  %v5099_v42 = vadd.s32 4294967169, %v1596_v2 }
  0xf9   : > { %v1469_v57 = vmul.f32 %v1468_v60, %v1466_v36  ;;  %v1575_v7 = vsub.s32 4, %v1551_v15  ;;  %v1699_v6 = vshrl.u32 %v1698_v27, 23  ;;  %vm1491_vm14 = vcmp.lt.s32.totalorder %v6708_v51, 0 }
  0xfa   : > { %v1555_v49 = vsub.s32 0, %v6936_v11  ;;  %v1600_v20 = vor.u32 8388608, %v1599_v12  ;;  %v1602_v26 = vadd.s32 1, %v5099_v42  ;;  %v6949_v10 = vand.u32 3, %v1475_v43 }
  0xfb   : > { %v1470_v14 = vxor.u32 2147483648, %v1469_v57  ;;  %v1695_v4 = vand.u32 2147483647, %v6911_v59  ;;  %v1545_v62 = vadd.s32 %v6871_v32, %v6881_v19  ;;  %v5103_v18 = vadd.s32 4294967169, %v1699_v6 }
  0xfc   : > { %v5096_v22 = vmin.u32 %v1555_v49, %v6936_v11  ;;  %vm1603_vm15 = vcmp.gt.s32.totalorder %v1602_v26, 0  ;;  %v6960_v24 = vsel %vm1491_vm14, %v1575_v7, %v1551_v15  ;;  %v6964_v28 = vshll.u32 %v1600_v20, 8 }
  0xfd   : > { %v1471_v38 = vsel %vm1388_vm12, %v1470_v14, %v1469_v57  ;;  %v1604_v52 = vsel %vm1603_vm15, %v1602_v26, 0  ;;  %v6968_v45 = vand.u32 8388607, %v1695_v4  ;;  %v1705_v32 = vadd.s32 1, %v5103_v18 }
  0xfe   : > { %v1474_v8 = vsel %vm6932_vm13, %v6690_v13, %v1471_v38  ;;  %v1557_v16 = vclz %v5096_v22  ;;  %v6962_v23 = vshrl.u32 %v1604_v52, 5  ;;  %v1606_v9 = vand.u32 31, %v1604_v52 }
  0xff   : > { %5776 = vcosq.f32 %v1474_v8  ;;  %v6971_v19 = vmul.f32 10.0, %v6808_v40  ;;  %vm1484_vm3 = vcmp.eq.s32.totalorder %v6949_v10, 2  ;;  %vm1481_vm4 = vcmp.eq.s32.totalorder %v6949_v10, 0 }
 0x100   : > { %5778 = vsinq.f32 %v1474_v8  ;;  %v5097_v5 = vadd.s32 4294967294, %v1557_v16  ;;  %v1607_v34 = vsub.s32 32, %v1606_v9  ;;  %v1609_v35 = vshll.u32 %v5973_v53, %v1606_v9 }
 0x101   : > { %v1612_v46 = vshll.u32 %v5974_v55, %v1606_v9  ;;  %v1615_v60 = vshll.u32 %v5975_v58, %v1606_v9  ;;  %v1618_v15 = vshll.u32 %v5976_v61, %v1606_v9  ;;  %v1621_v1 = vshll.u32 %v5977_v3, %v1606_v9 }
 0x102   : > { %vm5098_vm1 = vcmp.lt.s32.totalorder %v5097_v5, 0  ;;  %vm1624_vm2 = vcmp.lt.s32.totalorder %v6962_v23, 1  ;;  %v1608_v36 = vshrl.u32 %v5973_v53, %v1607_v34  ;;  %v1610_v50 = vshrl.u32 %v5974_v55, %v1607_v34 }
 0x103   : > { %v1560_v30 = vsel %vm5098_vm1, 0, %v5097_v5  ;;  %v1613_v54 = vshrl.u32 %v5975_v58, %v1607_v34  ;;  %v1616_v27 = vshrl.u32 %v5976_v61, %v1607_v34  ;;  %v1619_v43 = vshrl.u32 %v5977_v3, %v1607_v34 }
 0x104   : > { %v1561_v2 = vsub.s32 32, %v1560_v30  ;;  %v1562_v41 = vshll.u32 %v6936_v11, %v1560_v30  ;;  %v1565_v12 = vsub.s32 4294967266, %v1560_v30  ;;  %v1611_v56 = vor.u32 %v1610_v50, %v1609_v35  ;;  %v6997_v26 = vpop.eup %5774 }
 0x105   : > { %v1614_v57 = vor.u32 %v1613_v54, %v1612_v46  ;;  %v1622_v42 = vshrl.u32 %v5978_v17, %v1607_v34  ;;  %vm6990_vm5 = vcmp.le.f32.partialorder %v1489_v39, 0.7853982  ;;  %v1617_v7 = vor.u32 %v1616_v27, %v1615_v60 }
 0x106   : > { %v1563_v11 = vshrl.u32 %v1545_v62, %v1561_v2  ;;  %v1566_v49 = vadd.s32 127, %v1565_v12  ;;  %vm1625_vm6 = vcmp.lt.s32.totalorder %v6962_v23, 2  ;;  %v1620_v6 = vor.u32 %v1619_v43, %v1618_v15 }
 0x107   : > { %v1623_v20 = vor.u32 %v1622_v42, %v1621_v1  ;;  %vm1626_vm7 = vcmp.lt.s32.totalorder %v6962_v23, 3  ;;  %vm1627_vm8 = vcmp.lt.s32.totalorder %v6962_v23, 4  ;;  %v1628_v39 = vsel %vm1624_vm2, %v1608_v36, %v1611_v56 }
 0x108   : > { %v1564_v38 = vor.u32 %v1563_v11, %v1562_v41  ;;  %v1567_v22 = vshll.u32 %v1566_v49, 23  ;;  %v1629_v8 = vsel %vm1627_vm8, %v1617_v7, 2102212464  ;;  %v1632_v18 = vsel %vm1624_vm2, %v1611_v56, %v1614_v57 }
 0x109   : > { %v1630_v62 = vsel %vm1626_vm7, %v1614_v57, %v1629_v8  ;;  %v1633_v16 = vsel %vm1627_vm8, %v1620_v6, 920167782  ;;  %v1703_v52 = vor.u32 8388608, %v6968_v45  ;;  %v1636_v35 = vsel %vm1624_vm2, %v1614_v57, %v1617_v7 }
 0x10a   : > { %v1568_v9 = vor.u32 4788187, %v1567_v22  ;;  %v1571_v5 = vcvt.s32.f32 %v1564_v38  ;;  %v1634_v34 = vsel %vm1626_vm7, %v1617_v7, %v1633_v16  ;;  %v1631_v60 = vsel %vm1625_vm6, %v1628_v39, %v1630_v62 }
 0x10b   : > { %v1635_v15 = vsel %vm1625_vm6, %v1632_v18, %v1634_v34  ;;  %v1637_v1 = vsel %vm1627_vm8, %v1623_v20, 1326507024  ;;  %vm1706_vm9 = vcmp.gt.s32.totalorder %v1705_v32, 0  ;;  %v317_v42 = vmul.f32 11.0, %v6808_v40 }
 0x10c   : > { %v5777_v46 = vpop.eup %5776  ;;  %v1569_v36 = vand.u32 2147483647, %v1568_v9  ;;  %v1638_v50 = vsel %vm1626_vm7, %v1620_v6, %v1637_v1  ;;  %v1707_v54 = vsel %vm1706_vm9, %v1705_v32, 0  ;;  %5780 = vpow2.f32 %v6938_v0 }
 0x10d   : > { %v5779_v45 = vpop.eup %5778  ;;  %v1485_v30 = vxor.u32 2147483648, %v5777_v46  ;;  %v1639_v41 = vsel %vm1625_vm6, %v1636_v35, %v1638_v50  ;;  %v7025_v12 = vmul.u32.u64.low %v6964_v28, %v1635_v15  ;;  %v7026_v27 = vmul.u32.u64.high %v6964_v28, %v1635_v15, %v7025_v12 }
 0x10e   : > { %v1482_v2 = vxor.u32 2147483648, %v5779_v45  ;;  %v1572_v56 = vmul.f32 %v1571_v5, %v1569_v36  ;;  %v7030_v57 = vmul.u32.u64.low %v6964_v28, %v1639_v41  ;;  %v7031_v43 = vmul.u32.u64.high %v6964_v28, %v1639_v41, %v7030_v57 }
 0x10f   : > { %v1578_v32 = vsel %vm6990_vm5, 0, %v6960_v24  ;;  %v1709_v23 = vand.u32 31, %v1707_v54  ;;  %v7038_v11 = vshll.u32 %v1703_v52, 8  ;;  %v1486_v49 = vsel %vm1484_vm3, %v1485_v30, %v5779_v45 }
 0x110   : > { %v1573_v7 = vxor.u32 2147483648, %v1572_v56  ;;  %v1647_v6 = vmul.u32 %v6964_v28, %v1631_v60  ;;  %v349_v20 = vadd.f32 %v6971_v19, %v6113_v29  ;;  %v1483_v38 = vsel %vm1481_vm4, %v5777_v46, %v1482_v2 }
 0x111   : > { %v1650_v0 = vadd.s32 1, %v7026_v27  ;;  %v1710_v22 = vsub.s32 32, %v1709_v23  ;;  %v1712_v24 = vshll.u32 %v5973_v53, %v1709_v23  ;;  %vm1649_vm10 = vc.u32 %v7031_v43, %v7025_v12 }
 0x112   : > { %v1574_v39 = vsel %vm1491_vm14, %v1573_v7, %v1572_v56  ;;  %v1708_v8 = vshrl.u32 %v1707_v54, 5  ;;  %v350_v28 = vadd.f32 %v317_v42, %v6113_v29  ;;  %vm1480_vm11 = vcmp.lt.s32.totalorder %v6949_v10, 2 }
 0x113   : > { %v1577_v19 = vsel %vm6990_vm5, %v6708_v51, %v1574_v39  ;;  %v1651_v62 = vsel %vm1649_vm10, %v1650_v0, %v7026_v27  ;;  %v1711_v18 = vshrl.u32 %v5973_v53, %v1710_v22  ;;  %v1713_v16 = vshrl.u32 %v5974_v55, %v1710_v22 }
 0x114   : > { %5782 = vcosq.f32 %v1577_v19  ;;  %v1652_v52 = vadd.s32 %v1651_v62, %v1647_v6  ;;  %v1715_v9 = vshll.u32 %v5974_v55, %v1709_v23  ;;  %v1716_v5 = vshrl.u32 %v5975_v58, %v1710_v22 }
 0x115   : > { %5784 = vsinq.f32 %v1577_v19  ;;  %v1714_v34 = vor.u32 %v1713_v16, %v1712_v24  ;;  %v1718_v35 = vshll.u32 %v5975_v58, %v1709_v23  ;;  %v1719_v46 = vshrl.u32 %v5976_v61, %v1710_v22 }
 0x116   : > { %v1653_v14 = vadd.s32 536870912, %v1652_v52  ;;  %v1717_v60 = vor.u32 %v1716_v5, %v1715_v9  ;;  %v1721_v15 = vshll.u32 %v5976_v61, %v1709_v23  ;;  %v1722_v1 = vshrl.u32 %v5977_v3, %v1710_v22 }
 0x117   : > { %v1720_v45 = vor.u32 %v1719_v46, %v1718_v35  ;;  %v1724_v30 = vshll.u32 %v5977_v3, %v1709_v23  ;;  %v1725_v36 = vshrl.u32 %v5978_v17, %v1710_v22  ;;  %vm1727_vm12 = vcmp.lt.s32.totalorder %v1708_v8, 1 }
 0x118   : > { %v7069_v50 = vshrl.u32 %v1653_v14, 30  ;;  %v1723_v54 = vor.u32 %v1722_v1, %v1721_v15  ;;  %vm1729_vm13 = vcmp.lt.s32.totalorder %v1708_v8, 3  ;;  %v7072_v2 = vsub.f32 %v349_v20, %v6118_v31 }
 0x119   : > { %v1726_v41 = vor.u32 %v1725_v36, %v1724_v30  ;;  %vm1728_vm14 = vcmp.lt.s32.totalorder %v1708_v8, 2  ;;  %vm1730_vm15 = vcmp.lt.s32.totalorder %v1708_v8, 4  ;;  %v1735_v27 = vsel %vm1727_vm12, %v1714_v34, %v1717_v60  ;;  %v5781_v24 = vpop.eup %5780 }
 0x11a   : > { %v1655_v56 = vshll.u32 %v7069_v50, 30  ;;  %v1731_v57 = vsel %vm1727_vm12, %v1711_v18, %v1714_v34  ;;  %v1732_v42 = vsel %vm1730_vm15, %v1720_v45, 2102212464  ;;  %v1736_v7 = vsel %vm1730_vm15, %v1723_v54, 920167782 }
 0x11b   : > { %v1733_v23 = vsel %vm1729_vm13, %v1717_v60, %v1732_v42  ;;  %v1737_v6 = vsel %vm1729_vm13, %v1720_v45, %v1736_v7  ;;  %v1739_v0 = vsel %vm1727_vm12, %v1717_v60, %v1720_v45  ;;  %v1740_v22 = vsel %vm1730_vm15, %v1726_v41, 1326507024 }
 0x11c   : > { %vm1478_vm1 = vweird.f32 %v6690_v13  ;;  %v1582_v20 = vand.u32 3, %v1578_v32  ;;  %v7078_v39 = vsub.s32 %v1652_v52, %v1655_v56  ;;  %v1738_v19 = vsel %vm1728_vm14, %v1735_v27, %v1737_v6 }
 0x11d   : > { %vm1581_vm2 = vweird.f32 %v6708_v51  ;;  %v1741_v62 = vsel %vm1729_vm13, %v1723_v54, %v1740_v22  ;;  %v7084_v18 = vmul.u32.u64.low %v7038_v11, %v1738_v19  ;;  %v7085_v16 = vmul.u32.u64.high %v7038_v11, %v1738_v19, %v7084_v18 }
 0x11e   : > { %vm741_vm3 = vcmp.ge.s32.totalorder %v6928_v21, 1  ;;  %vm742_vm4 = vcmp.ge.s32.totalorder %v6941_v63, 1  ;;  %v1487_v32 = vsel %vm1480_vm11, %v1483_v38, %v1486_v49  ;;  %v1658_v52 = vsub.s32 0, %v7078_v39 }
 0x11f   : > { %v1734_v9 = vsel %vm1728_vm14, %v1731_v57, %v1733_v23  ;;  %v1742_v5 = vsel %vm1728_vm14, %v1739_v0, %v1741_v62  ;;  %v7100_v46 = vsub.f32 %v350_v28, %v6118_v31  ;;  %v415_v14 = vmul.f32 0.15915494, %v7072_v2  ;;  %vm5216_vm10 = vmpackc.low %vm742_vm4, %vm741_vm3 }
 0x120   : > { %v7096_v34 = vmul.u32.u64.low %v7038_v11, %v1742_v5  ;;  %v7097_v35 = vmul.u32.u64.high %v7038_v11, %v1742_v5, %v7096_v34  ;;  %v675_v60 = vmul.f32 %v6997_v26, %v6184_v37  ;;  %v676_v10 = vmul.f32 %v5781_v24, %v6184_v37 }
 0x121   : > { %vm1587_vm5 = vcmp.eq.s32.totalorder %v1582_v20, 2  ;;  %v5100_v49 = vmin.u32 %v1658_v52, %v7078_v39  ;;  %v5783_v38 = vpop.eup %5782  ;;  %v1750_v8 = vmul.u32 %v7038_v11, %v1734_v9  ;;  %v1753_v15 = vadd.s32 1, %v7085_v16 }
 0x122   : > { %v416_v1 = vmul.f32 0.15915494, %v7100_v46  ;;  %v448_v45 = vadd.f32 0.5, %v415_v14  ;;  %v5785_v28 = vpop.eup %5784  ;;  %v1488_v30 = vsel %vm1478_vm1, nan, %v1487_v32  ;;  %vm1584_vm6 = vcmp.eq.s32.totalorder %v1582_v20, 0 }
 0x123   : > { %v1588_v36 = vxor.u32 2147483648, %v5783_v38  ;;  %v1660_v26 = vclz %v5100_v49  ;;  %vm1583_vm7 = vcmp.lt.s32.totalorder %v1582_v20, 2  ;;  %v1585_v54 = vxor.u32 2147483648, %v5785_v28 }
 0x124   : > { %vm1752_vm8 = vc.u32 %v7097_v35, %v7084_v18  ;;  %v449_v41 = vadd.f32 0.5, %v416_v1  ;;  %v481_v57 = vfloor.f32 %v448_v45  ;;  %v4173_v7 = vmul.f32 %v1488_v30, %v675_v60 }
 0x125   : > { %v1589_v11 = vsel %vm1587_vm5, %v1588_v36, %v5785_v28  ;;  %v5101_v27 = vadd.s32 4294967294, %v1660_v26  ;;  %v1754_v56 = vsel %vm1752_vm8, %v1753_v15, %v7085_v16  ;;  %v1586_v42 = vsel %vm1584_vm6, %v5783_v38, %v1585_v54 }
 0x126   : > { %v578_v13 = vmul.f32 8.0, %v6695_v33  ;;  %v1755_v23 = vadd.s32 %v1754_v56, %v1750_v8  ;;  %v1590_v6 = vsel %vm1583_vm7, %v1586_v42, %v1589_v11  ;;  %v1648_v0 = vadd.s32 %v7025_v12, %v7031_v43 }
 0x127   : > { %vm5102_vm9 = vcmp.lt.s32.totalorder %v5101_v27, 0  ;;  %v514_v22 = vmul.f32 6.2831855, %v481_v57  ;;  %v1591_v24 = vsel %vm1581_vm2, nan, %v1590_v6  ;;  %v482_v62 = vfloor.f32 %v449_v41 }
 0x128   : > { %v1663_v20 = vsel %vm5102_vm9, 0, %v5101_v27  ;;  %v1756_v19 = vadd.s32 536870912, %v1755_v23  ;;  %v4174_v32 = vmul.f32 %v1591_v24, %v676_v10  ;;  %v1678_v14 = vsub.s32 4, %v7069_v50 }
 0x129   : > { %v1664_v16 = vsub.s32 32, %v1663_v20  ;;  %v1665_v52 = vshll.u32 %v7078_v39, %v1663_v20  ;;  %v1668_v9 = vsub.s32 4294967266, %v1663_v20  ;;  %v7127_v12 = vsub.f32 %v7072_v2, %v514_v22 }
 0x12a   : > { %v1757_v5 = vshrl.u32 %v1756_v19, 30  ;;  %v5217_v43 = vpack.c.bf16 %v4174_v32, %v4173_v7  ;;  %v579_v60 = vmul.f32 9.0, %v6695_v33  ;;  %v515_v49 = vmul.f32 6.2831855, %v482_v62 }
 0x12b   : > { %v1666_v51 = vshrl.u32 %v1648_v0, %v1664_v16  ;;  %v1669_v34 = vadd.s32 127, %v1668_v9  ;;  %v1798_v39 = vand.u32 2147483647, %v7127_v12  ;;  %v619_v21 = vmul.f32 1.442695, %v578_v13 }
 0x12c   : > { %v1758_v10 = vshll.u32 %v1757_v5, 30  ;;  %5414 = vmatmul.mubr.msk.bf16.gmra.mxu0 %vm5216_vm10, %v5217_v43  ;;  %5498 = vmatmul.mubr.msk.bf16.gmra.mxu1 %vm5216_vm10, %v5217_v43  ;;  %vm1594_vm11 = vcmp.lt.s32.totalorder %v6908_v25, 0  ;;  %v1781_v8 = vsub.s32 4, %v1757_v5  ;;  %v1801_v33 = vand.u32 2139095040, %v7127_v12 }
 0x12d   : > { %v1667_v63 = vor.u32 %v1666_v51, %v1665_v52  ;;  %v1670_v38 = vshll.u32 %v1669_v34, 23  ;;  %5417 = vmatprep.mubr.msk.bf16.mxu0 %vm5972_vm0, %v9873_v48  ;;  %5501 = vmatprep.mubr.msk.bf16.mxu1 %vm5972_vm0, %v9873_v48  ;;  %v1679_v45 = vsel %vm1594_vm11, %v1678_v14, %v7069_v50  ;;  %v1805_v28 = vand.u32 8388607, %v1798_v39 }
 0x12e   : > { %v1759_v2 = vsub.s32 %v1755_v23, %v1758_v10  ;;  %v621_v30 = vmul.f32 1.442695, %v579_v60  ;;  %v7144_v26 = vsub.f32 %v7100_v46, %v515_v49  ;;  %v1802_v54 = vshrl.u32 %v1801_v33, 23 }
 0x12f   : > { %v1671_v15 = vor.u32 4788187, %v1670_v38  ;;  %v1674_v1 = vcvt.s32.f32 %v1667_v63  ;;  %vm7148_vm12 = vcmp.le.f32.partialorder %v1592_v44, 0.7853982  ;;  %vm1697_vm13 = vcmp.lt.s32.totalorder %v6911_v59, 0 }
 0x130   : > { %v1761_v36 = vsub.s32 0, %v1759_v2  ;;  %5786 = vpow2.f32 %v619_v21  ;;  %v1681_v50 = vsel %vm7148_vm12, 0, %v1679_v45  ;;  %v7157_v56 = vsel %vm1697_vm13, %v1781_v8, %v1757_v5 }
 0x131   : > { %v1672_v11 = vand.u32 2147483647, %v1671_v15  ;;  %v5107_v57 = vadd.s32 4294967169, %v1802_v54  ;;  %v1806_v42 = vor.u32 8388608, %v1805_v28  ;;  %v1901_v44 = vand.u32 2147483647, %v7144_v26 }
 0x132   : > { %v5104_v27 = vmin.u32 %v1761_v36, %v1759_v2  ;;  %5788 = vpow2.f32 %v621_v30  ;;  %v1904_v13 = vand.u32 2139095040, %v7144_v26  ;;  %v7162_v23 = vadd.s32 8, %v6131_v47 }
 0x133   : > { %v1675_v46 = vmul.f32 %v1674_v1, %v1672_v11  ;;  %vm7166_vm14 = vcmp.le.f32.partialorder %v1695_v4, 0.7853982  ;;  %v1808_v22 = vadd.s32 1, %v5107_v57  ;;  %v7170_v24 = vand.u32 3, %v1681_v50 }
 0x134   : > { %v1763_v7 = vclz %v5104_v27  ;;  %v1751_v20 = vadd.s32 %v7084_v18, %v7097_v35  ;;  %v1784_v62 = vsel %vm7166_vm14, 0, %v7157_v56  ;;  %v7179_v16 = vshll.u32 %v1806_v42, 8 }
 0x135   : > { %v1676_v6 = vxor.u32 2147483648, %v1675_v46  ;;  %vm1809_vm15 = vcmp.gt.s32.totalorder %v1808_v22, 0  ;;  %v7183_v4 = vand.u32 8388607, %v1901_v44  ;;  %v1905_v35 = vshrl.u32 %v1904_v13, 23 }
 0x136   : > { %v5105_v19 = vadd.s32 4294967294, %v1763_v7  ;;  %v1810_v18 = vsel %vm1809_vm15, %v1808_v22, 0  ;;  %vm1686_vm6 = vcmp.lt.s32.totalorder %v7170_v24, 2  ;;  %vm1687_vm7 = vcmp.eq.s32.totalorder %v7170_v24, 0 }
 0x137   : > { %v1677_v32 = vsel %vm1594_vm11, %v1676_v6, %v1675_v46  ;;  %v1811_v5 = vshrl.u32 %v1810_v18, 5  ;;  %v1812_v43 = vand.u32 31, %v1810_v18  ;;  %vm1690_vm8 = vcmp.eq.s32.totalorder %v7170_v24, 2 }
 0x138   : > { %v1680_v52 = vsel %vm7148_vm12, %v6908_v25, %v1677_v32  ;;  %vm5106_vm1 = vcmp.lt.s32.totalorder %v5105_v19, 0  ;;  %vm1684_vm11 = vweird.f32 %v6908_v25  ;;  %vm1787_vm15 = vweird.f32 %v6911_v59 }
 0x139   : > { %5790 = vcosq.f32 %v1680_v52  ;;  %v1766_v9 = vsel %vm5106_vm1, 0, %v5105_v19  ;;  %v1813_v60 = vsub.s32 32, %v1812_v43  ;;  %v1815_v10 = vshll.u32 %v5973_v53, %v1812_v43 }
 0x13a   : > { %5792 = vsinq.f32 %v1680_v52  ;;  %v1767_v51 = vsub.s32 32, %v1766_v9  ;;  %v1768_v34 = vshll.u32 %v1759_v2, %v1766_v9  ;;  %v1771_v14 = vsub.s32 4294967266, %v1766_v9 }
 0x13b   : > { %v1818_v49 = vshll.u32 %v5974_v55, %v1812_v43  ;;  %v1821_v21 = vshll.u32 %v5975_v58, %v1812_v43  ;;  %v1824_v8 = vshll.u32 %v5976_v61, %v1812_v43  ;;  %v1827_v33 = vshll.u32 %v5977_v3, %v1812_v43 }
 0x13c   : > { %v1769_v63 = vshrl.u32 %v1751_v20, %v1767_v51  ;;  %v1772_v38 = vadd.s32 127, %v1771_v14  ;;  %v1814_v15 = vshrl.u32 %v5973_v53, %v1813_v60  ;;  %v1816_v1 = vshrl.u32 %v5974_v55, %v1813_v60 }
 0x13d   : > { %v1819_v2 = vshrl.u32 %v5975_v58, %v1813_v60  ;;  %v1822_v45 = vshrl.u32 %v5976_v61, %v1813_v60  ;;  %v1825_v36 = vshrl.u32 %v5977_v3, %v1813_v60  ;;  %v1828_v54 = vshrl.u32 %v5978_v17, %v1813_v60  ;;  %v5787_v41 = vpop.eup %5786 }
 0x13e   : > { %v1770_v28 = vor.u32 %v1769_v63, %v1768_v34  ;;  %v1773_v30 = vshll.u32 %v1772_v38, 23  ;;  %v1817_v11 = vor.u32 %v1816_v1, %v1815_v10  ;;  %vm1830_vm2 = vcmp.lt.s32.totalorder %v1811_v5, 1 }
 0x13f   : > { %v1820_v50 = vor.u32 %v1819_v2, %v1818_v49  ;;  %v1823_v27 = vor.u32 %v1822_v45, %v1821_v21  ;;  %v1826_v42 = vor.u32 %v1825_v36, %v1824_v8  ;;  %v1829_v7 = vor.u32 %v1828_v54, %v1827_v33  ;;  %v5789_v13 = vpop.eup %5788 }
 0x140   : > { %v1774_v46 = vor.u32 4788187, %v1773_v30  ;;  %v1777_v57 = vcvt.s32.f32 %v1770_v28  ;;  %vm1831_vm3 = vcmp.lt.s32.totalorder %v1811_v5, 2  ;;  %vm1832_vm4 = vcmp.lt.s32.totalorder %v1811_v5, 3 }
 0x141   : > { %vm1833_vm5 = vcmp.lt.s32.totalorder %v1811_v5, 4  ;;  %v1834_v6 = vsel %vm1830_vm2, %v1814_v15, %v1817_v11  ;;  %v1838_v19 = vsel %vm1830_vm2, %v1817_v11, %v1820_v50  ;;  %v1842_v9 = vsel %vm1830_vm2, %v1820_v50, %v1823_v27 }
 0x142   : > { %v1775_v22 = vand.u32 2147483647, %v1774_v46  ;;  %v1835_v20 = vsel %vm1833_vm5, %v1823_v27, 2102212464  ;;  %v1839_v32 = vsel %vm1833_vm5, %v1826_v42, 920167782 }
 0x143   : > { %v1836_v52 = vsel %vm1832_vm4, %v1820_v50, %v1835_v20  ;;  %v1840_v18 = vsel %vm1832_vm4, %v1823_v27, %v1839_v32  ;;  %v1843_v43 = vsel %vm1833_vm5, %v1829_v7, 1326507024  ;;  %v318_v60 = vmul.f32 12.0, %v6808_v40 }
 0x144   : > { %v1778_v51 = vmul.f32 %v1777_v57, %v1775_v22  ;;  %v1841_v34 = vsel %vm1831_vm3, %v1838_v19, %v1840_v18  ;;  %v1844_v14 = vsel %vm1832_vm4, %v1826_v42, %v1843_v43  ;;  %v1837_v10 = vsel %vm1831_vm3, %v1834_v6, %v1836_v52 }
 0x145   : > { %v1845_v49 = vsel %vm1831_vm3, %v1842_v9, %v1844_v14  ;;  %v7208_v21 = vmul.u32.u64.low %v7179_v16, %v1841_v34  ;;  %v7209_v63 = vmul.u32.u64.high %v7179_v16, %v1841_v34, %v7208_v21  ;;  %v5111_v1 = vadd.s32 4294967169, %v1905_v35 }
 0x146   : > { %v5791_v38 = vpop.eup %5790  ;;  %v1779_v8 = vxor.u32 2147483648, %v1778_v51  ;;  %v7213_v33 = vmul.u32.u64.low %v7179_v16, %v1845_v49  ;;  %v7214_v15 = vmul.u32.u64.high %v7179_v16, %v1845_v49, %v7213_v33  ;;  %v7222_v5 = vand.u32 3, %v1784_v62 }
 0x147   : > { %v5793_v2 = vpop.eup %5792  ;;  %v1691_v45 = vxor.u32 2147483648, %v5791_v38  ;;  %v1853_v36 = vmul.u32 %v7179_v16, %v1837_v10  ;;  %v1911_v54 = vadd.s32 1, %v5111_v1  ;;  %v1856_v11 = vadd.s32 1, %v7209_v63 }
 0x148   : > { %v1688_v28 = vxor.u32 2147483648, %v5793_v2  ;;  %v1780_v30 = vsel %vm1697_vm13, %v1779_v8, %v1778_v51  ;;  %v1909_v50 = vor.u32 8388608, %v7183_v4  ;;  %v319_v27 = vmul.f32 13.0, %v6808_v40 }
 0x149   : > { %v1783_v35 = vsel %vm7166_vm14, %v6911_v59, %v1780_v30  ;;  %v1692_v56 = vsel %vm1690_vm8, %v1691_v45, %v5793_v2  ;;  %vm1855_vm9 = vc.u32 %v7214_v15, %v7208_v21  ;;  %v351_v62 = vadd.f32 %v318_v60, %v6113_v29 }
 0x14a   : > { %5794 = vcosq.f32 %v1783_v35  ;;  %v1689_v16 = vsel %vm1687_vm7, %v5791_v38, %v1688_v28  ;;  %v1857_v0 = vsel %vm1855_vm9, %v1856_v11, %v7209_v63  ;;  %vm1912_vm10 = vcmp.gt.s32.totalorder %v1911_v54, 0 }
 0x14b   : > { %5796 = vsinq.f32 %v1783_v35  ;;  %v7240_v46 = vadd.s32 9, %v6131_v47  ;;  %v1858_v40 = vadd.s32 %v1857_v0, %v1853_v36  ;;  %v1913_v4 = vsel %vm1912_vm10, %v1911_v54, 0 }
 0x14c   : > { %v677_v57 = vmul.f32 %v5787_v41, %v6184_v37  ;;  %v7245_v42 = vmul.f32 %v5789_v13, %v6184_v37  ;;  %v1915_v7 = vand.u32 31, %v1913_v4  ;;  %v7247_v6 = vshll.u32 %v1909_v50, 8 }
 0x14d   : > { %v1693_v22 = vsel %vm1686_vm6, %v1689_v16, %v1692_v56  ;;  %v1859_v20 = vadd.s32 536870912, %v1858_v40  ;;  %v352_v19 = vadd.f32 %v319_v27, %v6113_v29  ;;  %v7253_v32 = vsub.f32 %v351_v62, %v6118_v31 }
 0x14e   : > { %vm1793_vm12 = vcmp.eq.s32.totalorder %v7222_v5, 2  ;;  %v1914_v52 = vshrl.u32 %v1913_v4, 5  ;;  %v1916_v18 = vsub.s32 32, %v1915_v7  ;;  %v1918_v41 = vshll.u32 %v5973_v53, %v1915_v7  ;;  %v4414_v49 = vpop.f32.mrf.mxu0 }
 0x14f   : > { %v1921_v13 = vshll.u32 %v5974_v55, %v1915_v7  ;;  %vm1790_vm13 = vcmp.eq.s32.totalorder %v7222_v5, 0  ;;  %v7259_v9 = vshrl.u32 %v1859_v20, 30  ;;  %v1924_v24 = vshll.u32 %v5975_v58, %v1915_v7 }
 0x150   : > { %v1927_v43 = vshll.u32 %v5976_v61, %v1915_v7  ;;  %v1930_v51 = vshll.u32 %v5977_v3, %v1915_v7  ;;  %v1694_v34 = vsel %vm1684_vm11, nan, %v1693_v22  ;;  %vm1789_vm14 = vcmp.lt.s32.totalorder %v7222_v5, 2  ;;  %v5403_v45 = vpop.f32.mrf.mxu0 }
 0x151   : > { %v1919_v14 = vshrl.u32 %v5974_v55, %v1916_v18  ;;  %v1922_v60 = vshrl.u32 %v5975_v58, %v1916_v18  ;;  %v1925_v10 = vshrl.u32 %v5976_v61, %v1916_v18  ;;  %v1861_v63 = vshll.u32 %v7259_v9, 30 }
 0x152   : > { %v1917_v38 = vshrl.u32 %v5973_v53, %v1916_v18  ;;  %v1928_v8 = vshrl.u32 %v5977_v3, %v1916_v18  ;;  %v1931_v25 = vshrl.u32 %v5978_v17, %v1916_v18  ;;  %vm1933_vm1 = vcmp.lt.s32.totalorder %v1914_v52, 1 }
 0x153   : > { %v1920_v33 = vor.u32 %v1919_v14, %v1918_v41  ;;  %v1923_v1 = vor.u32 %v1922_v60, %v1921_v13  ;;  %v7276_v2 = vsub.f32 %v352_v19, %v6118_v31  ;;  %vm743_vm2 = vcmp.ge.s32.totalorder %v7162_v23, 1 }
 0x154   : > { %vm744_vm3 = vcmp.ge.s32.totalorder %v7240_v46, 1  ;;  %v7280_v28 = vsub.s32 %v1858_v40, %v1861_v63  ;;  %v1926_v30 = vor.u32 %v1925_v10, %v1924_v24  ;;  %v1929_v36 = vor.u32 %v1928_v8, %v1927_v43 }
 0x155   : > { %v1932_v54 = vor.u32 %v1931_v25, %v1930_v51  ;;  %v4175_v35 = vmul.f32 %v1694_v34, %v677_v57  ;;  %vm1934_vm4 = vcmp.lt.s32.totalorder %v1914_v52, 2  ;;  %vm1936_vm5 = vcmp.lt.s32.totalorder %v1914_v52, 4  ;;  %vm5219_vm8 = vmpackc.low %vm744_vm3, %vm743_vm2 }
 0x156   : > { %v417_v11 = vmul.f32 0.15915494, %v7253_v32  ;;  %v1864_v50 = vsub.s32 0, %v7280_v28  ;;  %vm1935_vm6 = vcmp.lt.s32.totalorder %v1914_v52, 3  ;;  %v1937_v27 = vsel %vm1933_vm1, %v1917_v38, %v1920_v33 }
 0x157   : > { %v1938_v56 = vsel %vm1936_vm5, %v1926_v30, 2102212464  ;;  %v5795_v62 = vpop.eup %5794  ;;  %v1941_v0 = vsel %vm1933_vm1, %v1920_v33, %v1923_v1  ;;  %v1942_v40 = vsel %vm1936_vm5, %v1929_v36, 920167782  ;;  %v1946_v4 = vsel %vm1936_vm5, %v1932_v54, 1326507024 }
 0x158   : > { %v1939_v16 = vsel %vm1935_vm6, %v1923_v1, %v1938_v56  ;;  %v5797_v7 = vpop.eup %5796  ;;  %v1794_v22 = vxor.u32 2147483648, %v5795_v62  ;;  %v5108_v57 = vmin.u32 %v1864_v50, %v7280_v28  ;;  %v1945_v20 = vsel %vm1933_vm1, %v1923_v1, %v1926_v30 }
 0x159   : > { %v418_v19 = vmul.f32 0.15915494, %v7276_v2  ;;  %v1791_v18 = vxor.u32 2147483648, %v5797_v7  ;;  %v1940_v41 = vsel %vm1934_vm4, %v1937_v27, %v1939_v16  ;;  %v1943_v13 = vsel %vm1935_vm6, %v1926_v30, %v1942_v40 }
 0x15a   : > { %v450_v24 = vadd.f32 0.5, %v417_v11  ;;  %v1795_v43 = vsel %vm1793_vm12, %v1794_v22, %v5797_v7  ;;  %v1866_v51 = vclz %v5108_v57  ;;  %v1944_v34 = vsel %vm1934_vm4, %v1941_v0, %v1943_v13 }
 0x15b   : > { %v1947_v14 = vsel %vm1935_vm6, %v1929_v36, %v1946_v4  ;;  %v1792_v60 = vsel %vm1790_vm13, %v5795_v62, %v1791_v18  ;;  %v7300_v49 = vmul.u32.u64.low %v7247_v6, %v1944_v34  ;;  %v7301_v63 = vmul.u32.u64.high %v7247_v6, %v1944_v34, %v7300_v49 }
 0x15c   : > { %v1948_v10 = vsel %vm1934_vm4, %v1945_v20, %v1947_v14  ;;  %v1796_v38 = vsel %vm1789_vm14, %v1792_v60, %v1795_v43  ;;  %v5109_v8 = vadd.s32 4294967294, %v1866_v51  ;;  %v451_v45 = vadd.f32 0.5, %v418_v19 }
 0x15d   : > { %v7307_v25 = vmul.u32.u64.low %v7247_v6, %v1948_v10  ;;  %v7308_v33 = vmul.u32.u64.high %v7247_v6, %v1948_v10, %v7307_v25  ;;  %v1797_v1 = vsel %vm1787_vm15, nan, %v1796_v38  ;;  %v483_v30 = vfloor.f32 %v450_v24 }
 0x15e   : > { %v4176_v52 = vmul.f32 %v1797_v1, %v7245_v42  ;;  %v1854_v36 = vadd.s32 %v7208_v21, %v7214_v15  ;;  %vm5110_vm7 = vcmp.lt.s32.totalorder %v5109_v8, 0  ;;  %v1956_v54 = vmul.u32 %v7247_v6, %v1940_v41 }
 0x15f   : > { %v1869_v5 = vsel %vm5110_vm7, 0, %v5109_v8  ;;  %v1959_v11 = vadd.s32 1, %v7301_v63  ;;  %v484_v59 = vfloor.f32 %v451_v45  ;;  %v516_v50 = vmul.f32 6.2831855, %v483_v30 }
 0x160   : > { %v5220_v27 = vpack.c.bf16 %v4176_v52, %v4175_v35  ;;  %v1870_v56 = vsub.s32 32, %v1869_v5  ;;  %v1871_v42 = vshll.u32 %v7280_v28, %v1869_v5  ;;  %v1874_v62 = vsub.s32 4294967266, %v1869_v5  ;;  %v7335_v28 = vld [vmem:[%s9857_s0] sm:$0xff] }
 0x161   : > { %vm1958_vm9 = vc.u32 %v7308_v33, %v7300_v49  ;;  %v517_v21 = vmul.f32 6.2831855, %v484_v59  ;;  %v7325_v15 = vsub.f32 %v7253_v32, %v516_v50  ;;  %v580_v32 = vmul.f32 10.0, %v7335_v28 }
 0x162   : > { %5418 = vmatmul.mubr.msk.bf16.gmra.mxu0 %vm5219_vm8, %v5220_v27  ;;  %5502 = vmatmul.mubr.msk.bf16.gmra.mxu1 %vm5219_vm8, %v5220_v27  ;;  %v1872_v23 = vshrl.u32 %v1854_v36, %v1870_v56  ;;  %v1875_v46 = vadd.s32 127, %v1874_v62  ;;  %v1960_v6 = vsel %vm1958_vm9, %v1959_v11, %v7301_v63  ;;  %v581_v16 = vmul.f32 11.0, %v7335_v28 }
 0x163   : > { %5421 = vmatprep.mubr.msk.bf16.mxu0 %vm5972_vm0, %v9873_v48  ;;  %5505 = vmatprep.mubr.msk.bf16.mxu1 %vm5972_vm0, %v9873_v48  ;;  %v1961_v35 = vadd.s32 %v1960_v6, %v1956_v54  ;;  %v7340_v4 = vsub.f32 %v7276_v2, %v517_v21  ;;  %v1884_v7 = vsub.s32 4, %v7259_v9  ;;  %v2004_v57 = vand.u32 2147483647, %v7325_v15 }
 0x164   : > { %v1873_v0 = vor.u32 %v1872_v23, %v1871_v42  ;;  %v1876_v40 = vshll.u32 %v1875_v46, 23  ;;  %v2007_v20 = vand.u32 2139095040, %v7325_v15  ;;  %v623_v41 = vmul.f32 1.442695, %v580_v32 }
 0x165   : > { %v1962_v22 = vadd.s32 536870912, %v1961_v35  ;;  %v625_v43 = vmul.f32 1.442695, %v581_v16  ;;  %vm1800_vm10 = vcmp.lt.s32.totalorder %v7127_v12, 0  ;;  %v2110_v2 = vand.u32 2139095040, %v7340_v4 }
 0x166   : > { %v1877_v19 = vor.u32 4788187, %v1876_v40  ;;  %v1880_v18 = vcvt.s32.f32 %v1873_v0  ;;  %v2008_v24 = vshrl.u32 %v2007_v20, 23  ;;  %v1885_v34 = vsel %vm1800_vm10, %v1884_v7, %v7259_v9 }
 0x167   : > { %v7345_v13 = vshrl.u32 %v1962_v22, 30  ;;  %v2011_v10 = vand.u32 8388607, %v2004_v57  ;;  %v2111_v38 = vshrl.u32 %v2110_v2, 23  ;;  %v7356_v8 = vadd.s32 10, %v6131_v47 }
 0x168   : > { %v1878_v51 = vand.u32 2147483647, %v1877_v19  ;;  %v5115_v60 = vadd.s32 4294967169, %v2008_v24  ;;  %vm7360_vm11 = vcmp.le.f32.partialorder %v1798_v39, 0.7853982  ;;  %5798 = vpow2.f32 %v623_v41 }
 0x169   : > { %v1964_v14 = vshll.u32 %v7345_v13, 30  ;;  %v1887_v30 = vsel %vm7360_vm11, 0, %v1885_v34  ;;  %v5119_v52 = vadd.s32 4294967169, %v2111_v38  ;;  %5800 = vpow2.f32 %v625_v43 }
 0x16a   : > { %v1881_v63 = vmul.f32 %v1880_v18, %v1878_v51  ;;  %v2014_v9 = vadd.s32 1, %v5115_v60  ;;  %v2012_v54 = vor.u32 8388608, %v2011_v10  ;;  %v7370_v5 = vadd.s32 11, %v6131_v47 }
 0x16b   : > { %v7364_v1 = vsub.s32 %v1961_v35, %v1964_v14  ;;  %v2117_v59 = vadd.s32 1, %v5119_v52  ;;  %v7377_v27 = vand.u32 3, %v1887_v30  ;;  %v1957_v56 = vadd.s32 %v7300_v49, %v7308_v33 }
 0x16c   : > { %v1882_v45 = vxor.u32 2147483648, %v1881_v63  ;;  %vm2015_vm12 = vcmp.gt.s32.totalorder %v2014_v9, 0  ;;  %v1987_v62 = vsub.s32 4, %v7345_v13  ;;  %v2107_v23 = vand.u32 2147483647, %v7340_v4 }
 0x16d   : > { %v1967_v36 = vsub.s32 0, %v7364_v1  ;;  %v2016_v11 = vsel %vm2015_vm12, %v2014_v9, 0  ;;  %v7386_v32 = vshll.u32 %v2012_v54, 8  ;;  %vm2118_vm1 = vcmp.gt.s32.totalorder %v2117_v59, 0 }
 0x16e   : > { %v1883_v39 = vsel %vm1800_vm10, %v1882_v45, %v1881_v63  ;;  %v7383_v21 = vshrl.u32 %v2016_v11, 5  ;;  %v2018_v6 = vand.u32 31, %v2016_v11  ;;  %vm1903_vm3 = vcmp.lt.s32.totalorder %v7144_v26, 0 }
 0x16f   : > { %v1886_v50 = vsel %vm7360_vm11, %v7127_v12, %v1883_v39  ;;  %v5112_v42 = vmin.u32 %v1967_v36, %v7364_v1  ;;  %vm7406_vm5 = vcmp.le.f32.partialorder %v1901_v44, 0.7853982  ;;  %v2119_v44 = vsel %vm2118_vm1, %v2117_v59, 0 }
 0x170   : > { %5802 = vcosq.f32 %v1886_v50  ;;  %vm2036_vm13 = vcmp.lt.s32.totalorder %v7383_v21, 1  ;;  %vm2037_vm14 = vcmp.lt.s32.totalorder %v7383_v21, 2  ;;  %vm2038_vm15 = vcmp.lt.s32.totalorder %v7383_v21, 3 }
 0x171   : > { %5804 = vsinq.f32 %v1886_v50  ;;  %v1969_v46 = vclz %v5112_v42  ;;  %v2019_v33 = vsub.s32 32, %v2018_v6  ;;  %v2021_v35 = vshll.u32 %v5973_v53, %v2018_v6 }
 0x172   : > { %vm2039_vm2 = vcmp.lt.s32.totalorder %v7383_v21, 4  ;;  %v2024_v16 = vshll.u32 %v5974_v55, %v2018_v6  ;;  %v2027_v0 = vshll.u32 %v5975_v58, %v2018_v6  ;;  %v2030_v40 = vshll.u32 %v5976_v61, %v2018_v6 }
 0x173   : > { %v5113_v49 = vadd.s32 4294967294, %v1969_v46  ;;  %v2033_v7 = vshll.u32 %v5977_v3, %v2018_v6  ;;  %v2020_v22 = vshrl.u32 %v5973_v53, %v2019_v33  ;;  %v2022_v20 = vshrl.u32 %v5974_v55, %v2019_v33 }
 0x174   : > { %v2025_v19 = vshrl.u32 %v5975_v58, %v2019_v33  ;;  %v2028_v41 = vshrl.u32 %v5976_v61, %v2019_v33  ;;  %v2031_v24 = vshrl.u32 %v5977_v3, %v2019_v33  ;;  %v2034_v43 = vshrl.u32 %v5978_v17, %v2019_v33 }
 0x175   : > { %vm5114_vm4 = vcmp.lt.s32.totalorder %v5113_v49, 0  ;;  %v2023_v60 = vor.u32 %v2022_v20, %v2021_v35  ;;  %v7411_v9 = vpop.eup %5798  ;;  %v2121_v33 = vand.u32 31, %v2119_v44  ;;  %vm1896_vm6 = vcmp.eq.s32.totalorder %v7377_v27, 2 }
 0x176   : > { %v1972_v18 = vsel %vm5114_vm4, 0, %v5113_v49  ;;  %v2026_v10 = vor.u32 %v2025_v19, %v2024_v16  ;;  %v2029_v63 = vor.u32 %v2028_v41, %v2027_v0  ;;  %v2032_v38 = vor.u32 %v2031_v24, %v2030_v40  ;;  %v7416_v36 = vpop.eup %5800 }
 0x177   : > { %v1973_v2 = vsub.s32 32, %v1972_v18  ;;  %v1974_v34 = vshll.u32 %v7364_v1, %v1972_v18  ;;  %v1977_v14 = vsub.s32 4294967266, %v1972_v18  ;;  %v2035_v25 = vor.u32 %v2034_v43, %v2033_v7  ;;  %v7465_v43 = vld [vmem:[%s9858_s1] sm:$0xff] }
 0x178   : > { %v2040_v52 = vsel %vm2036_vm13, %v2020_v22, %v2023_v60  ;;  %v2041_v1 = vsel %vm2039_vm2, %v2029_v63, 2102212464  ;;  %v2044_v54 = vsel %vm2036_vm13, %v2023_v60, %v2026_v10  ;;  %v2045_v39 = vsel %vm2039_vm2, %v2032_v38, 920167782 }
 0x179   : > { %v1975_v45 = vshrl.u32 %v1957_v56, %v1973_v2  ;;  %v1978_v30 = vadd.s32 127, %v1977_v14  ;;  %v2048_v11 = vsel %vm2036_vm13, %v2026_v10, %v2029_v63  ;;  %v2042_v42 = vsel %vm2038_vm15, %v2026_v10, %v2041_v1 }
 0x17a   : > { %v2046_v59 = vsel %vm2038_vm15, %v2029_v63, %v2045_v39  ;;  %v2049_v6 = vsel %vm2039_vm2, %v2035_v25, 1326507024  ;;  %v7436_v49 = vand.u32 8388607, %v2107_v23  ;;  %v7443_v40 = vsel %vm1903_vm3, %v1987_v62, %v7345_v13 }
 0x17b   : > { %v1976_v50 = vor.u32 %v1975_v45, %v1974_v34  ;;  %v1979_v56 = vshll.u32 %v1978_v30, 23  ;;  %v2047_v46 = vsel %vm2037_vm14, %v2044_v54, %v2046_v59  ;;  %v2050_v7 = vsel %vm2038_vm15, %v2032_v38, %v2049_v6 }
 0x17c   : > { %v2043_v20 = vsel %vm2037_vm14, %v2040_v52, %v2042_v42  ;;  %v2051_v19 = vsel %vm2037_vm14, %v2048_v11, %v2050_v7  ;;  %v7454_v18 = vmul.u32.u64.low %v7386_v32, %v2047_v46  ;;  %v7455_v41 = vmul.u32.u64.high %v7386_v32, %v2047_v46, %v7454_v18 }
 0x17d   : > { %v7438_v35 = vpop.eup %5802  ;;  %v1980_v16 = vor.u32 4788187, %v1979_v56  ;;  %v1983_v0 = vcvt.s32.f32 %v1976_v50  ;;  %v7459_v13 = vmul.u32.u64.low %v7386_v32, %v2051_v19  ;;  %v7460_v62 = vmul.u32.u64.high %v7386_v32, %v2051_v19, %v7459_v13 }
 0x17e   : > { %v7447_v22 = vpop.eup %5804  ;;  %v7468_v2 = vmul.f32 14.0, %v7465_v43  ;;  %v1990_v21 = vsel %vm7406_vm5, 0, %v7443_v40  ;;  %v2115_v34 = vor.u32 8388608, %v7436_v49  ;;  %v2122_v14 = vsub.s32 32, %v2121_v33 }
 0x17f   : > { %v1981_v24 = vand.u32 2147483647, %v1980_v16  ;;  %v2124_v60 = vshll.u32 %v5973_v53, %v2121_v33  ;;  %v2059_v63 = vmul.u32 %v7386_v32, %v2043_v20  ;;  %v2120_v38 = vshrl.u32 %v2119_v44, 5 }
 0x180   : > { %v321_v25 = vmul.f32 15.0, %v7465_v43  ;;  %vm1893_vm7 = vcmp.eq.s32.totalorder %v7377_v27, 0  ;;  %v1897_v45 = vxor.u32 2147483648, %v7438_v35  ;;  %v2062_v30 = vadd.s32 1, %v7455_v41 }
 0x181   : > { %v1984_v10 = vmul.f32 %v1983_v0, %v1981_v24  ;;  %v2125_v52 = vshrl.u32 %v5974_v55, %v2122_v14  ;;  %v2127_v1 = vshll.u32 %v5974_v55, %v2121_v33  ;;  %vm2061_vm8 = vc.u32 %v7460_v62, %v7454_v18 }
 0x182   : > { %v2130_v39 = vshll.u32 %v5975_v58, %v2121_v33  ;;  %v2133_v32 = vshll.u32 %v5976_v61, %v2121_v33  ;;  %v2063_v44 = vsel %vm2061_vm8, %v2062_v30, %v7455_v41  ;;  %v2123_v11 = vshrl.u32 %v5973_v53, %v2122_v14 }
 0x183   : > { %v1985_v54 = vxor.u32 2147483648, %v1984_v10  ;;  %v2126_v50 = vor.u32 %v2125_v52, %v2124_v60  ;;  %v2128_v56 = vshrl.u32 %v5975_v58, %v2122_v14  ;;  %v2064_v59 = vadd.s32 %v2063_v44, %v2059_v63 }
 0x184   : > { %v2131_v46 = vshrl.u32 %v5976_v61, %v2122_v14  ;;  %v2134_v6 = vshrl.u32 %v5977_v3, %v2122_v14  ;;  %vm1892_vm9 = vcmp.lt.s32.totalorder %v7377_v27, 2  ;;  %v2136_v0 = vshll.u32 %v5977_v3, %v2121_v33 }
 0x185   : > { %v1986_v42 = vsel %vm1903_vm3, %v1985_v54, %v1984_v10  ;;  %v2129_v16 = vor.u32 %v2128_v56, %v2127_v1  ;;  %v2137_v7 = vshrl.u32 %v5978_v17, %v2122_v14  ;;  %v2065_v20 = vadd.s32 536870912, %v2064_v59 }
 0x186   : > { %v1989_v49 = vsel %vm7406_vm5, %v7144_v26, %v1986_v42  ;;  %v2132_v19 = vor.u32 %v2131_v46, %v2130_v39  ;;  %v2135_v41 = vor.u32 %v2134_v6, %v2133_v32  ;;  %v1894_v24 = vxor.u32 2147483648, %v7447_v22 }
 0x187   : > { %5806 = vcosq.f32 %v1989_v49  ;;  %v2138_v13 = vor.u32 %v2137_v7, %v2136_v0  ;;  %vm2139_vm10 = vcmp.lt.s32.totalorder %v2120_v38, 1  ;;  %vm1890_vm11 = vweird.f32 %v7127_v12 }
 0x188   : > { %5808 = vsinq.f32 %v1989_v49  ;;  %v7502_v60 = vshrl.u32 %v2065_v20, 30  ;;  %vm2140_vm12 = vcmp.lt.s32.totalorder %v2120_v38, 2  ;;  %vm2141_vm13 = vcmp.lt.s32.totalorder %v2120_v38, 3 }
 0x189   : > { %vm2142_vm14 = vcmp.lt.s32.totalorder %v2120_v38, 4  ;;  %v2143_v10 = vsel %vm2139_vm10, %v2123_v11, %v2126_v50  ;;  %v2147_v63 = vsel %vm2139_vm10, %v2126_v50, %v2129_v16  ;;  %v2151_v54 = vsel %vm2139_vm10, %v2129_v16, %v2132_v19 }
 0x18a   : > { %v2144_v33 = vsel %vm2142_vm14, %v2132_v19, 2102212464  ;;  %v2148_v14 = vsel %vm2142_vm14, %v2135_v41, 920167782  ;;  %v2067_v30 = vshll.u32 %v7502_v60, 30  ;;  %v1898_v39 = vsel %vm1896_vm6, %v1897_v45, %v7447_v22 }
 0x18b   : > { %v2145_v52 = vsel %vm2141_vm13, %v2129_v16, %v2144_v33  ;;  %v2149_v1 = vsel %vm2141_vm13, %v2132_v19, %v2148_v14  ;;  %v2152_v44 = vsel %vm2142_vm14, %v2138_v13, 1326507024  ;;  %v2155_v56 = vshll.u32 %v2115_v34, 8 }
 0x18c   : > { %v2150_v32 = vsel %vm2140_vm12, %v2147_v63, %v2149_v1  ;;  %v1895_v11 = vsel %vm1893_vm7, %v7438_v35, %v1894_v24  ;;  %v7514_v50 = vsub.s32 %v2064_v59, %v2067_v30  ;;  %v2153_v42 = vsel %vm2141_vm13, %v2135_v41, %v2152_v44 }
 0x18d   : > { %v353_v46 = vadd.f32 %v7468_v2, %v6113_v29  ;;  %v2146_v6 = vsel %vm2140_vm12, %v2143_v10, %v2145_v52  ;;  %v2154_v49 = vsel %vm2140_vm12, %v2151_v54, %v2153_v42  ;;  %v1994_v35 = vand.u32 3, %v1990_v21 }
 0x18e   : > { %v7521_v22 = vmul.u32.u64.low %v2155_v56, %v2150_v32  ;;  %v7522_v45 = vmul.u32.u64.high %v2155_v56, %v2150_v32, %v7521_v22  ;;  %v2070_v34 = vsub.s32 0, %v7514_v50  ;;  %v679_v2 = vmul.f32 %v7411_v9, %v6184_v37 }
 0x18f   : > { %v7530_v59 = vmul.u32.u64.low %v2155_v56, %v2154_v49  ;;  %v7531_v16 = vmul.u32.u64.high %v2155_v56, %v2154_v49, %v7530_v59  ;;  %vm1993_vm15 = vweird.f32 %v7144_v26  ;;  %v354_v38 = vadd.f32 %v321_v25, %v6113_v29 }
 0x190   : > { %v386_v0 = vsub.f32 %v353_v46, %v6118_v31  ;;  %vm745_vm1 = vcmp.ge.s32.totalorder %v7356_v8, 1  ;;  %vm746_vm2 = vcmp.ge.s32.totalorder %v7370_v5, 1  ;;  %v1899_v51 = vsel %vm1892_vm9, %v1895_v11, %v1898_v39 }
 0x191   : > { %v582_v40 = vmul.f32 12.0, %v7335_v28  ;;  %v5116_v21 = vmin.u32 %v2070_v34, %v7514_v50  ;;  %v2162_v7 = vmul.u32 %v2155_v56, %v2146_v6  ;;  %v680_v9 = vmul.f32 %v7416_v36, %v6184_v37  ;;  %vm5222_vm8 = vmpackc.low %vm746_vm2, %vm745_vm1 }
 0x192   : > { %v2165_v20 = vadd.s32 1, %v7522_v45  ;;  %v7548_v25 = vsub.f32 %v354_v38, %v6118_v31  ;;  %v419_v19 = vmul.f32 0.15915494, %v386_v0  ;;  %vm1995_vm3 = vcmp.lt.s32.totalorder %v1994_v35, 2 }
 0x193   : > { %vm1999_vm4 = vcmp.eq.s32.totalorder %v1994_v35, 2  ;;  %v2072_v41 = vclz %v5116_v21  ;;  %vm2164_vm5 = vc.u32 %v7531_v16, %v7521_v22  ;;  %v1900_v24 = vsel %vm1890_vm11, nan, %v1899_v51 }
 0x194   : > { %v5807_v27 = vpop.eup %5806  ;;  %v2166_v13 = vsel %vm2164_vm5, %v2165_v20, %v7522_v45  ;;  %v420_v36 = vmul.f32 0.15915494, %v7548_v25  ;;  %v452_v10 = vadd.f32 0.5, %v419_v19  ;;  %vm1996_vm6 = vcmp.eq.s32.totalorder %v1994_v35, 0 }
 0x195   : > { %v5809_v33 = vpop.eup %5808  ;;  %v2000_v63 = vxor.u32 2147483648, %v5807_v27  ;;  %v5117_v14 = vadd.s32 4294967294, %v2072_v41  ;;  %v2167_v30 = vadd.s32 %v2166_v13, %v2162_v7  ;;  %v2060_v1 = vadd.s32 %v7454_v18, %v7460_v62 }
 0x196   : > { %v1997_v52 = vxor.u32 2147483648, %v5809_v33  ;;  %v453_v54 = vadd.f32 0.5, %v420_v36  ;;  %v485_v39 = vfloor.f32 %v452_v10  ;;  %v4177_v12 = vmul.f32 %v1900_v24, %v679_v2 }
 0x197   : > { %v2001_v32 = vsel %vm1999_vm4, %v2000_v63, %v5809_v33  ;;  %vm5118_vm7 = vcmp.lt.s32.totalorder %v5117_v14, 0  ;;  %v2168_v44 = vadd.s32 536870912, %v2167_v30  ;;  %v2090_v62 = vsub.s32 4, %v7502_v60 }
 0x198   : > { %v1998_v56 = vsel %vm1996_vm6, %v5807_v27, %v1997_v52  ;;  %v2075_v11 = vsel %vm5118_vm7, 0, %v5117_v14  ;;  %v486_v42 = vfloor.f32 %v453_v54  ;;  %v518_v46 = vmul.f32 6.2831855, %v485_v39 }
 0x199   : > { %v2002_v6 = vsel %vm1995_vm3, %v1998_v56, %v2001_v32  ;;  %v2076_v49 = vsub.s32 32, %v2075_v11  ;;  %v2077_v45 = vshll.u32 %v7514_v50, %v2075_v11  ;;  %v2080_v34 = vsub.s32 4294967266, %v2075_v11 }
 0x19a   : > { %v2003_v18 = vsel %vm1993_vm15, nan, %v2002_v6  ;;  %v2169_v59 = vshrl.u32 %v2168_v44, 30  ;;  %v7564_v21 = vsub.f32 %v386_v0, %v518_v46  ;;  %v583_v35 = vmul.f32 13.0, %v7335_v28 }
 0x19b   : > { %v4178_v38 = vmul.f32 %v2003_v18, %v680_v9  ;;  %v2078_v2 = vshrl.u32 %v2060_v1, %v2076_v49  ;;  %v2081_v51 = vadd.s32 127, %v2080_v34  ;;  %v627_v50 = vmul.f32 1.442695, %v582_v40 }
 0x19c   : > { %vm2006_vm9 = vcmp.lt.s32.totalorder %v7325_v15, 0  ;;  %v2170_v26 = vshll.u32 %v2169_v59, 30  ;;  %v519_v41 = vmul.f32 6.2831855, %v486_v42  ;;  %v2210_v8 = vand.u32 2147483647, %v7564_v21 }
 0x19d   : > { %v5223_v7 = vpack.c.bf16 %v4178_v38, %v4177_v12  ;;  %v2079_v20 = vor.u32 %v2078_v2, %v2077_v45  ;;  %v2082_v19 = vshll.u32 %v2081_v51, 23  ;;  %v2091_v0 = vsel %vm2006_vm9, %v2090_v62, %v7502_v60 }
 0x19e   : > { %v7575_v9 = vsub.s32 %v2167_v30, %v2170_v26  ;;  %v2193_v40 = vsub.s32 4, %v2169_v59  ;;  %v2213_v24 = vand.u32 2139095040, %v7564_v21  ;;  %5810 = vpow2.f32 %v627_v50 }
 0x19f   : > { %5422 = vmatmul.mubr.msk.bf16.gmra.mxu0 %vm5222_vm8, %v5223_v7  ;;  %5506 = vmatmul.mubr.msk.bf16.gmra.mxu1 %vm5222_vm8, %v5223_v7  ;;  %v2083_v5 = vor.u32 4788187, %v2082_v19  ;;  %v2086_v27 = vcvt.s32.f32 %v2079_v20  ;;  %v629_v13 = vmul.f32 1.442695, %v583_v35  ;;  %v2217_v36 = vand.u32 8388607, %v2210_v8 }
 0x1a0   : > { %5425 = vmatprep.mubr.msk.bf16.mxu0 %vm5972_vm0, %v9873_v48  ;;  %5509 = vmatprep.mubr.msk.bf16.mxu1 %vm5972_vm0, %v9873_v48  ;;  %v2173_v60 = vsub.s32 0, %v7575_v9  ;;  %vm7588_vm10 = vcmp.le.f32.partialorder %v2004_v57, 0.7853982  ;;  %v7593_v63 = vsub.f32 %v7548_v25, %v519_v41  ;;  %v2214_v14 = vshrl.u32 %v2213_v24, 23 }
 0x1a1   : > { %v2084_v33 = vand.u32 2147483647, %v2083_v5  ;;  %v7596_v30 = vadd.s32 12, %v6131_v47  ;;  %v2093_v52 = vsel %vm7588_vm10, 0, %v2091_v0  ;;  %vm2109_vm11 = vcmp.lt.s32.totalorder %v7340_v4, 0 }
 0x1a2   : > { %v5120_v1 = vmin.u32 %v2173_v60, %v7575_v9  ;;  %v7604_v57 = vsel %vm2109_vm11, %v2193_v40, %v2169_v59  ;;  %v5123_v39 = vadd.s32 4294967169, %v2214_v14  ;;  %v2218_v32 = vor.u32 8388608, %v2217_v36 }
 0x1a3   : > { %v2087_v54 = vmul.f32 %v2086_v27, %v2084_v33  ;;  %5812 = vpow2.f32 %v629_v13  ;;  %v7607_v25 = vadd.s32 13, %v6131_v47  ;;  %vm7611_vm12 = vcmp.le.f32.partialorder %v2107_v23, 0.7853982 }
 0x1a4   : > { %v2175_v44 = vclz %v5120_v1  ;;  %v7615_v11 = vand.u32 3, %v2093_v52  ;;  %v2220_v42 = vadd.s32 1, %v5123_v39  ;;  %v2316_v46 = vand.u32 2139095040, %v7593_v63 }
 0x1a5   : > { %v2088_v56 = vxor.u32 2147483648, %v2087_v54  ;;  %v2163_v6 = vadd.s32 %v7521_v22, %v7531_v16  ;;  %v2196_v45 = vsel %vm7611_vm12, 0, %v7604_v57  ;;  %v7624_v23 = vmul.f32 14.0, %v7335_v28 }
 0x1a6   : > { %v5121_v49 = vadd.s32 4294967294, %v2175_v44  ;;  %vm2221_vm13 = vcmp.gt.s32.totalorder %v2220_v42, 0  ;;  %v7628_v18 = vshll.u32 %v2218_v32, 8  ;;  %v2313_v62 = vand.u32 2147483647, %v7593_v63 }
 0x1a7   : > { %v2089_v34 = vsel %vm2006_vm9, %v2088_v56, %v2087_v54  ;;  %v2222_v16 = vsel %vm2221_vm13, %v2220_v42, 0  ;;  %v2317_v59 = vshrl.u32 %v2316_v46, 23  ;;  %vm2102_vm15 = vcmp.eq.s32.totalorder %v7615_v11, 2 }
 0x1a8   : > { %v2092_v22 = vsel %vm7588_vm10, %v7325_v15, %v2089_v34  ;;  %vm5122_vm14 = vcmp.lt.s32.totalorder %v5121_v49, 0  ;;  %v2223_v2 = vshrl.u32 %v2222_v16, 5  ;;  %v2224_v51 = vand.u32 31, %v2222_v16 }
 0x1a9   : > { %5814 = vcosq.f32 %v2092_v22  ;;  %v2178_v38 = vsel %vm5122_vm14, 0, %v5121_v49  ;;  %vm2099_vm2 = vcmp.eq.s32.totalorder %v7615_v11, 0  ;;  %vm2098_vm6 = vcmp.lt.s32.totalorder %v7615_v11, 2 }
 0x1aa   : > { %5816 = vsinq.f32 %v2092_v22  ;;  %v2179_v35 = vsub.s32 32, %v2178_v38  ;;  %v2180_v50 = vshll.u32 %v7575_v9, %v2178_v38  ;;  %v2183_v26 = vsub.s32 4294967266, %v2178_v38 }
 0x1ab   : > { %v2225_v7 = vsub.s32 32, %v2224_v51  ;;  %v2227_v20 = vshll.u32 %v5973_v53, %v2224_v51  ;;  %v2230_v19 = vshll.u32 %v5974_v55, %v2224_v51  ;;  %v2233_v41 = vshll.u32 %v5975_v58, %v2224_v51  ;;  %v7640_v24 = vpop.eup %5810 }
 0x1ac   : > { %v2181_v0 = vshrl.u32 %v2163_v6, %v2179_v35  ;;  %v2184_v5 = vadd.s32 127, %v2183_v26  ;;  %v2236_v27 = vshll.u32 %v5976_v61, %v2224_v51  ;;  %v2239_v40 = vshll.u32 %v5977_v3, %v2224_v51 }
 0x1ad   : > { %v2226_v13 = vshrl.u32 %v5973_v53, %v2225_v7  ;;  %v2228_v9 = vshrl.u32 %v5974_v55, %v2225_v7  ;;  %v2231_v60 = vshrl.u32 %v5975_v58, %v2225_v7  ;;  %v2234_v36 = vshrl.u32 %v5976_v61, %v2225_v7 }
 0x1ae   : > { %v2182_v10 = vor.u32 %v2181_v0, %v2180_v50  ;;  %v2185_v33 = vshll.u32 %v2184_v5, 23  ;;  %v2237_v14 = vshrl.u32 %v5977_v3, %v2225_v7  ;;  %v2240_v52 = vshrl.u32 %v5978_v17, %v2225_v7 }
 0x1af   : > { %v2229_v1 = vor.u32 %v2228_v9, %v2227_v20  ;;  %v2232_v54 = vor.u32 %v2231_v60, %v2230_v19  ;;  %v2235_v39 = vor.u32 %v2234_v36, %v2233_v41  ;;  %vm2242_vm1 = vcmp.lt.s32.totalorder %v2223_v2, 1 }
 0x1b0   : > { %v2186_v32 = vor.u32 4788187, %v2185_v33  ;;  %v2189_v44 = vcvt.s32.f32 %v2182_v10  ;;  %v2238_v56 = vor.u32 %v2237_v14, %v2236_v27  ;;  %v2241_v42 = vor.u32 %v2240_v52, %v2239_v40  ;;  %v5813_v46 = vpop.eup %5812 }
 0x1b1   : > { %vm2243_vm3 = vcmp.lt.s32.totalorder %v2223_v2, 2  ;;  %vm2244_vm4 = vcmp.lt.s32.totalorder %v2223_v2, 3  ;;  %vm2245_vm5 = vcmp.lt.s32.totalorder %v2223_v2, 4  ;;  %v2246_v6 = vsel %vm2242_vm1, %v2226_v13, %v2229_v1 }
 0x1b2   : > { %v2187_v49 = vand.u32 2147483647, %v2186_v32  ;;  %v2247_v34 = vsel %vm2245_vm5, %v2235_v39, 2102212464  ;;  %v2250_v22 = vsel %vm2242_vm1, %v2229_v1, %v2232_v54  ;;  %v2251_v16 = vsel %vm2245_vm5, %v2238_v56, 920167782 }
 0x1b3   : > { %v2248_v38 = vsel %vm2244_vm4, %v2232_v54, %v2247_v34  ;;  %v2252_v51 = vsel %vm2244_vm4, %v2235_v39, %v2251_v16  ;;  %v2254_v35 = vsel %vm2242_vm1, %v2232_v54, %v2235_v39  ;;  %v2255_v50 = vsel %vm2245_vm5, %v2241_v42, 1326507024 }
 0x1b4   : > { %v2190_v26 = vmul.f32 %v2189_v44, %v2187_v49  ;;  %v2253_v7 = vsel %vm2243_vm3, %v2250_v22, %v2252_v51  ;;  %v2256_v20 = vsel %vm2244_vm4, %v2238_v56, %v2255_v50  ;;  %v2320_v19 = vand.u32 8388607, %v2313_v62 }
 0x1b5   : > { %v2249_v41 = vsel %vm2243_vm3, %v2246_v6, %v2248_v38  ;;  %v2257_v0 = vsel %vm2243_vm3, %v2254_v35, %v2256_v20  ;;  %v7660_v5 = vmul.u32.u64.low %v7628_v18, %v2253_v7  ;;  %v7661_v27 = vmul.u32.u64.high %v7628_v18, %v2253_v7, %v7660_v5 }
 0x1b6   : > { %v5815_v40 = vpop.eup %5814  ;;  %vm2096_vm7 = vweird.f32 %v7325_v15  ;;  %v2191_v13 = vxor.u32 2147483648, %v2190_v26  ;;  %v7666_v9 = vmul.u32.u64.low %v7628_v18, %v2257_v0  ;;  %v7667_v60 = vmul.u32.u64.high %v7628_v18, %v2257_v0, %v7666_v9 }
 0x1b7   : > { %v5127_v36 = vadd.s32 4294967169, %v2317_v59  ;;  %v5817_v10 = vpop.eup %5816  ;;  %v2103_v33 = vxor.u32 2147483648, %v5815_v40  ;;  %v7673_v2 = vand.u32 3, %v2196_v45  ;;  %v585_v14 = vmul.f32 15.0, %v7335_v28 }
 0x1b8   : > { %v631_v52 = vmul.f32 1.442695, %v7624_v23  ;;  %v2100_v1 = vxor.u32 2147483648, %v5817_v10  ;;  %v2192_v54 = vsel %vm2109_vm11, %v2191_v13, %v2190_v26  ;;  %v2265_v39 = vmul.u32 %v7628_v18, %v2249_v41 }
 0x1b9   : > { %v2323_v32 = vadd.s32 1, %v5127_v36  ;;  %v2195_v59 = vsel %vm7611_vm12, %v7340_v4, %v2192_v54  ;;  %v2268_v44 = vadd.s32 1, %v7661_v27  ;;  %v2321_v57 = vor.u32 8388608, %v2320_v19 }
 0x1ba   : > { %v322_v45 = vmul.f32 16.0, %v7465_v43  ;;  %v2104_v56 = vsel %vm2102_vm15, %v2103_v33, %v5817_v10  ;;  %5818 = vcosq.f32 %v2195_v59  ;;  %vm2267_vm8 = vc.u32 %v7667_v60, %v7660_v5 }
 0x1bb   : > { %v323_v23 = vmul.f32 17.0, %v7465_v43  ;;  %v2101_v18 = vsel %vm2099_vm2, %v5815_v40, %v2100_v1  ;;  %5820 = vsinq.f32 %v2195_v59  ;;  %v2269_v12 = vsel %vm2267_vm8, %v2268_v44, %v7661_v27 }
 0x1bc   : > { %vm2324_vm9 = vcmp.gt.s32.totalorder %v2323_v32, 0  ;;  %v681_v42 = vmul.f32 %v7640_v24, %v6184_v37  ;;  %v7696_v6 = vmul.f32 %v5813_v46, %v6184_v37  ;;  %v2270_v49 = vadd.s32 %v2269_v12, %v2265_v39 }
 0x1bd   : > { %v2325_v34 = vsel %vm2324_vm9, %v2323_v32, 0  ;;  %5822 = vpow2.f32 %v631_v52  ;;  %v7698_v22 = vmul.f32 1.442695, %v585_v14  ;;  %v7700_v38 = vshll.u32 %v2321_v57, 8 }
 0x1be   : > { %v2327_v16 = vand.u32 31, %v2325_v34  ;;  %v2105_v51 = vsel %vm2098_vm6, %v2101_v18, %v2104_v56  ;;  %v2271_v35 = vadd.s32 536870912, %v2270_v49  ;;  %v355_v50 = vadd.f32 %v322_v45, %v6113_v29 }
 0x1bf   : > { %v356_v26 = vadd.f32 %v323_v23, %v6113_v29  ;;  %vm2205_vm10 = vcmp.eq.s32.totalorder %v7673_v2, 2  ;;  %v2326_v24 = vshrl.u32 %v2325_v34, 5  ;;  %vm2202_vm11 = vcmp.eq.s32.totalorder %v7673_v2, 0 }
 0x1c0   : > { %v2328_v46 = vsub.s32 32, %v2327_v16  ;;  %v2330_v7 = vshll.u32 %v5973_v53, %v2327_v16  ;;  %v2333_v20 = vshll.u32 %v5974_v55, %v2327_v16  ;;  %v7710_v19 = vshrl.u32 %v2271_v35, 30 }
 0x1c1   : > { %v2336_v11 = vshll.u32 %v5975_v58, %v2327_v16  ;;  %v2339_v41 = vshll.u32 %v5976_v61, %v2327_v16  ;;  %v2342_v0 = vshll.u32 %v5977_v3, %v2327_v16  ;;  %v2106_v27 = vsel %vm2096_vm7, nan, %v2105_v51 }
 0x1c2   : > { %vm2201_vm12 = vcmp.lt.s32.totalorder %v7673_v2, 2  ;;  %v2331_v40 = vshrl.u32 %v5974_v55, %v2328_v46  ;;  %v2334_v13 = vshrl.u32 %v5975_v58, %v2328_v46  ;;  %v2337_v9 = vshrl.u32 %v5976_v61, %v2328_v46 }
 0x1c3   : > { %vm2199_vm13 = vweird.f32 %v7340_v4  ;;  %v2273_v36 = vshll.u32 %v7710_v19, 30  ;;  %v2329_v10 = vshrl.u32 %v5973_v53, %v2328_v46  ;;  %v2340_v33 = vshrl.u32 %v5977_v3, %v2328_v46 }
 0x1c4   : > { %v2343_v14 = vshrl.u32 %v5978_v17, %v2328_v46  ;;  %v2332_v15 = vor.u32 %v2331_v40, %v2330_v7  ;;  %v2335_v52 = vor.u32 %v2334_v13, %v2333_v20  ;;  %vm2345_vm14 = vcmp.lt.s32.totalorder %v2326_v24, 1 }
 0x1c5   : > { %v7727_v1 = vsub.f32 %v355_v50, %v6118_v31  ;;  %vm747_vm15 = vcmp.ge.s32.totalorder %v7596_v30, 1  ;;  %vm748_vm1 = vcmp.ge.s32.totalorder %v7607_v25, 1  ;;  %v7731_v54 = vsub.s32 %v2270_v49, %v2273_v36 }
 0x1c6   : > { %v2338_v39 = vor.u32 %v2337_v9, %v2336_v11  ;;  %v2341_v32 = vor.u32 %v2340_v33, %v2339_v41  ;;  %v2344_v59 = vor.u32 %v2343_v14, %v2342_v0  ;;  %v4179_v44 = vmul.f32 %v2106_v27, %v681_v42  ;;  %vm5225_vm6 = vmpackc.low %vm748_vm1, %vm747_vm15 }
 0x1c7   : > { %vm2346_vm2 = vcmp.lt.s32.totalorder %v2326_v24, 2  ;;  %vm2348_vm3 = vcmp.lt.s32.totalorder %v2326_v24, 4  ;;  %v7734_v57 = vsub.f32 %v356_v26, %v6118_v31  ;;  %v2276_v45 = vsub.s32 0, %v7731_v54  ;;  %v5819_v18 = vpop.eup %5818 }
 0x1c8   : > { %vm2347_vm4 = vcmp.lt.s32.totalorder %v2326_v24, 3  ;;  %v2349_v56 = vsel %vm2345_vm14, %v2329_v10, %v2332_v15  ;;  %v2350_v23 = vsel %vm2348_vm3, %v2338_v39, 2102212464  ;;  %v2353_v49 = vsel %vm2345_vm14, %v2332_v15, %v2335_v52  ;;  %v5821_v51 = vpop.eup %5820 }
 0x1c9   : > { %v2351_v12 = vsel %vm2347_vm4, %v2335_v52, %v2350_v23  ;;  %v2354_v34 = vsel %vm2348_vm3, %v2341_v32, 920167782  ;;  %v2358_v16 = vsel %vm2348_vm3, %v2344_v59, 1326507024  ;;  %v2206_v42 = vxor.u32 2147483648, %v5819_v18 }
 0x1ca   : > { %v5124_v35 = vmin.u32 %v2276_v45, %v7731_v54  ;;  %v2357_v50 = vsel %vm2345_vm14, %v2335_v52, %v2338_v39  ;;  %v421_v26 = vmul.f32 0.15915494, %v7727_v1  ;;  %v2203_v46 = vxor.u32 2147483648, %v5821_v51  ;;  %v7746_v41 = vpop.eup %5822 }
 0x1cb   : > { %v2352_v7 = vsel %vm2346_vm2, %v2349_v56, %v2351_v12  ;;  %v2355_v20 = vsel %vm2347_vm4, %v2338_v39, %v2354_v34  ;;  %v422_v11 = vmul.f32 0.15915494, %v7734_v57  ;;  %v2207_v0 = vsel %vm2205_vm10, %v2206_v42, %v5821_v51 }
 0x1cc   : > { %v2278_v27 = vclz %v5124_v35  ;;  %v2356_v40 = vsel %vm2346_vm2, %v2353_v49, %v2355_v20  ;;  %v2359_v13 = vsel %vm2347_vm4, %v2341_v32, %v2358_v16  ;;  %v2204_v9 = vsel %vm2202_vm11, %v5819_v18, %v2203_v46 }
 0x1cd   : > { %v2360_v36 = vsel %vm2346_vm2, %v2357_v50, %v2359_v13  ;;  %v7756_v10 = vmul.u32.u64.low %v7700_v38, %v2356_v40  ;;  %v7757_v33 = vmul.u32.u64.high %v7700_v38, %v2356_v40, %v7756_v10  ;;  %v2208_v14 = vsel %vm2201_vm12, %v2204_v9, %v2207_v0 }
 0x1ce   : > { %v5125_v15 = vadd.s32 4294967294, %v2278_v27  ;;  %v7763_v52 = vmul.u32.u64.low %v7700_v38, %v2360_v36  ;;  %v7764_v39 = vmul.u32.u64.high %v7700_v38, %v2360_v36, %v7763_v52  ;;  %v2209_v32 = vsel %vm2199_vm13, nan, %v2208_v14 }
 0x1cf   : > { %5824 = vpow2.f32 %v7698_v22  ;;  %v454_v24 = vadd.f32 0.5, %v421_v26  ;;  %v455_v59 = vadd.f32 0.5, %v422_v11  ;;  %v4180_v45 = vmul.f32 %v2209_v32, %v7696_v6 }
 0x1d0   : > { %v2266_v56 = vadd.s32 %v7660_v5, %v7667_v60  ;;  %vm5126_vm5 = vcmp.lt.s32.totalorder %v5125_v15, 0  ;;  %v2368_v2 = vmul.u32 %v7700_v38, %v2352_v7  ;;  %v2371_v4 = vadd.s32 1, %v7757_v33 }
 0x1d1   : > { %v2281_v23 = vsel %vm5126_vm5, 0, %v5125_v15  ;;  %v487_v18 = vfloor.f32 %v454_v24  ;;  %v488_v22 = vfloor.f32 %v455_v59  ;;  %v5226_v12 = vpack.c.bf16 %v4180_v45, %v4179_v44 }
 0x1d2   : > { %v2282_v49 = vsub.s32 32, %v2281_v23  ;;  %v2283_v6 = vshll.u32 %v7731_v54, %v2281_v23  ;;  %v2286_v34 = vsub.s32 4294967266, %v2281_v23  ;;  %vm2370_vm7 = vc.u32 %v7764_v39, %v7756_v10 }
 0x1d3   : > { %v520_v5 = vmul.f32 6.2831855, %v487_v18  ;;  %5426 = vmatmul.mubr.msk.bf16.gmra.mxu0 %vm5225_vm6, %v5226_v12  ;;  %5510 = vmatmul.mubr.msk.bf16.gmra.mxu1 %vm5225_vm6, %v5226_v12  ;;  %v2372_v25 = vsel %vm2370_vm7, %v2371_v4, %v7757_v33  ;;  %v521_v38 = vmul.f32 6.2831855, %v488_v22  ;;  %v7795_v11 = vadd.s32 14, %v6131_v47 }
 0x1d4   : > { %v2284_v30 = vshrl.u32 %v2266_v56, %v2282_v49  ;;  %v2287_v60 = vadd.s32 127, %v2286_v34  ;;  %5429 = vmatprep.mubr.msk.bf16.mxu0 %vm5972_vm0, %v9873_v48  ;;  %5513 = vmatprep.mubr.msk.bf16.mxu1 %vm5972_vm0, %v9873_v48  ;;  %v2373_v44 = vadd.s32 %v2372_v25, %v2368_v2  ;;  %v7799_v40 = vadd.s32 15, %v6131_v47 }
 0x1d5   : > { %v7787_v54 = vsub.f32 %v7727_v1, %v520_v5  ;;  %v7791_v46 = vsub.f32 %v7734_v57, %v521_v38  ;;  %v2296_v1 = vsub.s32 4, %v7710_v19  ;;  %vm2212_vm8 = vcmp.lt.s32.totalorder %v7564_v21, 0 }
 0x1d6   : > { %v2285_v16 = vor.u32 %v2284_v30, %v2283_v6  ;;  %v2288_v51 = vshll.u32 %v2287_v60, 23  ;;  %v2374_v42 = vadd.s32 536870912, %v2373_v44  ;;  %v7808_v52 = vmul.f32 %v7746_v41, %v6184_v37 }
 0x1d7   : > { %v2416_v35 = vand.u32 2147483647, %v7787_v54  ;;  %v2419_v7 = vand.u32 2139095040, %v7787_v54  ;;  %v2519_v14 = vand.u32 2147483647, %v7791_v46  ;;  %v2522_v15 = vand.u32 2139095040, %v7791_v46 }
 0x1d8   : > { %v2289_v50 = vor.u32 4788187, %v2288_v51  ;;  %v2292_v26 = vcvt.s32.f32 %v2285_v16  ;;  %v2375_v20 = vshrl.u32 %v2374_v42, 30  ;;  %vm7812_vm9 = vcmp.le.f32.partialorder %v2210_v8, 0.7853982 }
 0x1d9   : > { %v2420_v27 = vshrl.u32 %v2419_v7, 23  ;;  %v2423_v57 = vand.u32 8388607, %v2416_v35  ;;  %v586_v59 = vmul.f32 16.0, %v7335_v28  ;;  %v7822_v56 = vsel %vm2212_vm8, %v2296_v1, %v7710_v19 }
 0x1da   : > { %v2290_v0 = vand.u32 2147483647, %v2289_v50  ;;  %v2376_v13 = vshll.u32 %v2375_v20, 30  ;;  %v2399_v2 = vsub.s32 4, %v2375_v20  ;;  %vm2315_vm10 = vcmp.lt.s32.totalorder %v7593_v63, 0 }
 0x1db   : > { %v5131_v33 = vadd.s32 4294967169, %v2420_v27  ;;  %v2424_v4 = vor.u32 8388608, %v2423_v57  ;;  %v2523_v28 = vshrl.u32 %v2522_v15, 23  ;;  %v7833_v22 = vand.u32 8388607, %v2519_v14 }
 0x1dc   : > { %v5825_v9 = vpop.eup %5824  ;;  %v2293_v36 = vmul.f32 %v2292_v26, %v2290_v0  ;;  %v7816_v24 = vsub.s32 %v2373_v44, %v2376_v13  ;;  %v2299_v12 = vsel %vm7812_vm9, 0, %v7822_v56  ;;  %v7842_v6 = vmul.f32 1.442695, %v586_v59 }
 0x1dd   : > { %v2426_v23 = vadd.s32 1, %v5131_v33  ;;  %v7825_v41 = vmul.f32 %v5825_v9, %v6184_v37  ;;  %v2369_v34 = vadd.s32 %v7756_v10, %v7764_v39  ;;  %v7848_v5 = vsel %vm2315_vm10, %v2399_v2, %v2375_v20 }
 0x1de   : > { %v2294_v45 = vxor.u32 2147483648, %v2293_v36  ;;  %v2379_v8 = vsub.s32 0, %v7816_v24  ;;  %v7851_v60 = vmul.f32 18.0, %v7465_v43  ;;  %v7853_v16 = vshll.u32 %v2424_v4, 8 }
 0x1df   : > { %vm2427_vm11 = vcmp.gt.s32.totalorder %v2426_v23, 0  ;;  %v5135_v51 = vadd.s32 4294967169, %v2523_v28  ;;  %v2527_v42 = vor.u32 8388608, %v7833_v22  ;;  %vm7870_vm14 = vcmp.le.f32.partialorder %v2313_v62, 0.7853982 }
 0x1e0   : > { %v2295_v18 = vsel %vm2212_vm8, %v2294_v45, %v2293_v36  ;;  %v5128_v49 = vmin.u32 %v2379_v8, %v7816_v24  ;;  %v2428_v30 = vsel %vm2427_vm11, %v2426_v23, 0  ;;  %v2402_v32 = vsel %vm7870_vm14, 0, %v7848_v5 }
 0x1e1   : > { %v2298_v19 = vsel %vm7812_vm9, %v7564_v21, %v2295_v18  ;;  %v2429_v38 = vshrl.u32 %v2428_v30, 5  ;;  %v2430_v44 = vand.u32 31, %v2428_v30  ;;  %vm2302_vm8 = vweird.f32 %v7564_v21 }
 0x1e2   : > { %5826 = vcosq.f32 %v2298_v19  ;;  %v2381_v25 = vclz %v5128_v49  ;;  %v2529_v49 = vadd.s32 1, %v5135_v51 }
 0x1e3   : > { %5828 = vsinq.f32 %v2298_v19  ;;  %v2431_v10 = vsub.s32 32, %v2430_v44  ;;  %v2433_v39 = vshll.u32 %v5973_v53, %v2430_v44  ;;  %v2436_v26 = vshll.u32 %v5974_v55, %v2430_v44 }
 0x1e4   : > { %v5129_v50 = vadd.s32 4294967294, %v2381_v25  ;;  %v2439_v7 = vshll.u32 %v5975_v58, %v2430_v44  ;;  %v2442_v20 = vshll.u32 %v5976_v61, %v2430_v44  ;;  %v2445_v0 = vshll.u32 %v5977_v3, %v2430_v44 }
 0x1e5   : > { %vm2448_vm12 = vcmp.lt.s32.totalorder %v2429_v38, 1  ;;  %v2432_v1 = vshrl.u32 %v5973_v53, %v2431_v10  ;;  %v2434_v27 = vshrl.u32 %v5974_v55, %v2431_v10  ;;  %v2437_v13 = vshrl.u32 %v5975_v58, %v2431_v10 }
 0x1e6   : > { %vm5130_vm13 = vcmp.lt.s32.totalorder %v5129_v50, 0  ;;  %v2440_v9 = vshrl.u32 %v5976_v61, %v2431_v10  ;;  %v2443_v36 = vshrl.u32 %v5977_v3, %v2431_v10  ;;  %v2446_v33 = vshrl.u32 %v5978_v17, %v2431_v10 }
 0x1e7   : > { %v2384_v57 = vsel %vm5130_vm13, 0, %v5129_v50  ;;  %v2435_v2 = vor.u32 %v2434_v27, %v2433_v39  ;;  %v2438_v8 = vor.u32 %v2437_v13, %v2436_v26  ;;  %vm2450_vm15 = vcmp.lt.s32.totalorder %v2429_v38, 3 }
 0x1e8   : > { %v2385_v15 = vsub.s32 32, %v2384_v57  ;;  %v2386_v59 = vshll.u32 %v7816_v24, %v2384_v57  ;;  %v2389_v45 = vsub.s32 4294967266, %v2384_v57  ;;  %v2441_v4 = vor.u32 %v2440_v9, %v2439_v7 }
 0x1e9   : > { %v2444_v18 = vor.u32 %v2443_v36, %v2442_v20  ;;  %v2447_v28 = vor.u32 %v2446_v33, %v2445_v0  ;;  %vm2449_vm1 = vcmp.lt.s32.totalorder %v2429_v38, 2  ;;  %vm2451_vm2 = vcmp.lt.s32.totalorder %v2429_v38, 4 }
 0x1ea   : > { %v2387_v22 = vshrl.u32 %v2369_v34, %v2385_v15  ;;  %v2390_v19 = vadd.s32 127, %v2389_v45  ;;  %v2452_v24 = vsel %vm2448_vm12, %v2432_v1, %v2435_v2  ;;  %v2456_v30 = vsel %vm2448_vm12, %v2435_v2, %v2438_v8 }
 0x1eb   : > { %v2453_v62 = vsel %vm2451_vm2, %v2441_v4, 2102212464  ;;  %v2457_v50 = vsel %vm2451_vm2, %v2444_v18, 920167782  ;;  %v2460_v26 = vsel %vm2448_vm12, %v2438_v8, %v2441_v4  ;;  %v2461_v34 = vsel %vm2451_vm2, %v2447_v28, 1326507024 }
 0x1ec   : > { %v2388_v25 = vor.u32 %v2387_v22, %v2386_v59  ;;  %v2391_v44 = vshll.u32 %v2390_v19, 23  ;;  %v2454_v10 = vsel %vm2450_vm15, %v2438_v8, %v2453_v62  ;;  %v2458_v39 = vsel %vm2450_vm15, %v2441_v4, %v2457_v50 }
 0x1ed   : > { %v2459_v51 = vsel %vm2449_vm1, %v2456_v30, %v2458_v39  ;;  %vm2530_vm3 = vcmp.gt.s32.totalorder %v2529_v49, 0  ;;  %v2462_v1 = vsel %vm2450_vm15, %v2444_v18, %v2461_v34  ;;  %v325_v57 = vmul.f32 19.0, %v7465_v43 }
 0x1ee   : > { %v2392_v7 = vor.u32 4788187, %v2391_v44  ;;  %v2395_v20 = vcvt.s32.f32 %v2388_v25  ;;  %v7884_v27 = vmul.u32.u64.low %v7853_v16, %v2459_v51  ;;  %v7885_v13 = vmul.u32.u64.high %v7853_v16, %v2459_v51, %v7884_v27 }
 0x1ef   : > { %v7880_v0 = vpop.eup %5826  ;;  %v7895_v36 = vand.u32 3, %v2299_v12  ;;  %v2455_v15 = vsel %vm2449_vm1, %v2452_v24, %v2454_v10  ;;  %v2463_v59 = vsel %vm2449_vm1, %v2460_v26, %v2462_v1  ;;  %v2531_v8 = vsel %vm2530_vm3, %v2529_v49, 0 }
 0x1f0   : > { %v7889_v9 = vpop.eup %5828  ;;  %v2393_v33 = vand.u32 2147483647, %v2392_v7  ;;  %v7900_v45 = vmul.u32.u64.low %v7853_v16, %v2463_v59  ;;  %v7901_v2 = vmul.u32.u64.high %v7853_v16, %v2463_v59, %v7900_v45  ;;  %v357_v43 = vadd.f32 %v7851_v60, %v6113_v29 }
 0x1f1   : > { %v2533_v56 = vand.u32 31, %v2531_v8  ;;  %v7908_v12 = vshll.u32 %v2527_v42, 8  ;;  %v2309_v18 = vxor.u32 2147483648, %v7880_v0  ;;  %v2471_v38 = vmul.u32 %v7853_v16, %v2455_v15 }
 0x1f2   : > { %v2396_v4 = vmul.f32 %v2395_v20, %v2393_v33  ;;  %v2474_v28 = vadd.s32 1, %v7885_v13  ;;  %v358_v22 = vadd.f32 %v325_v57, %v6113_v29  ;;  %v2306_v19 = vxor.u32 2147483648, %v7889_v9 }
 0x1f3   : > { %vm2308_vm4 = vcmp.eq.s32.totalorder %v7895_v36, 2  ;;  %v2534_v49 = vsub.s32 32, %v2533_v56  ;;  %v2536_v24 = vshll.u32 %v5973_v53, %v2533_v56  ;;  %vm2305_vm5 = vcmp.eq.s32.totalorder %v7895_v36, 0 }
 0x1f4   : > { %v2397_v60 = vxor.u32 2147483648, %v2396_v4  ;;  %vm2473_vm6 = vc.u32 %v7901_v2, %v7884_v27  ;;  %v2532_v5 = vshrl.u32 %v2531_v8, 5  ;;  %v2539_v16 = vshll.u32 %v5974_v55, %v2533_v56 }
 0x1f5   : > { %v7922_v42 = vsub.f32 %v357_v43, %v6118_v31  ;;  %v2475_v25 = vsel %vm2473_vm6, %v2474_v28, %v7885_v13  ;;  %v2535_v44 = vshrl.u32 %v5973_v53, %v2534_v49  ;;  %v2537_v62 = vshrl.u32 %v5974_v55, %v2534_v49 }
 0x1f6   : > { %v2398_v30 = vsel %vm2315_vm10, %v2397_v60, %v2396_v4  ;;  %v2476_v10 = vadd.s32 %v2475_v25, %v2471_v38  ;;  %v2540_v39 = vshrl.u32 %v5975_v58, %v2534_v49  ;;  %v2542_v26 = vshll.u32 %v5975_v58, %v2533_v56 }
 0x1f7   : > { %v2401_v50 = vsel %vm7870_vm14, %v7593_v63, %v2398_v30  ;;  %v2538_v34 = vor.u32 %v2537_v62, %v2536_v24  ;;  %v2543_v7 = vshrl.u32 %v5976_v61, %v2534_v49  ;;  %v2545_v20 = vshll.u32 %v5976_v61, %v2533_v56 }
 0x1f8   : > { %5830 = vcosq.f32 %v2401_v50  ;;  %v2477_v51 = vadd.s32 536870912, %v2476_v10  ;;  %v2541_v1 = vor.u32 %v2540_v39, %v2539_v16  ;;  %v2546_v13 = vshrl.u32 %v5977_v3, %v2534_v49 }
 0x1f9   : > { %5832 = vsinq.f32 %v2401_v50  ;;  %v2544_v57 = vor.u32 %v2543_v7, %v2542_v26  ;;  %v2548_v23 = vshll.u32 %v5977_v3, %v2533_v56  ;;  %v2549_v33 = vshrl.u32 %v5978_v17, %v2534_v49 }
 0x1fa   : > { %vm2551_vm7 = vcmp.lt.s32.totalorder %v2532_v5, 1  ;;  %v7940_v15 = vshrl.u32 %v2477_v51, 30  ;;  %v2547_v59 = vor.u32 %v2546_v13, %v2545_v20  ;;  %vm2553_vm9 = vcmp.lt.s32.totalorder %v2532_v5, 3 }
 0x1fb   : > { %v7943_v45 = vsub.f32 %v358_v22, %v6118_v31  ;;  %v2550_v8 = vor.u32 %v2549_v33, %v2548_v23  ;;  %vm2552_vm10 = vcmp.lt.s32.totalorder %v2532_v5, 2  ;;  %vm2554_vm11 = vcmp.lt.s32.totalorder %v2532_v5, 4 }
 0x1fc   : > { %v2559_v43 = vsel %vm2551_vm7, %v2538_v34, %v2541_v1  ;;  %v2479_v4 = vshll.u32 %v7940_v15, 30  ;;  %v2555_v56 = vsel %vm2551_vm7, %v2535_v44, %v2538_v34  ;;  %v2556_v38 = vsel %vm2554_vm11, %v2544_v57, 2102212464 }
 0x1fd   : > { %v2560_v28 = vsel %vm2554_vm11, %v2547_v59, 920167782  ;;  %v2557_v60 = vsel %vm2553_vm9, %v2541_v1, %v2556_v38  ;;  %v2563_v24 = vsel %vm2551_vm7, %v2541_v1, %v2544_v57  ;;  %v2564_v16 = vsel %vm2554_vm11, %v2550_v8, 1326507024  ;;  %v7993_v38 = vld [vmem:[%s9857_s0] sm:$0xff] }
 0x1fe   : > { %v2561_v49 = vsel %vm2553_vm9, %v2544_v57, %v2560_v28  ;;  %vm2304_vm12 = vcmp.lt.s32.totalorder %v7895_v36, 2  ;;  %v2310_v22 = vsel %vm2308_vm4, %v2309_v18, %v7889_v9  ;;  %v7955_v30 = vsub.s32 %v2476_v10, %v2479_v4 }
 0x1ff   : > { %v2562_v25 = vsel %vm2552_vm10, %v2559_v43, %v2561_v49  ;;  %v2307_v44 = vsel %vm2305_vm5, %v7880_v0, %v2306_v19  ;;  %v2565_v62 = vsel %vm2553_vm9, %v2547_v59, %v2564_v16  ;;  %v2406_v26 = vand.u32 3, %v2402_v32 }
 0x200   : > { %v7963_v50 = vmul.u32.u64.low %v7908_v12, %v2562_v25  ;;  %v7964_v39 = vmul.u32.u64.high %v7908_v12, %v2562_v25, %v7963_v50  ;;  %v2482_v34 = vsub.s32 0, %v7955_v30  ;;  %v2558_v9 = vsel %vm2552_vm10, %v2555_v56, %v2557_v60 }
 0x201   : > { %v2566_v18 = vsel %vm2552_vm10, %v2563_v24, %v2565_v62  ;;  %vm749_vm13 = vcmp.ge.s32.totalorder %v7795_v11, 1  ;;  %vm750_vm14 = vcmp.ge.s32.totalorder %v7799_v40, 1  ;;  %v423_v10 = vmul.f32 0.15915494, %v7922_v42 }
 0x202   : > { %v7973_v0 = vmul.u32.u64.low %v7908_v12, %v2566_v18  ;;  %v7974_v19 = vmul.u32.u64.high %v7908_v12, %v2566_v18, %v7973_v0  ;;  %v424_v7 = vmul.f32 0.15915494, %v7943_v45  ;;  %v2311_v32 = vsel %vm2304_vm12, %v2307_v44, %v2310_v22  ;;  %vm5228_vm6 = vmpackc.low %vm750_vm14, %vm749_vm13 }
 0x203   : > { %vm2405_vm15 = vweird.f32 %v7593_v63  ;;  %5834 = vpow2.f32 %v7842_v6  ;;  %v5132_v5 = vmin.u32 %v2482_v34, %v7955_v30  ;;  %v2574_v20 = vmul.u32 %v7908_v12, %v2558_v9 }
 0x204   : > { %v2577_v51 = vadd.s32 1, %v7964_v39  ;;  %v456_v1 = vadd.f32 0.5, %v423_v10  ;;  %v457_v13 = vadd.f32 0.5, %v424_v7  ;;  %vm2407_vm1 = vcmp.lt.s32.totalorder %v2406_v26, 2 }
 0x205   : > { %v5831_v57 = vpop.eup %5830  ;;  %vm2408_vm2 = vcmp.eq.s32.totalorder %v2406_v26, 0  ;;  %vm2411_vm3 = vcmp.eq.s32.totalorder %v2406_v26, 2  ;;  %v2484_v23 = vclz %v5132_v5  ;;  %v2312_v36 = vsel %vm2302_vm8, nan, %v2311_v32 }
 0x206   : > { %v5833_v33 = vpop.eup %5832  ;;  %v2412_v59 = vxor.u32 2147483648, %v5831_v57  ;;  %vm2576_vm4 = vc.u32 %v7974_v19, %v7963_v50  ;;  %v489_v6 = vfloor.f32 %v456_v1  ;;  %v490_v4 = vfloor.f32 %v457_v13 }
 0x207   : > { %v2409_v8 = vxor.u32 2147483648, %v5833_v33  ;;  %v5133_v12 = vadd.s32 4294967294, %v2484_v23  ;;  %v2578_v43 = vsel %vm2576_vm4, %v2577_v51, %v7964_v39  ;;  %v587_v28 = vmul.f32 17.0, %v7993_v38 }
 0x208   : > { %v2413_v56 = vsel %vm2411_vm3, %v2412_v59, %v5833_v33  ;;  %v2579_v21 = vadd.s32 %v2578_v43, %v2574_v20  ;;  %v522_v60 = vmul.f32 6.2831855, %v489_v6  ;;  %v4181_v24 = vmul.f32 %v2312_v36, %v7808_v52 }
 0x209   : > { %v2410_v49 = vsel %vm2408_vm2, %v5831_v57, %v2409_v8  ;;  %v2472_v16 = vadd.s32 %v7884_v27, %v7901_v2  ;;  %vm5134_vm5 = vcmp.lt.s32.totalorder %v5133_v12, 0  ;;  %v523_v62 = vmul.f32 6.2831855, %v490_v4 }
 0x20a   : > { %v2414_v22 = vsel %vm2407_vm1, %v2410_v49, %v2413_v56  ;;  %v2487_v25 = vsel %vm5134_vm5, 0, %v5133_v12  ;;  %v2580_v44 = vadd.s32 536870912, %v2579_v21  ;;  %v637_v10 = vmul.f32 1.442695, %v587_v28 }
 0x20b   : > { %v2415_v39 = vsel %vm2405_vm15, nan, %v2414_v22  ;;  %v2488_v34 = vsub.s32 32, %v2487_v25  ;;  %v2489_v9 = vshll.u32 %v7955_v30, %v2487_v25  ;;  %v2492_v18 = vsub.s32 4294967266, %v2487_v25 }
 0x20c   : > { %v4182_v0 = vmul.f32 %v2415_v39, %v7825_v41  ;;  %v2581_v52 = vshrl.u32 %v2580_v44, 30  ;;  %v8006_v7 = vsub.f32 %v7922_v42, %v522_v60  ;;  %v2502_v26 = vsub.s32 4, %v7940_v15 }
 0x20d   : > { %v2490_v27 = vshrl.u32 %v2472_v16, %v2488_v34  ;;  %v2493_v2 = vadd.s32 127, %v2492_v18  ;;  %v8014_v30 = vsub.f32 %v7943_v45, %v523_v62  ;;  %5836 = vpow2.f32 %v637_v10 }
 0x20e   : > { %v5229_v63 = vpack.c.bf16 %v4182_v0, %v4181_v24  ;;  %v2582_v32 = vshll.u32 %v2581_v52, 30  ;;  %v2605_v20 = vsub.s32 4, %v2581_v52  ;;  %v2622_v42 = vand.u32 2147483647, %v8006_v7 }
 0x20f   : > { %v2491_v41 = vor.u32 %v2490_v27, %v2489_v9  ;;  %v2494_v5 = vshll.u32 %v2493_v2, 23  ;;  %v2625_v40 = vand.u32 2139095040, %v8006_v7  ;;  %v8025_v45 = vadd.s32 16, %v6131_v47 }
 0x210   : > { %v5835_v51 = vpop.eup %5834  ;;  %5430 = vmatmul.mubr.msk.bf16.gmra.mxu0 %vm5228_vm6, %v5229_v63  ;;  %5514 = vmatmul.mubr.msk.bf16.gmra.mxu1 %vm5228_vm6, %v5229_v63  ;;  %v8017_v11 = vsub.s32 %v2579_v21, %v2582_v32  ;;  %vm2418_vm7 = vcmp.lt.s32.totalorder %v7787_v54, 0  ;;  %vm2521_vm8 = vcmp.lt.s32.totalorder %v7791_v46, 0  ;;  %v2629_v6 = vand.u32 8388607, %v2622_v42 }
 0x211   : > { %5433 = vmatprep.mubr.msk.bf16.mxu0 %vm5972_vm0, %v9873_v48  ;;  %5517 = vmatprep.mubr.msk.bf16.mxu1 %vm5972_vm0, %v9873_v48  ;;  %v2495_v1 = vor.u32 4788187, %v2494_v5  ;;  %v2498_v13 = vcvt.s32.f32 %v2491_v41  ;;  %v2503_v57 = vsel %vm2418_vm7, %v2502_v26, %v7940_v15  ;;  %v2626_v33 = vshrl.u32 %v2625_v40, 23 }
 0x212   : > { %v2585_v23 = vsub.s32 0, %v8017_v11  ;;  %v2606_v59 = vsel %vm2521_vm8, %v2605_v20, %v2581_v52  ;;  %v2728_v8 = vand.u32 2139095040, %v8014_v30  ;;  %vm8040_vm9 = vcmp.le.f32.partialorder %v2416_v35, 0.7853982 }
 0x213   : > { %v2496_v36 = vand.u32 2147483647, %v2495_v1  ;;  %vm8046_vm10 = vcmp.le.f32.partialorder %v2519_v14, 0.7853982  ;;  %v588_v4 = vmul.f32 18.0, %v7993_v38  ;;  %v2505_v28 = vsel %vm8040_vm9, 0, %v2503_v57 }
 0x214   : > { %v5136_v43 = vmin.u32 %v2585_v23, %v8017_v11  ;;  %v5139_v21 = vadd.s32 4294967169, %v2626_v33  ;;  %v2725_v35 = vand.u32 2147483647, %v8014_v30  ;;  %v8056_v60 = vadd.s32 17, %v6131_v47 }
 0x215   : > { %v2499_v56 = vmul.f32 %v2498_v13, %v2496_v36  ;;  %v2608_v14 = vsel %vm8046_vm10, 0, %v2606_v59  ;;  %v2729_v24 = vshrl.u32 %v2728_v8, 23  ;;  %v8061_v16 = vmul.f32 %v5835_v51, %v6184_v37 }
 0x216   : > { %v2587_v49 = vclz %v5136_v43  ;;  %v2630_v25 = vor.u32 8388608, %v2629_v6  ;;  %v2632_v44 = vadd.s32 1, %v5139_v21  ;;  %v8063_v62 = vand.u32 3, %v2505_v28 }
 0x217   : > { %v2500_v22 = vxor.u32 2147483648, %v2499_v56  ;;  %v2575_v39 = vadd.s32 %v7963_v50, %v7974_v19  ;;  %v8067_v9 = vmul.f32 1.442695, %v588_v4  ;;  %v8071_v0 = vand.u32 3, %v2608_v14 }
 0x218   : > { %v5137_v34 = vadd.s32 4294967294, %v2587_v49  ;;  %vm2633_vm11 = vcmp.gt.s32.totalorder %v2632_v44, 0  ;;  %v8075_v10 = vand.u32 8388607, %v2725_v35  ;;  %v5143_v50 = vadd.s32 4294967169, %v2729_v24 }
 0x219   : > { %v2501_v18 = vsel %vm2418_vm7, %v2500_v22, %v2499_v56  ;;  %v2634_v27 = vsel %vm2633_vm11, %v2632_v44, 0  ;;  %v8080_v63 = vshll.u32 %v2630_v25, 8  ;;  %vm2511_vm2 = vcmp.eq.s32.totalorder %v8063_v62, 0 }
 0x21a   : > { %v2504_v52 = vsel %vm8040_vm9, %v7787_v54, %v2501_v18  ;;  %vm5138_vm12 = vcmp.lt.s32.totalorder %v5137_v34, 0  ;;  %v2635_v2 = vshrl.u32 %v2634_v27, 5  ;;  %v8083_v5 = vpop.eup %5836  ;;  %v2636_v20 = vand.u32 31, %v2634_v27 }
 0x21b   : > { %5838 = vcosq.f32 %v2504_v52  ;;  %v2590_v19 = vsel %vm5138_vm12, 0, %v5137_v34  ;;  %v2735_v1 = vadd.s32 1, %v5143_v50  ;;  %vm2514_vm3 = vcmp.eq.s32.totalorder %v8063_v62, 2 }
 0x21c   : > { %5840 = vsinq.f32 %v2504_v52  ;;  %v2591_v26 = vsub.s32 32, %v2590_v19  ;;  %v2592_v32 = vshll.u32 %v8017_v11, %v2590_v19  ;;  %v2595_v41 = vsub.s32 4294967266, %v2590_v19 }
 0x21d   : > { %vm2654_vm13 = vcmp.lt.s32.totalorder %v2635_v2, 1  ;;  %vm2655_vm14 = vcmp.lt.s32.totalorder %v2635_v2, 2  ;;  %vm2656_vm15 = vcmp.lt.s32.totalorder %v2635_v2, 3  ;;  %vm2657_vm1 = vcmp.lt.s32.totalorder %v2635_v2, 4 }
 0x21e   : > { %v2593_v51 = vshrl.u32 %v2575_v39, %v2591_v26  ;;  %v2596_v40 = vadd.s32 127, %v2595_v41  ;;  %v2637_v13 = vsub.s32 32, %v2636_v20  ;;  %v2639_v57 = vshll.u32 %v5973_v53, %v2636_v20 }
 0x21f   : > { %v2642_v23 = vshll.u32 %v5974_v55, %v2636_v20  ;;  %v2645_v33 = vshll.u32 %v5975_v58, %v2636_v20  ;;  %v2648_v59 = vshll.u32 %v5976_v61, %v2636_v20  ;;  %v2651_v6 = vshll.u32 %v5977_v3, %v2636_v20 }
 0x220   : > { %v2594_v36 = vor.u32 %v2593_v51, %v2592_v32  ;;  %v2597_v11 = vshll.u32 %v2596_v40, 23  ;;  %v2638_v8 = vshrl.u32 %v5973_v53, %v2637_v13  ;;  %v2640_v12 = vshrl.u32 %v5974_v55, %v2637_v13 }
 0x221   : > { %v2643_v43 = vshrl.u32 %v5975_v58, %v2637_v13  ;;  %v2646_v4 = vshrl.u32 %v5976_v61, %v2637_v13  ;;  %v2649_v21 = vshrl.u32 %v5977_v3, %v2637_v13  ;;  %v2652_v49 = vshrl.u32 %v5978_v17, %v2637_v13 }
 0x222   : > { %v2598_v56 = vor.u32 4788187, %v2597_v11  ;;  %v2601_v28 = vcvt.s32.f32 %v2594_v36  ;;  %v2641_v14 = vor.u32 %v2640_v12, %v2639_v57  ;;  %vm2736_vm4 = vcmp.gt.s32.totalorder %v2735_v1, 0 }
 0x223   : > { %v2644_v24 = vor.u32 %v2643_v43, %v2642_v23  ;;  %v2647_v22 = vor.u32 %v2646_v4, %v2645_v33  ;;  %v2650_v44 = vor.u32 %v2649_v21, %v2648_v59  ;;  %v2653_v39 = vor.u32 %v2652_v49, %v2651_v6 }
 0x224   : > { %v2599_v25 = vand.u32 2147483647, %v2598_v56  ;;  %v2737_v34 = vsel %vm2736_vm4, %v2735_v1, 0  ;;  %v2658_v18 = vsel %vm2654_vm13, %v2638_v8, %v2641_v14  ;;  %v2733_v40 = vor.u32 8388608, %v8075_v10  ;;  %v8111_v1 = vld [vmem:[%s9858_s1] sm:$0xff] }
 0x225   : > { %v2659_v52 = vsel %vm2657_vm1, %v2647_v22, 2102212464  ;;  %v2662_v27 = vsel %vm2654_vm13, %v2641_v14, %v2644_v24  ;;  %v2666_v50 = vsel %vm2654_vm13, %v2644_v24, %v2647_v22  ;;  %v2663_v32 = vsel %vm2657_vm1, %v2650_v44, 920167782 }
 0x226   : > { %v2602_v19 = vmul.f32 %v2601_v28, %v2599_v25  ;;  %v2660_v26 = vsel %vm2656_vm15, %v2644_v24, %v2659_v52  ;;  %v2667_v41 = vsel %vm2657_vm1, %v2653_v39, 1326507024  ;;  %v2664_v20 = vsel %vm2656_vm15, %v2647_v22, %v2663_v32 }
 0x227   : > { %v2668_v51 = vsel %vm2656_vm15, %v2650_v44, %v2667_v41  ;;  %v326_v13 = vmul.f32 20.0, %v8111_v1  ;;  %v2661_v33 = vsel %vm2655_vm14, %v2658_v18, %v2660_v26  ;;  %v2665_v36 = vsel %vm2655_vm14, %v2662_v27, %v2664_v20 }
 0x228   : > { %v5839_v57 = vpop.eup %5838  ;;  %v2603_v23 = vxor.u32 2147483648, %v2602_v19  ;;  %v2669_v11 = vsel %vm2655_vm14, %v2666_v50, %v2668_v51  ;;  %v2739_v43 = vand.u32 31, %v2737_v34  ;;  %vm2510_vm5 = vcmp.lt.s32.totalorder %v8063_v62, 2 }
 0x229   : > { %v5841_v59 = vpop.eup %5840  ;;  %v2515_v6 = vxor.u32 2147483648, %v5839_v57  ;;  %v8118_v8 = vmul.u32.u64.low %v8080_v63, %v2669_v11  ;;  %v8119_v12 = vmul.u32.u64.high %v8080_v63, %v2669_v11, %v8118_v8  ;;  %v327_v14 = vmul.f32 21.0, %v8111_v1 }
 0x22a   : > { %v2512_v4 = vxor.u32 2147483648, %v5841_v59  ;;  %v2604_v56 = vsel %vm2521_vm8, %v2603_v23, %v2602_v19  ;;  %v8124_v28 = vmul.u32.u64.low %v8080_v63, %v2665_v36  ;;  %v8125_v21 = vmul.u32.u64.high %v8080_v63, %v2665_v36, %v8124_v28 }
 0x22b   : > { %v2607_v2 = vsel %vm8046_vm10, %v7791_v46, %v2604_v56  ;;  %v2740_v49 = vsub.s32 32, %v2739_v43  ;;  %v359_v24 = vadd.f32 %v326_v13, %v6113_v29  ;;  %v2677_v22 = vmul.u32 %v8080_v63, %v2661_v33 }
 0x22c   : > { %5842 = vcosq.f32 %v2607_v2  ;;  %v2738_v25 = vshrl.u32 %v2737_v34, 5  ;;  %v2742_v44 = vshll.u32 %v5973_v53, %v2739_v43  ;;  %vm2679_vm6 = vc.u32 %v8119_v12, %v8124_v28 }
 0x22d   : > { %5844 = vsinq.f32 %v2607_v2  ;;  %v2745_v39 = vshll.u32 %v5974_v55, %v2739_v43  ;;  %v2748_v15 = vshll.u32 %v5975_v58, %v2739_v43  ;;  %v2513_v18 = vsel %vm2511_vm2, %v5839_v57, %v2512_v4 }
 0x22e   : > { %v2516_v52 = vsel %vm2514_vm3, %v2515_v6, %v5841_v59  ;;  %v2680_v27 = vadd.s32 1, %v8125_v21  ;;  %v2743_v63 = vshrl.u32 %v5974_v55, %v2740_v49  ;;  %vm2508_vm7 = vweird.f32 %v7787_v54 }
 0x22f   : > { %v2741_v34 = vshrl.u32 %v5973_v53, %v2740_v49  ;;  %v2746_v50 = vshrl.u32 %v5975_v58, %v2740_v49  ;;  %v2749_v19 = vshrl.u32 %v5976_v61, %v2740_v49  ;;  %v2751_v26 = vshll.u32 %v5976_v61, %v2739_v43 }
 0x230   : > { %v2681_v32 = vsel %vm2679_vm6, %v2680_v27, %v8125_v21  ;;  %v2744_v41 = vor.u32 %v2743_v63, %v2742_v44  ;;  %v2752_v20 = vshrl.u32 %v5977_v3, %v2740_v49  ;;  %v2754_v51 = vshll.u32 %v5977_v3, %v2739_v43 }
 0x231   : > { %v2682_v13 = vadd.s32 %v2681_v32, %v2677_v22  ;;  %v2747_v57 = vor.u32 %v2746_v50, %v2745_v39  ;;  %v2750_v23 = vor.u32 %v2749_v19, %v2748_v15  ;;  %v2755_v33 = vshrl.u32 %v5978_v17, %v2740_v49 }
 0x232   : > { %v2753_v36 = vor.u32 %v2752_v20, %v2751_v26  ;;  %vm2757_vm8 = vcmp.lt.s32.totalorder %v2738_v25, 1  ;;  %vm2758_vm9 = vcmp.lt.s32.totalorder %v2738_v25, 2  ;;  %vm2759_vm10 = vcmp.lt.s32.totalorder %v2738_v25, 3 }
 0x233   : > { %v2683_v11 = vadd.s32 536870912, %v2682_v13  ;;  %v2756_v59 = vor.u32 %v2755_v33, %v2754_v51  ;;  %vm2760_vm11 = vcmp.lt.s32.totalorder %v2738_v25, 4  ;;  %v2761_v6 = vsel %vm2757_vm8, %v2741_v34, %v2744_v41 }
 0x234   : > { %vm2611_vm12 = vweird.f32 %v7791_v46  ;;  %v2762_v8 = vsel %vm2760_vm11, %v2750_v23, 2102212464  ;;  %v2765_v4 = vsel %vm2757_vm8, %v2744_v41, %v2747_v57  ;;  %v2766_v56 = vsel %vm2760_vm11, %v2753_v36, 920167782 }
 0x235   : > { %v2769_v21 = vsel %vm2757_vm8, %v2747_v57, %v2750_v23  ;;  %v8156_v43 = vshrl.u32 %v2683_v11, 30  ;;  %v2763_v2 = vsel %vm2759_vm10, %v2747_v57, %v2762_v8  ;;  %v2767_v49 = vsel %vm2759_vm10, %v2750_v23, %v2766_v56 }
 0x236   : > { %v2770_v22 = vsel %vm2760_vm11, %v2756_v59, 1326507024  ;;  %vm751_vm13 = vcmp.ge.s32.totalorder %v8025_v45, 1  ;;  %v2517_v44 = vsel %vm2510_vm5, %v2513_v18, %v2516_v52  ;;  %v2768_v39 = vsel %vm2758_vm9, %v2765_v4, %v2767_v49 }
 0x237   : > { %v2771_v15 = vsel %vm2759_vm10, %v2753_v36, %v2770_v22  ;;  %v2773_v27 = vshll.u32 %v2733_v40, 8  ;;  %v2685_v63 = vshll.u32 %v8156_v43, 30  ;;  %v2764_v34 = vsel %vm2758_vm9, %v2761_v6, %v2763_v2 }
 0x238   : > { %v2772_v50 = vsel %vm2758_vm9, %v2769_v21, %v2771_v15  ;;  %v360_v19 = vadd.f32 %v327_v14, %v6113_v29  ;;  %vm2613_vm14 = vcmp.lt.s32.totalorder %v8071_v0, 2  ;;  %vm2617_vm15 = vcmp.eq.s32.totalorder %v8071_v0, 2 }
 0x239   : > { %v8171_v26 = vmul.u32.u64.low %v2773_v27, %v2772_v50  ;;  %v8172_v32 = vmul.u32.u64.high %v2773_v27, %v2772_v50, %v8171_v26  ;;  %v8174_v62 = vmul.u32.u64.low %v2773_v27, %v2768_v39  ;;  %v8175_v18 = vmul.u32.u64.high %v2773_v27, %v2768_v39, %v8174_v62  ;;  %v5843_v52 = vpop.eup %5842 }
 0x23a   : > { %v2686_v10 = vsub.s32 %v2682_v13, %v2685_v63  ;;  %v392_v40 = vsub.f32 %v359_v24, %v6118_v31  ;;  %v5845_v41 = vpop.eup %5844  ;;  %v2518_v25 = vsel %vm2508_vm7, nan, %v2517_v44  ;;  %vm2614_vm1 = vcmp.eq.s32.totalorder %v8071_v0, 0 }
 0x23b   : > { %v2618_v14 = vxor.u32 2147483648, %v5843_v52  ;;  %v393_v20 = vsub.f32 %v360_v19, %v6118_v31  ;;  %v2615_v51 = vxor.u32 2147483648, %v5845_v41  ;;  %v2780_v23 = vmul.u32 %v2773_v27, %v2764_v34 }
 0x23c   : > { %v2688_v57 = vsub.s32 0, %v2686_v10  ;;  %v425_v33 = vmul.f32 0.15915494, %v392_v40  ;;  %v686_v36 = vmul.f32 %v8083_v5, %v6184_v37  ;;  %vm2782_vm2 = vc.u32 %v8172_v32, %v8174_v62 }
 0x23d   : > { %v2619_v11 = vsel %vm2617_vm15, %v2618_v14, %v5845_v41  ;;  %v2783_v24 = vadd.s32 1, %v8175_v18  ;;  %vm752_vm3 = vcmp.ge.s32.totalorder %v8056_v60, 1  ;;  %v2616_v54 = vsel %vm2614_vm1, %v5843_v52, %v2615_v51 }
 0x23e   : > { %5846 = vpow2.f32 %v8067_v9  ;;  %v5140_v13 = vmin.u32 %v2688_v57, %v2686_v10  ;;  %v2620_v59 = vsel %vm2613_vm14, %v2616_v54, %v2619_v11  ;;  %v4183_v6 = vmul.f32 %v2518_v25, %v8061_v16  ;;  %vm5231_vm4 = vmpackc.low %vm752_vm3, %vm751_vm13 }
 0x23f   : > { %v2784_v8 = vsel %vm2782_vm2, %v2783_v24, %v8175_v18  ;;  %v426_v5 = vmul.f32 0.15915494, %v393_v20  ;;  %v2621_v4 = vsel %vm2611_vm12, nan, %v2620_v59  ;;  %v458_v2 = vadd.f32 0.5, %v425_v33 }
 0x240   : > { %v2690_v56 = vclz %v5140_v13  ;;  %v2785_v21 = vadd.s32 %v2784_v8, %v2780_v23  ;;  %v4184_v49 = vmul.f32 %v2621_v4, %v686_v36  ;;  %v2678_v16 = vadd.s32 %v8124_v28, %v8119_v12 }
 0x241   : > { %v459_v60 = vadd.f32 0.5, %v426_v5  ;;  %v491_v0 = vfloor.f32 %v458_v2  ;;  %v2708_v63 = vsub.s32 4, %v8156_v43  ;;  %v589_v12 = vmul.f32 19.0, %v7993_v38 }
 0x242   : > { %v5141_v9 = vadd.s32 4294967294, %v2690_v56  ;;  %v2786_v22 = vadd.s32 536870912, %v2785_v21  ;;  %v5232_v44 = vpack.c.bf16 %v4184_v49, %v4183_v6  ;;  %vm2624_vm6 = vcmp.lt.s32.totalorder %v8006_v7, 0 }
 0x243   : > { %v492_v39 = vfloor.f32 %v459_v60  ;;  %v524_v46 = vmul.f32 6.2831855, %v491_v0  ;;  %v641_v33 = vmul.f32 1.442695, %v589_v12  ;;  %vm8225_vm7 = vcmp.le.f32.partialorder %v2622_v42, 0.7853982 }
 0x244   : > { %vm5142_vm5 = vcmp.lt.s32.totalorder %v5141_v9, 0  ;;  %v2787_v15 = vshrl.u32 %v2786_v22, 30  ;;  %5434 = vmatmul.mubr.msk.bf16.gmra.mxu0 %vm5231_vm4, %v5232_v44  ;;  %5518 = vmatmul.mubr.msk.bf16.gmra.mxu1 %vm5231_vm4, %v5232_v44  ;;  %v8231_v6 = vadd.s32 18, %v6131_v47  ;;  %v8236_v4 = vadd.s32 19, %v6131_v47 }
 0x245   : > { %v2693_v27 = vsel %vm5142_vm5, 0, %v5141_v9  ;;  %5437 = vmatprep.mubr.msk.bf16.mxu0 %vm5972_vm0, %v9873_v48  ;;  %5521 = vmatprep.mubr.msk.bf16.mxu1 %vm5972_vm0, %v9873_v48  ;;  %v525_v28 = vmul.f32 6.2831855, %v492_v39  ;;  %v8208_v26 = vsub.f32 %v392_v40, %v524_v46  ;;  %5848 = vpow2.f32 %v641_v33 }
 0x246   : > { %v2694_v45 = vsub.s32 32, %v2693_v27  ;;  %v2695_v34 = vshll.u32 %v2686_v10, %v2693_v27  ;;  %v2698_v50 = vsub.s32 4294967266, %v2693_v27  ;;  %v2788_v19 = vshll.u32 %v2787_v15, 30 }
 0x247   : > { %v2828_v25 = vand.u32 2147483647, %v8208_v26  ;;  %v2831_v14 = vand.u32 2139095040, %v8208_v26  ;;  %v2709_v10 = vsel %vm2624_vm6, %v2708_v63, %v8156_v43  ;;  %v8219_v36 = vsub.f32 %v393_v20, %v525_v28 }
 0x248   : > { %v2696_v18 = vshrl.u32 %v2678_v16, %v2694_v45  ;;  %v2699_v52 = vadd.s32 127, %v2698_v50  ;;  %v8210_v41 = vsub.s32 %v2785_v21, %v2788_v19  ;;  %v2711_v20 = vsel %vm8225_vm7, 0, %v2709_v10 }
 0x249   : > { %v2832_v11 = vshrl.u32 %v2831_v14, 23  ;;  %v2835_v24 = vand.u32 8388607, %v2828_v25  ;;  %v2811_v8 = vsub.s32 4, %v2787_v15  ;;  %vm2727_vm8 = vcmp.lt.s32.totalorder %v8014_v30, 0 }
 0x24a   : > { %v2697_v51 = vor.u32 %v2696_v18, %v2695_v34  ;;  %v2700_v57 = vshll.u32 %v2699_v52, 23  ;;  %v2791_v23 = vsub.s32 0, %v8210_v41  ;;  %v2934_v49 = vand.u32 2139095040, %v8219_v36 }
 0x24b   : > { %v5847_v40 = vpop.eup %5846  ;;  %v5147_v5 = vadd.s32 4294967169, %v2832_v11  ;;  %v2836_v21 = vor.u32 8388608, %v2835_v24  ;;  %v8243_v22 = vand.u32 3, %v2711_v20  ;;  %v2781_v44 = vadd.s32 %v8174_v62, %v8172_v32 }
 0x24c   : > { %v2701_v13 = vor.u32 4788187, %v2700_v57  ;;  %v2704_v59 = vcvt.s32.f32 %v2697_v51  ;;  %v5144_v43 = vmin.u32 %v2791_v23, %v8210_v41  ;;  %v8241_v60 = vmul.f32 %v5847_v40, %v6184_v37 }
 0x24d   : > { %v2838_v2 = vadd.s32 1, %v5147_v5  ;;  %v8249_v39 = vsel %vm2727_vm8, %v2811_v8, %v2787_v15  ;;  %v2935_v16 = vshrl.u32 %v2934_v49, 23  ;;  %v8251_v63 = vshll.u32 %v2836_v21, 8 }
 0x24e   : > { %v2702_v56 = vand.u32 2147483647, %v2701_v13  ;;  %v2793_v42 = vclz %v5144_v43  ;;  %vm8267_vm11 = vcmp.le.f32.partialorder %v2725_v35, 0.7853982  ;;  %vm2717_vm1 = vcmp.eq.s32.totalorder %v8243_v22, 0 }
 0x24f   : > { %vm2839_vm9 = vcmp.gt.s32.totalorder %v2838_v2, 0  ;;  %v5151_v19 = vadd.s32 4294967169, %v2935_v16  ;;  %vm2720_vm2 = vcmp.eq.s32.totalorder %v8243_v22, 2  ;;  %vm2714_vm4 = vweird.f32 %v8006_v7 }
 0x250   : > { %v2705_v9 = vmul.f32 %v2704_v59, %v2702_v56  ;;  %v5145_v0 = vadd.s32 4294967294, %v2793_v42  ;;  %v2840_v27 = vsel %vm2839_vm9, %v2838_v2, 0  ;;  %vm2817_vm9 = vweird.f32 %v8014_v30 }
 0x251   : > { %v2841_v34 = vshrl.u32 %v2840_v27, 5  ;;  %v2842_v50 = vand.u32 31, %v2840_v27 }
 0x252   : > { %v2706_v46 = vxor.u32 2147483648, %v2705_v9  ;;  %vm5146_vm10 = vcmp.lt.s32.totalorder %v5145_v0, 0  ;;  %v5849_v2 = vpop.eup %5848 }
 0x253   : > { %v2796_v45 = vsel %vm5146_vm10, 0, %v5145_v0  ;;  %v2843_v18 = vsub.s32 32, %v2842_v50  ;;  %v2845_v52 = vshll.u32 %v5973_v53, %v2842_v50  ;;  %v2848_v14 = vshll.u32 %v5974_v55, %v2842_v50 }
 0x254   : > { %v2707_v12 = vsel %vm2624_vm6, %v2706_v46, %v2705_v9  ;;  %v2797_v28 = vsub.s32 32, %v2796_v45  ;;  %v2798_v32 = vshll.u32 %v8210_v41, %v2796_v45  ;;  %v2801_v62 = vsub.s32 4294967266, %v2796_v45 }
 0x255   : > { %v2710_v15 = vsel %vm8225_vm7, %v8006_v7, %v2707_v12  ;;  %v2851_v10 = vshll.u32 %v5975_v58, %v2842_v50  ;;  %v2844_v23 = vshrl.u32 %v5973_v53, %v2843_v18  ;;  %v2846_v41 = vshrl.u32 %v5974_v55, %v2843_v18 }
 0x256   : > { %5850 = vcosq.f32 %v2710_v15  ;;  %v2799_v51 = vshrl.u32 %v2781_v44, %v2797_v28  ;;  %v2802_v57 = vadd.s32 127, %v2801_v62  ;;  %v2849_v40 = vshrl.u32 %v5975_v58, %v2843_v18 }
 0x257   : > { %5852 = vsinq.f32 %v2710_v15  ;;  %v2852_v54 = vshrl.u32 %v5976_v61, %v2843_v18  ;;  %v2854_v13 = vshll.u32 %v5976_v61, %v2842_v50  ;;  %v2847_v59 = vor.u32 %v2846_v41, %v2845_v52 }
 0x258   : > { %v2800_v11 = vor.u32 %v2799_v51, %v2798_v32  ;;  %v2803_v24 = vshll.u32 %v2802_v57, 23  ;;  %v2850_v43 = vor.u32 %v2849_v40, %v2848_v14  ;;  %v2855_v20 = vshrl.u32 %v5977_v3, %v2843_v18 }
 0x259   : > { %v2857_v8 = vshll.u32 %v5977_v3, %v2842_v50  ;;  %v2853_v42 = vor.u32 %v2852_v54, %v2851_v10  ;;  %v2858_v35 = vshrl.u32 %v5978_v17, %v2843_v18  ;;  %vm2860_vm12 = vcmp.lt.s32.totalorder %v2841_v34, 1 }
 0x25a   : > { %v2804_v5 = vor.u32 4788187, %v2803_v24  ;;  %v2807_v56 = vcvt.s32.f32 %v2800_v11  ;;  %v2856_v21 = vor.u32 %v2855_v20, %v2854_v13  ;;  %vm2861_vm13 = vcmp.lt.s32.totalorder %v2841_v34, 2 }
 0x25b   : > { %vm2862_vm14 = vcmp.lt.s32.totalorder %v2841_v34, 3  ;;  %v2859_v9 = vor.u32 %v2858_v35, %v2857_v8  ;;  %vm2863_vm15 = vcmp.lt.s32.totalorder %v2841_v34, 4  ;;  %v2864_v0 = vsel %vm2860_vm12, %v2844_v23, %v2847_v59 }
 0x25c   : > { %v2805_v49 = vand.u32 2147483647, %v2804_v5  ;;  %v2865_v44 = vsel %vm2863_vm15, %v2853_v42, 2102212464  ;;  %v2868_v16 = vsel %vm2860_vm12, %v2847_v59, %v2850_v43  ;;  %v2869_v46 = vsel %vm2863_vm15, %v2856_v21, 920167782 }
 0x25d   : > { %v2872_v27 = vsel %vm2860_vm12, %v2850_v43, %v2853_v42  ;;  %v2866_v50 = vsel %vm2862_vm14, %v2850_v43, %v2865_v44  ;;  %v2870_v12 = vsel %vm2862_vm14, %v2853_v42, %v2869_v46  ;;  %v2873_v28 = vsel %vm2863_vm15, %v2859_v9, 1326507024 }
 0x25e   : > { %v2808_v45 = vmul.f32 %v2807_v56, %v2805_v49  ;;  %v2867_v32 = vsel %vm2861_vm13, %v2864_v0, %v2866_v50  ;;  %v2871_v62 = vsel %vm2861_vm13, %v2868_v16, %v2870_v12  ;;  %v2874_v15 = vsel %vm2862_vm14, %v2856_v21, %v2873_v28 }
 0x25f   : > { %v2931_v18 = vand.u32 2147483647, %v8219_v36  ;;  %v2875_v14 = vsel %vm2861_vm13, %v2872_v27, %v2874_v15  ;;  %v8284_v51 = vmul.u32.u64.low %v8251_v63, %v2871_v62  ;;  %v8285_v57 = vmul.u32.u64.high %v8251_v63, %v2871_v62, %v8284_v51 }
 0x260   : > { %v2809_v52 = vxor.u32 2147483648, %v2808_v45  ;;  %v8290_v10 = vmul.u32.u64.low %v8251_v63, %v2875_v14  ;;  %v8291_v23 = vmul.u32.u64.high %v8251_v63, %v2875_v14, %v8290_v10  ;;  %v2941_v41 = vadd.s32 1, %v5151_v19 }
 0x261   : > { %v2814_v34 = vsel %vm8267_vm11, 0, %v8249_v39  ;;  %v328_v11 = vmul.f32 22.0, %v8111_v1  ;;  %v2883_v13 = vmul.u32 %v8251_v63, %v2867_v32  ;;  %v2938_v19 = vand.u32 8388607, %v2931_v18 }
 0x262   : > { %v2810_v40 = vsel %vm2727_vm8, %v2809_v52, %v2808_v45  ;;  %vm2942_vm3 = vcmp.gt.s32.totalorder %v2941_v41, 0  ;;  %v2886_v20 = vadd.s32 1, %v8285_v57  ;;  %v8308_v5 = vand.u32 3, %v2814_v34 }
 0x263   : > { %v5851_v24 = vpop.eup %5850  ;;  %v2813_v54 = vsel %vm8267_vm11, %v8014_v30, %v2810_v40  ;;  %v2943_v8 = vsel %vm2942_vm3, %v2941_v41, 0  ;;  %vm2885_vm5 = vc.u32 %v8291_v23, %v8284_v51  ;;  %v8313_v63 = vmul.f32 %v5849_v2, %v6184_v37 }
 0x264   : > { %v5853_v59 = vpop.eup %5852  ;;  %v2721_v43 = vxor.u32 2147483648, %v5851_v24  ;;  %5854 = vcosq.f32 %v2813_v54  ;;  %v2887_v33 = vsel %vm2885_vm5, %v2886_v20, %v8285_v57  ;;  %v2945_v56 = vand.u32 31, %v2943_v8 }
 0x265   : > { %v2718_v39 = vxor.u32 2147483648, %v5853_v59  ;;  %5856 = vsinq.f32 %v2813_v54  ;;  %v329_v42 = vmul.f32 23.0, %v8111_v1  ;;  %vm2716_vm6 = vcmp.lt.s32.totalorder %v8243_v22, 2 }
 0x266   : > { %v2888_v35 = vadd.s32 %v2887_v33, %v2883_v13  ;;  %v2939_v21 = vor.u32 8388608, %v2938_v19  ;;  %v361_v49 = vadd.f32 %v328_v11, %v6113_v29  ;;  %v2722_v0 = vsel %vm2720_vm2, %v2721_v43, %v5853_v59 }
 0x267   : > { %v2719_v9 = vsel %vm2717_vm1, %v5851_v24, %v2718_v39  ;;  %v2946_v44 = vsub.s32 32, %v2945_v56  ;;  %v2948_v2 = vshll.u32 %v5973_v53, %v2945_v56  ;;  %vm2823_vm7 = vcmp.eq.s32.totalorder %v8308_v5, 2 }
 0x268   : > { %v2889_v16 = vadd.s32 536870912, %v2888_v35  ;;  %v2951_v46 = vshll.u32 %v5974_v55, %v2945_v56  ;;  %v2954_v27 = vshll.u32 %v5975_v58, %v2945_v56  ;;  %v2957_v45 = vshll.u32 %v5976_v61, %v2945_v56 }
 0x269   : > { %vm2820_vm8 = vcmp.eq.s32.totalorder %v8308_v5, 0  ;;  %v2944_v50 = vshrl.u32 %v2943_v8, 5  ;;  %v2949_v12 = vshrl.u32 %v5974_v55, %v2946_v44  ;;  %v2952_v28 = vshrl.u32 %v5975_v58, %v2946_v44 }
 0x26a   : > { %v362_v32 = vadd.f32 %v329_v42, %v6113_v29  ;;  %v8332_v62 = vshrl.u32 %v2889_v16, 30  ;;  %v2955_v15 = vshrl.u32 %v5976_v61, %v2946_v44  ;;  %v2958_v52 = vshrl.u32 %v5977_v3, %v2946_v44 }
 0x26b   : > { %v2960_v14 = vshll.u32 %v5977_v3, %v2945_v56  ;;  %v2723_v57 = vsel %vm2716_vm6, %v2719_v9, %v2722_v0  ;;  %v2947_v10 = vshrl.u32 %v5973_v53, %v2946_v44  ;;  %v2950_v41 = vor.u32 %v2949_v12, %v2948_v2 }
 0x26c   : > { %v2961_v40 = vshrl.u32 %v5978_v17, %v2946_v44  ;;  %v2891_v34 = vshll.u32 %v8332_v62, 30  ;;  %v2953_v11 = vor.u32 %v2952_v28, %v2951_v46  ;;  %v2956_v24 = vor.u32 %v2955_v15, %v2954_v27 }
 0x26d   : > { %v2959_v54 = vor.u32 %v2958_v52, %v2957_v45  ;;  %vm753_vm10 = vcmp.ge.s32.totalorder %v8231_v6, 1  ;;  %vm754_vm11 = vcmp.ge.s32.totalorder %v8236_v4, 1  ;;  %vm2963_vm12 = vcmp.lt.s32.totalorder %v2944_v50, 1 }
 0x26e   : > { %v2962_v13 = vor.u32 %v2961_v40, %v2960_v14  ;;  %vm2965_vm13 = vcmp.lt.s32.totalorder %v2944_v50, 3  ;;  %vm2966_vm14 = vcmp.lt.s32.totalorder %v2944_v50, 4  ;;  %v8345_v22 = vsub.s32 %v2888_v35, %v2891_v34  ;;  %vm5234_vm2 = vmpackc.low %vm754_vm11, %vm753_vm10 }
 0x26f   : > { %v2968_v19 = vsel %vm2966_vm14, %v2956_v24, 2102212464  ;;  %v8348_v59 = vshll.u32 %v2939_v21, 8  ;;  %v8351_v43 = vsub.f32 %v361_v49, %v6118_v31  ;;  %v2724_v20 = vsel %vm2714_vm4, nan, %v2723_v57 }
 0x270   : > { %vm2964_vm15 = vcmp.lt.s32.totalorder %v2944_v50, 2  ;;  %v2967_v8 = vsel %vm2963_vm12, %v2947_v10, %v2950_v41  ;;  %v2972_v39 = vsel %vm2966_vm14, %v2959_v54, 920167782  ;;  %v2894_v56 = vsub.s32 0, %v8345_v22 }
 0x271   : > { %v5855_v33 = vpop.eup %5854  ;;  %v2969_v42 = vsel %vm2965_vm13, %v2953_v11, %v2968_v19  ;;  %v2971_v35 = vsel %vm2963_vm12, %v2950_v41, %v2953_v11  ;;  %v2973_v21 = vsel %vm2965_vm13, %v2956_v24, %v2972_v39  ;;  %v2975_v0 = vsel %vm2963_vm12, %v2953_v11, %v2956_v24 }
 0x272   : > { %v5857_v9 = vpop.eup %5856  ;;  %v2824_v49 = vxor.u32 2147483648, %v5855_v33  ;;  %v2976_v7 = vsel %vm2966_vm14, %v2962_v13, 1326507024  ;;  %v395_v44 = vsub.f32 %v362_v32, %v6118_v31  ;;  %vm2819_vm1 = vcmp.lt.s32.totalorder %v8308_v5, 2 }
 0x273   : > { %v2821_v2 = vxor.u32 2147483648, %v5857_v9  ;;  %v4185_v16 = vmul.f32 %v2724_v20, %v8241_v60  ;;  %v5148_v46 = vmin.u32 %v2894_v56, %v8345_v22  ;;  %v2970_v45 = vsel %vm2964_vm15, %v2967_v8, %v2969_v42 }
 0x274   : > { %v2825_v27 = vsel %vm2823_vm7, %v2824_v49, %v5857_v9  ;;  %v2974_v12 = vsel %vm2964_vm15, %v2971_v35, %v2973_v21  ;;  %v2977_v28 = vsel %vm2965_vm13, %v2959_v54, %v2976_v7  ;;  %v427_v14 = vmul.f32 0.15915494, %v8351_v43 }
 0x275   : > { %v2822_v15 = vsel %vm2820_vm8, %v5855_v33, %v2821_v2  ;;  %v2896_v32 = vclz %v5148_v46  ;;  %v2978_v52 = vsel %vm2964_vm15, %v2975_v0, %v2977_v28  ;;  %v428_v41 = vmul.f32 0.15915494, %v395_v44 }
 0x276   : > { %v2826_v60 = vsel %vm2819_vm1, %v2822_v15, %v2825_v27  ;;  %v8377_v57 = vmul.u32.u64.low %v8348_v59, %v2978_v52  ;;  %v8378_v10 = vmul.u32.u64.high %v8348_v59, %v2978_v52, %v8377_v57  ;;  %v460_v50 = vadd.f32 0.5, %v427_v14 }
 0x277   : > { %v2827_v40 = vsel %vm2817_vm9, nan, %v2826_v60  ;;  %v5149_v34 = vadd.s32 4294967294, %v2896_v32  ;;  %v8383_v11 = vmul.u32.u64.low %v8348_v59, %v2974_v12  ;;  %v8384_v24 = vmul.u32.u64.high %v8348_v59, %v2974_v12, %v8383_v11 }
 0x278   : > { %v4186_v5 = vmul.f32 %v2827_v40, %v8313_v63  ;;  %v461_v54 = vadd.f32 0.5, %v428_v41  ;;  %v590_v13 = vmul.f32 20.0, %v7993_v38  ;;  %v591_v30 = vmul.f32 21.0, %v7993_v38 }
 0x279   : > { %v2884_v19 = vadd.s32 %v8284_v51, %v8291_v23  ;;  %vm5150_vm3 = vcmp.lt.s32.totalorder %v5149_v34, 0  ;;  %v2986_v39 = vmul.u32 %v8348_v59, %v2970_v45  ;;  %vm2988_vm4 = vc.u32 %v8378_v10, %v8383_v11 }
 0x27a   : > { %v5235_v20 = vpack.c.bf16 %v4186_v5, %v4185_v16  ;;  %v2899_v8 = vsel %vm5150_vm3, 0, %v5149_v34  ;;  %v2989_v33 = vadd.s32 1, %v8384_v24  ;;  %v493_v38 = vfloor.f32 %v460_v50 }
 0x27b   : > { %v2900_v63 = vsub.s32 32, %v2899_v8  ;;  %v2901_v6 = vshll.u32 %v8345_v22, %v2899_v8  ;;  %v2904_v4 = vsub.s32 4294967266, %v2899_v8  ;;  %v494_v56 = vfloor.f32 %v461_v54 }
 0x27c   : > { %5438 = vmatmul.mubr.msk.bf16.gmra.mxu0 %vm5234_vm2, %v5235_v20  ;;  %5522 = vmatmul.mubr.msk.bf16.gmra.mxu1 %vm5234_vm2, %v5235_v20  ;;  %v2990_v59 = vsel %vm2988_vm4, %v2989_v33, %v8384_v24  ;;  %v643_v42 = vmul.f32 1.442695, %v590_v13  ;;  %v526_v22 = vmul.f32 6.2831855, %v493_v38  ;;  %v645_v9 = vmul.f32 1.442695, %v591_v30 }
 0x27d   : > { %5441 = vmatprep.mubr.msk.bf16.mxu0 %vm5972_vm0, %v9873_v48  ;;  %5525 = vmatprep.mubr.msk.bf16.mxu1 %vm5972_vm0, %v9873_v48  ;;  %v2902_v51 = vshrl.u32 %v2884_v19, %v2900_v63  ;;  %v2905_v23 = vadd.s32 127, %v2904_v4  ;;  %v2991_v35 = vadd.s32 %v2990_v59, %v2986_v39  ;;  %v527_v21 = vmul.f32 6.2831855, %v494_v56  ;;  %v8444_v20 = vld [vmem:[%s9857_s0] sm:$0xff] }
 0x27e   : > { %v8407_v2 = vsub.f32 %v8351_v43, %v526_v22  ;;  %v2914_v27 = vsub.s32 4, %v8332_v62  ;;  %5858 = vpow2.f32 %v643_v42  ;;  %v8415_v32 = vadd.s32 20, %v6131_v47 }
 0x27f   : > { %v2903_v49 = vor.u32 %v2902_v51, %v2901_v6  ;;  %v2906_v0 = vshll.u32 %v2905_v23, 23  ;;  %v2992_v7 = vadd.s32 536870912, %v2991_v35  ;;  %v8410_v45 = vsub.f32 %v395_v44, %v527_v21 }
 0x280   : > { %v3034_v28 = vand.u32 2147483647, %v8407_v2  ;;  %v3037_v15 = vand.u32 2139095040, %v8407_v2  ;;  %5860 = vpow2.f32 %v645_v9  ;;  %v8418_v52 = vadd.s32 21, %v6131_v47 }
 0x281   : > { %v2907_v16 = vor.u32 4788187, %v2906_v0  ;;  %v2910_v46 = vcvt.s32.f32 %v2903_v49  ;;  %v2993_v12 = vshrl.u32 %v2992_v7, 30  ;;  %vm8422_vm5 = vcmp.le.f32.partialorder %v2828_v25, 0.7853982 }
 0x282   : > { %vm2830_vm6 = vcmp.lt.s32.totalorder %v8208_v26, 0  ;;  %v3038_v60 = vshrl.u32 %v3037_v15, 23  ;;  %v3137_v40 = vand.u32 2147483647, %v8410_v45  ;;  %v3140_v34 = vand.u32 2139095040, %v8410_v45 }
 0x283   : > { %v2908_v43 = vand.u32 2147483647, %v2907_v16  ;;  %v2994_v44 = vshll.u32 %v2993_v12, 30  ;;  %v2915_v41 = vsel %vm2830_vm6, %v2914_v27, %v8332_v62  ;;  %v3017_v5 = vsub.s32 4, %v2993_v12 }
 0x284   : > { %v5155_v25 = vadd.s32 4294967169, %v3038_v60  ;;  %v3041_v50 = vand.u32 8388607, %v3034_v28  ;;  %vm2933_vm7 = vcmp.lt.s32.totalorder %v8219_v36, 0  ;;  %v3141_v13 = vshrl.u32 %v3140_v34, 23 }
 0x285   : > { %v2911_v57 = vmul.f32 %v2910_v46, %v2908_v43  ;;  %v8432_v24 = vsub.s32 %v2991_v35, %v2994_v44  ;;  %v330_v30 = vmul.f32 24.0, %v8111_v1  ;;  %v2917_v62 = vsel %vm8422_vm5, 0, %v2915_v41 }
 0x286   : > { %v592_v8 = vmul.f32 22.0, %v8444_v20  ;;  %v3044_v39 = vadd.s32 1, %v5155_v25  ;;  %vm8451_vm8 = vcmp.le.f32.partialorder %v2931_v18, 0.7853982  ;;  %v8457_v4 = vand.u32 8388607, %v3137_v40 }
 0x287   : > { %v2912_v54 = vxor.u32 2147483648, %v2911_v57  ;;  %v2997_v19 = vsub.s32 0, %v8432_v24  ;;  %v331_v33 = vmul.f32 25.0, %v8111_v1  ;;  %v8463_v56 = vsel %vm2933_vm7, %v3017_v5, %v2993_v12 }
 0x288   : > { %v8466_v51 = vmul.f32 23.0, %v8444_v20  ;;  %v3042_v23 = vor.u32 8388608, %v3041_v50  ;;  %v8471_v59 = vand.u32 3, %v2917_v62  ;;  %v5159_v42 = vadd.s32 4294967169, %v3141_v13 }
 0x289   : > { %v2913_v63 = vsel %vm2830_vm6, %v2912_v54, %v2911_v57  ;;  %v5152_v38 = vmin.u32 %v2997_v19, %v8432_v24  ;;  %v363_v35 = vadd.f32 %v330_v30, %v6113_v29  ;;  %v2987_v1 = vadd.s32 %v8383_v11, %v8378_v10 }
 0x28a   : > { %v2916_v18 = vsel %vm8422_vm5, %v8208_v26, %v2913_v63  ;;  %v8476_v21 = vmul.f32 1.442695, %v592_v8  ;;  %vm3045_vm9 = vcmp.gt.s32.totalorder %v3044_v39, 0  ;;  %v3020_v9 = vsel %vm8451_vm8, 0, %v8463_v56 }
 0x28b   : > { %v2999_v22 = vclz %v5152_v38  ;;  %v3046_v49 = vsel %vm3045_vm9, %v3044_v39, 0  ;;  %v3145_v0 = vor.u32 8388608, %v8457_v4  ;;  %v364_v7 = vadd.f32 %v331_v33, %v6113_v29  ;;  %v8485_v12 = vpop.eup %5858 }
 0x28c   : > { %5862 = vcosq.f32 %v2916_v18  ;;  %v3048_v46 = vand.u32 31, %v3046_v49  ;;  %v8483_v27 = vshll.u32 %v3042_v23, 8  ;;  %v3047_v10 = vshrl.u32 %v3046_v49, 5 }
 0x28d   : > { %v5153_v16 = vadd.s32 4294967294, %v2999_v22  ;;  %5864 = vsinq.f32 %v2916_v18  ;;  %v3147_v11 = vadd.s32 1, %v5159_v42  ;;  %v8488_v15 = vsub.f32 %v363_v35, %v6118_v31  ;;  %v8490_v43 = vpop.eup %5860 }
 0x28e   : > { %v3049_v14 = vsub.s32 32, %v3048_v46  ;;  %v3051_v44 = vshll.u32 %v5973_v53, %v3048_v46  ;;  %v3054_v60 = vshll.u32 %v5974_v55, %v3048_v46  ;;  %v3057_v41 = vshll.u32 %v5975_v58, %v3048_v46 }
 0x28f   : > { %vm5154_vm10 = vcmp.lt.s32.totalorder %v5153_v16, 0  ;;  %v3060_v34 = vshll.u32 %v5976_v61, %v3048_v46  ;;  %v3063_v5 = vshll.u32 %v5977_v3, %v3048_v46  ;;  %vm3066_vm11 = vcmp.lt.s32.totalorder %v3047_v10, 1 }
 0x290   : > { %v3002_v57 = vsel %vm5154_vm10, 0, %v5153_v16  ;;  %v3050_v13 = vshrl.u32 %v5973_v53, %v3049_v14  ;;  %v3052_v30 = vshrl.u32 %v5974_v55, %v3049_v14  ;;  %v3055_v62 = vshrl.u32 %v5975_v58, %v3049_v14 }
 0x291   : > { %v3003_v25 = vsub.s32 32, %v3002_v57  ;;  %v3004_v50 = vshll.u32 %v8432_v24, %v3002_v57  ;;  %v3007_v54 = vsub.s32 4294967266, %v3002_v57  ;;  %v3058_v19 = vshrl.u32 %v5976_v61, %v3049_v14 }
 0x292   : > { %v3061_v8 = vshrl.u32 %v5977_v3, %v3049_v14  ;;  %v3064_v33 = vshrl.u32 %v5978_v17, %v3049_v14  ;;  %v3053_v38 = vor.u32 %v3052_v30, %v3051_v44  ;;  %v3056_v23 = vor.u32 %v3055_v62, %v3054_v60 }
 0x293   : > { %v3005_v39 = vshrl.u32 %v2987_v1, %v3003_v25  ;;  %v3008_v63 = vadd.s32 127, %v3007_v54  ;;  %v3059_v18 = vor.u32 %v3058_v19, %v3057_v41  ;;  %vm3148_vm12 = vcmp.gt.s32.totalorder %v3147_v11, 0 }
 0x294   : > { %v3062_v24 = vor.u32 %v3061_v8, %v3060_v34  ;;  %v3065_v22 = vor.u32 %v3064_v33, %v3063_v5  ;;  %vm3067_vm13 = vcmp.lt.s32.totalorder %v3047_v10, 2  ;;  %vm3068_vm14 = vcmp.lt.s32.totalorder %v3047_v10, 3 }
 0x295   : > { %v3006_v42 = vor.u32 %v3005_v39, %v3004_v50  ;;  %v3009_v35 = vshll.u32 %v3008_v63, 23  ;;  %vm3069_vm15 = vcmp.lt.s32.totalorder %v3047_v10, 4  ;;  %v3074_v49 = vsel %vm3066_vm11, %v3053_v38, %v3056_v23 }
 0x296   : > { %v3071_v1 = vsel %vm3069_vm15, %v3059_v18, 2102212464  ;;  %v3075_v14 = vsel %vm3069_vm15, %v3062_v24, 920167782  ;;  %v3070_v44 = vsel %vm3066_vm11, %v3050_v13, %v3053_v38  ;;  %v8511_v41 = vsub.f32 %v364_v7, %v6118_v31 }
 0x297   : > { %v3010_v16 = vor.u32 4788187, %v3009_v35  ;;  %v3013_v46 = vcvt.s32.f32 %v3006_v42  ;;  %v3072_v60 = vsel %vm3068_vm14, %v3056_v23, %v3071_v1  ;;  %v3076_v57 = vsel %vm3068_vm14, %v3059_v18, %v3075_v14 }
 0x298   : > { %v3077_v5 = vsel %vm3067_vm13, %v3074_v49, %v3076_v57  ;;  %v3078_v25 = vsel %vm3066_vm11, %v3056_v23, %v3059_v18  ;;  %v3149_v50 = vsel %vm3148_vm12, %v3147_v11, 0  ;;  %v8519_v30 = vmul.f32 1.442695, %v8466_v51 }
 0x299   : > { %v3011_v34 = vand.u32 2147483647, %v3010_v16  ;;  %v8516_v54 = vpop.eup %5862  ;;  %v3079_v13 = vsel %vm3069_vm15, %v3065_v22, 1326507024  ;;  %v8523_v62 = vmul.u32.u64.low %v8483_v27, %v3077_v5  ;;  %v8524_v19 = vmul.u32.u64.high %v8483_v27, %v3077_v5, %v8523_v62 }
 0x29a   : > { %v8527_v7 = vpop.eup %5864  ;;  %v8533_v11 = vand.u32 3, %v3020_v9  ;;  %v3073_v39 = vsel %vm3067_vm13, %v3070_v44, %v3072_v60  ;;  %v3080_v51 = vsel %vm3068_vm14, %v3062_v24, %v3079_v13  ;;  %v3151_v33 = vand.u32 31, %v3149_v50 }
 0x29b   : > { %v3014_v8 = vmul.f32 %v3013_v46, %v3011_v34  ;;  %v3081_v63 = vsel %vm3067_vm13, %v3078_v25, %v3080_v51  ;;  %v8540_v38 = vshll.u32 %v3145_v0, 8  ;;  %v429_v23 = vmul.f32 0.15915494, %v8488_v15 }
 0x29c   : > { %v8544_v42 = vmul.u32.u64.low %v8483_v27, %v3081_v63  ;;  %v8545_v35 = vmul.u32.u64.high %v8483_v27, %v3081_v63, %v8544_v42  ;;  %v8548_v56 = vmul.f32 0.15915494, %v8511_v41  ;;  %vm2926_vm1 = vcmp.eq.s32.totalorder %v8471_v59, 2 }
 0x29d   : > { %v3015_v18 = vxor.u32 2147483648, %v3014_v8  ;;  %v3089_v9 = vmul.u32 %v8483_v27, %v3073_v39  ;;  %v3092_v10 = vadd.s32 1, %v8524_v19  ;;  %v3152_v24 = vsub.s32 32, %v3151_v33 }
 0x29e   : > { %v3154_v4 = vshll.u32 %v5973_v53, %v3151_v33  ;;  %vm2923_vm2 = vcmp.eq.s32.totalorder %v8471_v59, 0  ;;  %v3150_v22 = vshrl.u32 %v3149_v50, 5  ;;  %v3157_v49 = vshll.u32 %v5974_v55, %v3151_v33 }
 0x29f   : > { %v3016_v0 = vsel %vm2933_vm7, %v3015_v18, %v3014_v8  ;;  %v3160_v16 = vshll.u32 %v5975_v58, %v3151_v33  ;;  %v3155_v27 = vshrl.u32 %v5974_v55, %v3152_v24  ;;  %v3158_v1 = vshrl.u32 %v5975_v58, %v3152_v24 }
 0x2a0   : > { %v3019_v46 = vsel %vm8451_vm8, %v8219_v36, %v3016_v0  ;;  %v3163_v14 = vshll.u32 %v5976_v61, %v3151_v33  ;;  %vm3091_vm3 = vc.u32 %v8545_v35, %v8523_v62  ;;  %v3153_v44 = vshrl.u32 %v5973_v53, %v3152_v24 }
 0x2a1   : > { %5866 = vcosq.f32 %v3019_v46  ;;  %v3161_v60 = vshrl.u32 %v5976_v61, %v3152_v24  ;;  %vm2922_vm4 = vcmp.lt.s32.totalorder %v8471_v59, 2  ;;  %v3093_v6 = vsel %vm3091_vm3, %v3092_v10, %v8524_v19 }
 0x2a2   : > { %5868 = vsinq.f32 %v3019_v46  ;;  %v3156_v57 = vor.u32 %v3155_v27, %v3154_v4  ;;  %v3159_v34 = vor.u32 %v3158_v1, %v3157_v49  ;;  %v3094_v5 = vadd.s32 %v3093_v6, %v3089_v9 }
 0x2a3   : > { %v3162_v25 = vor.u32 %v3161_v60, %v3160_v16  ;;  %v3164_v50 = vshrl.u32 %v5977_v3, %v3152_v24  ;;  %v3166_v13 = vshll.u32 %v5977_v3, %v3151_v33  ;;  %v2924_v8 = vxor.u32 2147483648, %v8527_v7 }
 0x2a4   : > { %v2927_v39 = vxor.u32 2147483648, %v8516_v54  ;;  %v3167_v51 = vshrl.u32 %v5978_v17, %v3152_v24  ;;  %vm3169_vm5 = vcmp.lt.s32.totalorder %v3150_v22, 1  ;;  %vm2920_vm6 = vweird.f32 %v8208_v26 }
 0x2a5   : > { %v3095_v63 = vadd.s32 536870912, %v3094_v5  ;;  %v3165_v18 = vor.u32 %v3164_v50, %v3163_v14  ;;  %vm3171_vm7 = vcmp.lt.s32.totalorder %v3150_v22, 3  ;;  %vm3172_vm8 = vcmp.lt.s32.totalorder %v3150_v22, 4 }
 0x2a6   : > { %v3168_v19 = vor.u32 %v3167_v51, %v3166_v13  ;;  %vm3170_vm9 = vcmp.lt.s32.totalorder %v3150_v22, 2  ;;  %v3174_v42 = vsel %vm3172_vm8, %v3162_v25, 2102212464  ;;  %v3177_v9 = vsel %vm3169_vm5, %v3156_v57, %v3159_v34 }
 0x2a7   : > { %v8577_v10 = vshrl.u32 %v3095_v63, 30  ;;  %v3173_v33 = vsel %vm3169_vm5, %v3153_v44, %v3156_v57  ;;  %v3178_v4 = vsel %vm3172_vm8, %v3165_v18, 920167782  ;;  %v3181_v0 = vsel %vm3169_vm5, %v3159_v34, %v3162_v25 }
 0x2a8   : > { %v3175_v49 = vsel %vm3171_vm7, %v3159_v34, %v3174_v42  ;;  %v3179_v24 = vsel %vm3171_vm7, %v3162_v25, %v3178_v4  ;;  %v3182_v16 = vsel %vm3172_vm8, %v3168_v19, 1326507024  ;;  %v462_v46 = vadd.f32 0.5, %v429_v23 }
 0x2a9   : > { %v2928_v27 = vsel %vm2926_vm1, %v2927_v39, %v8527_v7  ;;  %vm3023_vm10 = vweird.f32 %v8219_v36  ;;  %v3097_v1 = vshll.u32 %v8577_v10, 30  ;;  %v3180_v14 = vsel %vm3170_vm9, %v3177_v9, %v3179_v24 }
 0x2aa   : > { %v3183_v44 = vsel %vm3171_vm7, %v3165_v18, %v3182_v16  ;;  %v2925_v60 = vsel %vm2923_vm2, %v8516_v54, %v2924_v8  ;;  %v8593_v23 = vmul.u32.u64.low %v8540_v38, %v3180_v14  ;;  %v8594_v57 = vmul.u32.u64.high %v8540_v38, %v3180_v14, %v8593_v23 }
 0x2ab   : > { %v3184_v6 = vsel %vm3170_vm9, %v3181_v0, %v3183_v44  ;;  %v8597_v7 = vsub.s32 %v3094_v5, %v3097_v1  ;;  %v3176_v34 = vsel %vm3170_vm9, %v3173_v33, %v3175_v49  ;;  %v689_v13 = vmul.f32 %v8485_v12, %v6184_v37 }
 0x2ac   : > { %v8601_v25 = vmul.u32.u64.low %v8540_v38, %v3184_v6  ;;  %v8602_v50 = vmul.u32.u64.high %v8540_v38, %v3184_v6, %v8601_v25  ;;  %5870 = vpow2.f32 %v8476_v21  ;;  %v463_v54 = vadd.f32 0.5, %v8548_v56 }
 0x2ad   : > { %v495_v8 = vfloor.f32 %v462_v46  ;;  %v690_v39 = vmul.f32 %v8490_v43, %v6184_v37  ;;  %v2929_v5 = vsel %vm2922_vm4, %v2925_v60, %v2928_v27  ;;  %5872 = vpow2.f32 %v8519_v30 }
 0x2ae   : > { %v3100_v22 = vsub.s32 0, %v8597_v7  ;;  %v5867_v51 = vpop.eup %5866  ;;  %vm3029_vm11 = vcmp.eq.s32.totalorder %v8533_v11, 2  ;;  %v3192_v12 = vmul.u32 %v8540_v38, %v3176_v34  ;;  %v3195_v21 = vadd.s32 1, %v8594_v57 }
 0x2af   : > { %v528_v63 = vmul.f32 6.2831855, %v495_v8  ;;  %v5869_v56 = vpop.eup %5868  ;;  %vm3025_vm12 = vcmp.lt.s32.totalorder %v8533_v11, 2  ;;  %vm3026_vm13 = vcmp.eq.s32.totalorder %v8533_v11, 0  ;;  %v3030_v43 = vxor.u32 2147483648, %v5867_v51 }
 0x2b0   : > { %v5156_v59 = vmin.u32 %v3100_v22, %v8597_v7  ;;  %v2930_v30 = vsel %vm2920_vm6, nan, %v2929_v5  ;;  %v3027_v18 = vxor.u32 2147483648, %v5869_v56  ;;  %vm3194_vm14 = vc.u32 %v8602_v50, %v8593_v23 }
 0x2b1   : > { %v496_v19 = vfloor.f32 %v463_v54  ;;  %v3031_v38 = vsel %vm3029_vm11, %v3030_v43, %v5869_v56  ;;  %v3196_v9 = vsel %vm3194_vm14, %v3195_v21, %v8594_v57  ;;  %v8626_v33 = vsub.f32 %v8488_v15, %v528_v63 }
 0x2b2   : > { %v3102_v42 = vclz %v5156_v59  ;;  %vm755_vm15 = vcmp.ge.s32.totalorder %v8415_v32, 1  ;;  %v3028_v4 = vsel %vm3026_vm13, %v5867_v51, %v3027_v18  ;;  %v3197_v0 = vadd.s32 %v3196_v9, %v3192_v12 }
 0x2b3   : > { %vm756_vm1 = vcmp.ge.s32.totalorder %v8418_v52, 1  ;;  %v3032_v26 = vsel %vm3025_vm12, %v3028_v4, %v3031_v38  ;;  %v4187_v49 = vmul.f32 %v2930_v30, %v689_v13  ;;  %v3090_v46 = vadd.s32 %v8523_v62, %v8545_v35 }
 0x2b4   : > { %v5157_v24 = vadd.s32 4294967294, %v3102_v42  ;;  %v3033_v16 = vsel %vm3023_vm10, nan, %v3032_v26  ;;  %v3198_v27 = vadd.s32 536870912, %v3197_v0  ;;  %v529_v1 = vmul.f32 6.2831855, %v496_v19  ;;  %vm5237_vm3 = vmpackc.low %vm756_vm1, %vm755_vm15 }
 0x2b5   : > { %v4188_v15 = vmul.f32 %v3033_v16, %v690_v39  ;;  %v3243_v32 = vand.u32 2139095040, %v8626_v33  ;;  %v3120_v52 = vsub.s32 4, %v8577_v10  ;;  %v3240_v44 = vand.u32 2147483647, %v8626_v33 }
 0x2b6   : > { %vm5158_vm2 = vcmp.lt.s32.totalorder %v5157_v24, 0  ;;  %v8638_v11 = vshrl.u32 %v3198_v27, 30  ;;  %v8643_v62 = vadd.s32 22, %v6131_v47  ;;  %vm3036_vm4 = vcmp.lt.s32.totalorder %v8407_v2, 0 }
 0x2b7   : > { %v3105_v14 = vsel %vm5158_vm2, 0, %v5157_v24  ;;  %v5238_v60 = vpack.c.bf16 %v4188_v15, %v4187_v49  ;;  %v3244_v34 = vshrl.u32 %v3243_v32, 23  ;;  %v8648_v8 = vsub.f32 %v8511_v41, %v529_v1 }
 0x2b8   : > { %v3106_v36 = vsub.s32 32, %v3105_v14  ;;  %v3107_v6 = vshll.u32 %v8597_v7, %v3105_v14  ;;  %v3110_v57 = vsub.s32 4294967266, %v3105_v14  ;;  %v3200_v35 = vshll.u32 %v8638_v11, 30 }
 0x2b9   : > { %v5871_v25 = vpop.eup %5870  ;;  %5442 = vmatmul.mubr.msk.bf16.gmra.mxu0 %vm5237_vm3, %v5238_v60  ;;  %5526 = vmatmul.mubr.msk.bf16.gmra.mxu1 %vm5237_vm3, %v5238_v60  ;;  %v3121_v7 = vsel %vm3036_vm4, %v3120_v52, %v8577_v10  ;;  %v5163_v22 = vadd.s32 4294967169, %v3244_v34  ;;  %v3247_v51 = vand.u32 8388607, %v3240_v44  ;;  %v8662_v41 = vadd.s32 23, %v6131_v47 }
 0x2ba   : > { %v3108_v13 = vshrl.u32 %v3090_v46, %v3106_v36  ;;  %v3111_v54 = vadd.s32 127, %v3110_v57  ;;  %v5873_v39 = vpop.eup %5872  ;;  %5445 = vmatprep.mubr.msk.bf16.mxu0 %vm5972_vm0, %v9873_v48  ;;  %5529 = vmatprep.mubr.msk.bf16.mxu1 %vm5972_vm0, %v9873_v48  ;;  %v8657_v5 = vsub.s32 %v3197_v0, %v3200_v35  ;;  %v594_v63 = vmul.f32 24.0, %v8444_v20 }
 0x2bb   : > { %v8666_v56 = vmul.f32 %v5871_v25, %v6184_v37  ;;  %vm8670_vm5 = vcmp.le.f32.partialorder %v3034_v28, 0.7853982  ;;  %v3250_v59 = vadd.s32 1, %v5163_v22  ;;  %v3346_v38 = vand.u32 2139095040, %v8648_v8 }
 0x2bc   : > { %v3109_v12 = vor.u32 %v3108_v13, %v3107_v6  ;;  %v3112_v21 = vshll.u32 %v3111_v54, 23  ;;  %v3203_v43 = vsub.s32 0, %v8657_v5  ;;  %v3123_v19 = vsel %vm8670_vm5, 0, %v3121_v7 }
 0x2bd   : > { %v8679_v42 = vmul.f32 %v5873_v39, %v6184_v37  ;;  %v3248_v4 = vor.u32 8388608, %v3247_v51  ;;  %v3343_v28 = vand.u32 2147483647, %v8648_v8  ;;  %v8684_v26 = vmul.f32 25.0, %v8444_v20 }
 0x2be   : > { %v3113_v30 = vor.u32 4788187, %v3112_v21  ;;  %v3116_v18 = vcvt.s32.f32 %v3109_v12  ;;  %v5160_v9 = vmin.u32 %v3203_v43, %v8657_v5  ;;  %vm3251_vm6 = vcmp.gt.s32.totalorder %v3250_v59, 0 }
 0x2bf   : > { %v3347_v49 = vshrl.u32 %v3346_v38, 23  ;;  %v8686_v24 = vand.u32 3, %v3123_v19  ;;  %v8688_v46 = vmul.f32 1.442695, %v594_v63  ;;  %v3252_v27 = vsel %vm3251_vm6, %v3250_v59, 0 }
 0x2c0   : > { %v3114_v0 = vand.u32 2147483647, %v3113_v30  ;;  %v3205_v16 = vclz %v5160_v9  ;;  %v3193_v1 = vadd.s32 %v8593_v23, %v8602_v50  ;;  %v3223_v32 = vsub.s32 4, %v8638_v11 }
 0x2c1   : > { %v3254_v14 = vand.u32 31, %v3252_v27  ;;  %v8693_v60 = vshrl.u32 %v3252_v27, 5  ;;  %v8695_v36 = vshll.u32 %v3248_v4, 8  ;;  %v8699_v6 = vand.u32 8388607, %v3343_v28 }
 0x2c2   : > { %v3117_v15 = vmul.f32 %v3116_v18, %v3114_v0  ;;  %v5161_v52 = vadd.s32 4294967294, %v3205_v16  ;;  %v5167_v25 = vadd.s32 4294967169, %v3347_v49  ;;  %vm3139_vm8 = vcmp.lt.s32.totalorder %v8410_v45, 0 }
 0x2c3   : > { %v3255_v35 = vsub.s32 32, %v3254_v14  ;;  %v3257_v34 = vshll.u32 %v5973_v53, %v3254_v14  ;;  %v3260_v23 = vshll.u32 %v5974_v55, %v3254_v14  ;;  %v3263_v50 = vshll.u32 %v5975_v58, %v3254_v14 }
 0x2c4   : > { %v3118_v57 = vxor.u32 2147483648, %v3117_v15  ;;  %vm5162_vm7 = vcmp.lt.s32.totalorder %v5161_v52, 0  ;;  %v3266_v13 = vshll.u32 %v5976_v61, %v3254_v14  ;;  %v3269_v22 = vshll.u32 %v5977_v3, %v3254_v14 }
 0x2c5   : > { %v3208_v39 = vsel %vm5162_vm7, 0, %v5161_v52  ;;  %v3258_v7 = vshrl.u32 %v5974_v55, %v3255_v35  ;;  %v3256_v43 = vshrl.u32 %v5973_v53, %v3255_v35  ;;  %v3261_v59 = vshrl.u32 %v5975_v58, %v3255_v35 }
 0x2c6   : > { %v3119_v54 = vsel %vm3036_vm4, %v3118_v57, %v3117_v15  ;;  %v3209_v12 = vsub.s32 32, %v3208_v39  ;;  %v3210_v21 = vshll.u32 %v8657_v5, %v3208_v39  ;;  %v3213_v63 = vsub.s32 4294967266, %v3208_v39 }
 0x2c7   : > { %v3122_v51 = vsel %vm8670_vm5, %v8407_v2, %v3119_v54  ;;  %v3264_v30 = vshrl.u32 %v5976_v61, %v3255_v35  ;;  %v3259_v38 = vor.u32 %v3258_v7, %v3257_v34  ;;  %v3267_v9 = vshrl.u32 %v5977_v3, %v3255_v35 }
 0x2c8   : > { %5874 = vcosq.f32 %v3122_v51  ;;  %v3211_v18 = vshrl.u32 %v3193_v1, %v3209_v12  ;;  %v3214_v19 = vadd.s32 127, %v3213_v63  ;;  %v3262_v10 = vor.u32 %v3261_v59, %v3260_v23  ;;  %v8749_v59 = vld [vmem:[%s9858_s1] sm:$0xff] }
 0x2c9   : > { %v3265_v4 = vor.u32 %v3264_v30, %v3263_v50  ;;  %v3270_v0 = vshrl.u32 %v5978_v17, %v3255_v35  ;;  %vm3272_vm9 = vcmp.lt.s32.totalorder %v8693_v60, 1  ;;  %5876 = vsinq.f32 %v3122_v51 }
 0x2ca   : > { %vm8722_vm10 = vcmp.le.f32.partialorder %v3137_v40, 0.7853982  ;;  %v3212_v49 = vor.u32 %v3211_v18, %v3210_v21  ;;  %v3215_v16 = vshll.u32 %v3214_v19, 23  ;;  %v3268_v27 = vor.u32 %v3267_v9, %v3266_v13 }
 0x2cb   : > { %v3271_v15 = vor.u32 %v3270_v0, %v3269_v22  ;;  %vm3273_vm11 = vcmp.lt.s32.totalorder %v8693_v60, 2  ;;  %vm3274_vm12 = vcmp.lt.s32.totalorder %v8693_v60, 3  ;;  %vm3275_vm13 = vcmp.lt.s32.totalorder %v8693_v60, 4 }
 0x2cc   : > { %v3216_v1 = vor.u32 4788187, %v3215_v16  ;;  %v3219_v14 = vcvt.s32.f32 %v3212_v49  ;;  %v3277_v52 = vsel %vm3275_vm13, %v3265_v4, 2102212464  ;;  %v3280_v57 = vsel %vm3272_vm9, %v3259_v38, %v3262_v10 }
 0x2cd   : > { %v3276_v40 = vsel %vm3272_vm9, %v3256_v43, %v3259_v38  ;;  %v3281_v35 = vsel %vm3275_vm13, %v3268_v27, 920167782  ;;  %v3284_v34 = vsel %vm3272_vm9, %v3262_v10, %v3265_v4  ;;  %v3285_v23 = vsel %vm3275_vm13, %v3271_v15, 1326507024 }
 0x2ce   : > { %v3217_v50 = vand.u32 2147483647, %v3216_v1  ;;  %v3278_v13 = vsel %vm3274_vm12, %v3262_v10, %v3277_v52  ;;  %v3282_v54 = vsel %vm3274_vm12, %v3265_v4, %v3281_v35  ;;  %v3286_v39 = vsel %vm3274_vm12, %v3268_v27, %v3285_v23 }
 0x2cf   : > { %v3224_v7 = vsel %vm3139_vm8, %v3223_v32, %v8638_v11  ;;  %v3283_v22 = vsel %vm3273_vm11, %v3280_v57, %v3282_v54  ;;  %v3287_v51 = vsel %vm3273_vm11, %v3284_v34, %v3286_v39  ;;  %v3353_v12 = vadd.s32 1, %v5167_v25 }
 0x2d0   : > { %v3220_v21 = vmul.f32 %v3219_v14, %v3217_v50  ;;  %v8743_v63 = vmul.u32.u64.low %v8695_v36, %v3287_v51  ;;  %v8744_v43 = vmul.u32.u64.high %v8695_v36, %v3287_v51, %v8743_v63  ;;  %v332_v30 = vmul.f32 26.0, %v8749_v59 }
 0x2d1   : > { %v3279_v11 = vsel %vm3273_vm11, %v3276_v40, %v3278_v13  ;;  %v8755_v32 = vmul.u32.u64.low %v8695_v36, %v3283_v22  ;;  %v8756_v18 = vmul.u32.u64.high %v8695_v36, %v3283_v22, %v8755_v32  ;;  %vm3354_vm14 = vcmp.gt.s32.totalorder %v3353_v12, 0 }
 0x2d2   : > { %v3221_v25 = vxor.u32 2147483648, %v3220_v21  ;;  %v3351_v19 = vor.u32 8388608, %v8699_v6  ;;  %v3355_v38 = vsel %vm3354_vm14, %v3353_v12, 0  ;;  %v333_v9 = vmul.f32 27.0, %v8749_v59 }
 0x2d3   : > { %v3226_v10 = vsel %vm8722_vm10, 0, %v3224_v7  ;;  %5878 = vpow2.f32 %v8688_v46  ;;  %v8765_v60 = vmul.f32 1.442695, %v8684_v26  ;;  %v3357_v4 = vand.u32 31, %v3355_v38 }
 0x2d4   : > { %vm3129_vm15 = vcmp.eq.s32.totalorder %v8686_v24, 0  ;;  %vm3132_vm1 = vcmp.eq.s32.totalorder %v8686_v24, 2  ;;  %v3222_v6 = vsel %vm3139_vm8, %v3221_v25, %v3220_v21  ;;  %v3295_v49 = vmul.u32 %v8695_v36, %v3279_v11 }
 0x2d5   : > { %v5875_v0 = vpop.eup %5874  ;;  %vm3297_vm2 = vc.u32 %v8744_v43, %v8755_v32  ;;  %v3225_v46 = vsel %vm8722_vm10, %v8410_v45, %v3222_v6  ;;  %v3298_v26 = vadd.s32 1, %v8756_v18  ;;  %v3358_v16 = vsub.s32 32, %v3357_v4 }
 0x2d6   : > { %v365_v27 = vadd.f32 %v332_v30, %v6113_v29  ;;  %5880 = vcosq.f32 %v3225_v46  ;;  %v8779_v15 = vand.u32 3, %v3226_v10  ;;  %v8781_v1 = vshll.u32 %v3351_v19, 8  ;;  %v5877_v36 = vpop.eup %5876 }
 0x2d7   : > { %v366_v14 = vadd.f32 %v333_v9, %v6113_v29  ;;  %vm3128_vm3 = vcmp.lt.s32.totalorder %v8686_v24, 2  ;;  %5882 = vsinq.f32 %v3225_v46  ;;  %v3299_v52 = vsel %vm3297_vm2, %v3298_v26, %v8756_v18 }
 0x2d8   : > { %v3360_v5 = vshll.u32 %v5973_v53, %v3357_v4  ;;  %v3363_v57 = vshll.u32 %v5974_v55, %v3357_v4  ;;  %v3300_v40 = vadd.s32 %v3299_v52, %v3295_v49  ;;  %v3356_v35 = vshrl.u32 %v3355_v38, 5 }
 0x2d9   : > { %v3361_v34 = vshrl.u32 %v5974_v55, %v3358_v16  ;;  %v3364_v23 = vshrl.u32 %v5975_v58, %v3358_v16  ;;  %v3366_v50 = vshll.u32 %v5975_v58, %v3357_v4  ;;  %v3367_v13 = vshrl.u32 %v5976_v61, %v3358_v16 }
 0x2da   : > { %v3369_v54 = vshll.u32 %v5976_v61, %v3357_v4  ;;  %v8794_v39 = vsub.f32 %v365_v27, %v6118_v31  ;;  %vm3126_vm4 = vweird.f32 %v8407_v2  ;;  %v3130_v7 = vxor.u32 2147483648, %v5877_v36 }
 0x2db   : > { %v3133_v22 = vxor.u32 2147483648, %v5875_v0  ;;  %v3301_v51 = vadd.s32 536870912, %v3300_v40  ;;  %v8798_v12 = vsub.f32 %v366_v14, %v6118_v31  ;;  %v3362_v21 = vor.u32 %v3361_v34, %v3360_v5 }
 0x2dc   : > { %v3365_v63 = vor.u32 %v3364_v23, %v3363_v57  ;;  %v3370_v30 = vshrl.u32 %v5977_v3, %v3358_v16  ;;  %v3372_v11 = vshll.u32 %v5977_v3, %v3357_v4  ;;  %v3368_v25 = vor.u32 %v3367_v13, %v3366_v50 }
 0x2dd   : > { %v8802_v18 = vshrl.u32 %v3301_v51, 30  ;;  %v3373_v19 = vshrl.u32 %v5978_v17, %v3358_v16  ;;  %vm3375_vm5 = vcmp.lt.s32.totalorder %v3356_v35, 1  ;;  %vm3231_vm6 = vcmp.lt.s32.totalorder %v8779_v15, 2 }
 0x2de   : > { %v3359_v38 = vshrl.u32 %v5973_v53, %v3358_v16  ;;  %v3371_v9 = vor.u32 %v3370_v30, %v3369_v54  ;;  %vm3377_vm7 = vcmp.lt.s32.totalorder %v3356_v35, 3  ;;  %vm3378_vm8 = vcmp.lt.s32.totalorder %v3356_v35, 4 }
 0x2df   : > { %vm3229_vm9 = vweird.f32 %v8410_v45  ;;  %v3303_v10 = vshll.u32 %v8802_v18, 30  ;;  %v3374_v6 = vor.u32 %v3373_v19, %v3372_v11  ;;  %vm3376_vm10 = vcmp.lt.s32.totalorder %v3356_v35, 2 }
 0x2e0   : > { %v3380_v4 = vsel %vm3378_vm8, %v3368_v25, 2102212464  ;;  %v3131_v49 = vsel %vm3129_vm15, %v5875_v0, %v3130_v7  ;;  %v3134_v46 = vsel %vm3132_vm1, %v3133_v22, %v5877_v36  ;;  %v3383_v26 = vsel %vm3375_vm5, %v3362_v21, %v3365_v63  ;;  %v8816_v27 = vpop.eup %5878 }
 0x2e1   : > { %v3384_v16 = vsel %vm3378_vm8, %v3371_v9, 920167782  ;;  %vm757_vm11 = vcmp.ge.s32.totalorder %v8643_v62, 1  ;;  %vm758_vm12 = vcmp.ge.s32.totalorder %v8662_v41, 1  ;;  %vm3235_vm13 = vcmp.eq.s32.totalorder %v8779_v15, 2 }
 0x2e2   : > { %v8821_v14 = vsub.s32 %v3300_v40, %v3303_v10  ;;  %v3385_v52 = vsel %vm3377_vm7, %v3368_v25, %v3384_v16  ;;  %v3387_v0 = vsel %vm3375_vm5, %v3365_v63, %v3368_v25  ;;  %v3379_v36 = vsel %vm3375_vm5, %v3359_v38, %v3362_v21  ;;  %vm5240_vm2 = vmpackc.low %vm758_vm12, %vm757_vm11 }
 0x2e3   : > { %v3381_v5 = vsel %vm3377_vm7, %v3365_v63, %v3380_v4  ;;  %v3386_v57 = vsel %vm3376_vm10, %v3383_v26, %v3385_v52  ;;  %v3388_v34 = vsel %vm3378_vm8, %v3374_v6, 1326507024  ;;  %v3135_v23 = vsel %vm3128_vm3, %v3131_v49, %v3134_v46  ;;  %v5881_v54 = vpop.eup %5880 }
 0x2e4   : > { %v3306_v50 = vsub.s32 0, %v8821_v14  ;;  %v3389_v40 = vsel %vm3377_vm7, %v3371_v9, %v3388_v34  ;;  %v431_v13 = vmul.f32 0.15915494, %v8794_v39  ;;  %v432_v21 = vmul.f32 0.15915494, %v8798_v12  ;;  %v5883_v63 = vpop.eup %5882 }
 0x2e5   : > { %v3390_v7 = vsel %vm3376_vm10, %v3387_v0, %v3389_v40  ;;  %v8836_v22 = vmul.u32.u64.low %v8781_v1, %v3386_v57  ;;  %v8837_v51 = vmul.u32.u64.high %v8781_v1, %v3386_v57, %v8836_v22  ;;  %vm3232_vm14 = vcmp.eq.s32.totalorder %v8779_v15, 0 }
 0x2e6   : > { %v3236_v24 = vxor.u32 2147483648, %v5881_v54  ;;  %v5164_v30 = vmin.u32 %v3306_v50, %v8821_v14  ;;  %v3382_v11 = vsel %vm3376_vm10, %v3379_v36, %v3381_v5  ;;  %v3136_v25 = vsel %vm3126_vm4, nan, %v3135_v23 }
 0x2e7   : > { %v3233_v19 = vxor.u32 2147483648, %v5883_v63  ;;  %v8847_v38 = vmul.u32.u64.low %v8781_v1, %v3390_v7  ;;  %v8848_v9 = vmul.u32.u64.high %v8781_v1, %v3390_v7, %v8847_v38  ;;  %v464_v4 = vadd.f32 0.5, %v431_v13 }
 0x2e8   : > { %v3237_v10 = vsel %vm3235_vm13, %v3236_v24, %v5883_v63  ;;  %v3308_v6 = vclz %v5164_v30  ;;  %v465_v49 = vadd.f32 0.5, %v432_v21  ;;  %5884 = vpow2.f32 %v8765_v60 }
 0x2e9   : > { %v3234_v46 = vsel %vm3232_vm14, %v5881_v54, %v3233_v19  ;;  %v3398_v35 = vmul.u32 %v8781_v1, %v3382_v11  ;;  %v3401_v26 = vadd.s32 1, %v8837_v51  ;;  %v4189_v16 = vmul.f32 %v3136_v25, %v8666_v56 }
 0x2ea   : > { %v3238_v2 = vsel %vm3231_vm6, %v3234_v46, %v3237_v10  ;;  %v5165_v52 = vadd.s32 4294967294, %v3308_v6  ;;  %v497_v0 = vfloor.f32 %v464_v4  ;;  %v3296_v5 = vadd.s32 %v8755_v32, %v8744_v43 }
 0x2eb   : > { %v3239_v36 = vsel %vm3229_vm9, nan, %v3238_v2  ;;  %vm3400_vm15 = vc.u32 %v8848_v9, %v8836_v22  ;;  %v498_v60 = vfloor.f32 %v465_v49  ;;  %v3326_v50 = vsub.s32 4, %v8802_v18 }
 0x2ec   : > { %v4190_v1 = vmul.f32 %v3239_v36, %v8679_v42  ;;  %vm5166_vm1 = vcmp.lt.s32.totalorder %v5165_v52, 0  ;;  %v3402_v15 = vsel %vm3400_vm15, %v3401_v26, %v8837_v51  ;;  %v530_v57 = vmul.f32 6.2831855, %v497_v0 }
 0x2ed   : > { %v3311_v45 = vsel %vm5166_vm1, 0, %v5165_v52  ;;  %v3403_v56 = vadd.s32 %v3402_v15, %v3398_v35  ;;  %v531_v54 = vmul.f32 6.2831855, %v498_v60  ;;  %vm3242_vm3 = vcmp.lt.s32.totalorder %v8626_v33, 0 }
 0x2ee   : > { %v5241_v34 = vpack.c.bf16 %v4190_v1, %v4189_v16  ;;  %v3312_v23 = vsub.s32 32, %v3311_v45  ;;  %v3313_v43 = vshll.u32 %v8821_v14, %v3311_v45  ;;  %v3316_v32 = vsub.s32 4294967266, %v3311_v45 }
 0x2ef   : > { %v3404_v40 = vadd.s32 536870912, %v3403_v56  ;;  %v8873_v42 = vsub.f32 %v8794_v39, %v530_v57  ;;  %v3327_v21 = vsel %vm3242_vm3, %v3326_v50, %v8802_v18  ;;  %v8888_v25 = vsub.f32 %v8798_v12, %v531_v54 }
 0x2f0   : > { %5446 = vmatmul.mubr.msk.bf16.gmra.mxu0 %vm5240_vm2, %v5241_v34  ;;  %5530 = vmatmul.mubr.msk.bf16.gmra.mxu1 %vm5240_vm2, %v5241_v34  ;;  %v3314_v13 = vshrl.u32 %v3296_v5, %v3312_v23  ;;  %v3317_v62 = vadd.s32 127, %v3316_v32  ;;  %v8891_v38 = vadd.s32 24, %v6131_v47  ;;  %v8894_v10 = vadd.s32 25, %v6131_v47 }
 0x2f1   : > { %5449 = vmatprep.mubr.msk.bf16.mxu0 %vm5972_vm0, %v9873_v48  ;;  %5533 = vmatprep.mubr.msk.bf16.mxu1 %vm5972_vm0, %v9873_v48  ;;  %v3405_v41 = vshrl.u32 %v3404_v40, 30  ;;  %v3446_v14 = vand.u32 2147483647, %v8873_v42  ;;  %v3449_v39 = vand.u32 2139095040, %v8873_v42  ;;  %vm8898_vm4 = vcmp.le.f32.partialorder %v3240_v44, 0.7853982 }
 0x2f2   : > { %v3315_v7 = vor.u32 %v3314_v13, %v3313_v43  ;;  %v3318_v51 = vshll.u32 %v3317_v62, 23  ;;  %v8906_v12 = vmul.f32 %v8816_v27, %v6184_v37  ;;  %vm3345_vm5 = vcmp.lt.s32.totalorder %v8648_v8, 0 }
 0x2f3   : > { %v3406_v63 = vshll.u32 %v3405_v41, 30  ;;  %v3453_v24 = vand.u32 8388607, %v3446_v14  ;;  %v3450_v19 = vshrl.u32 %v3449_v39, 23  ;;  %v3329_v35 = vsel %vm8898_vm4, 0, %v3327_v21 }
 0x2f4   : > { %v3319_v30 = vor.u32 4788187, %v3318_v51  ;;  %v3322_v11 = vcvt.s32.f32 %v3315_v7  ;;  %v3429_v44 = vsub.s32 4, %v3405_v41  ;;  %v3549_v0 = vand.u32 2147483647, %v8888_v25 }
 0x2f5   : > { %v8902_v6 = vsub.s32 %v3403_v56, %v3406_v63  ;;  %v5885_v4 = vpop.eup %5884  ;;  %v5171_v46 = vadd.s32 4294967169, %v3450_v19  ;;  %v3454_v2 = vor.u32 8388608, %v3453_v24  ;;  %v3552_v36 = vand.u32 2139095040, %v8888_v25 }
 0x2f6   : > { %v3320_v49 = vand.u32 2147483647, %v3319_v30  ;;  %v8915_v27 = vmul.f32 %v5885_v4, %v6184_v37  ;;  %v596_v60 = vmul.f32 26.0, %v8444_v20  ;;  %v8920_v1 = vmul.f32 27.0, %v8444_v20 }
 0x2f7   : > { %v3409_v26 = vsub.s32 0, %v8902_v6  ;;  %v3456_v52 = vadd.s32 1, %v5171_v46  ;;  %v8922_v57 = vand.u32 3, %v3329_v35  ;;  %v3553_v45 = vshrl.u32 %v3552_v36, 23 }
 0x2f8   : > { %v3323_v16 = vmul.f32 %v3322_v11, %v3320_v49  ;;  %v3399_v56 = vadd.s32 %v8836_v22, %v8848_v9  ;;  %v8928_v23 = vsel %vm3345_vm5, %v3429_v44, %v3405_v41  ;;  %v8932_v20 = vshll.u32 %v3454_v2, 8 }
 0x2f9   : > { %v5168_v5 = vmin.u32 %v3409_v26, %v8902_v6  ;;  %vm3457_vm6 = vcmp.gt.s32.totalorder %v3456_v52, 0  ;;  %v8936_v40 = vand.u32 8388607, %v3549_v0  ;;  %v5175_v62 = vadd.s32 4294967169, %v3553_v45 }
 0x2fa   : > { %v3324_v15 = vxor.u32 2147483648, %v3323_v16  ;;  %v3458_v43 = vsel %vm3457_vm6, %v3456_v52, 0  ;;  %vm8950_vm8 = vcmp.le.f32.partialorder %v3343_v28, 0.7853982  ;;  %vm3335_vm13 = vcmp.eq.s32.totalorder %v8922_v57, 0 }
 0x2fb   : > { %v3411_v34 = vclz %v5168_v5  ;;  %v3460_v50 = vand.u32 31, %v3458_v43  ;;  %v3459_v13 = vshrl.u32 %v3458_v43, 5  ;;  %vm3338_vm14 = vcmp.eq.s32.totalorder %v8922_v57, 2 }
 0x2fc   : > { %v3325_v32 = vsel %vm3242_vm3, %v3324_v15, %v3323_v16  ;;  %vm3334_vm1 = vcmp.lt.s32.totalorder %v8922_v57, 2  ;;  %vm3332_vm3 = vweird.f32 %v8626_v33 }
 0x2fd   : > { %v3328_v22 = vsel %vm8898_vm4, %v8626_v33, %v3325_v32  ;;  %v5169_v9 = vadd.s32 4294967294, %v3411_v34  ;;  %v3461_v54 = vsub.s32 32, %v3460_v50  ;;  %v3463_v41 = vshll.u32 %v5973_v53, %v3460_v50 }
 0x2fe   : > { %5886 = vcosq.f32 %v3328_v22  ;;  %v3466_v7 = vshll.u32 %v5974_v55, %v3460_v50  ;;  %v3469_v51 = vshll.u32 %v5975_v58, %v3460_v50  ;;  %v3472_v39 = vshll.u32 %v5976_v61, %v3460_v50 }
 0x2ff   : > { %5888 = vsinq.f32 %v3328_v22  ;;  %vm5170_vm7 = vcmp.lt.s32.totalorder %v5169_v9, 0  ;;  %v3462_v63 = vshrl.u32 %v5973_v53, %v3461_v54  ;;  %v3464_v24 = vshrl.u32 %v5974_v55, %v3461_v54 }
 0x300   : > { %v3414_v21 = vsel %vm5170_vm7, 0, %v5169_v9  ;;  %v3467_v30 = vshrl.u32 %v5975_v58, %v3461_v54  ;;  %v3470_v49 = vshrl.u32 %v5976_v61, %v3461_v54  ;;  %v3473_v26 = vshrl.u32 %v5977_v3, %v3461_v54 }
 0x301   : > { %v3415_v19 = vsub.s32 32, %v3414_v21  ;;  %v3416_v18 = vshll.u32 %v8902_v6, %v3414_v21  ;;  %v3419_v4 = vsub.s32 4294967266, %v3414_v21  ;;  %v3465_v46 = vor.u32 %v3464_v24, %v3463_v41 }
 0x302   : > { %v3468_v35 = vor.u32 %v3467_v30, %v3466_v7  ;;  %v3475_v44 = vshll.u32 %v5977_v3, %v3460_v50  ;;  %v3471_v52 = vor.u32 %v3470_v49, %v3469_v51  ;;  %v3476_v28 = vshrl.u32 %v5978_v17, %v3461_v54 }
 0x303   : > { %v3417_v2 = vshrl.u32 %v3399_v56, %v3415_v19  ;;  %v3420_v16 = vadd.s32 127, %v3419_v4  ;;  %v3474_v36 = vor.u32 %v3473_v26, %v3472_v39  ;;  %vm3478_vm9 = vcmp.lt.s32.totalorder %v3459_v13, 1 }
 0x304   : > { %vm3479_vm10 = vcmp.lt.s32.totalorder %v3459_v13, 2  ;;  %vm3480_vm11 = vcmp.lt.s32.totalorder %v3459_v13, 3  ;;  %v3477_v15 = vor.u32 %v3476_v28, %v3475_v44  ;;  %vm3481_vm12 = vcmp.lt.s32.totalorder %v3459_v13, 4 }
 0x305   : > { %v3418_v5 = vor.u32 %v3417_v2, %v3416_v18  ;;  %v3421_v6 = vshll.u32 %v3420_v16, 23  ;;  %v3482_v45 = vsel %vm3478_vm9, %v3462_v63, %v3465_v46  ;;  %v3483_v34 = vsel %vm3481_vm12, %v3471_v52, 2102212464 }
 0x306   : > { %v3486_v43 = vsel %vm3478_vm9, %v3465_v46, %v3468_v35  ;;  %v3487_v32 = vsel %vm3481_vm12, %v3474_v36, 920167782  ;;  %v3484_v22 = vsel %vm3480_vm11, %v3468_v35, %v3483_v34  ;;  %v655_v54 = vmul.f32 1.442695, %v596_v60 }
 0x307   : > { %v3422_v50 = vor.u32 4788187, %v3421_v6  ;;  %v3425_v56 = vcvt.s32.f32 %v3418_v5  ;;  %v3488_v9 = vsel %vm3480_vm11, %v3471_v52, %v3487_v32  ;;  %v3490_v7 = vsel %vm3478_vm9, %v3468_v35, %v3471_v52 }
 0x308   : > { %v3489_v41 = vsel %vm3479_vm10, %v3486_v43, %v3488_v9  ;;  %v3491_v51 = vsel %vm3481_vm12, %v3477_v15, 1326507024  ;;  %v3432_v30 = vsel %vm8950_vm8, 0, %v8928_v23  ;;  %v3485_v19 = vsel %vm3479_vm10, %v3482_v45, %v3484_v22 }
 0x309   : > { %v3423_v39 = vand.u32 2147483647, %v3422_v50  ;;  %v3492_v21 = vsel %vm3480_vm11, %v3474_v36, %v3491_v51  ;;  %v8967_v63 = vmul.u32.u64.low %v8932_v20, %v3489_v41  ;;  %v8968_v24 = vmul.u32.u64.high %v8932_v20, %v3489_v41, %v8967_v63 }
 0x30a   : > { %v3493_v60 = vsel %vm3479_vm10, %v3490_v7, %v3492_v21  ;;  %v3559_v18 = vadd.s32 1, %v5175_v62  ;;  %v3557_v26 = vor.u32 8388608, %v8936_v40  ;;  %v8984_v23 = vmul.f32 1.442695, %v8920_v1 }
 0x30b   : > { %v5887_v4 = vpop.eup %5886  ;;  %v3426_v49 = vmul.f32 %v3425_v56, %v3423_v39  ;;  %v8977_v46 = vmul.u32.u64.low %v8932_v20, %v3493_v60  ;;  %v8978_v35 = vmul.u32.u64.high %v8932_v20, %v3493_v60, %v8977_v46  ;;  %v334_v13 = vmul.f32 28.0, %v8749_v59 }
 0x30c   : > { %v5889_v44 = vpop.eup %5888  ;;  %vm3560_vm15 = vcmp.gt.s32.totalorder %v3559_v18, 0  ;;  %v3501_v2 = vmul.u32 %v8932_v20, %v3485_v19  ;;  %v3504_v16 = vadd.s32 1, %v8968_v24  ;;  %v3339_v28 = vxor.u32 2147483648, %v5887_v4 }
 0x30d   : > { %v3427_v62 = vxor.u32 2147483648, %v3426_v49  ;;  %v3561_v52 = vsel %vm3560_vm15, %v3559_v18, 0  ;;  %v8989_v36 = vand.u32 3, %v3432_v30  ;;  %5890 = vpow2.f32 %v655_v54 }
 0x30e   : > { %v3563_v40 = vand.u32 31, %v3561_v52  ;;  %vm3503_vm2 = vc.u32 %v8978_v35, %v8967_v63  ;;  %v8996_v5 = vshll.u32 %v3557_v26, 8  ;;  %v335_v20 = vmul.f32 29.0, %v8749_v59 }
 0x30f   : > { %v3428_v1 = vsel %vm3345_vm5, %v3427_v62, %v3426_v49  ;;  %v3505_v15 = vsel %vm3503_vm2, %v3504_v16, %v8968_v24  ;;  %v367_v34 = vadd.f32 %v334_v13, %v6113_v29  ;;  %v3336_v43 = vxor.u32 2147483648, %v5889_v44 }
 0x310   : > { %v3431_v6 = vsel %vm8950_vm8, %v8648_v8, %v3428_v1  ;;  %v3564_v45 = vsub.s32 32, %v3563_v40  ;;  %v3506_v32 = vadd.s32 %v3505_v15, %v3501_v2  ;;  %v3566_v50 = vshll.u32 %v5973_v53, %v3563_v40 }
 0x311   : > { %5892 = vcosq.f32 %v3431_v6  ;;  %v3340_v56 = vsel %vm3338_vm14, %v3339_v28, %v5889_v44  ;;  %v3562_v22 = vshrl.u32 %v3561_v52, 5  ;;  %v3569_v54 = vshll.u32 %v5974_v55, %v3563_v40 }
 0x312   : > { %5894 = vsinq.f32 %v3431_v6  ;;  %v3567_v11 = vshrl.u32 %v5974_v55, %v3564_v45  ;;  %v3507_v9 = vadd.s32 536870912, %v3506_v32  ;;  %v3570_v41 = vshrl.u32 %v5975_v58, %v3564_v45 }
 0x313   : > { %v3572_v7 = vshll.u32 %v5975_v58, %v3563_v40  ;;  %v3573_v39 = vshrl.u32 %v5976_v61, %v3564_v45  ;;  %v3575_v21 = vshll.u32 %v5976_v61, %v3563_v40  ;;  %v3576_v24 = vshrl.u32 %v5977_v3, %v3564_v45 }
 0x314   : > { %v3568_v51 = vor.u32 %v3567_v11, %v3566_v50  ;;  %v9015_v30 = vshrl.u32 %v3507_v9, 30  ;;  %v3571_v19 = vor.u32 %v3570_v41, %v3569_v54  ;;  %v3578_v60 = vshll.u32 %v5977_v3, %v3563_v40 }
 0x315   : > { %v3579_v18 = vshrl.u32 %v5978_v17, %v3564_v45  ;;  %v3565_v49 = vshrl.u32 %v5973_v53, %v3564_v45  ;;  %v3574_v46 = vor.u32 %v3573_v39, %v3572_v7  ;;  %v3577_v26 = vor.u32 %v3576_v24, %v3575_v21 }
 0x316   : > { %vm3581_vm4 = vcmp.lt.s32.totalorder %v3562_v22, 1  ;;  %v3337_v44 = vsel %vm3335_vm13, %v5887_v4, %v3336_v43  ;;  %v3509_v13 = vshll.u32 %v9015_v30, 30  ;;  %vm3583_vm5 = vcmp.lt.s32.totalorder %v3562_v22, 3 }
 0x317   : > { %v3580_v62 = vor.u32 %v3579_v18, %v3578_v60  ;;  %vm3582_vm6 = vcmp.lt.s32.totalorder %v3562_v22, 2  ;;  %vm3584_vm7 = vcmp.lt.s32.totalorder %v3562_v22, 4  ;;  %v3589_v2 = vsel %vm3581_vm4, %v3568_v51, %v3571_v19 }
 0x318   : > { %v368_v16 = vadd.f32 %v335_v20, %v6113_v29  ;;  %vm3435_vm8 = vweird.f32 %v8648_v8  ;;  %v9026_v52 = vsub.s32 %v3506_v32, %v3509_v13  ;;  %v3586_v28 = vsel %vm3584_vm7, %v3574_v46, 2102212464 }
 0x319   : > { %v3590_v40 = vsel %vm3584_vm7, %v3577_v26, 920167782  ;;  %v400_v1 = vsub.f32 %v367_v34, %v6118_v31  ;;  %v3341_v4 = vsel %vm3334_vm1, %v3337_v44, %v3340_v56  ;;  %v3585_v6 = vsel %vm3581_vm4, %v3565_v49, %v3568_v51 }
 0x31a   : > { %v3591_v15 = vsel %vm3583_vm5, %v3574_v46, %v3590_v40  ;;  %v3594_v45 = vsel %vm3584_vm7, %v3580_v62, 1326507024  ;;  %v9033_v43 = vpop.eup %5890  ;;  %vm759_vm9 = vcmp.ge.s32.totalorder %v8891_v38, 1  ;;  %vm760_vm10 = vcmp.ge.s32.totalorder %v8894_v10, 1 }
 0x31b   : > { %v3512_v20 = vsub.s32 0, %v9026_v52  ;;  %v3587_v32 = vsel %vm3583_vm5, %v3571_v19, %v3586_v28  ;;  %v3592_v34 = vsel %vm3582_vm6, %v3589_v2, %v3591_v15  ;;  %v3593_v57 = vsel %vm3581_vm4, %v3571_v19, %v3574_v46  ;;  %vm5243_vm1 = vmpackc.low %vm760_vm10, %vm759_vm9 }
 0x31c   : > { %vm3437_vm11 = vcmp.lt.s32.totalorder %v8989_v36, 2  ;;  %v3595_v50 = vsel %vm3583_vm5, %v3577_v26, %v3594_v45  ;;  %v9044_v56 = vmul.u32.u64.low %v8996_v5, %v3592_v34  ;;  %v9045_v11 = vmul.u32.u64.high %v8996_v5, %v3592_v34, %v9044_v56 }
 0x31d   : > { %v3342_v9 = vsel %vm3332_vm3, nan, %v3341_v4  ;;  %vm3438_vm12 = vcmp.eq.s32.totalorder %v8989_v36, 0  ;;  %vm3441_vm13 = vcmp.eq.s32.totalorder %v8989_v36, 2  ;;  %v5172_v54 = vmin.u32 %v3512_v20, %v9026_v52 }
 0x31e   : > { %v5893_v41 = vpop.eup %5892  ;;  %v3588_v7 = vsel %vm3582_vm6, %v3585_v6, %v3587_v32  ;;  %v3596_v51 = vsel %vm3582_vm6, %v3593_v57, %v3595_v50  ;;  %v401_v39 = vsub.f32 %v368_v16, %v6118_v31  ;;  %v433_v21 = vmul.f32 0.15915494, %v400_v1 }
 0x31f   : > { %v5895_v24 = vpop.eup %5894  ;;  %v3442_v19 = vxor.u32 2147483648, %v5893_v41  ;;  %v3514_v60 = vclz %v5172_v54  ;;  %v9057_v33 = vmul.u32.u64.low %v8996_v5, %v3596_v51  ;;  %v9058_v18 = vmul.u32.u64.high %v8996_v5, %v3596_v51, %v9057_v33 }
 0x320   : > { %v3439_v49 = vxor.u32 2147483648, %v5895_v24  ;;  %v3607_v46 = vadd.s32 1, %v9045_v11  ;;  %v434_v26 = vmul.f32 0.15915494, %v401_v39  ;;  %v466_v44 = vadd.f32 0.5, %v433_v21 }
 0x321   : > { %v3443_v13 = vsel %vm3441_vm13, %v3442_v19, %v5895_v24  ;;  %5896 = vpow2.f32 %v8984_v23  ;;  %v3502_v22 = vadd.s32 %v8967_v63, %v8978_v35  ;;  %v5173_v62 = vadd.s32 4294967294, %v3514_v60 }
 0x322   : > { %v3440_v2 = vsel %vm3438_vm12, %v5893_v41, %v3439_v49  ;;  %v3604_v16 = vmul.u32 %v8996_v5, %v3588_v7  ;;  %v467_v28 = vadd.f32 0.5, %v434_v26  ;;  %v499_v40 = vfloor.f32 %v466_v44 }
 0x323   : > { %v3444_v4 = vsel %vm3437_vm11, %v3440_v2, %v3443_v13  ;;  %v4191_v6 = vmul.f32 %v3342_v9, %v8906_v12  ;;  %vm5174_vm14 = vcmp.lt.s32.totalorder %v5173_v62, 0  ;;  %vm3606_vm15 = vc.u32 %v9058_v18, %v9044_v56 }
 0x324   : > { %v3445_v63 = vsel %vm3435_vm8, nan, %v3444_v4  ;;  %v3517_v35 = vsel %vm5174_vm14, 0, %v5173_v62  ;;  %v3608_v23 = vsel %vm3606_vm15, %v3607_v46, %v9045_v11  ;;  %v500_v15 = vfloor.f32 %v467_v28 }
 0x325   : > { %v4192_v5 = vmul.f32 %v3445_v63, %v8915_v27  ;;  %v3518_v45 = vsub.s32 32, %v3517_v35  ;;  %v3519_v20 = vshll.u32 %v9026_v52, %v3517_v35  ;;  %v3522_v36 = vsub.s32 4294967266, %v3517_v35 }
 0x326   : > { %v3609_v12 = vadd.s32 %v3608_v23, %v3604_v16  ;;  %v532_v32 = vmul.f32 6.2831855, %v499_v40  ;;  %v533_v34 = vmul.f32 6.2831855, %v500_v15  ;;  %v3532_v51 = vsub.s32 4, %v9015_v30 }
 0x327   : > { %v5244_v8 = vpack.c.bf16 %v4192_v5, %v4191_v6  ;;  %v3520_v57 = vshrl.u32 %v3502_v22, %v3518_v45  ;;  %v3523_v50 = vadd.s32 127, %v3522_v36  ;;  %v9097_v49 = vadd.s32 26, %v6131_v47 }
 0x328   : > { %v3610_v9 = vadd.s32 536870912, %v3609_v12  ;;  %v9083_v11 = vsub.f32 %v400_v1, %v532_v32  ;;  %v9089_v10 = vsub.f32 %v401_v39, %v533_v34  ;;  %v9100_v39 = vadd.s32 27, %v6131_v47 }
 0x329   : > { %5450 = vmatmul.mubr.msk.bf16.gmra.mxu0 %vm5243_vm1, %v5244_v8  ;;  %5534 = vmatmul.mubr.msk.bf16.gmra.mxu1 %vm5243_vm1, %v5244_v8  ;;  %v3521_v27 = vor.u32 %v3520_v57, %v3519_v20  ;;  %v3524_v54 = vshll.u32 %v3523_v50, 23  ;;  %vm9107_vm2 = vcmp.le.f32.partialorder %v3446_v14, 0.7853982  ;;  %vm3448_vm3 = vcmp.lt.s32.totalorder %v8873_v42, 0 }
 0x32a   : > { %5453 = vmatprep.mubr.msk.bf16.mxu0 %vm5972_vm0, %v9873_v48  ;;  %5537 = vmatprep.mubr.msk.bf16.mxu1 %vm5972_vm0, %v9873_v48  ;;  %v3611_v38 = vshrl.u32 %v3610_v9, 30  ;;  %v3652_v52 = vand.u32 2147483647, %v9083_v11  ;;  %v3655_v1 = vand.u32 2139095040, %v9083_v11  ;;  %v3758_v26 = vand.u32 2139095040, %v9089_v10 }
 0x32b   : > { %v3525_v41 = vor.u32 4788187, %v3524_v54  ;;  %v3528_v7 = vcvt.s32.f32 %v3521_v27  ;;  %v9113_v62 = vsel %vm3448_vm3, %v3532_v51, %v9015_v30  ;;  %vm3551_vm4 = vcmp.lt.s32.totalorder %v8888_v25, 0 }
 0x32c   : > { %v3612_v21 = vshll.u32 %v3611_v38, 30  ;;  %v3656_v19 = vshrl.u32 %v3655_v1, 23  ;;  %v3659_v60 = vand.u32 8388607, %v3652_v52  ;;  %v3759_v16 = vshrl.u32 %v3758_v26, 23 }
 0x32d   : > { %v3526_v24 = vand.u32 2147483647, %v3525_v41  ;;  %v3635_v40 = vsub.s32 4, %v3611_v38  ;;  %v9119_v14 = vmul.f32 %v9033_v43, %v6184_v37  ;;  %v3755_v30 = vand.u32 2147483647, %v9089_v10 }
 0x32e   : > { %v5897_v33 = vpop.eup %5896  ;;  %v9102_v46 = vsub.s32 %v3609_v12, %v3612_v21  ;;  %v5179_v22 = vadd.s32 4294967169, %v3656_v19  ;;  %v3660_v4 = vor.u32 8388608, %v3659_v60  ;;  %v3535_v15 = vsel %vm9107_vm2, 0, %v9113_v62 }
 0x32f   : > { %v3529_v13 = vmul.f32 %v3528_v7, %v3526_v24  ;;  %v9122_v63 = vmul.f32 %v5897_v33, %v6184_v37  ;;  %v5183_v5 = vadd.s32 4294967169, %v3759_v16  ;;  %v3605_v43 = vadd.s32 %v9044_v56, %v9058_v18 }
 0x330   : > { %v3615_v2 = vsub.s32 0, %v9102_v46  ;;  %v3662_v6 = vadd.s32 1, %v5179_v22  ;;  %v9136_v12 = vsel %vm3551_vm4, %v3635_v40, %v3611_v38  ;;  %v9138_v34 = vshll.u32 %v3660_v4, 8 }
 0x331   : > { %v3530_v28 = vxor.u32 2147483648, %v3529_v13  ;;  %v3762_v50 = vand.u32 8388607, %v3755_v30  ;;  %v3765_v18 = vadd.s32 1, %v5183_v5  ;;  %vm9156_vm7 = vcmp.le.f32.partialorder %v3549_v0, 0.7853982 }
 0x332   : > { %v5176_v35 = vmin.u32 %v3615_v2, %v9102_v46  ;;  %vm3663_vm5 = vcmp.gt.s32.totalorder %v3662_v6, 0  ;;  %v3638_v62 = vsel %vm9156_vm7, 0, %v9136_v12  ;;  %v337_v12 = vmul.f32 31.0, %v8749_v59 }
 0x333   : > { %v3531_v23 = vsel %vm3448_vm3, %v3530_v28, %v3529_v13  ;;  %v3664_v36 = vsel %vm3663_vm5, %v3662_v6, 0  ;;  %vm3766_vm12 = vcmp.gt.s32.totalorder %v3765_v18, 0  ;;  %vm3538_vm3 = vweird.f32 %v8873_v42 }
 0x334   : > { %v3534_v45 = vsel %vm9107_vm2, %v8873_v42, %v3531_v23  ;;  %v3617_v20 = vclz %v5176_v35  ;;  %v3666_v32 = vand.u32 31, %v3664_v36  ;;  %v3665_v57 = vshrl.u32 %v3664_v36, 5 }
 0x335   : > { %5898 = vcosq.f32 %v3534_v45 }
 0x336   : > { %5900 = vsinq.f32 %v3534_v45  ;;  %v5177_v8 = vadd.s32 4294967294, %v3617_v20  ;;  %v3667_v9 = vsub.s32 32, %v3666_v32  ;;  %v3669_v27 = vshll.u32 %v5973_v53, %v3666_v32 }
 0x337   : > { %v3672_v56 = vshll.u32 %v5974_v55, %v3666_v32  ;;  %v3675_v54 = vshll.u32 %v5975_v58, %v3666_v32  ;;  %v3678_v38 = vshll.u32 %v5976_v61, %v3666_v32  ;;  %v3681_v41 = vshll.u32 %v5977_v3, %v3666_v32 }
 0x338   : > { %vm5178_vm6 = vcmp.lt.s32.totalorder %v5177_v8, 0  ;;  %v3668_v1 = vshrl.u32 %v5973_v53, %v3667_v9  ;;  %v3670_v51 = vshrl.u32 %v5974_v55, %v3667_v9  ;;  %v3673_v21 = vshrl.u32 %v5975_v58, %v3667_v9 }
 0x339   : > { %v3620_v7 = vsel %vm5178_vm6, 0, %v5177_v8  ;;  %v3676_v33 = vshrl.u32 %v5976_v61, %v3667_v9  ;;  %v3679_v22 = vshrl.u32 %v5977_v3, %v3667_v9  ;;  %v3682_v2 = vshrl.u32 %v5978_v17, %v3667_v9 }
 0x33a   : > { %v3621_v24 = vsub.s32 32, %v3620_v7  ;;  %v3622_v19 = vshll.u32 %v9102_v46, %v3620_v7  ;;  %v3625_v60 = vsub.s32 4294967266, %v3620_v7  ;;  %v3671_v26 = vor.u32 %v3670_v51, %v3669_v27 }
 0x33b   : > { %v3674_v13 = vor.u32 %v3673_v21, %v3672_v56  ;;  %v3677_v4 = vor.u32 %v3676_v33, %v3675_v54  ;;  %vm3684_vm8 = vcmp.lt.s32.totalorder %v3665_v57, 1  ;;  %v3680_v46 = vor.u32 %v3679_v22, %v3678_v38 }
 0x33c   : > { %v3623_v28 = vshrl.u32 %v3605_v43, %v3621_v24  ;;  %v3626_v40 = vadd.s32 127, %v3625_v60  ;;  %v3683_v6 = vor.u32 %v3682_v2, %v3681_v41  ;;  %vm3686_vm9 = vcmp.lt.s32.totalorder %v3665_v57, 3 }
 0x33d   : > { %vm3687_vm10 = vcmp.lt.s32.totalorder %v3665_v57, 4  ;;  %vm3685_vm11 = vcmp.lt.s32.totalorder %v3665_v57, 2  ;;  %v3688_v45 = vsel %vm3684_vm8, %v3668_v1, %v3671_v26  ;;  %v3692_v0 = vsel %vm3684_vm8, %v3671_v26, %v3674_v13  ;;  %v9187_v26 = vld [vmem:[%s9857_s0] sm:$0xff] }
 0x33e   : > { %v3624_v35 = vor.u32 %v3623_v28, %v3622_v19  ;;  %v3627_v23 = vshll.u32 %v3626_v40, 23  ;;  %v3689_v5 = vsel %vm3687_vm10, %v3677_v4, 2102212464  ;;  %v3693_v36 = vsel %vm3687_vm10, %v3680_v46, 920167782 }
 0x33f   : > { %v3690_v20 = vsel %vm3686_vm9, %v3674_v13, %v3689_v5  ;;  %v3694_v8 = vsel %vm3686_vm9, %v3677_v4, %v3693_v36  ;;  %v3696_v9 = vsel %vm3684_vm8, %v3674_v13, %v3677_v4  ;;  %v3697_v56 = vsel %vm3687_vm10, %v3683_v6, 1326507024 }
 0x340   : > { %v3628_v32 = vor.u32 4788187, %v3627_v23  ;;  %v3631_v43 = vcvt.s32.f32 %v3624_v35  ;;  %v3695_v27 = vsel %vm3685_vm11, %v3692_v0, %v3694_v8  ;;  %v3763_v54 = vor.u32 8388608, %v3762_v50 }
 0x341   : > { %v3698_v7 = vsel %vm3686_vm9, %v3680_v46, %v3697_v56  ;;  %v9170_v1 = vmul.u32.u64.low %v9138_v34, %v3695_v27  ;;  %v9171_v51 = vmul.u32.u64.high %v9138_v34, %v3695_v27, %v9170_v1  ;;  %v9180_v24 = vand.u32 3, %v3535_v15 }
 0x342   : > { %v9166_v38 = vpop.eup %5898  ;;  %v3629_v41 = vand.u32 2147483647, %v3628_v32  ;;  %v3691_v50 = vsel %vm3685_vm11, %v3688_v45, %v3690_v20  ;;  %v3699_v19 = vsel %vm3685_vm11, %v3696_v9, %v3698_v7  ;;  %v3767_v60 = vsel %vm3766_vm12, %v3765_v18, 0 }
 0x343   : > { %v9174_v21 = vpop.eup %5900  ;;  %v9190_v13 = vmul.f32 28.0, %v9187_v26  ;;  %v9193_v44 = vmul.u32.u64.low %v9138_v34, %v3699_v19  ;;  %v9194_v22 = vmul.u32.u64.high %v9138_v34, %v3699_v19, %v9193_v44  ;;  %v3769_v15 = vand.u32 31, %v3767_v60 }
 0x344   : > { %v3632_v33 = vmul.f32 %v3631_v43, %v3629_v41  ;;  %v9199_v57 = vshll.u32 %v3763_v54, 8  ;;  %v336_v18 = vmul.f32 30.0, %v8749_v59  ;;  %v3545_v2 = vxor.u32 2147483648, %v9166_v38 }
 0x345   : > { %v3707_v40 = vmul.u32 %v9138_v34, %v3691_v50  ;;  %v3710_v4 = vadd.s32 1, %v9171_v51  ;;  %v3542_v46 = vxor.u32 2147483648, %v9174_v21  ;;  %vm3544_vm13 = vcmp.eq.s32.totalorder %v9180_v24, 2 }
 0x346   : > { %v3633_v28 = vxor.u32 2147483648, %v3632_v33  ;;  %v3768_v6 = vshrl.u32 %v3767_v60, 5  ;;  %v3770_v35 = vsub.s32 32, %v3769_v15  ;;  %vm3541_vm14 = vcmp.eq.s32.totalorder %v9180_v24, 0 }
 0x347   : > { %vm3709_vm15 = vc.u32 %v9194_v22, %v9170_v1  ;;  %v3772_v34 = vshll.u32 %v5973_v53, %v3769_v15  ;;  %v3775_v5 = vshll.u32 %v5974_v55, %v3769_v15  ;;  %v369_v0 = vadd.f32 %v336_v18, %v6113_v29 }
 0x348   : > { %v3634_v23 = vsel %vm3551_vm4, %v3633_v28, %v3632_v33  ;;  %v3711_v20 = vsel %vm3709_vm15, %v3710_v4, %v9171_v51  ;;  %v3771_v59 = vshrl.u32 %v5973_v53, %v3770_v35  ;;  %v3773_v32 = vshrl.u32 %v5974_v55, %v3770_v35 }
 0x349   : > { %v3637_v45 = vsel %vm9156_vm7, %v8888_v25, %v3634_v23  ;;  %v3712_v36 = vadd.s32 %v3711_v20, %v3707_v40  ;;  %v3776_v43 = vshrl.u32 %v5975_v58, %v3770_v35  ;;  %vm3540_vm1 = vcmp.lt.s32.totalorder %v9180_v24, 2 }
 0x34a   : > { %5902 = vcosq.f32 %v3637_v45  ;;  %v3778_v8 = vshll.u32 %v5975_v58, %v3769_v15  ;;  %v3779_v16 = vshrl.u32 %v5976_v61, %v3770_v35  ;;  %v3781_v9 = vshll.u32 %v5976_v61, %v3769_v15 }
 0x34b   : > { %5904 = vsinq.f32 %v3637_v45  ;;  %v3713_v27 = vadd.s32 536870912, %v3712_v36  ;;  %v3774_v56 = vor.u32 %v3773_v32, %v3772_v34  ;;  %v3777_v54 = vor.u32 %v3776_v43, %v3775_v5 }
 0x34c   : > { %v3782_v41 = vshrl.u32 %v5977_v3, %v3770_v35  ;;  %v3780_v7 = vor.u32 %v3779_v16, %v3778_v8  ;;  %v3784_v51 = vshll.u32 %v5977_v3, %v3769_v15  ;;  %v3785_v50 = vshrl.u32 %v5978_v17, %v3770_v35 }
 0x34d   : > { %vm3787_vm2 = vcmp.lt.s32.totalorder %v3768_v6, 1  ;;  %v9231_v19 = vshrl.u32 %v3713_v27, 30  ;;  %vm3789_vm4 = vcmp.lt.s32.totalorder %v3768_v6, 3  ;;  %v370_v33 = vadd.f32 %v337_v12, %v6113_v29 }
 0x34e   : > { %v3783_v60 = vor.u32 %v3782_v41, %v3781_v9  ;;  %v3786_v44 = vor.u32 %v3785_v50, %v3784_v51  ;;  %vm3788_vm5 = vcmp.lt.s32.totalorder %v3768_v6, 2  ;;  %vm3790_vm6 = vcmp.lt.s32.totalorder %v3768_v6, 4 }
 0x34f   : > { %v3795_v18 = vsel %vm3787_vm2, %v3774_v56, %v3777_v54  ;;  %v3715_v28 = vshll.u32 %v9231_v19, 30  ;;  %v3791_v15 = vsel %vm3787_vm2, %v3771_v59, %v3774_v56  ;;  %v3792_v40 = vsel %vm3790_vm6, %v3780_v7, 2102212464 }
 0x350   : > { %v3796_v4 = vsel %vm3790_vm6, %v3783_v60, 920167782  ;;  %v3793_v35 = vsel %vm3789_vm4, %v3777_v54, %v3792_v40  ;;  %v3799_v34 = vsel %vm3787_vm2, %v3777_v54, %v3780_v7  ;;  %v3800_v5 = vsel %vm3790_vm6, %v3786_v44, 1326507024 }
 0x351   : > { %v3797_v23 = vsel %vm3789_vm4, %v3780_v7, %v3796_v4  ;;  %v3546_v12 = vsel %vm3544_vm13, %v3545_v2, %v9174_v21  ;;  %vm3641_vm7 = vweird.f32 %v8888_v25  ;;  %v3642_v45 = vand.u32 3, %v3638_v62 }
 0x352   : > { %v9244_v20 = vsub.s32 %v3712_v36, %v3715_v28  ;;  %v3798_v59 = vsel %vm3788_vm5, %v3795_v18, %v3797_v23  ;;  %v3543_v32 = vsel %vm3541_vm14, %v9166_v38, %v3542_v46  ;;  %v3801_v43 = vsel %vm3789_vm4, %v3783_v60, %v3800_v5 }
 0x353   : > { %v9252_v8 = vmul.u32.u64.low %v9199_v57, %v3798_v59  ;;  %v9253_v16 = vmul.u32.u64.high %v9199_v57, %v3798_v59, %v9252_v8  ;;  %vm761_vm8 = vcmp.ge.s32.totalorder %v9097_v49, 1  ;;  %vm762_vm9 = vcmp.ge.s32.totalorder %v9100_v39, 1 }
 0x354   : > { %v599_v21 = vmul.f32 29.0, %v9187_v26  ;;  %v3718_v62 = vsub.s32 0, %v9244_v20  ;;  %v3794_v2 = vsel %vm3788_vm5, %v3791_v15, %v3793_v35  ;;  %v3802_v36 = vsel %vm3788_vm5, %v3799_v34, %v3801_v43  ;;  %vm5246_vm15 = vmpackc.low %vm762_vm9, %vm761_vm8 }
 0x355   : > { %v9263_v38 = vmul.u32.u64.low %v9199_v57, %v3802_v36  ;;  %v9264_v46 = vmul.u32.u64.high %v9199_v57, %v3802_v36, %v9263_v38  ;;  %v402_v9 = vsub.f32 %v369_v0, %v6118_v31  ;;  %v403_v27 = vsub.f32 %v370_v33, %v6118_v31 }
 0x356   : > { %v3547_v56 = vsel %vm3540_vm1, %v3543_v32, %v3546_v12  ;;  %vm3647_vm10 = vcmp.eq.s32.totalorder %v3642_v45, 2  ;;  %v659_v54 = vmul.f32 1.442695, %v9190_v13  ;;  %v5180_v41 = vmin.u32 %v3718_v62, %v9244_v20 }
 0x357   : > { %v5903_v7 = vpop.eup %5902  ;;  %v3810_v6 = vmul.u32 %v9199_v57, %v3794_v2  ;;  %v3813_v51 = vadd.s32 1, %v9253_v16  ;;  %v435_v50 = vmul.f32 0.15915494, %v402_v9  ;;  %v436_v60 = vmul.f32 0.15915494, %v403_v27 }
 0x358   : > { %v5905_v44 = vpop.eup %5904  ;;  %vm3643_vm11 = vcmp.lt.s32.totalorder %v3642_v45, 2  ;;  %vm3644_vm12 = vcmp.eq.s32.totalorder %v3642_v45, 0  ;;  %v3648_v0 = vxor.u32 2147483648, %v5903_v7  ;;  %v3720_v33 = vclz %v5180_v41 }
 0x359   : > { %v3548_v24 = vsel %vm3538_vm3, nan, %v3547_v56  ;;  %v3645_v18 = vxor.u32 2147483648, %v5905_v44  ;;  %vm3812_vm13 = vc.u32 %v9264_v46, %v9252_v8  ;;  %v468_v13 = vadd.f32 0.5, %v435_v50 }
 0x35a   : > { %v3649_v28 = vsel %vm3647_vm10, %v3648_v0, %v5905_v44  ;;  %v5181_v57 = vadd.s32 4294967294, %v3720_v33  ;;  %v3814_v15 = vsel %vm3812_vm13, %v3813_v51, %v9253_v16  ;;  %v469_v40 = vadd.f32 0.5, %v436_v60 }
 0x35b   : > { %v3646_v4 = vsel %vm3644_vm12, %v5903_v7, %v3645_v18  ;;  %v3708_v35 = vadd.s32 %v9170_v1, %v9194_v22  ;;  %v3815_v23 = vadd.s32 %v3814_v15, %v3810_v6  ;;  %v501_v34 = vfloor.f32 %v468_v13 }
 0x35c   : > { %v3650_v42 = vsel %vm3643_vm11, %v3646_v4, %v3649_v28  ;;  %v4193_v5 = vmul.f32 %v3548_v24, %v9119_v14  ;;  %vm5182_vm14 = vcmp.lt.s32.totalorder %v5181_v57, 0  ;;  %v502_v12 = vfloor.f32 %v469_v40 }
 0x35d   : > { %v3651_v59 = vsel %vm3641_vm7, nan, %v3650_v42  ;;  %v3723_v32 = vsel %vm5182_vm14, 0, %v5181_v57  ;;  %v3816_v43 = vadd.s32 536870912, %v3815_v23  ;;  %v534_v62 = vmul.f32 6.2831855, %v501_v34 }
 0x35e   : > { %v4194_v16 = vmul.f32 %v3651_v59, %v9122_v63  ;;  %v3724_v2 = vsub.s32 32, %v3723_v32  ;;  %v3725_v36 = vshll.u32 %v9244_v20, %v3723_v32  ;;  %v3728_v1 = vsub.s32 4294967266, %v3723_v32 }
 0x35f   : > { %v3817_v14 = vshrl.u32 %v3816_v43, 30  ;;  %5906 = vpow2.f32 %v659_v54  ;;  %v535_v56 = vmul.f32 6.2831855, %v502_v12  ;;  %v9292_v41 = vsub.f32 %v402_v9, %v534_v62 }
 0x360   : > { %v5247_v22 = vpack.c.bf16 %v4194_v16, %v4193_v5  ;;  %v3726_v45 = vshrl.u32 %v3708_v35, %v3724_v2  ;;  %v3729_v25 = vadd.s32 127, %v3728_v1  ;;  %v661_v63 = vmul.f32 1.442695, %v599_v21 }
 0x361   : > { %v3818_v38 = vshll.u32 %v3817_v14, 30  ;;  %v3738_v49 = vsub.s32 4, %v9231_v19  ;;  %v3858_v9 = vand.u32 2147483647, %v9292_v41  ;;  %v9303_v50 = vsub.f32 %v403_v27, %v535_v56 }
 0x362   : > { %5454 = vmatmul.mubr.msk.bf16.gmra.mxu0 %vm5246_vm15, %v5247_v22  ;;  %5538 = vmatmul.mubr.msk.bf16.gmra.mxu1 %vm5246_vm15, %v5247_v22  ;;  %v3727_v7 = vor.u32 %v3726_v45, %v3725_v36  ;;  %v3730_v20 = vshll.u32 %v3729_v25, 23  ;;  %v3861_v21 = vand.u32 2139095040, %v9292_v41  ;;  %5908 = vpow2.f32 %v661_v63 }
 0x363   : > { %5457 = vmatprep.mubr.msk.bf16.mxu0 %vm5972_vm0, %v9873_v48  ;;  %5541 = vmatprep.mubr.msk.bf16.mxu1 %vm5972_vm0, %v9873_v48  ;;  %v9299_v39 = vsub.s32 %v3815_v23, %v3818_v38  ;;  %v9307_v60 = vadd.s32 28, %v6131_v47  ;;  %vm3654_vm1 = vcmp.lt.s32.totalorder %v9083_v11, 0  ;;  %v9311_v0 = vadd.s32 29, %v6131_v47  ;;  %v5945_v23 = vld [vmem:[%s9858_s1] sm:$0xff] }
 0x364   : > { %v3731_v54 = vor.u32 4788187, %v3730_v20  ;;  %v3734_v6 = vcvt.s32.f32 %v3727_v7  ;;  %vm9315_vm2 = vcmp.le.f32.partialorder %v3652_v52, 0.7853982  ;;  %v3739_v27 = vsel %vm3654_vm1, %v3738_v49, %v9231_v19 }
 0x365   : > { %v3821_v51 = vsub.s32 0, %v9299_v39  ;;  %v3841_v13 = vsub.s32 4, %v3817_v14  ;;  %v3862_v28 = vshrl.u32 %v3861_v21, 23  ;;  %v3865_v57 = vand.u32 8388607, %v3858_v9 }
 0x366   : > { %v3732_v44 = vand.u32 2147483647, %v3731_v54  ;;  %vm3757_vm3 = vcmp.lt.s32.totalorder %v9089_v10, 0  ;;  %v3961_v52 = vand.u32 2147483647, %v9303_v50  ;;  %v3964_v40 = vand.u32 2139095040, %v9303_v50 }
 0x367   : > { %v5184_v24 = vmin.u32 %v3821_v51, %v9299_v39  ;;  %vm9330_vm4 = vcmp.le.f32.partialorder %v3755_v30, 0.7853982  ;;  %v5187_v35 = vadd.s32 4294967169, %v3862_v28  ;;  %v338_v34 = vmul.f32 32.0, %v5945_v23 }
 0x368   : > { %v3735_v18 = vmul.f32 %v3734_v6, %v3732_v44  ;;  %v3741_v42 = vsel %vm9315_vm2, 0, %v3739_v27  ;;  %v3811_v5 = vadd.s32 %v9252_v8, %v9264_v46  ;;  %v3965_v59 = vshrl.u32 %v3964_v40, 23 }
 0x369   : > { %v3823_v15 = vclz %v5184_v24  ;;  %v9345_v32 = vsel %vm3757_vm3, %v3841_v13, %v3817_v14  ;;  %v3866_v43 = vor.u32 8388608, %v3865_v57  ;;  %v3868_v62 = vadd.s32 1, %v5187_v35  ;;  %v9379_v13 = vpop.f32.mrf.mxu0 }
 0x36a   : > { %v3736_v4 = vxor.u32 2147483648, %v3735_v18  ;;  %v9352_v8 = vand.u32 8388607, %v3961_v52  ;;  %v371_v46 = vadd.f32 %v338_v34, %v6113_v29  ;;  %v5191_v1 = vadd.s32 4294967169, %v3965_v59 }
 0x36b   : > { %v5185_v12 = vadd.s32 4294967294, %v3823_v15  ;;  %vm3869_vm6 = vcmp.gt.s32.totalorder %v3868_v62, 0  ;;  %v9359_v38 = vand.u32 3, %v3741_v42  ;;  %v3844_v56 = vsel %vm9330_vm4, 0, %v9345_v32  ;;  %v5404_v42 = vpop.f32.mrf.mxu0 }
 0x36c   : > { %v3737_v30 = vsel %vm3654_vm1, %v3736_v4, %v3735_v18  ;;  %v5907_v16 = vpop.eup %5906  ;;  %v3870_v63 = vsel %vm3869_vm6, %v3868_v62, 0  ;;  %v9364_v49 = vshll.u32 %v3866_v43, 8  ;;  %v9369_v6 = vadd.s32 1, %v5191_v1  ;;  %v9377_v18 = vpop.f32.mrf.mxu1 }
 0x36d   : > { %v3740_v2 = vsel %vm9315_vm2, %v9083_v11, %v3737_v30  ;;  %vm5186_vm5 = vcmp.lt.s32.totalorder %v5185_v12, 0  ;;  %v9357_v25 = vmul.f32 %v5907_v16, %v6184_v37  ;;  %v3872_v20 = vand.u32 31, %v3870_v63 }
 0x36e   : > { %5910 = vcosq.f32 %v3740_v2  ;;  %v3826_v36 = vsel %vm5186_vm5, 0, %v5185_v12  ;;  %v9366_v54 = vshrl.u32 %v3870_v63, 5  ;;  %v9372_v51 = vsub.f32 %v371_v46, %v6118_v31  ;;  %v5487_v34 = vpop.f32.mrf.mxu1 }
 0x36f   : > { %5912 = vsinq.f32 %v3740_v2  ;;  %v3827_v14 = vsub.s32 32, %v3826_v36  ;;  %v3828_v22 = vshll.u32 %v9299_v39, %v3826_v36  ;;  %v3831_v45 = vsub.s32 4294967266, %v3826_v36  ;;  %v9374_v21 = vpop.eup %5908  ;;  %v9396_v2 = vpop.f32.mrf.mxu0 }
 0x370   : > { %v3969_v39 = vor.u32 8388608, %v9352_v8  ;;  %v3873_v27 = vsub.s32 32, %v3872_v20  ;;  %v3875_v24 = vshll.u32 %v5973_v53, %v3872_v20  ;;  %v3878_v28 = vshll.u32 %v5974_v55, %v3872_v20  ;;  %v9394_v16 = vpop.f32.mrf.mxu1 }
 0x371   : > { %v3829_v29 = vshrl.u32 %v3811_v5, %v3827_v14  ;;  %v3832_v7 = vadd.s32 127, %v3831_v45  ;;  %v3881_v57 = vshll.u32 %v5975_v58, %v3872_v20  ;;  %v3884_v15 = vshll.u32 %v5976_v61, %v3872_v20 }
 0x372   : > { %v3887_v31 = vshll.u32 %v5977_v3, %v3872_v20  ;;  %v3874_v35 = vshrl.u32 %v5973_v53, %v3873_v27  ;;  %v3876_v23 = vshrl.u32 %v5974_v55, %v3873_v27  ;;  %v3879_v5 = vshrl.u32 %v5975_v58, %v3873_v27  ;;  %v5488_v63 = vpop.f32.mrf.mxu1 }
 0x373   : > { %v3830_v44 = vor.u32 %v3829_v29, %v3828_v22  ;;  %v3833_v33 = vshll.u32 %v3832_v7, 23  ;;  %v3882_v12 = vshrl.u32 %v5976_v61, %v3873_v27  ;;  %v3885_v59 = vshrl.u32 %v5977_v3, %v3873_v27  ;;  %v5407_v29 = vpop.f32.mrf.mxu0 }
 0x374   : > { %v3888_v30 = vshrl.u32 %v5978_v17, %v3873_v27  ;;  %vm3747_vm7 = vcmp.eq.s32.totalorder %v9359_v38, 0  ;;  %v3877_v62 = vor.u32 %v3876_v23, %v3875_v24  ;;  %vm3890_vm8 = vcmp.lt.s32.totalorder %v9366_v54, 1 }
 0x375   : > { %v3834_v40 = vor.u32 4788187, %v3833_v33  ;;  %v3837_v4 = vcvt.s32.f32 %v3830_v44  ;;  %vm3891_vm9 = vcmp.lt.s32.totalorder %v9366_v54, 2  ;;  %v3880_v46 = vor.u32 %v3879_v5, %v3878_v28 }
 0x376   : > { %v3883_v36 = vor.u32 %v3882_v12, %v3881_v57  ;;  %v3886_v1 = vor.u32 %v3885_v59, %v3884_v15  ;;  %v3889_v14 = vor.u32 %v3888_v30, %v3887_v31  ;;  %vm3892_vm10 = vcmp.lt.s32.totalorder %v9366_v54, 3  ;;  %v9410_v31 = vpop.f32.mrf.mxu1 }
 0x377   : > { %v3835_v43 = vand.u32 2147483647, %v3834_v40  ;;  %vm3893_vm11 = vcmp.lt.s32.totalorder %v9366_v54, 4  ;;  %v3894_v45 = vsel %vm3890_vm8, %v3874_v35, %v3877_v62  ;;  %v3898_v20 = vsel %vm3890_vm8, %v3877_v62, %v3880_v46  ;;  %v9412_v40 = vpop.f32.mrf.mxu0 }
 0x378   : > { %v3895_v7 = vsel %vm3893_vm11, %v3883_v36, 2102212464  ;;  %v3899_v44 = vsel %vm3893_vm11, %v3886_v1, 920167782  ;;  %v3902_v33 = vsel %vm3890_vm8, %v3880_v46, %v3883_v36  ;;  %v3903_v15 = vsel %vm3893_vm11, %v3889_v14, 1326507024  ;;  %v5491_v30 = vpop.f32.mrf.mxu1 }
 0x379   : > { %v3838_v22 = vmul.f32 %v3837_v4, %v3835_v43  ;;  %v3896_v28 = vsel %vm3892_vm10, %v3880_v46, %v3895_v7  ;;  %v3900_v57 = vsel %vm3892_vm10, %v3883_v36, %v3899_v44  ;;  %v3904_v23 = vsel %vm3892_vm10, %v3886_v1, %v3903_v15  ;;  %v5408_v43 = vpop.f32.mrf.mxu0 }
 0x37a   : > { %v3901_v35 = vsel %vm3891_vm9, %v3898_v20, %v3900_v57  ;;  %vm3972_vm12 = vcmp.gt.s32.totalorder %v9369_v6, 0  ;;  %v437_v34 = vmul.f32 0.15915494, %v9372_v51  ;;  %v3897_v12 = vsel %vm3891_vm9, %v3894_v45, %v3896_v28  ;;  %v9439_v54 = vpop.f32.mrf.mxu1 }
 0x37b   : > { %v5911_v27 = vpop.eup %5910  ;;  %v3839_v24 = vxor.u32 2147483648, %v3838_v22  ;;  %v3905_v59 = vsel %vm3891_vm9, %v3902_v33, %v3904_v23  ;;  %vm3750_vm13 = vcmp.eq.s32.totalorder %v9359_v38, 2  ;;  %v9441_v45 = vpop.f32.mrf.mxu0  ;;  %vm3746_vm14 = vcmp.lt.s32.totalorder %v9359_v38, 2 }
 0x37c   : > { %v5913_v4 = vpop.eup %5912  ;;  %v3751_v42 = vxor.u32 2147483648, %v5911_v27  ;;  %v9430_v36 = vmul.u32.u64.low %v9364_v49, %v3905_v59  ;;  %v9431_v1 = vmul.u32.u64.high %v9364_v49, %v3905_v59, %v9430_v36  ;;  %v9448_v63 = vand.u32 3, %v3844_v56  ;;  %v5492_v19 = vpop.f32.mrf.mxu1 }
 0x37d   : > { %v3840_v5 = vsel %vm3757_vm3, %v3839_v24, %v3838_v22  ;;  %v3748_v62 = vxor.u32 2147483648, %v5913_v4  ;;  %v9435_v14 = vmul.u32.u64.low %v9364_v49, %v3901_v35  ;;  %v9436_v22 = vmul.u32.u64.high %v9364_v49, %v3901_v35, %v9435_v14  ;;  %v5411_v24 = vpop.f32.mrf.mxu0 }
 0x37e   : > { %v3843_v46 = vsel %vm9330_vm4, %v9089_v10, %v3840_v5  ;;  %v3973_v29 = vsel %vm3972_vm12, %v9369_v6, 0  ;;  %vm3744_vm15 = vweird.f32 %v9083_v11  ;;  %v3913_v7 = vmul.u32 %v9364_v49, %v3897_v12 }
 0x37f   : > { %5914 = vcosq.f32 %v3843_v46  ;;  %v9455_v20 = vshrl.u32 %v3973_v29, 5  ;;  %v3975_v44 = vand.u32 31, %v3973_v29  ;;  %v9459_v33 = vshll.u32 %v3969_v39, 8  ;;  %v9470_v39 = vpop.f32.mrf.mxu1  ;;  %v9472_v15 = vpop.f32.mrf.mxu0 }
 0x380   : > { %5916 = vsinq.f32 %v3843_v46  ;;  %v3749_v32 = vsel %vm3747_vm7, %v5911_v27, %v3748_v62  ;;  %v3752_v56 = vsel %vm3750_vm13, %v3751_v42, %v5913_v4  ;;  %vm3915_vm1 = vc.u32 %v9431_v1, %v9435_v14 }
 0x381   : > { %v470_v6 = vadd.f32 0.5, %v437_v34  ;;  %v3916_v49 = vadd.s32 1, %v9436_v22  ;;  %v3976_v28 = vsub.s32 32, %v3975_v44  ;;  %v3978_v57 = vshll.u32 %v5973_v53, %v3975_v44  ;;  %v5495_v12 = vpop.f32.mrf.mxu1  ;;  %v5412_v59 = vpop.f32.mrf.mxu0 }
 0x382   : > { %v3981_v8 = vshll.u32 %v5974_v55, %v3975_v44  ;;  %vm3853_vm2 = vcmp.eq.s32.totalorder %v9448_v63, 2  ;;  %v3984_v27 = vshll.u32 %v5975_v58, %v3975_v44  ;;  %v3987_v4 = vshll.u32 %v5976_v61, %v3975_v44 }
 0x383   : > { %v3990_v35 = vshll.u32 %v5977_v3, %v3975_v44  ;;  %vm3993_vm3 = vcmp.lt.s32.totalorder %v9455_v20, 1  ;;  %vm3850_vm4 = vcmp.eq.s32.totalorder %v9448_v63, 0  ;;  %v3917_v23 = vsel %vm3915_vm1, %v3916_v49, %v9436_v22  ;;  %v9491_v44 = vpop.f32.mrf.mxu1  ;;  %v9493_v19 = vpop.f32.mrf.mxu0 }
 0x384   : > { %v3977_v34 = vshrl.u32 %v5973_v53, %v3976_v28  ;;  %v3979_v42 = vshrl.u32 %v5974_v55, %v3976_v28  ;;  %v3982_v5 = vshrl.u32 %v5975_v58, %v3976_v28  ;;  %vm3849_vm5 = vcmp.lt.s32.totalorder %v9448_v63, 2 }
 0x385   : > { %v3918_v30 = vadd.s32 %v3917_v23, %v3913_v7  ;;  %v3985_v43 = vshrl.u32 %v5976_v61, %v3976_v28  ;;  %v3988_v62 = vshrl.u32 %v5977_v3, %v3976_v28  ;;  %v3991_v46 = vshrl.u32 %v5978_v17, %v3976_v28 }
 0x386   : > { %vm3847_vm6 = vweird.f32 %v9089_v10  ;;  %v3980_v36 = vor.u32 %v3979_v42, %v3978_v57  ;;  %v3983_v22 = vor.u32 %v3982_v5, %v3981_v8  ;;  %vm3995_vm7 = vcmp.lt.s32.totalorder %v9455_v20, 3  ;;  %v5496_v57 = vpop.f32.mrf.mxu1  ;;  %v5415_v8 = vpop.f32.mrf.mxu0 }
 0x387   : > { %v503_v29 = vfloor.f32 %v470_v6  ;;  %v3919_v7 = vadd.s32 536870912, %v3918_v30  ;;  %v3986_v24 = vor.u32 %v3985_v43, %v3984_v27  ;;  %v3989_v49 = vor.u32 %v3988_v62, %v3987_v4 }
 0x388   : > { %v3992_v23 = vor.u32 %v3991_v46, %v3990_v35  ;;  %vm763_vm8 = vcmp.ge.s32.totalorder %v9307_v60, 1  ;;  %v3753_v28 = vsel %vm3746_vm14, %v3749_v32, %v3752_v56  ;;  %vm3994_vm9 = vcmp.lt.s32.totalorder %v9455_v20, 2  ;;  %v9518_v12 = vpop.f32.mrf.mxu1 }
 0x389   : > { %vm3996_vm10 = vcmp.lt.s32.totalorder %v9455_v20, 4  ;;  %v4001_v6 = vsel %vm3993_vm3, %v3980_v36, %v3983_v22  ;;  %v9502_v42 = vshrl.u32 %v3919_v7, 30  ;;  %v3997_v27 = vsel %vm3993_vm3, %v3977_v34, %v3980_v36  ;;  %v9520_v34 = vpop.f32.mrf.mxu0 }
 0x38a   : > { %v3998_v4 = vsel %vm3996_vm10, %v3986_v24, 2102212464  ;;  %v4002_v35 = vsel %vm3996_vm10, %v3989_v49, 920167782  ;;  %v4005_v56 = vsel %vm3993_vm3, %v3983_v22, %v3986_v24  ;;  %v4006_v5 = vsel %vm3996_vm10, %v3992_v23, 1326507024  ;;  %v5499_v8 = vpop.f32.mrf.mxu1 }
 0x38b   : > { %v3999_v38 = vsel %vm3995_vm7, %v3983_v22, %v3998_v4  ;;  %v4003_v32 = vsel %vm3995_vm7, %v3986_v24, %v4002_v35  ;;  %v3754_v43 = vsel %vm3744_vm15, nan, %v3753_v28  ;;  %v3921_v62 = vshll.u32 %v9502_v42, 30  ;;  %v5416_v4 = vpop.f32.mrf.mxu0 }
 0x38c   : > { %v5915_v59 = vpop.eup %5914  ;;  %v4004_v46 = vsel %vm3994_vm9, %v4001_v6, %v4003_v32  ;;  %v536_v36 = vmul.f32 6.2831855, %v503_v29  ;;  %v4007_v22 = vsel %vm3995_vm7, %v3989_v49, %v4006_v5  ;;  %v4000_v35 = vsel %vm3994_vm9, %v3997_v27, %v3999_v38  ;;  %v9554_v5 = vpop.f32.mrf.mxu1 }
 0x38d   : > { %v5917_v7 = vpop.eup %5916  ;;  %v3854_v57 = vxor.u32 2147483648, %v5915_v59  ;;  %v9530_v24 = vmul.u32.u64.low %v9459_v33, %v4004_v46  ;;  %v9531_v23 = vmul.u32.u64.high %v9459_v33, %v4004_v46, %v9530_v24  ;;  %v9534_v28 = vsub.s32 %v3918_v30, %v3921_v62  ;;  %v9556_v27 = vpop.f32.mrf.mxu0 }
 0x38e   : > { %v3851_v11 = vxor.u32 2147483648, %v5917_v7  ;;  %v4008_v29 = vsel %vm3994_vm9, %v4005_v56, %v4007_v22  ;;  %v698_v49 = vmul.f32 %v9374_v21, %v6184_v37  ;;  %vm764_vm11 = vcmp.ge.s32.totalorder %v9311_v0, 1 }
 0x38f   : > { %v3855_v6 = vsel %vm3853_vm2, %v3854_v57, %v5917_v7  ;;  %v9551_v30 = vmul.u32.u64.low %v9459_v33, %v4008_v29  ;;  %v9552_v32 = vmul.u32.u64.high %v9459_v33, %v4008_v29, %v9551_v30  ;;  %v4195_v38 = vmul.f32 %v3754_v43, %v9357_v25  ;;  %v5500_v57 = vpop.f32.mrf.mxu1  ;;  %v5419_v22 = vpop.f32.mrf.mxu0  ;;  %vm5249_vm13 = vmpackc.low %vm764_vm11, %vm763_vm8 }
 0x390   : > { %v3852_v20 = vsel %vm3850_vm4, %v5915_v59, %v3851_v11  ;;  %v3924_v21 = vsub.s32 0, %v9534_v28  ;;  %v4016_v62 = vmul.u32 %v9459_v33, %v4000_v35  ;;  %v4019_v46 = vadd.s32 1, %v9531_v23 }
 0x391   : > { %v3856_v56 = vsel %vm3849_vm5, %v3852_v20, %v3855_v6  ;;  %v9568_v7 = vsub.f32 %v9372_v51, %v536_v36  ;;  %vm4018_vm12 = vc.u32 %v9552_v32, %v9530_v24  ;;  %v4678_v63 = vpop.f32.mrf.mxu1  ;;  %v4448_v43 = vpop.f32.mrf.mxu0  ;;  %v4779_v0 = vadd.f32 %v9377_v18, %v9379_v13 }
 0x392   : > { %v3857_v8 = vsel %vm3847_vm6, nan, %v3856_v56  ;;  %v5188_v59 = vmin.u32 %v3924_v21, %v9534_v28  ;;  %v4020_v33 = vsel %vm4018_vm12, %v4019_v46, %v9531_v23  ;;  %vm4780_vm14 = vcmask 261120  }
 0x393   : > { %v4196_v25 = vmul.f32 %v3857_v8, %v698_v49  ;;  %v4064_v10 = vand.u32 2147483647, %v9568_v7  ;;  %v4021_v4 = vadd.s32 %v4020_v33, %v4016_v62  ;;  %v4067_v11 = vand.u32 2139095040, %v9568_v7  ;;  %v5503_v35 = vpop.f32.mrf.mxu1  ;;  %v5420_v29 = vpop.f32.mrf.mxu0  ;;  %4781 = vst.msk [vmem:[%s9586_s13] sm:$0xff] %vm4780_vm14, %v4779_v0 }
 0x394   : > { %v3926_v51 = vclz %v5188_v59  ;;  %v4782_v6 = vadd.f32 %v9394_v16, %v9396_v2  ;;  %v4803_v13 = vadd.f32 %v9470_v39, %v9472_v15  ;;  %v9610_v62 = vmul.f32 30.0, %v9187_v26 }
 0x395   : > { %v5250_v36 = vpack.c.bf16 %v4196_v25, %v4195_v38  ;;  %v4022_v23 = vadd.s32 536870912, %v4021_v4  ;;  %v4068_v49 = vshrl.u32 %v4067_v11, 23  ;;  %v4681_v30 = vpop.f32.mrf.mxu1  ;;  %v4453_v20 = vpop.f32.mrf.mxu0  ;;  %v3914_v38 = vadd.s32 %v9435_v14, %v9431_v1 }
 0x396   : > { %v5189_v60 = vadd.s32 4294967294, %v3926_v51  ;;  %v4071_v18 = vand.u32 8388607, %v4064_v10  ;;  %4784 = vrot.lane.b32.xlu0 %v4782_v6, %s5979_s14  ;;  %v4789_v1 = vadd.f32 %v9410_v31, %v9412_v40  ;;  %4804 = vst.msk [vmem:[%s9586_s13 + $0x8] sm:$0xff] %vm4780_vm14, %v4803_v13  ;;  %v9616_v39 = vmul.f32 31.0, %v9187_v26 }
 0x397   : > { %5458 = vmatmul.mubr.msk.bf16.gmra.mxu0 %vm5249_vm13, %v5250_v36  ;;  %5542 = vmatmul.mubr.msk.bf16.gmra.mxu1 %vm5249_vm13, %v5250_v36  ;;  %v9604_v2 = vshrl.u32 %v4022_v23, 30  ;;  %v5195_v21 = vadd.s32 4294967169, %v4068_v49  ;;  %v5504_v14 = vpop.f32.mrf.mxu1  ;;  %v5423_v56 = vpop.f32.mrf.mxu0  ;;  %v4811_v31 = vadd.f32 %v9518_v12, %v9520_v34  ;;  %v4823_v36 = vadd.f32 %v4678_v63, %v4448_v43 }
 0x398   : > { %5461 = vmatprep.mubr.msk.bf16.mxu0 %vm5972_vm0, %v9873_v48  ;;  %5545 = vmatprep.mubr.msk.bf16.mxu1 %vm5972_vm0, %v9873_v48  ;;  %vm5190_vm15 = vcmp.lt.s32.totalorder %v5189_v60, 0  ;;  %v4072_v33 = vor.u32 8388608, %v4071_v18  ;;  %vm3860_vm1 = vcmp.lt.s32.totalorder %v9292_v41, 0  ;;  %v4796_v26 = vadd.f32 %v9439_v54, %v9441_v45 }
 0x399   : > { %v3929_v16 = vsel %vm5190_vm15, 0, %v5189_v60  ;;  %v4024_v15 = vshll.u32 %v9604_v2, 30  ;;  %v4074_v8 = vadd.s32 1, %v5195_v21  ;;  %v4686_v40 = vpop.f32.mrf.mxu1  ;;  %v4456_v59 = vpop.f32.mrf.mxu0  ;;  %4813 = vrot.lane.b32.xlu1 %v4811_v31, %s5980_s19  ;;  %v4817_v12 = vadd.f32 %v9554_v5, %v9556_v27  ;;  %4824 = vst.msk [vmem:[%s9586_s13 + $0x10] sm:$0xff] %vm4780_vm14, %v4823_v36 }
 0x39a   : > { %v3930_v46 = vsub.s32 32, %v3929_v16  ;;  %v3931_v57 = vshll.u32 %v9534_v28, %v3929_v16  ;;  %v3934_v22 = vsub.s32 4294967266, %v3929_v16  ;;  %4791 = vrot.lane.b32.xlu0 %v4789_v1, %s5980_s19  ;;  %vm9632_vm3 = vcmp.le.f32.partialorder %v3858_v9, 0.7853982 }
 0x39b   : > { %v9622_v28 = vsub.s32 %v4021_v4, %v4024_v15  ;;  %vm4075_vm2 = vcmp.gt.s32.totalorder %v4074_v8, 0  ;;  %v5507_v34 = vpop.f32.mrf.mxu1  ;;  %v5424_v11 = vpop.f32.mrf.mxu0  ;;  %v3944_v54 = vsub.s32 4, %v9502_v42  ;;  %v9641_v45 = vadd.s32 %v9530_v24, %v9552_v32 }
 0x39c   : > { %v3932_v25 = vshrl.u32 %v3914_v38, %v3930_v46  ;;  %v3935_v51 = vadd.s32 127, %v3934_v22  ;;  %v4076_v35 = vsel %vm4075_vm2, %v4074_v8, 0  ;;  %v9644_v23 = vshll.u32 %v4072_v33, 8 }
 0x39d   : > { %v4027_v5 = vsub.s32 0, %v9622_v28  ;;  %v4078_v27 = vand.u32 31, %v4076_v35  ;;  %v4689_v29 = vpop.f32.mrf.mxu1  ;;  %v4461_v60 = vpop.f32.mrf.mxu0  ;;  %v4805_v49 = vadd.f32 %v9491_v44, %v9493_v19  ;;  %v9649_v38 = vshrl.u32 %v4076_v35, 5  ;;  %4819 = vrot.lane.b32.xlu1 %v4817_v12, %s5981_s20 }
 0x39e   : > { %v3933_v43 = vor.u32 %v3932_v25, %v3931_v57  ;;  %v3936_v4 = vshll.u32 %v3935_v51, 23  ;;  %4798 = vrot.lane.b32.xlu0 %v4796_v26, %s5981_s20  ;;  %v4825_v24 = vadd.f32 %v4681_v30, %v4453_v20  ;;  %v4831_v32 = vadd.f32 %v4686_v40, %v4456_v59 }
 0x39f   : > { %v5192_v6 = vmin.u32 %v4027_v5, %v9622_v28  ;;  %v5508_v18 = vpop.f32.mrf.mxu1  ;;  %v5427_v13 = vpop.f32.mrf.mxu0  ;;  %v4079_v21 = vsub.s32 32, %v4078_v27  ;;  %v4081_v1 = vshll.u32 %v5973_v53, %v4078_v27  ;;  %v4084_v14 = vshll.u32 %v5974_v55, %v4078_v27 }
 0x3a0   : > { %v3937_v9 = vor.u32 4788187, %v3936_v4  ;;  %v3940_v0 = vcvt.s32.f32 %v3933_v43  ;;  %v4087_v19 = vshll.u32 %v5975_v58, %v4078_v27  ;;  %v4090_v56 = vshll.u32 %v5976_v61, %v4078_v27 }
 0x3a1   : > { %v4029_v44 = vclz %v5192_v6  ;;  %v4837_v46 = vadd.f32 %v4689_v29, %v4461_v60  ;;  %v4694_v57 = vpop.f32.mrf.mxu1  ;;  %v4464_v22 = vpop.f32.mrf.mxu0  ;;  %v4082_v30 = vshrl.u32 %v5974_v55, %v4079_v21  ;;  %v4085_v20 = vshrl.u32 %v5975_v58, %v4079_v21  ;;  %4827 = vrot.lane.b32.xlu1 %v4825_v24, %s5979_s14 }
 0x3a2   : > { %v3938_v16 = vand.u32 2147483647, %v3937_v9  ;;  %v4093_v8 = vshll.u32 %v5977_v3, %v4078_v27  ;;  %v4088_v40 = vshrl.u32 %v5976_v61, %v4079_v21  ;;  %v4091_v59 = vshrl.u32 %v5977_v3, %v4079_v21  ;;  %4807 = vrot.lane.b32.xlu0 %v4805_v49, %s5979_s14 }
 0x3a3   : > { %v5193_v31 = vadd.s32 4294967294, %v4029_v44  ;;  %v4094_v25 = vshrl.u32 %v5978_v17, %v4079_v21  ;;  %v5511_v51 = vpop.f32.mrf.mxu1  ;;  %v5428_v33 = vpop.f32.mrf.mxu0  ;;  %v4080_v55 = vshrl.u32 %v5973_v53, %v4079_v21  ;;  %v4083_v26 = vor.u32 %v4082_v30, %v4081_v1 }
 0x3a4   : > { %v3941_v15 = vmul.f32 %v3940_v0, %v3938_v16  ;;  %v4086_v58 = vor.u32 %v4085_v20, %v4084_v14  ;;  %v4089_v12 = vor.u32 %v4088_v40, %v4087_v19  ;;  %v4092_v34 = vor.u32 %v4091_v59, %v4090_v56 }
 0x3a5   : > { %vm5194_vm4 = vcmp.lt.s32.totalorder %v5193_v31, 0  ;;  %vm4096_vm5 = vcmp.lt.s32.totalorder %v9649_v38, 1  ;;  %v4697_v61 = vpop.f32.mrf.mxu1  ;;  %v4469_v3 = vpop.f32.mrf.mxu0  ;;  %v4095_v43 = vor.u32 %v4094_v25, %v4093_v8  ;;  %vm4097_vm6 = vcmp.lt.s32.totalorder %v9649_v38, 2 }
 0x3a6   : > { %v3942_v36 = vxor.u32 2147483648, %v3941_v15  ;;  %v4032_v11 = vsel %vm5194_vm4, 0, %v5193_v31  ;;  %4833 = vrot.lane.b32.xlu0 %v4831_v32, %s5980_s19  ;;  %vm4098_vm7 = vcmp.lt.s32.totalorder %v9649_v38, 3  ;;  %vm4099_vm8 = vcmp.lt.s32.totalorder %v9649_v38, 4 }
 0x3a7   : > { %v4033_v4 = vsub.s32 32, %v4032_v11  ;;  %v4034_v35 = vshll.u32 %v9622_v28, %v4032_v11  ;;  %v4037_v5 = vsub.s32 4294967266, %v4032_v11  ;;  %v5512_v27 = vpop.f32.mrf.mxu1  ;;  %v5431_v29 = vpop.f32.mrf.mxu0  ;;  %v4100_v60 = vsel %vm4096_vm5, %v4080_v55, %v4083_v26 }
 0x3a8   : > { %v3943_v17 = vsel %vm3860_vm1, %v3942_v36, %v3941_v15  ;;  %v4101_v49 = vsel %vm4099_vm8, %v4089_v12, 2102212464  ;;  %v4104_v28 = vsel %vm4096_vm5, %v4083_v26, %v4086_v58  ;;  %v4105_v18 = vsel %vm4099_vm8, %v4092_v34, 920167782 }
 0x3a9   : > { %v3946_v53 = vsel %vm9632_vm3, %v9292_v41, %v3943_v17  ;;  %v4035_v9 = vshrl.u32 %v9641_v45, %v4033_v4  ;;  %v4038_v0 = vadd.s32 127, %v4037_v5  ;;  %v4702_v6 = vpop.f32.mrf.mxu1  ;;  %v4472_v24 = vpop.f32.mrf.mxu0  ;;  %v4102_v32 = vsel %vm4098_vm7, %v4086_v58, %v4101_v49 }
 0x3aa   : > { %5918 = vcosq.f32 %v3946_v53  ;;  %v4108_v13 = vsel %vm4096_vm5, %v4086_v58, %v4089_v12  ;;  %v4109_v16 = vsel %vm4099_vm8, %v4095_v43, 1326507024  ;;  %v4106_v45 = vsel %vm4098_vm7, %v4089_v12, %v4105_v18  ;;  %4839 = vrot.lane.b32.xlu0 %v4837_v46, %s5981_s20 }
 0x3ab   : > { %5920 = vsinq.f32 %v3946_v53  ;;  %v4036_v21 = vor.u32 %v4035_v9, %v4034_v35  ;;  %v4039_v1 = vshll.u32 %v4038_v0, 23  ;;  %v5515_v14 = vpop.f32.mrf.mxu1  ;;  %v5432_v44 = vpop.f32.mrf.mxu0  ;;  %v4103_v19 = vsel %vm4097_vm6, %v4100_v60, %v4102_v32 }
 0x3ac   : > { %v4107_v56 = vsel %vm4097_vm6, %v4104_v28, %v4106_v45  ;;  %v4110_v15 = vsel %vm4098_vm7, %v4092_v34, %v4109_v16  ;;  %v4843_v30 = vadd.f32 %v4694_v57, %v4464_v22  ;;  %v4845_v40 = vadd.f32 %v4697_v61, %v4469_v3 }
 0x3ad   : > { %v4040_v20 = vor.u32 4788187, %v4039_v1  ;;  %v4043_v8 = vcvt.s32.f32 %v4036_v21  ;;  %v4111_v31 = vsel %vm4097_vm6, %v4108_v13, %v4110_v15  ;;  %v4705_v59 = vpop.f32.mrf.mxu1  ;;  %v4477_v46 = vpop.f32.mrf.mxu0  ;;  %v4851_v22 = vadd.f32 %v4702_v6, %v4472_v24 }
 0x3ae   : > { %v9698_v25 = vmul.u32.u64.low %v9644_v23, %v4111_v31  ;;  %v9699_v51 = vmul.u32.u64.high %v9644_v23, %v4111_v31, %v9698_v25  ;;  %v9702_v33 = vmul.u32.u64.low %v9644_v23, %v4107_v56  ;;  %v9703_v36 = vmul.u32.u64.high %v9644_v23, %v4107_v56, %v9702_v33  ;;  %4844 = vst.msk [vmem:[%s9586_s13 + $0x18] sm:$0xff] %vm4780_vm14, %v4843_v30  ;;  %4847 = vrot.lane.b32.xlu1 %v4845_v40, %s5979_s14 }
 0x3af   : > { %v4041_v57 = vand.u32 2147483647, %v4040_v20  ;;  %v5516_v38 = vpop.f32.mrf.mxu1  ;;  %v5435_v55 = vpop.f32.mrf.mxu0  ;;  %v663_v26 = vmul.f32 1.442695, %v9610_v62  ;;  %v665_v58 = vmul.f32 1.442695, %v9616_v39  ;;  %v4119_v34 = vmul.u32 %v9644_v23, %v4103_v19 }
 0x3b0   : > { %vm3963_vm9 = vcmp.lt.s32.totalorder %v9303_v50, 0  ;;  %v3945_v17 = vsel %vm3860_vm1, %v3944_v54, %v9502_v42  ;;  %vm4121_vm10 = vc.u32 %v9699_v51, %v9702_v33  ;;  %v4122_v62 = vadd.s32 1, %v9703_v36 }
 0x3b1   : > { %v4044_v12 = vmul.f32 %v4043_v8, %v4041_v57  ;;  %v4710_v61 = vpop.f32.mrf.mxu1  ;;  %v4480_v3 = vpop.f32.mrf.mxu0  ;;  %vm9723_vm11 = vcmp.le.f32.partialorder %v3961_v52, 0.7853982  ;;  %v4857_v43 = vadd.f32 %v4705_v59, %v4477_v46  ;;  %5922 = vpow2.f32 %v663_v26 }
 0x3b2   : > { %v4863_v39 = vadd.f32 %v4710_v61, %v4480_v3  ;;  %4853 = vrot.lane.b32.xlu1 %v4851_v22, %s5980_s19  ;;  %v4123_v42 = vsel %vm4121_vm10, %v4122_v62, %v9703_v36  ;;  %v3947_v35 = vsel %vm9632_vm3, 0, %v3945_v17  ;;  %5924 = vpow2.f32 %v665_v58 }
 0x3b3   : > { %v4045_v23 = vxor.u32 2147483648, %v4044_v12  ;;  %v5519_v53 = vpop.f32.mrf.mxu1  ;;  %v5436_v4 = vpop.f32.mrf.mxu0  ;;  %v4124_v5 = vadd.s32 %v4123_v42, %v4119_v34  ;;  %v4047_v60 = vsub.s32 4, %v9604_v2  ;;  %v3951_v24 = vand.u32 3, %v3947_v35 }
 0x3b4   : > { %4864 = vst.msk [vmem:[%s9586_s13 + $0x20] sm:$0xff] %vm4780_vm14, %v4863_v39  ;;  %v732_v25 = vadd.s32 30, %v6131_v47  ;;  %vm3950_vm1 = vweird.f32 %v9292_v41  ;;  %v733_v39 = vadd.s32 31, %v6131_v47  ;;  %vm4053_vm5 = vweird.f32 %v9303_v50 }
 0x3b5   : > { %v4046_v52 = vsel %vm3963_vm9, %v4045_v23, %v4044_v12  ;;  %v4713_v27 = vpop.f32.mrf.mxu1  ;;  %v4485_v29 = vpop.f32.mrf.mxu0  ;;  %v4125_v49 = vadd.s32 536870912, %v4124_v5  ;;  %v4048_v16 = vsel %vm3963_vm9, %v4047_v60, %v9604_v2  ;;  %vm3953_vm12 = vcmp.eq.s32.totalorder %v3951_v24, 0 }
 0x3b6   : > { %v4049_v9 = vsel %vm9723_vm11, %v9303_v50, %v4046_v52  ;;  %v4865_v0 = vadd.f32 %v4713_v27, %v4485_v29  ;;  %4859 = vrot.lane.b32.xlu1 %v4857_v43, %s5981_s20  ;;  %vm3956_vm13 = vcmp.eq.s32.totalorder %v3951_v24, 2  ;;  %v4050_v56 = vsel %vm9723_vm11, 0, %v4048_v16 }
 0x3b7   : > { %v5919_v54 = vpop.eup %5918  ;;  %5926 = vcosq.f32 %v4049_v9  ;;  %v5520_v63 = vpop.f32.mrf.mxu1  ;;  %v9741_v32 = vshrl.u32 %v4125_v49, 30  ;;  %vm3952_vm15 = vcmp.lt.s32.totalorder %v3951_v24, 2  ;;  %v4054_v36 = vand.u32 3, %v4050_v56 }
 0x3b8   : > { %v5439_v28 = vpop.f32.mrf.mxu0  ;;  %v5921_v6 = vpop.eup %5920  ;;  %5928 = vsinq.f32 %v4049_v9  ;;  %4867 = vrot.lane.b32.xlu0 %v4865_v0, %s5979_s14  ;;  %v3957_v45 = vxor.u32 2147483648, %v5919_v54  ;;  %vm765_vm2 = vcmp.ge.s32.totalorder %v732_v25, 1  ;;  %vm766_vm8 = vcmp.ge.s32.totalorder %v733_v39, 1 }
 0x3b9   : > { %v4718_v18 = vpop.f32.mrf.mxu1  ;;  %v3954_v1 = vxor.u32 2147483648, %v5921_v6  ;;  %v4127_v14 = vshll.u32 %v9741_v32, 30  ;;  %vm4059_vm3 = vcmp.eq.s32.totalorder %v4054_v36, 2  ;;  %vm4056_vm4 = vcmp.eq.s32.totalorder %v4054_v36, 0  ;;  %vm5252_vm9 = vmpackc.low %vm766_vm8, %vm765_vm2 }
 0x3ba   : > { %v4488_v13 = vpop.f32.mrf.mxu0  ;;  %v3958_v31 = vsel %vm3956_vm13, %v3957_v45, %v5921_v6  ;;  %vm4055_vm6 = vcmp.lt.s32.totalorder %v4054_v36, 2  ;;  %vm4066_vm10 = vcmp.lt.s32.totalorder %v9568_v7, 0  ;;  %vm4065_vm11 = vcmp.le.f32.partialorder %v4064_v10, 0.7853982 }
 0x3bb   : > { %v4871_v21 = vadd.f32 %v4718_v18, %v4488_v13  ;;  %v5523_v44 = vpop.f32.mrf.mxu1  ;;  %v9750_v15 = vsub.s32 %v4124_v5, %v4127_v14  ;;  %v3955_v2 = vsel %vm3953_vm12, %v5919_v54, %v3954_v1  ;;  %v4120_v5 = vadd.s32 %v9702_v33, %v9699_v51 }
 0x3bc   : > { %v5440_v19 = vpop.f32.mrf.mxu0  ;;  %v3959_v26 = vsel %vm3952_vm15, %v3955_v2, %v3958_v31  ;;  %v4150_v25 = vsub.s32 4, %v9741_v32  ;;  %vm4156_vm15 = vweird.f32 %v9568_v7 }
 0x3bd   : > { %4873 = vrot.lane.b32.xlu0 %v4871_v21, %s5980_s19  ;;  %v4721_v30 = vpop.f32.mrf.mxu1  ;;  %v4130_v40 = vsub.s32 0, %v9750_v15  ;;  %v3960_v23 = vsel %vm3950_vm1, nan, %v3959_v26 }
 0x3be   : > { %v4493_v20 = vpop.f32.mrf.mxu0  ;;  %v5923_v57 = vpop.eup %5922 }
 0x3bf   : > { %v4877_v8 = vadd.f32 %v4721_v30, %v4493_v20  ;;  %v5524_v59 = vpop.f32.mrf.mxu1  ;;  %v5196_v22 = vmin.u32 %v4130_v40, %v9750_v15  ;;  %v5925_v12 = vpop.eup %5924  ;;  %v699_v62 = vmul.f32 %v5923_v57, %v6184_v37  ;;  %v5946_v20 = vld [vmem:[%s9857_s0] sm:$0xff]  ;;  %v4151_v57 = vsel %vm4066_vm10, %v4150_v25, %v9741_v32 }
 0x3c0   : > { %v5443_v46 = vpop.f32.mrf.mxu0  ;;  %v700_v35 = vmul.f32 %v5925_v12, %v6184_v37 }
 0x3c1   : > { %4879 = vrot.lane.b32.xlu0 %v4877_v8, %s5981_s20  ;;  %v4726_v38 = vpop.f32.mrf.mxu1  ;;  %v4132_v34 = vclz %v5196_v22  ;;  %v4197_v9 = vmul.f32 %v3960_v23, %v699_v62  ;;  %v602_v8 = vmul.f32 32.0, %v5946_v20 }
 0x3c2   : > { %v4496_v55 = vpop.f32.mrf.mxu0 }
 0x3c3   : > { %v4883_v58 = vadd.f32 %v4726_v38, %v4496_v55  ;;  %v5527_v61 = vpop.f32.mrf.mxu1  ;;  %v5197_v41 = vadd.s32 4294967294, %v4132_v34  ;;  %v667_v40 = vmul.f32 1.442695, %v602_v8 }
 0x3c4   : > { %v5444_v3 = vpop.f32.mrf.mxu0  ;;  %v5927_v17 = vpop.eup %5926 }
 0x3c5   : > { %4884 = vst.msk [vmem:[%s9586_s13 + $0x28] sm:$0xff] %vm4780_vm14, %v4883_v58  ;;  %v5929_v11 = vpop.eup %5928  ;;  %v4060_v43 = vxor.u32 2147483648, %v5927_v17  ;;  %v4729_v53 = vpop.f32.mrf.mxu1  ;;  %vm5198_vm7 = vcmp.lt.s32.totalorder %v5197_v41, 0  ;;  %5930 = vpow2.f32 %v667_v40  ;;  %v734_v58 = vadd.s32 32, %v6131_v47 }
 0x3c6   : > { %v4501_v4 = vpop.f32.mrf.mxu0  ;;  %v4057_v42 = vxor.u32 2147483648, %v5929_v11  ;;  %v4135_v0 = vsel %vm5198_vm7, 0, %v5197_v41 }
 0x3c7   : > { %v4885_v54 = vadd.f32 %v4729_v53, %v4501_v4  ;;  %v4061_v52 = vsel %vm4059_vm3, %v4060_v43, %v5929_v11  ;;  %v5528_v27 = vpop.f32.mrf.mxu1  ;;  %v4136_v63 = vsub.s32 32, %v4135_v0  ;;  %v4137_v28 = vshll.u32 %v9750_v15, %v4135_v0 }
 0x3c8   : > { %v5447_v29 = vpop.f32.mrf.mxu0  ;;  %v4058_v60 = vsel %vm4056_vm4, %v5927_v17, %v4057_v42  ;;  %v4140_v6 = vsub.s32 4294967266, %v4135_v0  ;;  %vm767_vm1 = vcmp.ge.s32.totalorder %v734_v58, 1  ;;  %vm4787_vm3 = vcmask 523520  }
 0x3c9   : > { %4887 = vrot.lane.b32.xlu1 %v4885_v54, %s5979_s14  ;;  %v4062_v49 = vsel %vm4055_vm6, %v4058_v60, %v4061_v52  ;;  %v4734_v24 = vpop.f32.mrf.mxu1  ;;  %v4138_v16 = vshrl.u32 %v4120_v5, %v4136_v63  ;;  %vm5255_vm2 = vmpackc.low %vm767_vm1, %vm767_vm1  ;;  %vm4794_vm4 = vcmask 785920  }
 0x3ca   : > { %v4504_v18 = vpop.f32.mrf.mxu0  ;;  %v4063_v51 = vsel %vm4053_vm5, nan, %v4062_v49  ;;  %v4141_v21 = vadd.s32 127, %v4140_v6  ;;  %vm4801_vm5 = vcmask 1048320  }
 0x3cb   : > { %v4891_v33 = vadd.f32 %v4734_v24, %v4504_v18  ;;  %v4198_v13 = vmul.f32 %v4063_v51, %v700_v35  ;;  %v5531_v1 = vpop.f32.mrf.mxu1  ;;  %v4139_v44 = vor.u32 %v4138_v16, %v4137_v28 }
 0x3cc   : > { %v5448_v45 = vpop.f32.mrf.mxu0  ;;  %v4142_v19 = vshll.u32 %v4141_v21, 23 }
 0x3cd   : > { %4893 = vrot.lane.b32.xlu1 %v4891_v33, %s5980_s19  ;;  %v5253_v14 = vpack.c.bf16 %v4198_v13, %v4197_v9  ;;  %v4737_v56 = vpop.f32.mrf.mxu1  ;;  %v4146_v50 = vcvt.s32.f32 %v4139_v44 }
 0x3ce   : > { %v4143_v15 = vor.u32 4788187, %v4142_v19 }
 0x3cf   : > { %5462 = vmatmul.mubr.msk.bf16.gmra.mxu0 %vm5252_vm9, %v5253_v14  ;;  %5546 = vmatmul.mubr.msk.bf16.gmra.mxu1 %vm5252_vm9, %v5253_v14  ;;  %v5532_v30 = vpop.f32.mrf.mxu1 }
 0x3d0   : > { %5465 = vmatprep.mubr.msk.bf16.mxu0 %vm5972_vm0, %v9873_v48  ;;  %5549 = vmatprep.mubr.msk.bf16.mxu1 %vm5972_vm0, %v9873_v48  ;;  %v4144_v2 = vand.u32 2147483647, %v4143_v15  ;;  %v4153_v48 = vsel %vm4065_vm11, 0, %v4151_v57 }
 0x3d1   : > { %v4157_v22 = vand.u32 3, %v4153_v48 }
 0x3d2   : > { %v4147_v31 = vmul.f32 %v4146_v50, %v4144_v2  ;;  %v5931_v38 = vpop.eup %5930 }
 0x3d3   : > { %vm4162_vm0 = vcmp.eq.s32.totalorder %v4157_v22, 2  ;;  %vm4159_vm12 = vcmp.eq.s32.totalorder %v4157_v22, 0  ;;  %vm4158_vm13 = vcmp.lt.s32.totalorder %v4157_v22, 2  ;;  %v701_v17 = vmul.f32 %v5931_v38, %v6184_v37 }
 0x3d4   : > { %v4148_v59 = vxor.u32 2147483648, %v4147_v31 }
 0x3d6   : > { %v4149_v46 = vsel %vm4066_vm10, %v4148_v59, %v4147_v31 }
 0x3d7   : > { %v4152_v36 = vsel %vm4065_vm11, %v9568_v7, %v4149_v46 }
 0x3d8   : > { %5932 = vcosq.f32 %v4152_v36 }
 0x3d9   : > { %5934 = vsinq.f32 %v4152_v36 }
 0x3e5   : > { %v5933_v55 = vpop.eup %5932 }
 0x3e6   : > { %v5935_v26 = vpop.eup %5934  ;;  %v4163_v10 = vxor.u32 2147483648, %v5933_v55 }
 0x3e7   : > { %v4160_v61 = vxor.u32 2147483648, %v5935_v26 }
 0x3e8   : > { %v4164_v32 = vsel %vm4162_vm0, %v4163_v10, %v5935_v26 }
 0x3e9   : > { %v4509_v12 = vpop.f32.mrf.mxu0  ;;  %v4742_v34 = vpop.f32.mrf.mxu1  ;;  %v4161_v11 = vsel %vm4159_vm12, %v5933_v55, %v4160_v61 }
 0x3ea   : > { %v4897_v3 = vadd.f32 %v4737_v56, %v4509_v12  ;;  %v4165_v47 = vsel %vm4158_vm13, %v4161_v11, %v4164_v32 }
 0x3eb   : > { %v5451_v62 = vpop.f32.mrf.mxu0  ;;  %v5535_v39 = vpop.f32.mrf.mxu1  ;;  %v4166_v41 = vsel %vm4156_vm15, nan, %v4165_v47 }
 0x3ec   : > { %4899 = vrot.lane.b32.xlu1 %v4897_v3, %s5981_s20  ;;  %v4199_v4 = vmul.f32 %v4166_v41, %v701_v17 }
 0x3ed   : > { %v4512_v23 = vpop.f32.mrf.mxu0  ;;  %v4745_v43 = vpop.f32.mrf.mxu1 }
 0x3ee   : > { %v4903_v53 = vadd.f32 %v4742_v34, %v4512_v23  ;;  %v5256_v37 = vpack.c.bf16 %v4199_v4, %v4199_v4 }
 0x3ef   : > { %v5452_v42 = vpop.f32.mrf.mxu0  ;;  %v5536_v54 = vpop.f32.mrf.mxu1 }
 0x3f0   : > { %4904 = vst.msk [vmem:[%s9586_s13 + $0x30] sm:$0xff] %vm4780_vm14, %v4903_v53  ;;  %5466 = vmatmul.mubr.msk.bf16.gmra.mxu0 %vm5255_vm2, %v5256_v37  ;;  %5550 = vmatmul.mubr.msk.bf16.gmra.mxu1 %vm5255_vm2, %v5256_v37 }
 0x408   : > { %v4785_v7 = vpop.permute.xlu0 %4784 }
 0x409   : > { %4788 = vst.msk [vmem:[%s9586_s13] sm:$0xff] %vm4787_vm3, %v4785_v7 }
 0x40b   : > { %v4814_v24 = vpop.permute.xlu1 %4813 }
 0x40c   : > { %v4792_v28 = vpop.permute.xlu0 %4791 }
 0x40d   : > { %4795 = vst.msk [vmem:[%s9586_s13] sm:$0xff] %vm4794_vm4, %v4792_v28 }
 0x40f   : > { %v4820_v51 = vpop.permute.xlu1 %4819 }
 0x410   : > { %v4799_v6 = vpop.permute.xlu0 %4798 }
 0x411   : > { %4802 = vst.msk [vmem:[%s9586_s13] sm:$0xff] %vm4801_vm5, %v4799_v6 }
 0x413   : > { %v4828_v13 = vpop.permute.xlu1 %4827 }
 0x414   : > { %v4808_v18 = vpop.permute.xlu0 %4807  ;;  %4830 = vst.msk [vmem:[%s9586_s13 + $0x10] sm:$0xff] %vm4787_vm3, %v4828_v13 }
 0x415   : > { %4810 = vst.msk [vmem:[%s9586_s13 + $0x8] sm:$0xff] %vm4787_vm3, %v4808_v18 }
 0x416   : > { %4816 = vst.msk [vmem:[%s9586_s13 + $0x8] sm:$0xff] %vm4794_vm4, %v4814_v24 }
 0x417   : > { %4822 = vst.msk [vmem:[%s9586_s13 + $0x8] sm:$0xff] %vm4801_vm5, %v4820_v51 }
 0x418   : > { %v4834_v33 = vpop.permute.xlu0 %4833 }
 0x419   : > { %4836 = vst.msk [vmem:[%s9586_s13 + $0x10] sm:$0xff] %vm4794_vm4, %v4834_v33 }
 0x41c   : > { %v4840_v16 = vpop.permute.xlu0 %4839 }
 0x41d   : > { %4842 = vst.msk [vmem:[%s9586_s13 + $0x10] sm:$0xff] %vm4801_vm5, %v4840_v16 }
 0x420   : > { %v4848_v21 = vpop.permute.xlu1 %4847 }
 0x421   : > { %4850 = vst.msk [vmem:[%s9586_s13 + $0x18] sm:$0xff] %vm4787_vm3, %v4848_v21 }
 0x422   : > { %v4517_v35 = vpop.f32.mrf.mxu0  ;;  %v4750_v52 = vpop.f32.mrf.mxu1 }
 0x423   : > { %v4905_v5 = vadd.f32 %v4745_v43, %v4517_v35 }
 0x424   : > { %v5455_v27 = vpop.f32.mrf.mxu0  ;;  %v5539_v29 = vpop.f32.mrf.mxu1 }
 0x425   : > { %4907 = vrot.lane.b32.xlu0 %v4905_v5, %s5979_s14  ;;  %v4854_v45 = vpop.permute.xlu1 %4853 }
 0x426   : > { %v4520_v60 = vpop.f32.mrf.mxu0  ;;  %v4753_v9 = vpop.f32.mrf.mxu1  ;;  %4856 = vst.msk [vmem:[%s9586_s13 + $0x18] sm:$0xff] %vm4794_vm4, %v4854_v45 }
 0x427   : > { %v4911_v0 = vadd.f32 %v4750_v52, %v4520_v60 }
 0x428   : > { %v5456_v49 = vpop.f32.mrf.mxu0  ;;  %v5540_v63 = vpop.f32.mrf.mxu1 }
 0x429   : > { %4913 = vrot.lane.b32.xlu0 %v4911_v0, %s5980_s19  ;;  %v4860_v44 = vpop.permute.xlu1 %4859 }
 0x42a   : > { %v4868_v1 = vpop.permute.xlu0 %4867  ;;  %4862 = vst.msk [vmem:[%s9586_s13 + $0x18] sm:$0xff] %vm4801_vm5, %v4860_v44 }
 0x42b   : > { %4870 = vst.msk [vmem:[%s9586_s13 + $0x20] sm:$0xff] %vm4787_vm3, %v4868_v1 }
 0x42f   : > { %v4874_v14 = vpop.permute.xlu0 %4873 }
 0x430   : > { %4876 = vst.msk [vmem:[%s9586_s13 + $0x20] sm:$0xff] %vm4794_vm4, %v4874_v14 }
 0x433   : > { %v4880_v19 = vpop.permute.xlu0 %4879 }
 0x434   : > { %4882 = vst.msk [vmem:[%s9586_s13 + $0x20] sm:$0xff] %vm4801_vm5, %v4880_v19 }
 0x43b   : > { %v4888_v56 = vpop.permute.xlu1 %4887 }
 0x43c   : > { %4890 = vst.msk [vmem:[%s9586_s13 + $0x28] sm:$0xff] %vm4787_vm3, %v4888_v56 }
 0x43f   : > { %v4894_v15 = vpop.permute.xlu1 %4893 }
 0x440   : > { %4896 = vst.msk [vmem:[%s9586_s13 + $0x28] sm:$0xff] %vm4794_vm4, %v4894_v15 }
 0x457   : > { %v4525_v50 = vpop.f32.mrf.mxu0  ;;  %v4758_v30 = vpop.f32.mrf.mxu1 }
 0x458   : > { %v4917_v20 = vadd.f32 %v4753_v9, %v4525_v50 }
 0x459   : > { %v5459_v8 = vpop.f32.mrf.mxu0  ;;  %v5543_v2 = vpop.f32.mrf.mxu1 }
 0x45a   : > { %4919 = vrot.lane.b32.xlu0 %v4917_v20, %s5981_s20 }
 0x45b   : > { %v4528_v31 = vpop.f32.mrf.mxu0  ;;  %v4761_v40 = vpop.f32.mrf.mxu1 }
 0x45c   : > { %v4923_v59 = vadd.f32 %v4758_v30, %v4528_v31 }
 0x45d   : > { %v5460_v46 = vpop.f32.mrf.mxu0  ;;  %v5544_v25 = vpop.f32.mrf.mxu1 }
 0x45e   : > { %4924 = vst.msk [vmem:[%s9586_s13 + $0x38] sm:$0xff] %vm4780_vm14, %v4923_v59  ;;  %v4900_v36 = vpop.permute.xlu1 %4899 }
 0x45f   : > { %4902 = vst.msk [vmem:[%s9586_s13 + $0x28] sm:$0xff] %vm4801_vm5, %v4900_v36 }
 0x48f   : > { %v4533_v57 = vpop.f32.mrf.mxu0  ;;  %v4766_v48 = vpop.f32.mrf.mxu1 }
 0x490   : > { %v4925_v22 = vadd.f32 %v4761_v40, %v4533_v57 }
 0x491   : > { %v5463_v38 = vpop.f32.mrf.mxu0  ;;  %v5547_v55 = vpop.f32.mrf.mxu1 }
 0x492   : > { %4927 = vrot.lane.b32.xlu1 %v4925_v22, %s5979_s14 }
 0x493   : > { %v4536_v26 = vpop.f32.mrf.mxu0  ;;  %v4769_v58 = vpop.f32.mrf.mxu1 }
 0x494   : > { %v4931_v10 = vadd.f32 %v4766_v48, %v4536_v26 }
 0x495   : > { %v5464_v12 = vpop.f32.mrf.mxu0  ;;  %v5548_v34 = vpop.f32.mrf.mxu1 }
 0x496   : > { %4933 = vrot.lane.b32.xlu1 %v4931_v10, %s5980_s19 }
 0x497   : > { %v4908_v61 = vpop.permute.xlu0 %4907 }
 0x498   : > { %4910 = vst.msk [vmem:[%s9586_s13 + $0x30] sm:$0xff] %vm4787_vm3, %v4908_v61 }
 0x49b   : > { %v4914_v3 = vpop.permute.xlu0 %4913 }
 0x49c   : > { %4916 = vst.msk [vmem:[%s9586_s13 + $0x30] sm:$0xff] %vm4794_vm4, %v4914_v3 }
 0x4b0   : > { %v4541_v17 = vpop.f32.mrf.mxu0  ;;  %v4774_v32 = vpop.f32.mrf.mxu1 }
 0x4b1   : > { %v4937_v62 = vadd.f32 %v4769_v58, %v4541_v17 }
 0x4b2   : > { %v5467_v39 = vpop.f32.mrf.mxu0  ;;  %v5551_v11 = vpop.f32.mrf.mxu1 }
 0x4b3   : > { %4939 = vrot.lane.b32.xlu1 %v4937_v62, %s5981_s20 }
 0x4b4   : > { %v4544_v47 = vpop.f32.mrf.mxu0  ;;  %v4776_v23 = vpop.f32.mrf.mxu1 }
 0x4b6   : > { %v5468_v43 = vpop.f32.mrf.mxu0  ;;  %v5552_v41 = vpop.f32.mrf.mxu1 }
 0x4cc   : > { %v4920_v53 = vpop.permute.xlu0 %4919 }
 0x4cd   : > { %4922 = vst.msk [vmem:[%s9586_s13 + $0x30] sm:$0xff] %vm4801_vm5, %v4920_v53 }
 0x504   : > { %v4928_v4 = vpop.permute.xlu1 %4927 }
 0x505   : > { %4930 = vst.msk [vmem:[%s9586_s13 + $0x38] sm:$0xff] %vm4787_vm3, %v4928_v4 }
 0x508   : > { %v4934_v42 = vpop.permute.xlu1 %4933 }
 0x509   : > { %4936 = vst.msk [vmem:[%s9586_s13 + $0x38] sm:$0xff] %vm4794_vm4, %v4934_v42 }
 0x525   : > { %v4940_v54 = vpop.permute.xlu1 %4939 }
 0x526   : > { %4942 = vst.msk [vmem:[%s9586_s13 + $0x38] sm:$0xff] %vm4801_vm5, %v4940_v54 }
 0x527 PF: > { %s14_s17 = sadd.s32 1, %s5969_s17   ;;  %s9933_s15 = smov %s5965_s16 }
 0x528   : > { %p11_p5 = scmp.ge.s32.totalorder %s14_s17, 4   ;;  %s9934_s16 = smov %s9936_s18 }
 0x52a   :  { %13 = sbr.rel (!%p11_p5) target bundleno = 2 (0x2), region = 73 }

</bundles_post_ra>
